<compile_context>
chip_gen: v6e
topology: v6e:2x2x1
jax: 0.10.0
libtpu: 0.0.40
codegen_flags: <defaults>
</compile_context>

<pallas_src>
import functools
import math

import numpy as np
import jax
import jax.numpy as jnp
from jax.experimental import pallas as pl
from jax.experimental.pallas import tpu as pltpu


# ------------------------------ helpers ------------------------------------ #
def _round_up(x, n):
    return ((x + n - 1) // n) * n


def _build_tap_geometry(D, H, W):
    """Flat-index offsets and validity masks for a 3x3x3 'same' convolution."""
    dd, hh, ww = np.meshgrid(np.arange(D), np.arange(H), np.arange(W), indexing="ij")
    dd = dd.reshape(-1)
    hh = hh.reshape(-1)
    ww = ww.reshape(-1)
    deltas = []
    rows = []
    for kd in (-1, 0, 1):
        for kh in (-1, 0, 1):
            for kw in (-1, 0, 1):
                deltas.append(kd * H * W + kh * W + kw)
                valid = ((dd + kd >= 0) & (dd + kd < D) &
                         (hh + kh >= 0) & (hh + kh < H) &
                         (ww + kw >= 0) & (ww + kw < W))
                rows.append(valid)
    mask = np.stack(rows, axis=0).astype(np.float32)  # (27, D*H*W)
    return tuple(deltas), mask


# ----------------------------- Pallas kernel -------------------------------- #
def _fused_encoder_kernel(x_ref, mask_ref, w1_ref, b1_ref, w2_ref, b2_ref, o_ref,
                          *, deltas, pad, m):
    c1 = w1_ref.shape[0]                                    # 16

    masks = mask_ref[...]                                   # (27, M) f32
    mask_rows = [masks[t:t + 1, :] for t in range(len(deltas))]

    # ---- Conv1 (1 -> 16): 27 shifted VPU FMAs, all f32 ----------------------
    x_buf = x_ref[...]                                      # (1, M + 2*pad) f32
    w1 = w1_ref[...]                                        # (16, 27)        f32
    acc1 = jnp.zeros((c1, m), jnp.float32)
    for t, d in enumerate(deltas):
        xs = x_buf[:, pad + d: pad + d + m] * mask_rows[t]  # (1, M)
        acc1 = acc1 + w1[:, t:t + 1] * xs                   # (16, M)
    h1 = jnp.maximum(acc1 + b1_ref[...], 0.0)               # (16, M) f32, ReLU

    # ---- Conv2 (16 -> 32): in-kernel 27-tap gather + one bf16 MXU matmul ----
    zpad = jnp.zeros((c1, pad), jnp.float32)
    h1_buf = jnp.concatenate([zpad, h1, zpad], axis=1)      # (16, M + 2*pad)
    parts = []
    for t, d in enumerate(deltas):
        sl = h1_buf[:, pad + d: pad + d + m] * mask_rows[t]  # (16, M) f32
        parts.append(sl.astype(jnp.bfloat16))
    h_stack = jnp.concatenate(parts, axis=0)                # (432, M) bf16

    out = jnp.dot(w2_ref[...], h_stack,                     # (32, 432) @ (432, M)
                  preferred_element_type=jnp.float32)
    out = jnp.maximum(out + b2_ref[...], 0.0)               # (32, M) f32, ReLU
    o_ref[...] = out.astype(o_ref.dtype)


# ------------------------- Module: forward pass ----------------------------- #
def vertex_normal_predictor_cnn_forward(patch, params):
    """forward(patch) = encoder(patch): Conv3d(1->16)+ReLU, Conv3d(16->32)+ReLU."""
    (w1, b1), (w2, b2) = params
    N, cin, D, H, W = patch.shape
    assert cin == 1
    c1 = w1.shape[0]                 # 16
    c2 = w2.shape[0]                 # 32
    M = D * H * W                    # 512 at 8x8x8

    deltas, mask_np = _build_tap_geometry(D, H, W)
    pad = _round_up(max(-min(deltas), max(deltas), 1), 128)
    mb = M + 2 * pad

    # NCDHW with Cin=1 -> channels-first flat (N, 1, M); lane-pad for the taps.
    x = patch.reshape(N, 1, M).astype(jnp.float32)
    x = jnp.pad(x, ((0, 0), (0, 0), (pad, pad)))
    mask = jnp.asarray(mask_np, dtype=jnp.float32)                     # (27, M)

    # Fold conv weights (tap-major, channels-first).
    w1f = w1.reshape(c1, 27).astype(jnp.float32)                       # (16, 27)
    w2f = jnp.transpose(w2, (0, 2, 3, 4, 1)).reshape(c2, 27 * c1)
    w2f = w2f.astype(jnp.bfloat16)                                     # (32, 432)
    b1f = b1.reshape(c1, 1).astype(jnp.float32)
    b2f = b2.reshape(c2, 1).astype(jnp.float32)

    kernel = functools.partial(_fused_encoder_kernel, deltas=deltas, pad=pad, m=M)

    out = pl.pallas_call(
        kernel,
        out_shape=jax.ShapeDtypeStruct((N, c2, M), jnp.float32),
        grid_spec=pltpu.PrefetchScalarGridSpec(
            num_scalar_prefetch=0,
            grid=(N,),                                   # >=2 parallel steps (v7x 2 TCs)
            in_specs=[
                pl.BlockSpec((None, 1, mb), lambda b: (b, 0, 0)),       # x (per batch)
                pl.BlockSpec((27, M), lambda b: (0, 0)),                # tap masks
                pl.BlockSpec((c1, 27), lambda b: (0, 0)),               # w1 folded
                pl.BlockSpec((c1, 1), lambda b: (0, 0)),                # b1
                pl.BlockSpec((c2, 27 * c1), lambda b: (0, 0)),          # w2 folded
                pl.BlockSpec((c2, 1), lambda b: (0, 0)),                # b2
            ],
            out_specs=pl.BlockSpec((None, c2, M), lambda b: (b, 0, 0)),
        ),
        compiler_params=pltpu.CompilerParams(
            dimension_semantics=("parallel",)),
        # TODO(synk): if D/H/W scale up, re-derive per-step VMEM and set
        # vmem_limit_bytes explicitly for v7x's 64 MiB VMEM.
    )(x, mask, w1f, b1f, w2f, b2f)

    return out.reshape(N, c2, D, H, W)                    # free reshape, already NCDHW


# ------------------------------ init / reference ---------------------------- #
def init_params(key):
    """Deterministic init mirroring PyTorch Conv3d defaults (uniform +/- 1/sqrt(fan_in))."""
    k1, k2, k3, k4 = jax.random.split(key, 4)

    def conv_init(kw, kb, c_out, c_in):
        fan_in = c_in * 3 * 3 * 3
        bound = 1.0 / math.sqrt(fan_in)
        w = jax.random.uniform(kw, (c_out, c_in, 3, 3, 3), jnp.float32, -bound, bound)
        b = jax.random.uniform(kb, (c_out,), jnp.float32, -bound, bound)
        return w, b

    w1, b1 = conv_init(k1, k2, 16, 1)
    w2, b2 = conv_init(k3, k4, 32, 16)
    return (w1, b1), (w2, b2)


def _ref_conv3d_relu(x, w, b):
    dn = jax.lax.conv_dimension_numbers(x.shape, w.shape, ('NCDHW', 'OIDHW', 'NCDHW'))
    y = jax.lax.conv_general_dilated(x, w, (1, 1, 1), 'SAME', dimension_numbers=dn,
                                     precision=jax.lax.Precision.HIGHEST)
    return jnp.maximum(y + b.reshape(1, -1, 1, 1, 1), 0.0)


def _ref_forward(patch, params):
    (w1, b1), (w2, b2) = params
    return _ref_conv3d_relu(_ref_conv3d_relu(patch, w1, b1), w2, b2)


# --------------------------------- main ------------------------------------- #
if __name__ == "__main__":
    key = jax.random.PRNGKey(0)
    kx, kp = jax.random.split(key)

    # Small volumetric patch: (N=2, C=1, D=8, H=8, W=8)
    patch = jax.random.normal(kx, (2, 1, 8, 8, 8), dtype=jnp.float32)
    params = init_params(kp)

    out = jax.jit(vertex_normal_predictor_cnn_forward)(patch, params)
    out = jax.block_until_ready(out)

    assert out.shape == (2, 32, 8, 8, 8)
    assert out.dtype == jnp.float32
    assert bool(jnp.all(jnp.isfinite(out)))

    ref = jax.block_until_ready(_ref_forward(patch, params))
    assert bool(jnp.allclose(out, ref, atol=5e-2, rtol=5e-2))

    print("KERNEL_OK")
</pallas_src>

<mosaic_0001>
module attributes {stable_mosaic.version = 11 : i64} {
  func.func @_fused_encoder_kernel(%arg0: i32, %arg1: memref<1x1x768xf32, #tpu.memory_space<vmem>>, %arg2: memref<27x512xf32, #tpu.memory_space<vmem>>, %arg3: memref<16x27xf32, #tpu.memory_space<vmem>>, %arg4: memref<16x1xf32, #tpu.memory_space<vmem>>, %arg5: memref<32x432xbf16, #tpu.memory_space<vmem>>, %arg6: memref<32x1xf32, #tpu.memory_space<vmem>>, %arg7: memref<1x32x512xf32, #tpu.memory_space<vmem>>) attributes {dimension_semantics = [#tpu.dimension_semantics<parallel>], iteration_bounds = array<i64: 2>, scalar_prefetch = 0 : i64, scratch_operands = 0 : i64, tpu.core_type = #tpu.core_type<tc>, window_params = [{transform_indices = @transform_0, window_bounds = array<i64: 1, 1, 768>}, {pipeline_mode = #tpu.pipeline_mode<synchronous>, transform_indices = @transform_1, window_bounds = array<i64: 27, 512>}, {pipeline_mode = #tpu.pipeline_mode<synchronous>, transform_indices = @transform_2, window_bounds = array<i64: 16, 27>}, {pipeline_mode = #tpu.pipeline_mode<synchronous>, transform_indices = @transform_3, window_bounds = array<i64: 16, 1>}, {pipeline_mode = #tpu.pipeline_mode<synchronous>, transform_indices = @transform_4, window_bounds = array<i64: 32, 432>}, {pipeline_mode = #tpu.pipeline_mode<synchronous>, transform_indices = @transform_5, window_bounds = array<i64: 32, 1>}, {transform_indices = @transform_6, window_bounds = array<i64: 1, 32, 512>}]} {
    %c0 = arith.constant 0 : index
    %c0_0 = arith.constant 0 : index
    %0 = vector.load %arg2[%c0, %c0_0] : memref<27x512xf32, #tpu.memory_space<vmem>>, vector<27x512xf32>
    %1 = vector.extract_strided_slice %0 {offsets = [0, 0], sizes = [1, 512], strides = [1, 1]} : vector<27x512xf32> to vector<1x512xf32>
    %2 = vector.extract_strided_slice %0 {offsets = [1, 0], sizes = [1, 512], strides = [1, 1]} : vector<27x512xf32> to vector<1x512xf32>
    %3 = vector.extract_strided_slice %0 {offsets = [2, 0], sizes = [1, 512], strides = [1, 1]} : vector<27x512xf32> to vector<1x512xf32>
    %4 = vector.extract_strided_slice %0 {offsets = [3, 0], sizes = [1, 512], strides = [1, 1]} : vector<27x512xf32> to vector<1x512xf32>
    %5 = vector.extract_strided_slice %0 {offsets = [4, 0], sizes = [1, 512], strides = [1, 1]} : vector<27x512xf32> to vector<1x512xf32>
    %6 = vector.extract_strided_slice %0 {offsets = [5, 0], sizes = [1, 512], strides = [1, 1]} : vector<27x512xf32> to vector<1x512xf32>
    %7 = vector.extract_strided_slice %0 {offsets = [6, 0], sizes = [1, 512], strides = [1, 1]} : vector<27x512xf32> to vector<1x512xf32>
    %8 = vector.extract_strided_slice %0 {offsets = [7, 0], sizes = [1, 512], strides = [1, 1]} : vector<27x512xf32> to vector<1x512xf32>
    %9 = vector.extract_strided_slice %0 {offsets = [8, 0], sizes = [1, 512], strides = [1, 1]} : vector<27x512xf32> to vector<1x512xf32>
    %10 = vector.extract_strided_slice %0 {offsets = [9, 0], sizes = [1, 512], strides = [1, 1]} : vector<27x512xf32> to vector<1x512xf32>
    %11 = vector.extract_strided_slice %0 {offsets = [10, 0], sizes = [1, 512], strides = [1, 1]} : vector<27x512xf32> to vector<1x512xf32>
    %12 = vector.extract_strided_slice %0 {offsets = [11, 0], sizes = [1, 512], strides = [1, 1]} : vector<27x512xf32> to vector<1x512xf32>
    %13 = vector.extract_strided_slice %0 {offsets = [12, 0], sizes = [1, 512], strides = [1, 1]} : vector<27x512xf32> to vector<1x512xf32>
    %14 = vector.extract_strided_slice %0 {offsets = [13, 0], sizes = [1, 512], strides = [1, 1]} : vector<27x512xf32> to vector<1x512xf32>
    %15 = vector.extract_strided_slice %0 {offsets = [14, 0], sizes = [1, 512], strides = [1, 1]} : vector<27x512xf32> to vector<1x512xf32>
    %16 = vector.extract_strided_slice %0 {offsets = [15, 0], sizes = [1, 512], strides = [1, 1]} : vector<27x512xf32> to vector<1x512xf32>
    %17 = vector.extract_strided_slice %0 {offsets = [16, 0], sizes = [1, 512], strides = [1, 1]} : vector<27x512xf32> to vector<1x512xf32>
    %18 = vector.extract_strided_slice %0 {offsets = [17, 0], sizes = [1, 512], strides = [1, 1]} : vector<27x512xf32> to vector<1x512xf32>
    %19 = vector.extract_strided_slice %0 {offsets = [18, 0], sizes = [1, 512], strides = [1, 1]} : vector<27x512xf32> to vector<1x512xf32>
    %20 = vector.extract_strided_slice %0 {offsets = [19, 0], sizes = [1, 512], strides = [1, 1]} : vector<27x512xf32> to vector<1x512xf32>
    %21 = vector.extract_strided_slice %0 {offsets = [20, 0], sizes = [1, 512], strides = [1, 1]} : vector<27x512xf32> to vector<1x512xf32>
    %22 = vector.extract_strided_slice %0 {offsets = [21, 0], sizes = [1, 512], strides = [1, 1]} : vector<27x512xf32> to vector<1x512xf32>
    %23 = vector.extract_strided_slice %0 {offsets = [22, 0], sizes = [1, 512], strides = [1, 1]} : vector<27x512xf32> to vector<1x512xf32>
    %24 = vector.extract_strided_slice %0 {offsets = [23, 0], sizes = [1, 512], strides = [1, 1]} : vector<27x512xf32> to vector<1x512xf32>
    %25 = vector.extract_strided_slice %0 {offsets = [24, 0], sizes = [1, 512], strides = [1, 1]} : vector<27x512xf32> to vector<1x512xf32>
    %26 = vector.extract_strided_slice %0 {offsets = [25, 0], sizes = [1, 512], strides = [1, 1]} : vector<27x512xf32> to vector<1x512xf32>
    %27 = vector.extract_strided_slice %0 {offsets = [26, 0], sizes = [1, 512], strides = [1, 1]} : vector<27x512xf32> to vector<1x512xf32>
    %c0_1 = arith.constant 0 : index
    %c0_2 = arith.constant 0 : index
    %c0_3 = arith.constant 0 : index
    %28 = vector.load %arg1[%c0_1, %c0_2, %c0_3] : memref<1x1x768xf32, #tpu.memory_space<vmem>>, vector<1x1x768xf32>
    %29 = vector.shape_cast %28 : vector<1x1x768xf32> to vector<1x768xf32>
    %c0_4 = arith.constant 0 : index
    %c0_5 = arith.constant 0 : index
    %30 = vector.load %arg3[%c0_4, %c0_5] : memref<16x27xf32, #tpu.memory_space<vmem>>, vector<16x27xf32>
    %cst = arith.constant 0.000000e+00 : f32
    %31 = vector.broadcast %cst : f32 to vector<16x512xf32>
    %32 = vector.extract_strided_slice %29 {offsets = [0, 55], sizes = [1, 512], strides = [1, 1]} : vector<1x768xf32> to vector<1x512xf32>
    %33 = arith.mulf %32, %1 : vector<1x512xf32>
    %34 = vector.extract_strided_slice %30 {offsets = [0, 0], sizes = [16, 1], strides = [1, 1]} : vector<16x27xf32> to vector<16x1xf32>
    %35 = vector.broadcast %34 : vector<16x1xf32> to vector<16x512xf32>
    %36 = vector.broadcast %33 : vector<1x512xf32> to vector<16x512xf32>
    %37 = arith.mulf %35, %36 : vector<16x512xf32>
    %38 = arith.addf %31, %37 : vector<16x512xf32>
    %39 = vector.extract_strided_slice %29 {offsets = [0, 56], sizes = [1, 512], strides = [1, 1]} : vector<1x768xf32> to vector<1x512xf32>
    %40 = arith.mulf %39, %2 : vector<1x512xf32>
    %41 = vector.extract_strided_slice %30 {offsets = [0, 1], sizes = [16, 1], strides = [1, 1]} : vector<16x27xf32> to vector<16x1xf32>
    %42 = vector.broadcast %41 : vector<16x1xf32> to vector<16x512xf32>
    %43 = vector.broadcast %40 : vector<1x512xf32> to vector<16x512xf32>
    %44 = arith.mulf %42, %43 : vector<16x512xf32>
    %45 = arith.addf %38, %44 : vector<16x512xf32>
    %46 = vector.extract_strided_slice %29 {offsets = [0, 57], sizes = [1, 512], strides = [1, 1]} : vector<1x768xf32> to vector<1x512xf32>
    %47 = arith.mulf %46, %3 : vector<1x512xf32>
    %48 = vector.extract_strided_slice %30 {offsets = [0, 2], sizes = [16, 1], strides = [1, 1]} : vector<16x27xf32> to vector<16x1xf32>
    %49 = vector.broadcast %48 : vector<16x1xf32> to vector<16x512xf32>
    %50 = vector.broadcast %47 : vector<1x512xf32> to vector<16x512xf32>
    %51 = arith.mulf %49, %50 : vector<16x512xf32>
    %52 = arith.addf %45, %51 : vector<16x512xf32>
    %53 = vector.extract_strided_slice %29 {offsets = [0, 63], sizes = [1, 512], strides = [1, 1]} : vector<1x768xf32> to vector<1x512xf32>
    %54 = arith.mulf %53, %4 : vector<1x512xf32>
    %55 = vector.extract_strided_slice %30 {offsets = [0, 3], sizes = [16, 1], strides = [1, 1]} : vector<16x27xf32> to vector<16x1xf32>
    %56 = vector.broadcast %55 : vector<16x1xf32> to vector<16x512xf32>
    %57 = vector.broadcast %54 : vector<1x512xf32> to vector<16x512xf32>
    %58 = arith.mulf %56, %57 : vector<16x512xf32>
    %59 = arith.addf %52, %58 : vector<16x512xf32>
    %60 = vector.extract_strided_slice %29 {offsets = [0, 64], sizes = [1, 512], strides = [1, 1]} : vector<1x768xf32> to vector<1x512xf32>
    %61 = arith.mulf %60, %5 : vector<1x512xf32>
    %62 = vector.extract_strided_slice %30 {offsets = [0, 4], sizes = [16, 1], strides = [1, 1]} : vector<16x27xf32> to vector<16x1xf32>
    %63 = vector.broadcast %62 : vector<16x1xf32> to vector<16x512xf32>
    %64 = vector.broadcast %61 : vector<1x512xf32> to vector<16x512xf32>
    %65 = arith.mulf %63, %64 : vector<16x512xf32>
    %66 = arith.addf %59, %65 : vector<16x512xf32>
    %67 = vector.extract_strided_slice %29 {offsets = [0, 65], sizes = [1, 512], strides = [1, 1]} : vector<1x768xf32> to vector<1x512xf32>
    %68 = arith.mulf %67, %6 : vector<1x512xf32>
    %69 = vector.extract_strided_slice %30 {offsets = [0, 5], sizes = [16, 1], strides = [1, 1]} : vector<16x27xf32> to vector<16x1xf32>
    %70 = vector.broadcast %69 : vector<16x1xf32> to vector<16x512xf32>
    %71 = vector.broadcast %68 : vector<1x512xf32> to vector<16x512xf32>
    %72 = arith.mulf %70, %71 : vector<16x512xf32>
    %73 = arith.addf %66, %72 : vector<16x512xf32>
    %74 = vector.extract_strided_slice %29 {offsets = [0, 71], sizes = [1, 512], strides = [1, 1]} : vector<1x768xf32> to vector<1x512xf32>
    %75 = arith.mulf %74, %7 : vector<1x512xf32>
    %76 = vector.extract_strided_slice %30 {offsets = [0, 6], sizes = [16, 1], strides = [1, 1]} : vector<16x27xf32> to vector<16x1xf32>
    %77 = vector.broadcast %76 : vector<16x1xf32> to vector<16x512xf32>
    %78 = vector.broadcast %75 : vector<1x512xf32> to vector<16x512xf32>
    %79 = arith.mulf %77, %78 : vector<16x512xf32>
    %80 = arith.addf %73, %79 : vector<16x512xf32>
    %81 = vector.extract_strided_slice %29 {offsets = [0, 72], sizes = [1, 512], strides = [1, 1]} : vector<1x768xf32> to vector<1x512xf32>
    %82 = arith.mulf %81, %8 : vector<1x512xf32>
    %83 = vector.extract_strided_slice %30 {offsets = [0, 7], sizes = [16, 1], strides = [1, 1]} : vector<16x27xf32> to vector<16x1xf32>
    %84 = vector.broadcast %83 : vector<16x1xf32> to vector<16x512xf32>
    %85 = vector.broadcast %82 : vector<1x512xf32> to vector<16x512xf32>
    %86 = arith.mulf %84, %85 : vector<16x512xf32>
    %87 = arith.addf %80, %86 : vector<16x512xf32>
    %88 = vector.extract_strided_slice %29 {offsets = [0, 73], sizes = [1, 512], strides = [1, 1]} : vector<1x768xf32> to vector<1x512xf32>
    %89 = arith.mulf %88, %9 : vector<1x512xf32>
    %90 = vector.extract_strided_slice %30 {offsets = [0, 8], sizes = [16, 1], strides = [1, 1]} : vector<16x27xf32> to vector<16x1xf32>
    %91 = vector.broadcast %90 : vector<16x1xf32> to vector<16x512xf32>
    %92 = vector.broadcast %89 : vector<1x512xf32> to vector<16x512xf32>
    %93 = arith.mulf %91, %92 : vector<16x512xf32>
    %94 = arith.addf %87, %93 : vector<16x512xf32>
    %95 = vector.extract_strided_slice %29 {offsets = [0, 119], sizes = [1, 512], strides = [1, 1]} : vector<1x768xf32> to vector<1x512xf32>
    %96 = arith.mulf %95, %10 : vector<1x512xf32>
    %97 = vector.extract_strided_slice %30 {offsets = [0, 9], sizes = [16, 1], strides = [1, 1]} : vector<16x27xf32> to vector<16x1xf32>
    %98 = vector.broadcast %97 : vector<16x1xf32> to vector<16x512xf32>
    %99 = vector.broadcast %96 : vector<1x512xf32> to vector<16x512xf32>
    %100 = arith.mulf %98, %99 : vector<16x512xf32>
    %101 = arith.addf %94, %100 : vector<16x512xf32>
    %102 = vector.extract_strided_slice %29 {offsets = [0, 120], sizes = [1, 512], strides = [1, 1]} : vector<1x768xf32> to vector<1x512xf32>
    %103 = arith.mulf %102, %11 : vector<1x512xf32>
    %104 = vector.extract_strided_slice %30 {offsets = [0, 10], sizes = [16, 1], strides = [1, 1]} : vector<16x27xf32> to vector<16x1xf32>
    %105 = vector.broadcast %104 : vector<16x1xf32> to vector<16x512xf32>
    %106 = vector.broadcast %103 : vector<1x512xf32> to vector<16x512xf32>
    %107 = arith.mulf %105, %106 : vector<16x512xf32>
    %108 = arith.addf %101, %107 : vector<16x512xf32>
    %109 = vector.extract_strided_slice %29 {offsets = [0, 121], sizes = [1, 512], strides = [1, 1]} : vector<1x768xf32> to vector<1x512xf32>
    %110 = arith.mulf %109, %12 : vector<1x512xf32>
    %111 = vector.extract_strided_slice %30 {offsets = [0, 11], sizes = [16, 1], strides = [1, 1]} : vector<16x27xf32> to vector<16x1xf32>
    %112 = vector.broadcast %111 : vector<16x1xf32> to vector<16x512xf32>
    %113 = vector.broadcast %110 : vector<1x512xf32> to vector<16x512xf32>
    %114 = arith.mulf %112, %113 : vector<16x512xf32>
    %115 = arith.addf %108, %114 : vector<16x512xf32>
    %116 = vector.extract_strided_slice %29 {offsets = [0, 127], sizes = [1, 512], strides = [1, 1]} : vector<1x768xf32> to vector<1x512xf32>
    %117 = arith.mulf %116, %13 : vector<1x512xf32>
    %118 = vector.extract_strided_slice %30 {offsets = [0, 12], sizes = [16, 1], strides = [1, 1]} : vector<16x27xf32> to vector<16x1xf32>
    %119 = vector.broadcast %118 : vector<16x1xf32> to vector<16x512xf32>
    %120 = vector.broadcast %117 : vector<1x512xf32> to vector<16x512xf32>
    %121 = arith.mulf %119, %120 : vector<16x512xf32>
    %122 = arith.addf %115, %121 : vector<16x512xf32>
    %123 = vector.extract_strided_slice %29 {offsets = [0, 128], sizes = [1, 512], strides = [1, 1]} : vector<1x768xf32> to vector<1x512xf32>
    %124 = arith.mulf %123, %14 : vector<1x512xf32>
    %125 = vector.extract_strided_slice %30 {offsets = [0, 13], sizes = [16, 1], strides = [1, 1]} : vector<16x27xf32> to vector<16x1xf32>
    %126 = vector.broadcast %125 : vector<16x1xf32> to vector<16x512xf32>
    %127 = vector.broadcast %124 : vector<1x512xf32> to vector<16x512xf32>
    %128 = arith.mulf %126, %127 : vector<16x512xf32>
    %129 = arith.addf %122, %128 : vector<16x512xf32>
    %130 = vector.extract_strided_slice %29 {offsets = [0, 129], sizes = [1, 512], strides = [1, 1]} : vector<1x768xf32> to vector<1x512xf32>
    %131 = arith.mulf %130, %15 : vector<1x512xf32>
    %132 = vector.extract_strided_slice %30 {offsets = [0, 14], sizes = [16, 1], strides = [1, 1]} : vector<16x27xf32> to vector<16x1xf32>
    %133 = vector.broadcast %132 : vector<16x1xf32> to vector<16x512xf32>
    %134 = vector.broadcast %131 : vector<1x512xf32> to vector<16x512xf32>
    %135 = arith.mulf %133, %134 : vector<16x512xf32>
    %136 = arith.addf %129, %135 : vector<16x512xf32>
    %137 = vector.extract_strided_slice %29 {offsets = [0, 135], sizes = [1, 512], strides = [1, 1]} : vector<1x768xf32> to vector<1x512xf32>
    %138 = arith.mulf %137, %16 : vector<1x512xf32>
    %139 = vector.extract_strided_slice %30 {offsets = [0, 15], sizes = [16, 1], strides = [1, 1]} : vector<16x27xf32> to vector<16x1xf32>
    %140 = vector.broadcast %139 : vector<16x1xf32> to vector<16x512xf32>
    %141 = vector.broadcast %138 : vector<1x512xf32> to vector<16x512xf32>
    %142 = arith.mulf %140, %141 : vector<16x512xf32>
    %143 = arith.addf %136, %142 : vector<16x512xf32>
    %144 = vector.extract_strided_slice %29 {offsets = [0, 136], sizes = [1, 512], strides = [1, 1]} : vector<1x768xf32> to vector<1x512xf32>
    %145 = arith.mulf %144, %17 : vector<1x512xf32>
    %146 = vector.extract_strided_slice %30 {offsets = [0, 16], sizes = [16, 1], strides = [1, 1]} : vector<16x27xf32> to vector<16x1xf32>
    %147 = vector.broadcast %146 : vector<16x1xf32> to vector<16x512xf32>
    %148 = vector.broadcast %145 : vector<1x512xf32> to vector<16x512xf32>
    %149 = arith.mulf %147, %148 : vector<16x512xf32>
    %150 = arith.addf %143, %149 : vector<16x512xf32>
    %151 = vector.extract_strided_slice %29 {offsets = [0, 137], sizes = [1, 512], strides = [1, 1]} : vector<1x768xf32> to vector<1x512xf32>
    %152 = arith.mulf %151, %18 : vector<1x512xf32>
    %153 = vector.extract_strided_slice %30 {offsets = [0, 17], sizes = [16, 1], strides = [1, 1]} : vector<16x27xf32> to vector<16x1xf32>
    %154 = vector.broadcast %153 : vector<16x1xf32> to vector<16x512xf32>
    %155 = vector.broadcast %152 : vector<1x512xf32> to vector<16x512xf32>
    %156 = arith.mulf %154, %155 : vector<16x512xf32>
    %157 = arith.addf %150, %156 : vector<16x512xf32>
    %158 = vector.extract_strided_slice %29 {offsets = [0, 183], sizes = [1, 512], strides = [1, 1]} : vector<1x768xf32> to vector<1x512xf32>
    %159 = arith.mulf %158, %19 : vector<1x512xf32>
    %160 = vector.extract_strided_slice %30 {offsets = [0, 18], sizes = [16, 1], strides = [1, 1]} : vector<16x27xf32> to vector<16x1xf32>
    %161 = vector.broadcast %160 : vector<16x1xf32> to vector<16x512xf32>
    %162 = vector.broadcast %159 : vector<1x512xf32> to vector<16x512xf32>
    %163 = arith.mulf %161, %162 : vector<16x512xf32>
    %164 = arith.addf %157, %163 : vector<16x512xf32>
    %165 = vector.extract_strided_slice %29 {offsets = [0, 184], sizes = [1, 512], strides = [1, 1]} : vector<1x768xf32> to vector<1x512xf32>
    %166 = arith.mulf %165, %20 : vector<1x512xf32>
    %167 = vector.extract_strided_slice %30 {offsets = [0, 19], sizes = [16, 1], strides = [1, 1]} : vector<16x27xf32> to vector<16x1xf32>
    %168 = vector.broadcast %167 : vector<16x1xf32> to vector<16x512xf32>
    %169 = vector.broadcast %166 : vector<1x512xf32> to vector<16x512xf32>
    %170 = arith.mulf %168, %169 : vector<16x512xf32>
    %171 = arith.addf %164, %170 : vector<16x512xf32>
    %172 = vector.extract_strided_slice %29 {offsets = [0, 185], sizes = [1, 512], strides = [1, 1]} : vector<1x768xf32> to vector<1x512xf32>
    %173 = arith.mulf %172, %21 : vector<1x512xf32>
    %174 = vector.extract_strided_slice %30 {offsets = [0, 20], sizes = [16, 1], strides = [1, 1]} : vector<16x27xf32> to vector<16x1xf32>
    %175 = vector.broadcast %174 : vector<16x1xf32> to vector<16x512xf32>
    %176 = vector.broadcast %173 : vector<1x512xf32> to vector<16x512xf32>
    %177 = arith.mulf %175, %176 : vector<16x512xf32>
    %178 = arith.addf %171, %177 : vector<16x512xf32>
    %179 = vector.extract_strided_slice %29 {offsets = [0, 191], sizes = [1, 512], strides = [1, 1]} : vector<1x768xf32> to vector<1x512xf32>
    %180 = arith.mulf %179, %22 : vector<1x512xf32>
    %181 = vector.extract_strided_slice %30 {offsets = [0, 21], sizes = [16, 1], strides = [1, 1]} : vector<16x27xf32> to vector<16x1xf32>
    %182 = vector.broadcast %181 : vector<16x1xf32> to vector<16x512xf32>
    %183 = vector.broadcast %180 : vector<1x512xf32> to vector<16x512xf32>
    %184 = arith.mulf %182, %183 : vector<16x512xf32>
    %185 = arith.addf %178, %184 : vector<16x512xf32>
    %186 = vector.extract_strided_slice %29 {offsets = [0, 192], sizes = [1, 512], strides = [1, 1]} : vector<1x768xf32> to vector<1x512xf32>
    %187 = arith.mulf %186, %23 : vector<1x512xf32>
    %188 = vector.extract_strided_slice %30 {offsets = [0, 22], sizes = [16, 1], strides = [1, 1]} : vector<16x27xf32> to vector<16x1xf32>
    %189 = vector.broadcast %188 : vector<16x1xf32> to vector<16x512xf32>
    %190 = vector.broadcast %187 : vector<1x512xf32> to vector<16x512xf32>
    %191 = arith.mulf %189, %190 : vector<16x512xf32>
    %192 = arith.addf %185, %191 : vector<16x512xf32>
    %193 = vector.extract_strided_slice %29 {offsets = [0, 193], sizes = [1, 512], strides = [1, 1]} : vector<1x768xf32> to vector<1x512xf32>
    %194 = arith.mulf %193, %24 : vector<1x512xf32>
    %195 = vector.extract_strided_slice %30 {offsets = [0, 23], sizes = [16, 1], strides = [1, 1]} : vector<16x27xf32> to vector<16x1xf32>
    %196 = vector.broadcast %195 : vector<16x1xf32> to vector<16x512xf32>
    %197 = vector.broadcast %194 : vector<1x512xf32> to vector<16x512xf32>
    %198 = arith.mulf %196, %197 : vector<16x512xf32>
    %199 = arith.addf %192, %198 : vector<16x512xf32>
    %200 = vector.extract_strided_slice %29 {offsets = [0, 199], sizes = [1, 512], strides = [1, 1]} : vector<1x768xf32> to vector<1x512xf32>
    %201 = arith.mulf %200, %25 : vector<1x512xf32>
    %202 = vector.extract_strided_slice %30 {offsets = [0, 24], sizes = [16, 1], strides = [1, 1]} : vector<16x27xf32> to vector<16x1xf32>
    %203 = vector.broadcast %202 : vector<16x1xf32> to vector<16x512xf32>
    %204 = vector.broadcast %201 : vector<1x512xf32> to vector<16x512xf32>
    %205 = arith.mulf %203, %204 : vector<16x512xf32>
    %206 = arith.addf %199, %205 : vector<16x512xf32>
    %207 = vector.extract_strided_slice %29 {offsets = [0, 200], sizes = [1, 512], strides = [1, 1]} : vector<1x768xf32> to vector<1x512xf32>
    %208 = arith.mulf %207, %26 : vector<1x512xf32>
    %209 = vector.extract_strided_slice %30 {offsets = [0, 25], sizes = [16, 1], strides = [1, 1]} : vector<16x27xf32> to vector<16x1xf32>
    %210 = vector.broadcast %209 : vector<16x1xf32> to vector<16x512xf32>
    %211 = vector.broadcast %208 : vector<1x512xf32> to vector<16x512xf32>
    %212 = arith.mulf %210, %211 : vector<16x512xf32>
    %213 = arith.addf %206, %212 : vector<16x512xf32>
    %214 = vector.extract_strided_slice %29 {offsets = [0, 201], sizes = [1, 512], strides = [1, 1]} : vector<1x768xf32> to vector<1x512xf32>
    %215 = arith.mulf %214, %27 : vector<1x512xf32>
    %216 = vector.extract_strided_slice %30 {offsets = [0, 26], sizes = [16, 1], strides = [1, 1]} : vector<16x27xf32> to vector<16x1xf32>
    %217 = vector.broadcast %216 : vector<16x1xf32> to vector<16x512xf32>
    %218 = vector.broadcast %215 : vector<1x512xf32> to vector<16x512xf32>
    %219 = arith.mulf %217, %218 : vector<16x512xf32>
    %220 = arith.addf %213, %219 : vector<16x512xf32>
    %c0_6 = arith.constant 0 : index
    %c0_7 = arith.constant 0 : index
    %221 = vector.load %arg4[%c0_6, %c0_7] : memref<16x1xf32, #tpu.memory_space<vmem>>, vector<16x1xf32>
    %222 = vector.broadcast %221 : vector<16x1xf32> to vector<16x512xf32>
    %223 = arith.addf %220, %222 : vector<16x512xf32>
    %cst_8 = arith.constant 0.000000e+00 : f32
    %224 = vector.broadcast %cst_8 : f32 to vector<16x512xf32>
    %225 = arith.maximumf %223, %224 : vector<16x512xf32>
    %cst_9 = arith.constant 0.000000e+00 : f32
    %226 = vector.broadcast %cst_9 : f32 to vector<16x128xf32>
    %227 = tpu.concatenate %226, %225, %226 in 1 : vector<16x128xf32>, vector<16x512xf32>, vector<16x128xf32> -> vector<16x768xf32>
    %228 = vector.extract_strided_slice %227 {offsets = [0, 55], sizes = [16, 512], strides = [1, 1]} : vector<16x768xf32> to vector<16x512xf32>
    %229 = vector.broadcast %1 : vector<1x512xf32> to vector<16x512xf32>
    %230 = arith.mulf %228, %229 : vector<16x512xf32>
    %231 = arith.truncf %230 : vector<16x512xf32> to vector<16x512xbf16>
    %232 = vector.extract_strided_slice %227 {offsets = [0, 56], sizes = [16, 512], strides = [1, 1]} : vector<16x768xf32> to vector<16x512xf32>
    %233 = vector.broadcast %2 : vector<1x512xf32> to vector<16x512xf32>
    %234 = arith.mulf %232, %233 : vector<16x512xf32>
    %235 = arith.truncf %234 : vector<16x512xf32> to vector<16x512xbf16>
    %236 = vector.extract_strided_slice %227 {offsets = [0, 57], sizes = [16, 512], strides = [1, 1]} : vector<16x768xf32> to vector<16x512xf32>
    %237 = vector.broadcast %3 : vector<1x512xf32> to vector<16x512xf32>
    %238 = arith.mulf %236, %237 : vector<16x512xf32>
    %239 = arith.truncf %238 : vector<16x512xf32> to vector<16x512xbf16>
    %240 = vector.extract_strided_slice %227 {offsets = [0, 63], sizes = [16, 512], strides = [1, 1]} : vector<16x768xf32> to vector<16x512xf32>
    %241 = vector.broadcast %4 : vector<1x512xf32> to vector<16x512xf32>
    %242 = arith.mulf %240, %241 : vector<16x512xf32>
    %243 = arith.truncf %242 : vector<16x512xf32> to vector<16x512xbf16>
    %244 = vector.extract_strided_slice %227 {offsets = [0, 64], sizes = [16, 512], strides = [1, 1]} : vector<16x768xf32> to vector<16x512xf32>
    %245 = vector.broadcast %5 : vector<1x512xf32> to vector<16x512xf32>
    %246 = arith.mulf %244, %245 : vector<16x512xf32>
    %247 = arith.truncf %246 : vector<16x512xf32> to vector<16x512xbf16>
    %248 = vector.extract_strided_slice %227 {offsets = [0, 65], sizes = [16, 512], strides = [1, 1]} : vector<16x768xf32> to vector<16x512xf32>
    %249 = vector.broadcast %6 : vector<1x512xf32> to vector<16x512xf32>
    %250 = arith.mulf %248, %249 : vector<16x512xf32>
    %251 = arith.truncf %250 : vector<16x512xf32> to vector<16x512xbf16>
    %252 = vector.extract_strided_slice %227 {offsets = [0, 71], sizes = [16, 512], strides = [1, 1]} : vector<16x768xf32> to vector<16x512xf32>
    %253 = vector.broadcast %7 : vector<1x512xf32> to vector<16x512xf32>
    %254 = arith.mulf %252, %253 : vector<16x512xf32>
    %255 = arith.truncf %254 : vector<16x512xf32> to vector<16x512xbf16>
    %256 = vector.extract_strided_slice %227 {offsets = [0, 72], sizes = [16, 512], strides = [1, 1]} : vector<16x768xf32> to vector<16x512xf32>
    %257 = vector.broadcast %8 : vector<1x512xf32> to vector<16x512xf32>
    %258 = arith.mulf %256, %257 : vector<16x512xf32>
    %259 = arith.truncf %258 : vector<16x512xf32> to vector<16x512xbf16>
    %260 = vector.extract_strided_slice %227 {offsets = [0, 73], sizes = [16, 512], strides = [1, 1]} : vector<16x768xf32> to vector<16x512xf32>
    %261 = vector.broadcast %9 : vector<1x512xf32> to vector<16x512xf32>
    %262 = arith.mulf %260, %261 : vector<16x512xf32>
    %263 = arith.truncf %262 : vector<16x512xf32> to vector<16x512xbf16>
    %264 = vector.extract_strided_slice %227 {offsets = [0, 119], sizes = [16, 512], strides = [1, 1]} : vector<16x768xf32> to vector<16x512xf32>
    %265 = vector.broadcast %10 : vector<1x512xf32> to vector<16x512xf32>
    %266 = arith.mulf %264, %265 : vector<16x512xf32>
    %267 = arith.truncf %266 : vector<16x512xf32> to vector<16x512xbf16>
    %268 = vector.extract_strided_slice %227 {offsets = [0, 120], sizes = [16, 512], strides = [1, 1]} : vector<16x768xf32> to vector<16x512xf32>
    %269 = vector.broadcast %11 : vector<1x512xf32> to vector<16x512xf32>
    %270 = arith.mulf %268, %269 : vector<16x512xf32>
    %271 = arith.truncf %270 : vector<16x512xf32> to vector<16x512xbf16>
    %272 = vector.extract_strided_slice %227 {offsets = [0, 121], sizes = [16, 512], strides = [1, 1]} : vector<16x768xf32> to vector<16x512xf32>
    %273 = vector.broadcast %12 : vector<1x512xf32> to vector<16x512xf32>
    %274 = arith.mulf %272, %273 : vector<16x512xf32>
    %275 = arith.truncf %274 : vector<16x512xf32> to vector<16x512xbf16>
    %276 = vector.extract_strided_slice %227 {offsets = [0, 127], sizes = [16, 512], strides = [1, 1]} : vector<16x768xf32> to vector<16x512xf32>
    %277 = vector.broadcast %13 : vector<1x512xf32> to vector<16x512xf32>
    %278 = arith.mulf %276, %277 : vector<16x512xf32>
    %279 = arith.truncf %278 : vector<16x512xf32> to vector<16x512xbf16>
    %280 = vector.extract_strided_slice %227 {offsets = [0, 128], sizes = [16, 512], strides = [1, 1]} : vector<16x768xf32> to vector<16x512xf32>
    %281 = vector.broadcast %14 : vector<1x512xf32> to vector<16x512xf32>
    %282 = arith.mulf %280, %281 : vector<16x512xf32>
    %283 = arith.truncf %282 : vector<16x512xf32> to vector<16x512xbf16>
    %284 = vector.extract_strided_slice %227 {offsets = [0, 129], sizes = [16, 512], strides = [1, 1]} : vector<16x768xf32> to vector<16x512xf32>
    %285 = vector.broadcast %15 : vector<1x512xf32> to vector<16x512xf32>
    %286 = arith.mulf %284, %285 : vector<16x512xf32>
    %287 = arith.truncf %286 : vector<16x512xf32> to vector<16x512xbf16>
    %288 = vector.extract_strided_slice %227 {offsets = [0, 135], sizes = [16, 512], strides = [1, 1]} : vector<16x768xf32> to vector<16x512xf32>
    %289 = vector.broadcast %16 : vector<1x512xf32> to vector<16x512xf32>
    %290 = arith.mulf %288, %289 : vector<16x512xf32>
    %291 = arith.truncf %290 : vector<16x512xf32> to vector<16x512xbf16>
    %292 = vector.extract_strided_slice %227 {offsets = [0, 136], sizes = [16, 512], strides = [1, 1]} : vector<16x768xf32> to vector<16x512xf32>
    %293 = vector.broadcast %17 : vector<1x512xf32> to vector<16x512xf32>
    %294 = arith.mulf %292, %293 : vector<16x512xf32>
    %295 = arith.truncf %294 : vector<16x512xf32> to vector<16x512xbf16>
    %296 = vector.extract_strided_slice %227 {offsets = [0, 137], sizes = [16, 512], strides = [1, 1]} : vector<16x768xf32> to vector<16x512xf32>
    %297 = vector.broadcast %18 : vector<1x512xf32> to vector<16x512xf32>
    %298 = arith.mulf %296, %297 : vector<16x512xf32>
    %299 = arith.truncf %298 : vector<16x512xf32> to vector<16x512xbf16>
    %300 = vector.extract_strided_slice %227 {offsets = [0, 183], sizes = [16, 512], strides = [1, 1]} : vector<16x768xf32> to vector<16x512xf32>
    %301 = vector.broadcast %19 : vector<1x512xf32> to vector<16x512xf32>
    %302 = arith.mulf %300, %301 : vector<16x512xf32>
    %303 = arith.truncf %302 : vector<16x512xf32> to vector<16x512xbf16>
    %304 = vector.extract_strided_slice %227 {offsets = [0, 184], sizes = [16, 512], strides = [1, 1]} : vector<16x768xf32> to vector<16x512xf32>
    %305 = vector.broadcast %20 : vector<1x512xf32> to vector<16x512xf32>
    %306 = arith.mulf %304, %305 : vector<16x512xf32>
    %307 = arith.truncf %306 : vector<16x512xf32> to vector<16x512xbf16>
    %308 = vector.extract_strided_slice %227 {offsets = [0, 185], sizes = [16, 512], strides = [1, 1]} : vector<16x768xf32> to vector<16x512xf32>
    %309 = vector.broadcast %21 : vector<1x512xf32> to vector<16x512xf32>
    %310 = arith.mulf %308, %309 : vector<16x512xf32>
    %311 = arith.truncf %310 : vector<16x512xf32> to vector<16x512xbf16>
    %312 = vector.extract_strided_slice %227 {offsets = [0, 191], sizes = [16, 512], strides = [1, 1]} : vector<16x768xf32> to vector<16x512xf32>
    %313 = vector.broadcast %22 : vector<1x512xf32> to vector<16x512xf32>
    %314 = arith.mulf %312, %313 : vector<16x512xf32>
    %315 = arith.truncf %314 : vector<16x512xf32> to vector<16x512xbf16>
    %316 = vector.extract_strided_slice %227 {offsets = [0, 192], sizes = [16, 512], strides = [1, 1]} : vector<16x768xf32> to vector<16x512xf32>
    %317 = vector.broadcast %23 : vector<1x512xf32> to vector<16x512xf32>
    %318 = arith.mulf %316, %317 : vector<16x512xf32>
    %319 = arith.truncf %318 : vector<16x512xf32> to vector<16x512xbf16>
    %320 = vector.extract_strided_slice %227 {offsets = [0, 193], sizes = [16, 512], strides = [1, 1]} : vector<16x768xf32> to vector<16x512xf32>
    %321 = vector.broadcast %24 : vector<1x512xf32> to vector<16x512xf32>
    %322 = arith.mulf %320, %321 : vector<16x512xf32>
    %323 = arith.truncf %322 : vector<16x512xf32> to vector<16x512xbf16>
    %324 = vector.extract_strided_slice %227 {offsets = [0, 199], sizes = [16, 512], strides = [1, 1]} : vector<16x768xf32> to vector<16x512xf32>
    %325 = vector.broadcast %25 : vector<1x512xf32> to vector<16x512xf32>
    %326 = arith.mulf %324, %325 : vector<16x512xf32>
    %327 = arith.truncf %326 : vector<16x512xf32> to vector<16x512xbf16>
    %328 = vector.extract_strided_slice %227 {offsets = [0, 200], sizes = [16, 512], strides = [1, 1]} : vector<16x768xf32> to vector<16x512xf32>
    %329 = vector.broadcast %26 : vector<1x512xf32> to vector<16x512xf32>
    %330 = arith.mulf %328, %329 : vector<16x512xf32>
    %331 = arith.truncf %330 : vector<16x512xf32> to vector<16x512xbf16>
    %332 = vector.extract_strided_slice %227 {offsets = [0, 201], sizes = [16, 512], strides = [1, 1]} : vector<16x768xf32> to vector<16x512xf32>
    %333 = vector.broadcast %27 : vector<1x512xf32> to vector<16x512xf32>
    %334 = arith.mulf %332, %333 : vector<16x512xf32>
    %335 = arith.truncf %334 : vector<16x512xf32> to vector<16x512xbf16>
    %336 = tpu.concatenate %231, %235, %239, %243, %247, %251, %255, %259, %263, %267, %271, %275, %279, %283, %287, %291 in 0 : vector<16x512xbf16>, vector<16x512xbf16>, vector<16x512xbf16>, vector<16x512xbf16>, vector<16x512xbf16>, vector<16x512xbf16>, vector<16x512xbf16>, vector<16x512xbf16>, vector<16x512xbf16>, vector<16x512xbf16>, vector<16x512xbf16>, vector<16x512xbf16>, vector<16x512xbf16>, vector<16x512xbf16>, vector<16x512xbf16>, vector<16x512xbf16> -> vector<256x512xbf16>
    %337 = tpu.concatenate %295, %299, %303, %307, %311, %315, %319, %323, %327, %331, %335 in 0 : vector<16x512xbf16>, vector<16x512xbf16>, vector<16x512xbf16>, vector<16x512xbf16>, vector<16x512xbf16>, vector<16x512xbf16>, vector<16x512xbf16>, vector<16x512xbf16>, vector<16x512xbf16>, vector<16x512xbf16>, vector<16x512xbf16> -> vector<176x512xbf16>
    %338 = tpu.concatenate %336, %337 in 0 : vector<256x512xbf16>, vector<176x512xbf16> -> vector<432x512xbf16>
    %c0_10 = arith.constant 0 : index
    %c0_11 = arith.constant 0 : index
    %339 = vector.load %arg5[%c0_10, %c0_11] : memref<32x432xbf16, #tpu.memory_space<vmem>>, vector<32x432xbf16>
    %cst_12 = arith.constant dense<0.000000e+00> : vector<32x512xf32>
    %340 = tpu.matmul %339, %338, %cst_12 {dimension_numbers = #tpu.dot_dimension_numbers<[1], [0], [0], [1], [0, 0, 1, 1], [], []>} : vector<32x432xbf16>, vector<432x512xbf16>, vector<32x512xf32> -> vector<32x512xf32>
    %c0_13 = arith.constant 0 : index
    %c0_14 = arith.constant 0 : index
    %341 = vector.load %arg6[%c0_13, %c0_14] : memref<32x1xf32, #tpu.memory_space<vmem>>, vector<32x1xf32>
    %342 = vector.broadcast %341 : vector<32x1xf32> to vector<32x512xf32>
    %343 = arith.addf %340, %342 : vector<32x512xf32>
    %cst_15 = arith.constant 0.000000e+00 : f32
    %344 = vector.broadcast %cst_15 : f32 to vector<32x512xf32>
    %345 = arith.maximumf %343, %344 : vector<32x512xf32>
    %c0_16 = arith.constant 0 : index
    %c0_17 = arith.constant 0 : index
    %c0_18 = arith.constant 0 : index
    %346 = vector.load %arg7[%c0_16, %c0_17, %c0_18] : memref<1x32x512xf32, #tpu.memory_space<vmem>>, vector<1x32x512xf32>
    %347 = vector.shape_cast %346 : vector<1x32x512xf32> to vector<32x512xf32>
    %348 = vector.shape_cast %345 : vector<32x512xf32> to vector<1x32x512xf32>
    tpu.vector_store %arg7[%c0_16, %c0_17, %c0_18], %348 {strides = array<i32>} : memref<1x32x512xf32, #tpu.memory_space<vmem>>, vector<1x32x512xf32>,
    return
  }
  func.func @transform_0(%arg0: i32) -> (i32, i32, i32) {
    %c0_i32 = arith.constant 0 : i32
    %c0_i32_0 = arith.constant 0 : i32
    %c0_i32_1 = arith.constant 0 : i32
    return %arg0, %c0_i32, %c0_i32_0 : i32, i32, i32
  }
  func.func @transform_1(%arg0: i32) -> (i32, i32) {
    %c0_i32 = arith.constant 0 : i32
    %c0_i32_0 = arith.constant 0 : i32
    %c0_i32_1 = arith.constant 0 : i32
    return %c0_i32, %c0_i32_0 : i32, i32
  }
  func.func @transform_2(%arg0: i32) -> (i32, i32) {
    %c0_i32 = arith.constant 0 : i32
    %c0_i32_0 = arith.constant 0 : i32
    %c0_i32_1 = arith.constant 0 : i32
    return %c0_i32, %c0_i32_0 : i32, i32
  }
  func.func @transform_3(%arg0: i32) -> (i32, i32) {
    %c0_i32 = arith.constant 0 : i32
    %c0_i32_0 = arith.constant 0 : i32
    %c0_i32_1 = arith.constant 0 : i32
    return %c0_i32, %c0_i32_0 : i32, i32
  }
  func.func @transform_4(%arg0: i32) -> (i32, i32) {
    %c0_i32 = arith.constant 0 : i32
    %c0_i32_0 = arith.constant 0 : i32
    %c0_i32_1 = arith.constant 0 : i32
    return %c0_i32, %c0_i32_0 : i32, i32
  }
  func.func @transform_5(%arg0: i32) -> (i32, i32) {
    %c0_i32 = arith.constant 0 : i32
    %c0_i32_0 = arith.constant 0 : i32
    %c0_i32_1 = arith.constant 0 : i32
    return %c0_i32, %c0_i32_0 : i32, i32
  }
  func.func @transform_6(%arg0: i32) -> (i32, i32, i32) {
    %c0_i32 = arith.constant 0 : i32
    %c0_i32_0 = arith.constant 0 : i32
    %c0_i32_1 = arith.constant 0 : i32
    return %arg0, %c0_i32, %c0_i32_0 : i32, i32, i32
  }
}

</mosaic_0001>

<bundles_post_ra>
// kernel: vertex_normal_predictor_cnn_forward.1
= control target key start
LH: loop header
LB: loop body
LE: loop exit
PB: predicated region body
PF: predicated region fallthrough
CT: control target
= control target key end

     0   :  { %s6451_s21 = smov 0   ;;  %s10777_s0 = inlined_call_operand.vmem [shape: f32[2,1,768], index: 0, kind: input, shape index: {}]   ;;  %s10778_s1 = inlined_call_operand.vmem [shape: f32[27,512], index: 1, kind: input, shape index: {}]   ;;  %s10779_s2 = inlined_call_operand.vmem [shape: f32[16,27], index: 2, kind: input, shape index: {}]   ;;  %s10780_s3 = inlined_call_operand.vmem [shape: f32[16,1], index: 3, kind: input, shape index: {}]   ;;  %s10781_s4 = inlined_call_operand.vmem [shape: bf16[32,432], index: 4, kind: input, shape index: {}]   ;;  %s10782_s5 = inlined_call_operand.vmem [shape: f32[32,1], index: 5, kind: input, shape index: {}]   ;;  %s10783_s6 = inlined_call_operand.vmem [shape: f32[2,32,512], index: 6, kind: output, shape index: {}]  }
   0x1 LB: > { %s6156_s22 = sadd.s32 4294967295, %s6357_s21   ;;  %p6160_p0 = scmp.ge.s32.totalorder %s6357_s21, 1  ;;  %s6357_s21 = sphi %s6451_s21, %s16_s21  }
   0x2   : > { %p211_p1 = scmp.lt.s32.totalorder %s6357_s21, 3 }
   0x4   : > { %p212_p2 = pnand %p6160_p0, %p211_p1 }
   0x6   : > { %215 = sbr.rel (%p212_p2) target bundleno = 4694 (0x1256), region = 44 }
   0xb   : > { %v6462_v0 = vld [vmem:[%s10779_s2 + $0x8] sm:$0xff]  ;;  %v250_v1 = vld [vmem:[%s10778_s1] sm:$0xff]  ;;  %v278_v2 = vlaneseq  ;;  %v6359_v3 = vmov 1   ;;  %v10784_v4 = vmov 0   ;;  %v252_v6 = vld [vmem:[%s10778_s1 + $0x10] sm:$0xff]  ;;  %v6362_v16 = vmov 2  }
   0xc   : > { %6246 = vset.pattern.permute.xlu0 %v6359_v3  ;;  %6244 = vset.pattern.permute.xlu1 %v10784_v4  ;;  %v251_v5 = vld [vmem:[%s10778_s1 + $0x8] sm:$0xff]  ;;  %v253_v7 = vld [vmem:[%s10778_s1 + $0x18] sm:$0xff]  ;;  %v6361_v8 = vmov 1966171168   ;;  %v6484_v11 = vld [vmem:[%s10779_s2] sm:$0xff]  ;;  %s6363_s11 = smov 55  }
   0xd   : > { %380 = vperm.xlu0 %6246, %v6462_v0   ;;  %311 = vperm.xlu1 %6244, %v6462_v0   ;;  %v276_v9 = vunpack.c.l.s4 %v6361_v8  ;;  %v6479_v10 = vshrl.u32 %v278_v2, 7  ;;  %v273_v12 = vcombine.low %v250_v1, %v251_v5  ;;  %v274_v13 = vcombine.low %v252_v6, %v253_v7  ;;  %s6364_s12 = smov 56   ;;  %s6366_s13 = smov 57  }
   0xe   : > { %v6365_v24 = vmov 3   ;;  %v700_v25 = vcombine.high %v250_v1, %v251_v5  ;;  %v701_v26 = vcombine.high %v252_v6, %v253_v7  ;;  %v6367_v30 = vmov 4   ;;  %s6368_s14 = smov 63   ;;  %s6370_s15 = smov 64  }
   0xf   : > { %11048 = vst [vmem:[#allocation2_spill] sm:$0xff] %v6479_v10  ;;  %v277_v14 = vunpack.c.0.s8 %v276_v9  ;;  %v6369_v32 = vmov 5   ;;  %s6371_s16 = smov 65   ;;  %p240_p3 = scmp.lt.s32.totalorder %s6156_s22, 1  ;;  %v6372_v41 = vmov 6   ;;  %vm11035_vm0 = vcmask 457728  }
  0x10   : > { %v6545_v47 = vsub.s32 0, %v6479_v10  ;;  %v6548_v48 = vsub.s32 2, %v6479_v10  ;;  %v6552_v50 = vsub.s32 1, %v6479_v10  ;;  %v6559_v54 = vsub.s32 4, %v6479_v10  ;;  %s6373_s23 = smov 127   ;;  %s6374_s24 = smov 119  }
  0x11   : > { %6245 = vset.pattern.permute.xlu1 %v6359_v3  ;;  %v6487_v15 = vsub.s32 %v277_v14, %v6479_v10  ;;  %6248 = vset.pattern.permute.xlu0 %v6362_v16  ;;  %s11602_s22 = smov (!%p240_p3, %s6156_s22), 1  ;;  %v6564_v59 = vsub.s32 3, %v6479_v10  ;;  %vm11042_vm1 = vcmask 523264   ;;  %vm845_vm2 = vcmask 531456   ;;  %s10879_s25 = smov 118  }
  0x12   : > { %376 = vperm.xlu1 %6245, %v6484_v11   ;;  %s6178_s17 = smul.u32 6, %s11602_s22  ;;  %11049 = vst [vmem:[#allocation3_spill] sm:$0xff] %v6545_v47  ;;  %11050 = vst [vmem:[#allocation4_spill] sm:$0xff] %v6548_v48  ;;  %vm482_vm3 = vcmask 465920   ;;  %vm593_vm4 = vcmask 515072   ;;  %s10881_s26 = smov 126  }
  0x13   : > { %v281_v17 = vrot.slane %v273_v12, %v6487_v15  ;;  %v288_v18 = vrot.slane %v274_v13, %v6487_v15  ;;  %v708_v28 = vrot.slane %v700_v25, %v6487_v15  ;;  %v715_v29 = vrot.slane %v701_v26, %v6487_v15  ;;  %11051 = vst [vmem:[#allocation5_spill] sm:$0xff] %v6552_v50  ;;  %s6377_s27 = smov 120   ;;  %s6378_s28 = smov 71  }
  0x14   : > { %s6536_s20 = scalar_lea.vmem %s10777_s0, %s6178_s17  ;;  %11052 = vst [vmem:[#allocation6_spill] sm:$0xff] %v6559_v54  ;;  %11053 = vst [vmem:[#allocation7_spill] sm:$0xff] %v6564_v59  ;;  %vm956_vm5 = vcmask 580608   ;;  %s10803_s29 = smov 112   ;;  %vm1067_vm6 = vcmask 588800   ;;  %vm1205_vm7 = vcmask 596992  }
  0x15   : > { %v289_v19 = vcombine.low %v281_v17, %v288_v18  ;;  %v360_v20 = vcombine.high %v281_v17, %v288_v18  ;;  %v716_v31 = vcombine.low %v708_v28, %v715_v29  ;;  %v834_v34 = vcombine.high %v708_v28, %v715_v29  ;;  %v6541_v45 = vld [vmem:[%s6536_s20] sm:$0x3f]  ;;  %s6381_s30 = smov 72   ;;  %s10877_s7 = smov 111  }
  0x16   : > { %6247 = vset.pattern.permute.xlu1 %v6362_v16  ;;  %s10875_s8 = smov 110   ;;  %vm805_vm8 = vcmask 973824   ;;  %vm671_vm9 = vcmask 982016   ;;  %s6389_s9 = smov 121   ;;  %vm1541_vm10 = vcmask 990208   ;;  %vm449_vm11 = vcmask 1039360  }
  0x17   : > { %487 = vperm.xlu1 %6247, %v6484_v11   ;;  %v296_v21 = vrot.slane %v289_v19, %v6487_v15  ;;  %v367_v23 = vrot.slane %v360_v20, %v6487_v15  ;;  %v6506_v33 = vrot.slane %v716_v31, %v6487_v15  ;;  %v6513_v35 = vrot.slane %v834_v34, %v6487_v15  ;;  %s10873_s10 = smov 62   ;;  %s6406_s17 = smov 1  }
  0x18   : > { %vm300_vm12 = vcmask 449536   ;;  %vm10978_vm13 = vcmask 965632   ;;  %vm10977_vm14 = vcmask 1031168   ;;  %vm11043_vm15 = vcmask 916480  }
  0x19   : > { %297 = vrot.lane.b32.xlu0 %v296_v21, %s6363_s11  ;;  %v478_v22 = vcombine.high %v296_v21, %v296_v21  ;;  %v589_v27 = vcombine.high %v367_v23, %v367_v23 }
  0x1b   : > { %368 = vrot.lane.b32.xlu1 %v367_v23, %s6364_s12 }
  0x1c   : > { %6249 = vset.pattern.permute.xlu1 %v6365_v24 }
  0x1d   : > { %479 = vrot.lane.b32.xlu0 %v478_v22, %s6366_s13 }
  0x1f   : > { %598 = vperm.xlu1 %6249, %v6484_v11  }
  0x21   : > { %491 = vperm.xlu0 %6248, %v6462_v0  }
  0x23   : > { %6251 = vset.pattern.permute.xlu1 %v6367_v30 }
  0x24   : > { %732 = vperm.xlu1 %6251, %v6484_v11  }
  0x25   : > { %590 = vrot.lane.b32.xlu0 %v589_v27, %s6368_s14 }
  0x26   : > { %6250 = vset.pattern.permute.xlu0 %v6365_v24 }
  0x28   : > { %6253 = vset.pattern.permute.xlu1 %v6369_v32 }
  0x29   : > { %602 = vperm.xlu0 %6250, %v6462_v0   ;;  %850 = vperm.xlu1 %6253, %v6484_v11  }
  0x2d   : > { %724 = vrot.lane.b32.xlu0 %v6506_v33, %s6370_s15  ;;  %6255 = vset.pattern.permute.xlu1 %v6372_v41 }
  0x2e   : > { %6252 = vset.pattern.permute.xlu0 %v6367_v30 }
  0x31   : > { %736 = vperm.xlu0 %6252, %v6462_v0  }
  0x35   : > { %842 = vrot.lane.b32.xlu0 %v6513_v35, %s6371_s16 }
  0x36   : > { %6254 = vset.pattern.permute.xlu0 %v6369_v32 }
  0x39   : > { %854 = vperm.xlu0 %6254, %v6462_v0  }
  0x3d   : > { %6256 = vset.pattern.permute.xlu0 %v6372_v41 }
  0x88   : > { %v6518_v36 = vpop.permute.xlu1 %311  ;;  %v6522_v37 = vpop.permute.xlu0 %380 }
  0x8c   : > { %v6528_v39 = vpop.permute.xlu0 %297 }
  0x8d   : > { %v377_v38 = vpop.permute.xlu1 %376 }
  0x90   : > { %v6538_v44 = vpop.permute.xlu0 %479 }
  0x91   : > { %v481_v41 = vrot.slane %v6538_v44, 7 }
  0x92   : > { %v6531_v40 = vpop.permute.xlu1 %487 }
  0x96   : > { %v369_v42 = vpop.permute.xlu1 %368 }
  0x97   : > { %v370_v43 = vrot.slane %v369_v42, 7 }
  0x99   : > { %v372_v46 = vsel %vm11035_vm0, %v370_v43, %v369_v42 }
  0x9a   : > { %v374_v49 = vmul.f32 %v372_v46, %v6541_v45  ;;  %v6578_v6 = vpop.permute.xlu1 %598 }
  0x9c   : > { %v6554_v51 = vpop.permute.xlu0 %491  ;;  %v395_v52 = vrot.slane %v374_v49, %v6548_v48  ;;  %v387_v53 = vrot.slane %v374_v49, %v6545_v47  ;;  %v403_v57 = vrot.slane %v374_v49, %v6559_v54  ;;  %v391_v58 = vrot.slane %v374_v49, %v6552_v50 }
  0x9d   : > { %v399_v63 = vrot.slane %v374_v49, %v6564_v59  ;;  %v483_v49 = vsel %vm482_vm3, %v481_v41, %v6538_v44 }
  0x9e   : > { %v411_v55 = vmul.f32 %v395_v52, %v377_v38  ;;  %v409_v56 = vmul.f32 %v387_v53, %v377_v38  ;;  %v413_v61 = vmul.f32 %v403_v57, %v377_v38  ;;  %v410_v62 = vmul.f32 %v391_v58, %v377_v38 }
  0x9f   : > { %v415_v2 = vmul.f32 %v391_v58, %v6522_v37  ;;  %v412_v3 = vmul.f32 %v399_v63, %v377_v38  ;;  %v417_v8 = vmul.f32 %v399_v63, %v6522_v37  ;;  %v414_v9 = vmul.f32 %v387_v53, %v6522_v37  ;;  %v733_v16 = vpop.permute.xlu1 %732 }
  0xa0   : > { %v6566_v60 = vpop.permute.xlu0 %590  ;;  %433 = vrot.lane.b32.xlu0 %v411_v55, %s6373_s23  ;;  %429 = vrot.lane.b32.xlu1 %v409_v56, %s6373_s23  ;;  %v416_v17 = vmul.f32 %v395_v52, %v6522_v37  ;;  %v418_v23 = vmul.f32 %v403_v57, %v6522_v37  ;;  %v485_v57 = vmul.f32 %v483_v49, %v6541_v45 }
  0xa2   : > { %v506_v44 = vrot.slane %v485_v57, %v6548_v48 }
  0xa4   : > { %v6571_v1 = vpop.permute.xlu0 %602  ;;  %437 = vrot.lane.b32.xlu0 %v413_v61, %s6373_s23  ;;  %431 = vrot.lane.b32.xlu1 %v410_v62, %s6373_s23  ;;  %v851_v37 = vpop.permute.xlu1 %850  ;;  %v527_v41 = vmul.f32 %v506_v44, %v6554_v51 }
  0xa8   : > { %v725_v5 = vpop.permute.xlu0 %724  ;;  %441 = vrot.lane.b32.xlu0 %v415_v2, %s6373_s23  ;;  %435 = vrot.lane.b32.xlu1 %v412_v3, %s6373_s23  ;;  %v522_v2 = vmul.f32 %v506_v44, %v6531_v40  ;;  %v514_v3 = vrot.slane %v485_v57, %v6559_v54 }
  0xa9   : > { %v726_v7 = vrot.slane %v725_v5, 7 }
  0xab   : > { %v728_v12 = vsel %vm11042_vm1, %v726_v7, %v725_v5  ;;  %v592_v5 = vrot.slane %v6566_v60, 7 }
  0xac   : > { %v730_v13 = vmul.f32 %v728_v12, %v6541_v45  ;;  %445 = vrot.lane.b32.xlu0 %v417_v8, %s6373_s23  ;;  %439 = vrot.lane.b32.xlu1 %v414_v9, %s6373_s23  ;;  %v737_v14 = vpop.permute.xlu0 %736  ;;  %v524_v8 = vmul.f32 %v514_v3, %v6531_v40 }
  0xad   : > { %v594_v9 = vsel %vm593_vm4, %v592_v5, %v6566_v60 }
  0xae   : > { %v751_v18 = vrot.slane %v730_v13, %v6548_v48  ;;  %v759_v19 = vrot.slane %v730_v13, %v6559_v54  ;;  %v743_v25 = vrot.slane %v730_v13, %v6545_v47  ;;  %v747_v27 = vrot.slane %v730_v13, %v6552_v50 }
  0xaf   : > { %v755_v31 = vrot.slane %v730_v13, %v6564_v59  ;;  %v502_v13 = vrot.slane %v485_v57, %v6552_v50 }
  0xb0   : > { %443 = vrot.lane.b32.xlu1 %v416_v17, %s6373_s23  ;;  %v767_v20 = vmul.f32 %v751_v18, %v733_v16  ;;  %v843_v21 = vpop.permute.xlu0 %842  ;;  %v769_v24 = vmul.f32 %v759_v19, %v733_v16  ;;  %v765_v29 = vmul.f32 %v743_v25, %v733_v16  ;;  %v771_v30 = vmul.f32 %v747_v27, %v737_v14 }
  0xb1   : > { %v844_v22 = vrot.slane %v843_v21, 7  ;;  %v766_v32 = vmul.f32 %v747_v27, %v733_v16  ;;  %v773_v38 = vmul.f32 %v755_v31, %v737_v14  ;;  %v768_v42 = vmul.f32 %v755_v31, %v733_v16 }
  0xb2   : > { %789 = vrot.lane.b32.xlu0 %v767_v20, %s6374_s24  ;;  %v770_v52 = vmul.f32 %v743_v25, %v737_v14  ;;  %v772_v58 = vmul.f32 %v751_v18, %v737_v14  ;;  %v774_v62 = vmul.f32 %v759_v19, %v737_v14  ;;  %v596_v16 = vmul.f32 %v594_v9, %v6541_v45 }
  0xb3   : > { %v846_v26 = vsel %vm845_vm2, %v844_v22, %v843_v21  ;;  %v526_v17 = vmul.f32 %v502_v13, %v6554_v51  ;;  %v510_v19 = vrot.slane %v485_v57, %v6564_v59  ;;  %v498_v22 = vrot.slane %v485_v57, %v6545_v47 }
  0xb4   : > { %447 = vrot.lane.b32.xlu1 %v418_v23, %s6373_s23  ;;  %v848_v28 = vmul.f32 %v846_v26, %v6541_v45  ;;  %v6617_v56 = vpop.permute.xlu0 %854  ;;  %v617_v20 = vrot.slane %v596_v16, %v6548_v48  ;;  %v613_v27 = vrot.slane %v596_v16, %v6552_v50 }
  0xb5   : > { %v528_v60 = vmul.f32 %v510_v19, %v6554_v51  ;;  %v520_v25 = vmul.f32 %v498_v22, %v6531_v40  ;;  %v523_v31 = vmul.f32 %v510_v19, %v6531_v40 }
  0xb6   : > { %793 = vrot.lane.b32.xlu0 %v769_v24, %s6374_s24  ;;  %v6602_v34 = vrot.slane %v848_v28, %v6548_v48  ;;  %v6609_v46 = vrot.slane %v848_v28, %v6559_v54  ;;  %v865_v55 = vrot.slane %v848_v28, %v6552_v50  ;;  %v861_v63 = vrot.slane %v848_v28, %v6545_v47 }
  0xb7   : > { %v873_v14 = vrot.slane %v848_v28, %v6564_v59  ;;  %v633_v23 = vmul.f32 %v617_v20, %v6578_v6  ;;  %v625_v24 = vrot.slane %v596_v16, %v6559_v54  ;;  %v521_v28 = vmul.f32 %v502_v13, %v6531_v40 }
  0xb8   : > { %785 = vrot.lane.b32.xlu1 %v765_v29, %s6374_s24  ;;  %v885_v43 = vmul.f32 %v6602_v34, %v851_v37  ;;  %v887_v53 = vmul.f32 %v6609_v46, %v851_v37  ;;  %v889_v61 = vmul.f32 %v865_v55, %v6617_v56  ;;  %v883_v7 = vmul.f32 %v861_v63, %v851_v37 }
  0xb9   : > { %v884_v12 = vmul.f32 %v865_v55, %v851_v37  ;;  %v886_v18 = vmul.f32 %v873_v14, %v851_v37  ;;  %v888_v21 = vmul.f32 %v861_v63, %v6617_v56  ;;  %v635_v26 = vmul.f32 %v625_v24, %v6578_v6 }
  0xba   : > { %797 = vrot.lane.b32.xlu0 %v771_v30, %s6374_s24  ;;  %v637_v29 = vmul.f32 %v613_v27, %v6571_v1  ;;  %v621_v30 = vrot.slane %v596_v16, %v6564_v59  ;;  %v525_v37 = vmul.f32 %v498_v22, %v6554_v51  ;;  %v529_v40 = vmul.f32 %v514_v3, %v6554_v51 }
  0xbb   : > { %v640_v55 = vmul.f32 %v625_v24, %v6571_v1  ;;  %v890_v57 = vmul.f32 %v6602_v34, %v6617_v56 }
  0xbc   : > { %787 = vrot.lane.b32.xlu1 %v766_v32, %s6374_s24  ;;  %v639_v32 = vmul.f32 %v621_v30, %v6571_v1 }
  0xbe   : > { %801 = vrot.lane.b32.xlu0 %v773_v38, %s6374_s24  ;;  %v891_v38 = vmul.f32 %v873_v14, %v6617_v56 }
  0xc0   : > { %791 = vrot.lane.b32.xlu1 %v768_v42, %s6374_s24  ;;  %v952_v42 = vcombine.high %v6506_v33, %v6506_v33  ;;  %v634_v33 = vmul.f32 %v621_v30, %v6578_v6 }
  0xc2   : > { %907 = vrot.lane.b32.xlu0 %v885_v43, %s10879_s25  ;;  %v609_v43 = vrot.slane %v596_v16, %v6545_v47 }
  0xc4   : > { %795 = vrot.lane.b32.xlu1 %v770_v52, %s6374_s24  ;;  %v631_v49 = vmul.f32 %v609_v43, %v6578_v6  ;;  %v632_v52 = vmul.f32 %v613_v27, %v6578_v6  ;;  %v636_v51 = vmul.f32 %v609_v43, %v6571_v1 }
  0xc6   : > { %911 = vrot.lane.b32.xlu0 %v887_v53, %s10879_s25  ;;  %v638_v53 = vmul.f32 %v617_v20, %v6571_v1 }
  0xc8   : > { %799 = vrot.lane.b32.xlu1 %v772_v58, %s6374_s24 }
  0xca   : > { %915 = vrot.lane.b32.xlu0 %v889_v61, %s10879_s25  ;;  %v892_v61 = vmul.f32 %v6609_v46, %v6617_v56 }
  0xcc   : > { %803 = vrot.lane.b32.xlu1 %v774_v62, %s6374_s24 }
  0xce   : > { %544 = vrot.lane.b32.xlu0 %v522_v2, %s10881_s26 }
  0xd0   : > { %903 = vrot.lane.b32.xlu1 %v883_v7, %s10879_s25  ;;  %v6379_v7 = vmov 7  }
  0xd2   : > { %548 = vrot.lane.b32.xlu0 %v524_v8, %s10881_s26 }
  0xd4   : > { %905 = vrot.lane.b32.xlu1 %v884_v12, %s10879_s25 }
  0xd6   : > { %552 = vrot.lane.b32.xlu0 %v526_v17, %s10881_s26 }
  0xd8   : > { %909 = vrot.lane.b32.xlu1 %v886_v18, %s10879_s25 }
  0xda   : > { %556 = vrot.lane.b32.xlu0 %v528_v60, %s10881_s26 }
  0xdc   : > { %913 = vrot.lane.b32.xlu1 %v888_v21, %s10879_s25 }
  0xde   : > { %655 = vrot.lane.b32.xlu0 %v633_v23, %s6377_s27 }
  0xe0   : > { %540 = vrot.lane.b32.xlu1 %v520_v25, %s10881_s26 }
  0xe2   : > { %659 = vrot.lane.b32.xlu0 %v635_v26, %s6377_s27 }
  0xe4   : > { %542 = vrot.lane.b32.xlu1 %v521_v28, %s10881_s26 }
  0xe6   : > { %663 = vrot.lane.b32.xlu0 %v637_v29, %s6377_s27 }
  0xe8   : > { %546 = vrot.lane.b32.xlu1 %v523_v31, %s10881_s26 }
  0xea   : > { %667 = vrot.lane.b32.xlu0 %v639_v32, %s6377_s27 }
  0xec   : > { %550 = vrot.lane.b32.xlu1 %v525_v37, %s10881_s26 }
  0xee   : > { %919 = vrot.lane.b32.xlu0 %v891_v38, %s10879_s25 }
  0xf0   : > { %554 = vrot.lane.b32.xlu1 %v527_v41, %s10881_s26 }
  0xf2   : > { %953 = vrot.lane.b32.xlu0 %v952_v42, %s6378_s28 }
  0xf4   : > { %558 = vrot.lane.b32.xlu1 %v529_v40, %s10881_s26 }
  0xf6   : > { %965 = vperm.xlu0 %6256, %v6462_v0  }
  0xf8   : > { %651 = vrot.lane.b32.xlu1 %v631_v49, %s6377_s27 }
  0xfa   : > { %6258 = vset.pattern.permute.xlu0 %v6379_v7 }
  0xfc   : > { %653 = vrot.lane.b32.xlu1 %v632_v52, %s6377_s27 }
 0x100   : > { %657 = vrot.lane.b32.xlu1 %v634_v33, %s6377_s27 }
 0x104   : > { %661 = vrot.lane.b32.xlu1 %v636_v51, %s6377_s27 }
 0x108   : > { %665 = vrot.lane.b32.xlu1 %v638_v53, %s6377_s27 }
 0x10c   : > { %669 = vrot.lane.b32.xlu1 %v640_v55, %s6377_s27 }
 0x110   : > { %917 = vrot.lane.b32.xlu1 %v890_v57, %s10879_s25 }
 0x112   : > { %v6696_v6 = vpop.permute.xlu0 %433  ;;  %v6698_v58 = vpop.permute.xlu1 %429 }
 0x114   : > { %921 = vrot.lane.b32.xlu1 %v892_v61, %s10879_s25  ;;  %s6408_s25 = smov 8  }
 0x116   : > { %v6703_v44 = vpop.permute.xlu0 %437  ;;  %v6705_v62 = vpop.permute.xlu1 %431 }
 0x118   : > { %961 = vperm.xlu1 %6255, %v6484_v11  }
 0x11a   : > { %v6708_v1 = vpop.permute.xlu0 %441  ;;  %v6710_v34 = vpop.permute.xlu1 %435 }
 0x11c   : > { %6257 = vset.pattern.permute.xlu1 %v6379_v7 }
 0x11e   : > { %v6712_v63 = vpop.permute.xlu1 %439  ;;  %v6714_v2 = vpop.permute.xlu0 %445 }
 0x122   : > { %v6716_v3 = vpop.permute.xlu1 %443 }
 0x124   : > { %v6718_v5 = vpop.permute.xlu0 %789 }
 0x126   : > { %v6720_v46 = vpop.permute.xlu1 %447 }
 0x128   : > { %v6724_v8 = vpop.permute.xlu0 %793 }
 0x12a   : > { %v6722_v56 = vpop.permute.xlu1 %785 }
 0x12c   : > { %v6728_v12 = vpop.permute.xlu0 %797 }
 0x12e   : > { %v6726_v9 = vpop.permute.xlu1 %787 }
 0x130   : > { %v6734_v16 = vpop.permute.xlu0 %801 }
 0x132   : > { %v6730_v13 = vpop.permute.xlu1 %791 }
 0x134   : > { %v6738_v18 = vpop.permute.xlu0 %907 }
 0x135   : > { %11054 = vst [vmem:[#allocation8_spill] sm:$0xff] %v6738_v18 }
 0x136   : > { %v6732_v14 = vpop.permute.xlu1 %795 }
 0x138   : > { %v6744_v20 = vpop.permute.xlu0 %911 }
 0x139   : > { %11055 = vst [vmem:[#allocation9_spill] sm:$0xff] %v6744_v20 }
 0x13a   : > { %v6736_v17 = vpop.permute.xlu1 %799 }
 0x13c   : > { %v6748_v22 = vpop.permute.xlu0 %915 }
 0x13d   : > { %11056 = vst [vmem:[#allocation10_spill] sm:$0xff] %v6748_v22 }
 0x13e   : > { %v6740_v19 = vpop.permute.xlu1 %803 }
 0x140   : > { %v6754_v25 = vpop.permute.xlu0 %544 }
 0x142   : > { %v6742_v60 = vpop.permute.xlu1 %903 }
 0x144   : > { %v6758_v27 = vpop.permute.xlu0 %548 }
 0x145   : > { %11059 = vst [vmem:[#allocation13_spill] sm:$0xff] %v6758_v27 }
 0x146   : > { %v6746_v21 = vpop.permute.xlu1 %905 }
 0x148   : > { %v6764_v30 = vpop.permute.xlu0 %552 }
 0x14a   : > { %v6750_v23 = vpop.permute.xlu1 %909 }
 0x14b   : > { %11057 = vst [vmem:[#allocation11_spill] sm:$0xff] %v6750_v23 }
 0x14c   : > { %v6768_v32 = vpop.permute.xlu0 %556 }
 0x14d   : > { %11060 = vst [vmem:[#allocation14_spill] sm:$0xff] %v6768_v32 }
 0x14e   : > { %v6752_v24 = vpop.permute.xlu1 %913 }
 0x14f   : > { %11058 = vst [vmem:[#allocation12_spill] sm:$0xff] %v6752_v24 }
 0x150   : > { %v6774_v41 = vpop.permute.xlu0 %655 }
 0x151   : > { %11062 = vst [vmem:[#allocation16_spill] sm:$0xff] %v6774_v41 }
 0x152   : > { %v6756_v26 = vpop.permute.xlu1 %540 }
 0x154   : > { %v6778_v40 = vpop.permute.xlu0 %659 }
 0x155   : > { %11064 = vst [vmem:[#allocation18_spill] sm:$0xff] %v6778_v40 }
 0x156   : > { %v6760_v28 = vpop.permute.xlu1 %542 }
 0x158   : > { %v6784_v52 = vpop.permute.xlu0 %663 }
 0x15a   : > { %v6762_v29 = vpop.permute.xlu1 %546 }
 0x15c   : > { %v6788_v51 = vpop.permute.xlu0 %667 }
 0x15d   : > { %11067 = vst [vmem:[#allocation21_spill] sm:$0xff] %v6788_v51 }
 0x15e   : > { %v6766_v31 = vpop.permute.xlu1 %550 }
 0x160   : > { %v6792_v55 = vpop.permute.xlu0 %919 }
 0x161   : > { %11069 = vst [vmem:[#allocation23_spill] sm:$0xff] %v6792_v55 }
 0x162   : > { %v6770_v37 = vpop.permute.xlu1 %554 }
 0x164   : > { %v954_v61 = vpop.permute.xlu0 %953 }
 0x165   : > { %v955_v7 = vrot.slane %v954_v61, 7 }
 0x166   : > { %v6772_v38 = vpop.permute.xlu1 %558 }
 0x167   : > { %11061 = vst [vmem:[#allocation15_spill] sm:$0xff] %v6772_v38  ;;  %v957_v10 = vsel %vm956_vm5, %v955_v7, %v954_v61 }
 0x168   : > { %v959_v24 = vmul.f32 %v957_v10, %v6541_v45 }
 0x16a   : > { %v6776_v42 = vpop.permute.xlu1 %651  ;;  %v980_v22 = vrot.slane %v959_v24, %v6548_v48  ;;  %v972_v23 = vrot.slane %v959_v24, %v6545_v47  ;;  %v976_v61 = vrot.slane %v959_v24, %v6552_v50 }
 0x16b   : > { %11063 = vst [vmem:[#allocation17_spill] sm:$0xff] %v6776_v42 }
 0x16e   : > { %v6780_v43 = vpop.permute.xlu1 %653 }
 0x16f   : > { %11065 = vst [vmem:[#allocation19_spill] sm:$0xff] %v6780_v43 }
 0x172   : > { %v6782_v49 = vpop.permute.xlu1 %657 }
 0x173   : > { %11066 = vst [vmem:[#allocation20_spill] sm:$0xff] %v6782_v49  ;;  %v1063_v49 = vcombine.high %v6513_v35, %v6513_v35 }
 0x176   : > { %v6786_v33 = vpop.permute.xlu1 %661 }
 0x17a   : > { %v6790_v53 = vpop.permute.xlu1 %665 }
 0x17b   : > { %11068 = vst [vmem:[#allocation22_spill] sm:$0xff] %v6790_v53 }
 0x17e   : > { %v6794_v57 = vpop.permute.xlu1 %669 }
 0x17f   : > { %11070 = vst [vmem:[#allocation24_spill] sm:$0xff] %v6794_v57  ;;  %v966_v57 = vpop.permute.xlu0 %965 }
 0x180   : > { %v1000_v51 = vmul.f32 %v976_v61, %v966_v57 }
 0x182   : > { %v6796_v4 = vpop.permute.xlu1 %917 }
 0x183   : > { %11071 = vst [vmem:[#allocation25_spill] sm:$0xff] %v6796_v4  ;;  %v988_v4 = vrot.slane %v959_v24, %v6559_v54 }
 0x186   : > { %v6800_v20 = vpop.permute.xlu1 %921 }
 0x187   : > { %11072 = vst [vmem:[#allocation26_spill] sm:$0xff] %v6800_v20  ;;  %v984_v20 = vrot.slane %v959_v24, %v6564_v59  ;;  %v1003_v24 = vmul.f32 %v988_v4, %v966_v57 }
 0x193   : > { %v962_v40 = vpop.permute.xlu1 %961 }
 0x194   : > { %v996_v18 = vmul.f32 %v980_v22, %v962_v40  ;;  %v994_v55 = vmul.f32 %v972_v23, %v962_v40  ;;  %v998_v7 = vmul.f32 %v988_v4, %v962_v40  ;;  %v995_v10 = vmul.f32 %v976_v61, %v962_v40 }
 0x195   : > { %v997_v41 = vmul.f32 %v984_v20, %v962_v40 }
 0x196   : > { %1018 = vrot.lane.b32.xlu0 %v996_v18, %s10803_s29  ;;  %1014 = vrot.lane.b32.xlu1 %v994_v55, %s10803_s29  ;;  %v1002_v18 = vmul.f32 %v984_v20, %v966_v57  ;;  %v999_v55 = vmul.f32 %v972_v23, %v966_v57  ;;  %v6382_v20 = vmov 8  }
 0x19a   : > { %1022 = vrot.lane.b32.xlu0 %v998_v7, %s10803_s29  ;;  %1016 = vrot.lane.b32.xlu1 %v995_v10, %s10803_s29  ;;  %v1001_v7 = vmul.f32 %v980_v22, %v966_v57 }
 0x19e   : > { %1026 = vrot.lane.b32.xlu0 %v1000_v51, %s10803_s29  ;;  %1020 = vrot.lane.b32.xlu1 %v997_v41, %s10803_s29 }
 0x1a2   : > { %1030 = vrot.lane.b32.xlu0 %v1002_v18, %s10803_s29  ;;  %1024 = vrot.lane.b32.xlu1 %v999_v55, %s10803_s29 }
 0x1a6   : > { %1028 = vrot.lane.b32.xlu1 %v1001_v7, %s10803_s29  ;;  %1064 = vrot.lane.b32.xlu0 %v1063_v49, %s6381_s30 }
 0x1aa   : > { %1032 = vrot.lane.b32.xlu1 %v1003_v24, %s10803_s29  ;;  %1076 = vperm.xlu0 %6258, %v6462_v0   ;;  %s6384_s29 = smov 73  }
 0x1ae   : > { %1072 = vperm.xlu1 %6257, %v6484_v11   ;;  %6260 = vset.pattern.permute.xlu0 %v6382_v20 }
 0x1b2   : > { %6259 = vset.pattern.permute.xlu1 %v6382_v20 }
 0x208   : > { %v6822_v23 = vpop.permute.xlu0 %1018  ;;  %v6824_v41 = vpop.permute.xlu1 %1014 }
 0x209   : > { %11073 = vst [vmem:[#allocation27_spill] sm:$0xff] %v6822_v23  ;;  %11074 = vst [vmem:[#allocation28_spill] sm:$0xff] %v6824_v41 }
 0x20c   : > { %v6826_v35 = vpop.permute.xlu0 %1022  ;;  %v6828_v22 = vpop.permute.xlu1 %1016 }
 0x20d   : > { %11075 = vst [vmem:[#allocation29_spill] sm:$0xff] %v6826_v35  ;;  %11076 = vst [vmem:[#allocation30_spill] sm:$0xff] %v6828_v22  ;;  %v6849_v35 = vld [vmem:[%s10778_s1 + $0x20] sm:$0xff] }
 0x210   : > { %v6830_v40 = vpop.permute.xlu0 %1026  ;;  %v6832_v4 = vpop.permute.xlu1 %1020 }
 0x211   : > { %11077 = vst [vmem:[#allocation31_spill] sm:$0xff] %v6830_v40  ;;  %11078 = vst [vmem:[#allocation32_spill] sm:$0xff] %v6832_v4  ;;  %v6854_v4 = vld [vmem:[%s10778_s1 + $0x28] sm:$0xff] }
 0x212   : > { %v1178_v41 = vcombine.low %v6849_v35, %v6854_v4 }
 0x214   : > { %v6834_v49 = vpop.permute.xlu0 %1030  ;;  %v6836_v51 = vpop.permute.xlu1 %1024 }
 0x215   : > { %11079 = vst [vmem:[#allocation33_spill] sm:$0xff] %v6834_v49  ;;  %11080 = vst [vmem:[#allocation34_spill] sm:$0xff] %v6836_v51 }
 0x218   : > { %v1065_v57 = vpop.permute.xlu0 %1064  ;;  %v6838_v10 = vpop.permute.xlu1 %1028 }
 0x219   : > { %v1066_v61 = vrot.slane %v1065_v57, 7  ;;  %11081 = vst [vmem:[#allocation35_spill] sm:$0xff] %v6838_v10 }
 0x21b   : > { %v1068_v18 = vsel %vm1067_vm6, %v1066_v61, %v1065_v57  ;;  %v6859_v57 = vld [vmem:[%s10778_s1 + $0x30] sm:$0xff]  ;;  %v6864_v61 = vld [vmem:[%s10778_s1 + $0x38] sm:$0xff] }
 0x21c   : > { %v1070_v55 = vmul.f32 %v1068_v18, %v6541_v45  ;;  %v6842_v7 = vpop.permute.xlu1 %1032  ;;  %v1179_v10 = vcombine.low %v6859_v57, %v6864_v61 }
 0x21d   : > { %11082 = vst [vmem:[#allocation36_spill] sm:$0xff] %v6842_v7 }
 0x21e   : > { %v1091_v24 = vrot.slane %v1070_v55, %v6548_v48  ;;  %v1083_v20 = vrot.slane %v1070_v55, %v6545_v47  ;;  %v1099_v22 = vrot.slane %v1070_v55, %v6559_v54  ;;  %v1087_v49 = vrot.slane %v1070_v55, %v6552_v50 }
 0x21f   : > { %v1095_v43 = vrot.slane %v1070_v55, %v6564_v59 }
 0x225   : > { %v1077_v42 = vpop.permute.xlu0 %1076 }
 0x226   : > { %v1111_v53 = vmul.f32 %v1087_v49, %v1077_v42  ;;  %v1110_v32 = vmul.f32 %v1083_v20, %v1077_v42 }
 0x229   : > { %v1073_v23 = vpop.permute.xlu1 %1072 }
 0x22a   : > { %v1107_v18 = vmul.f32 %v1091_v24, %v1073_v23  ;;  %v1105_v7 = vmul.f32 %v1083_v20, %v1073_v23  ;;  %v1109_v51 = vmul.f32 %v1099_v22, %v1073_v23  ;;  %v1106_v40 = vmul.f32 %v1087_v49, %v1073_v23 }
 0x22b   : > { %v1108_v38 = vmul.f32 %v1095_v43, %v1073_v23 }
 0x22c   : > { %1129 = vrot.lane.b32.xlu0 %v1107_v18, %s10877_s7  ;;  %1125 = vrot.lane.b32.xlu1 %v1105_v7, %s10877_s7  ;;  %v6878_v18 = vrot.slane %v1178_v41, %v6487_v15  ;;  %v6881_v7 = vrot.slane %v1179_v10, %v6487_v15 }
 0x22e   : > { %v1194_v27 = vcombine.low %v6878_v18, %v6881_v7 }
 0x230   : > { %1133 = vrot.lane.b32.xlu0 %v1109_v51, %s10877_s7  ;;  %1127 = vrot.lane.b32.xlu1 %v1106_v40, %s10877_s7  ;;  %v1113_v51 = vmul.f32 %v1095_v43, %v1077_v42  ;;  %v6890_v41 = vrot.slane %v1194_v27, %v6487_v15  ;;  %v1112_v40 = vmul.f32 %v1091_v24, %v1077_v42  ;;  %v6385_v43 = vmov 9  }
 0x234   : > { %1137 = vrot.lane.b32.xlu0 %v1111_v53, %s10877_s7  ;;  %1131 = vrot.lane.b32.xlu1 %v1108_v38, %s10877_s7  ;;  %v1114_v38 = vmul.f32 %v1099_v22, %v1077_v42 }
 0x238   : > { %1141 = vrot.lane.b32.xlu0 %v1113_v51, %s10877_s7  ;;  %1135 = vrot.lane.b32.xlu1 %v1110_v32, %s10877_s7 }
 0x23c   : > { %1139 = vrot.lane.b32.xlu1 %v1112_v40, %s10877_s7  ;;  %1202 = vrot.lane.b32.xlu0 %v6890_v41, %s6384_s29 }
 0x240   : > { %1143 = vrot.lane.b32.xlu1 %v1114_v38, %s10877_s7  ;;  %1214 = vperm.xlu0 %6260, %v6462_v0  }
 0x244   : > { %1210 = vperm.xlu1 %6259, %v6484_v11   ;;  %6262 = vset.pattern.permute.xlu0 %v6385_v43 }
 0x248   : > { %6261 = vset.pattern.permute.xlu1 %v6385_v43 }
 0x29e   : > { %v6898_v32 = vpop.permute.xlu0 %1129  ;;  %v6900_v27 = vpop.permute.xlu1 %1125 }
 0x29f   : > { %11083 = vst [vmem:[#allocation37_spill] sm:$0xff] %v6898_v32  ;;  %11084 = vst [vmem:[#allocation38_spill] sm:$0xff] %v6900_v27 }
 0x2a2   : > { %v6902_v53 = vpop.permute.xlu0 %1133  ;;  %v6904_v23 = vpop.permute.xlu1 %1127 }
 0x2a3   : > { %11085 = vst [vmem:[#allocation39_spill] sm:$0xff] %v6902_v53  ;;  %11086 = vst [vmem:[#allocation40_spill] sm:$0xff] %v6904_v23 }
 0x2a6   : > { %v6906_v49 = vpop.permute.xlu0 %1137  ;;  %v6908_v42 = vpop.permute.xlu1 %1131 }
 0x2a7   : > { %11087 = vst [vmem:[#allocation41_spill] sm:$0xff] %v6906_v49  ;;  %11088 = vst [vmem:[#allocation42_spill] sm:$0xff] %v6908_v42 }
 0x2aa   : > { %v6910_v22 = vpop.permute.xlu0 %1141  ;;  %v6912_v10 = vpop.permute.xlu1 %1135 }
 0x2ab   : > { %11089 = vst [vmem:[#allocation43_spill] sm:$0xff] %v6910_v22  ;;  %11090 = vst [vmem:[#allocation44_spill] sm:$0xff] %v6912_v10 }
 0x2ae   : > { %v1203_v55 = vpop.permute.xlu0 %1202  ;;  %v6914_v20 = vpop.permute.xlu1 %1139 }
 0x2af   : > { %v1204_v24 = vrot.slane %v1203_v55, 7  ;;  %11091 = vst [vmem:[#allocation45_spill] sm:$0xff] %v6914_v20 }
 0x2b1   : > { %v1206_v51 = vsel %vm1205_vm7, %v1204_v24, %v1203_v55 }
 0x2b2   : > { %v1208_v40 = vmul.f32 %v1206_v51, %v6541_v45  ;;  %v6918_v38 = vpop.permute.xlu1 %1143 }
 0x2b3   : > { %11092 = vst [vmem:[#allocation46_spill] sm:$0xff] %v6918_v38 }
 0x2b4   : > { %v1229_v43 = vrot.slane %v1208_v40, %v6548_v48  ;;  %v1221_v53 = vrot.slane %v1208_v40, %v6545_v47  ;;  %v1237_v20 = vrot.slane %v1208_v40, %v6559_v54  ;;  %v1225_v55 = vrot.slane %v1208_v40, %v6552_v50 }
 0x2b5   : > { %v1233_v38 = vrot.slane %v1208_v40, %v6564_v59 }
 0x2bb   : > { %v1215_v10 = vpop.permute.xlu0 %1214 }
 0x2bc   : > { %v1249_v42 = vmul.f32 %v1225_v55, %v1215_v10  ;;  %v1248_v23 = vmul.f32 %v1221_v53, %v1215_v10 }
 0x2bf   : > { %v1211_v49 = vpop.permute.xlu1 %1210 }
 0x2c0   : > { %v1245_v32 = vmul.f32 %v1229_v43, %v1211_v49  ;;  %v1243_v22 = vmul.f32 %v1221_v53, %v1211_v49  ;;  %v1247_v24 = vmul.f32 %v1237_v20, %v1211_v49  ;;  %v1244_v51 = vmul.f32 %v1225_v55, %v1211_v49 }
 0x2c1   : > { %v1246_v27 = vmul.f32 %v1233_v38, %v1211_v49  ;;  %v1252_v49 = vmul.f32 %v1237_v20, %v1215_v10 }
 0x2c2   : > { %1267 = vrot.lane.b32.xlu0 %v1245_v32, %s10875_s8  ;;  %1263 = vrot.lane.b32.xlu1 %v1243_v22, %s10875_s8  ;;  %v1312_v32 = vcombine.high %v6878_v18, %v6881_v7  ;;  %v1251_v22 = vmul.f32 %v1233_v38, %v1215_v10  ;;  %v6387_v18 = vmov 10  }
 0x2c6   : > { %1271 = vrot.lane.b32.xlu0 %v1247_v24, %s10875_s8  ;;  %1265 = vrot.lane.b32.xlu1 %v1244_v51, %s10875_s8  ;;  %v6936_v24 = vrot.slane %v1312_v32, %v6487_v15  ;;  %v1250_v51 = vmul.f32 %v1229_v43, %v1215_v10 }
 0x2ca   : > { %1275 = vrot.lane.b32.xlu0 %v1249_v42, %s10875_s8  ;;  %1269 = vrot.lane.b32.xlu1 %v1246_v27, %s10875_s8 }
 0x2ce   : > { %1279 = vrot.lane.b32.xlu0 %v1251_v22, %s10875_s8  ;;  %1273 = vrot.lane.b32.xlu1 %v1248_v23, %s10875_s8 }
 0x2d2   : > { %1277 = vrot.lane.b32.xlu1 %v1250_v51, %s10875_s8  ;;  %1320 = vrot.lane.b32.xlu0 %v6936_v24, %s6374_s24 }
 0x2d6   : > { %1281 = vrot.lane.b32.xlu1 %v1252_v49, %s10875_s8  ;;  %1331 = vperm.xlu0 %6262, %v6462_v0  }
 0x2da   : > { %1327 = vperm.xlu1 %6261, %v6484_v11   ;;  %6264 = vset.pattern.permute.xlu0 %v6387_v18 }
 0x2de   : > { %6263 = vset.pattern.permute.xlu1 %v6387_v18 }
 0x334   : > { %v6944_v7 = vpop.permute.xlu0 %1267  ;;  %v6946_v27 = vpop.permute.xlu1 %1263 }
 0x335   : > { %11093 = vst [vmem:[#allocation47_spill] sm:$0xff] %v6944_v7  ;;  %11094 = vst [vmem:[#allocation48_spill] sm:$0xff] %v6946_v27  ;;  %v1428_v27 = vcombine.high %v6890_v41, %v6890_v41 }
 0x338   : > { %v6948_v53 = vpop.permute.xlu0 %1271  ;;  %v6950_v23 = vpop.permute.xlu1 %1265 }
 0x339   : > { %11095 = vst [vmem:[#allocation49_spill] sm:$0xff] %v6948_v53  ;;  %11096 = vst [vmem:[#allocation50_spill] sm:$0xff] %v6950_v23 }
 0x33c   : > { %v6952_v42 = vpop.permute.xlu0 %1275  ;;  %v6954_v10 = vpop.permute.xlu1 %1269 }
 0x33d   : > { %11097 = vst [vmem:[#allocation51_spill] sm:$0xff] %v6952_v42  ;;  %11098 = vst [vmem:[#allocation52_spill] sm:$0xff] %v6954_v10 }
 0x340   : > { %v6956_v20 = vpop.permute.xlu0 %1279  ;;  %v6958_v40 = vpop.permute.xlu1 %1273 }
 0x341   : > { %11099 = vst [vmem:[#allocation53_spill] sm:$0xff] %v6956_v20  ;;  %11100 = vst [vmem:[#allocation54_spill] sm:$0xff] %v6958_v40 }
 0x344   : > { %v1321_v38 = vpop.permute.xlu0 %1320  ;;  %v6960_v55 = vpop.permute.xlu1 %1277 }
 0x345   : > { %v1322_v43 = vrot.slane %v1321_v38, 7  ;;  %11101 = vst [vmem:[#allocation55_spill] sm:$0xff] %v6960_v55 }
 0x347   : > { %v1323_v32 = vsel %vm805_vm8, %v1322_v43, %v1321_v38 }
 0x348   : > { %v1325_v22 = vmul.f32 %v1323_v32, %v6541_v45  ;;  %v6964_v51 = vpop.permute.xlu1 %1281 }
 0x349   : > { %11102 = vst [vmem:[#allocation56_spill] sm:$0xff] %v6964_v51 }
 0x34a   : > { %v1346_v49 = vrot.slane %v1325_v22, %v6548_v48  ;;  %v1338_v18 = vrot.slane %v1325_v22, %v6545_v47  ;;  %v1354_v55 = vrot.slane %v1325_v22, %v6559_v54  ;;  %v1342_v40 = vrot.slane %v1325_v22, %v6552_v50 }
 0x34b   : > { %v1350_v51 = vrot.slane %v1325_v22, %v6564_v59 }
 0x351   : > { %v1332_v32 = vpop.permute.xlu0 %1331 }
 0x352   : > { %v1366_v7 = vmul.f32 %v1342_v40, %v1332_v32 }
 0x355   : > { %v1328_v53 = vpop.permute.xlu1 %1327 }
 0x356   : > { %v1362_v42 = vmul.f32 %v1346_v49, %v1328_v53  ;;  %v1360_v20 = vmul.f32 %v1338_v18, %v1328_v53  ;;  %v1364_v38 = vmul.f32 %v1354_v55, %v1328_v53  ;;  %v1361_v43 = vmul.f32 %v1342_v40, %v1328_v53 }
 0x357   : > { %v1363_v10 = vmul.f32 %v1350_v51, %v1328_v53  ;;  %v1369_v40 = vmul.f32 %v1354_v55, %v1332_v32 }
 0x358   : > { %1384 = vrot.lane.b32.xlu0 %v1362_v42, %s6370_s15  ;;  %1380 = vrot.lane.b32.xlu1 %v1360_v20, %s6370_s15  ;;  %v1368_v42 = vmul.f32 %v1350_v51, %v1332_v32  ;;  %v1365_v20 = vmul.f32 %v1338_v18, %v1332_v32 }
 0x35c   : > { %1388 = vrot.lane.b32.xlu0 %v1364_v38, %s6370_s15  ;;  %1382 = vrot.lane.b32.xlu1 %v1361_v43, %s6370_s15  ;;  %v1367_v38 = vmul.f32 %v1346_v49, %v1332_v32 }
 0x360   : > { %1392 = vrot.lane.b32.xlu0 %v1366_v7, %s6370_s15  ;;  %1386 = vrot.lane.b32.xlu1 %v1363_v10, %s6370_s15  ;;  %v6388_v7 = vmov 11  }
 0x364   : > { %1396 = vrot.lane.b32.xlu0 %v1368_v42, %s6370_s15  ;;  %1390 = vrot.lane.b32.xlu1 %v1365_v20, %s6370_s15 }
 0x368   : > { %1394 = vrot.lane.b32.xlu1 %v1367_v38, %s6370_s15  ;;  %1429 = vrot.lane.b32.xlu0 %v1428_v27, %s6377_s27 }
 0x36c   : > { %1398 = vrot.lane.b32.xlu1 %v1369_v40, %s6370_s15  ;;  %1440 = vperm.xlu0 %6264, %v6462_v0  }
 0x370   : > { %1436 = vperm.xlu1 %6263, %v6484_v11   ;;  %6266 = vset.pattern.permute.xlu0 %v6388_v7 }
 0x374   : > { %6265 = vset.pattern.permute.xlu1 %v6388_v7 }
 0x3ca   : > { %v6986_v41 = vpop.permute.xlu0 %1384  ;;  %v6988_v53 = vpop.permute.xlu1 %1380 }
 0x3cb   : > { %11103 = vst [vmem:[#allocation57_spill] sm:$0xff] %v6986_v41  ;;  %11104 = vst [vmem:[#allocation58_spill] sm:$0xff] %v6988_v53  ;;  %v1537_v41 = vcombine.high %v6936_v24, %v6936_v24  ;;  %v7035_v24 = vld [vmem:[%s10779_s2] sm:$0xff] }
 0x3ce   : > { %v6990_v10 = vpop.permute.xlu0 %1388  ;;  %v6992_v22 = vpop.permute.xlu1 %1382 }
 0x3cf   : > { %11105 = vst [vmem:[#allocation59_spill] sm:$0xff] %v6990_v10  ;;  %11106 = vst [vmem:[#allocation60_spill] sm:$0xff] %v6992_v22 }
 0x3d2   : > { %v6994_v51 = vpop.permute.xlu0 %1392  ;;  %v6996_v27 = vpop.permute.xlu1 %1386 }
 0x3d3   : > { %11107 = vst [vmem:[#allocation61_spill] sm:$0xff] %v6994_v51  ;;  %11108 = vst [vmem:[#allocation62_spill] sm:$0xff] %v6996_v27 }
 0x3d6   : > { %v6998_v55 = vpop.permute.xlu0 %1396  ;;  %v7000_v0 = vpop.permute.xlu1 %1390 }
 0x3d7   : > { %11109 = vst [vmem:[#allocation63_spill] sm:$0xff] %v6998_v55  ;;  %11110 = vst [vmem:[#allocation64_spill] sm:$0xff] %v7000_v0 }
 0x3da   : > { %v1430_v11 = vpop.permute.xlu0 %1429  ;;  %v7002_v18 = vpop.permute.xlu1 %1394 }
 0x3db   : > { %v1431_v49 = vrot.slane %v1430_v11, 7  ;;  %11111 = vst [vmem:[#allocation65_spill] sm:$0xff] %v7002_v18 }
 0x3dd   : > { %v1432_v43 = vsel %vm671_vm9, %v1431_v49, %v1430_v11 }
 0x3de   : > { %v1434_v32 = vmul.f32 %v1432_v43, %v6541_v45  ;;  %v7006_v42 = vpop.permute.xlu1 %1398 }
 0x3df   : > { %11112 = vst [vmem:[#allocation66_spill] sm:$0xff] %v7006_v42 }
 0x3e0   : > { %v1455_v20 = vrot.slane %v1434_v32, %v6548_v48  ;;  %v1447_v38 = vrot.slane %v1434_v32, %v6545_v47  ;;  %v1463_v55 = vrot.slane %v1434_v32, %v6559_v54  ;;  %v1451_v18 = vrot.slane %v1434_v32, %v6552_v50 }
 0x3e1   : > { %v1459_v42 = vrot.slane %v1434_v32, %v6564_v59 }
 0x3e7   : > { %v1441_v43 = vpop.permute.xlu0 %1440 }
 0x3e8   : > { %v1475_v0 = vmul.f32 %v1451_v18, %v1441_v43 }
 0x3eb   : > { %v1437_v40 = vpop.permute.xlu1 %1436 }
 0x3ec   : > { %v1471_v7 = vmul.f32 %v1455_v20, %v1437_v40  ;;  %v1469_v10 = vmul.f32 %v1447_v38, %v1437_v40  ;;  %v1473_v11 = vmul.f32 %v1463_v55, %v1437_v40  ;;  %v1470_v49 = vmul.f32 %v1451_v18, %v1437_v40 }
 0x3ed   : > { %v1472_v51 = vmul.f32 %v1459_v42, %v1437_v40  ;;  %v1478_v18 = vmul.f32 %v1463_v55, %v1441_v43  ;;  %v1649_v55 = vcombine.high %v6859_v57, %v6864_v61 }
 0x3ee   : > { %1493 = vrot.lane.b32.xlu0 %v1471_v7, %s6368_s14  ;;  %1489 = vrot.lane.b32.xlu1 %v1469_v10, %s6368_s14  ;;  %v1477_v10 = vmul.f32 %v1459_v42, %v1441_v43  ;;  %v1474_v7 = vmul.f32 %v1447_v38, %v1441_v43 }
 0x3ef   : > { %v7046_v32 = vrot.slane %v1649_v55, %v6487_v15 }
 0x3f2   : > { %1497 = vrot.lane.b32.xlu0 %v1473_v11, %s6368_s14  ;;  %1491 = vrot.lane.b32.xlu1 %v1470_v49, %s6368_s14  ;;  %v1476_v11 = vmul.f32 %v1455_v20, %v1441_v43  ;;  %v6390_v20 = vmov 12  }
 0x3f6   : > { %1501 = vrot.lane.b32.xlu0 %v1475_v0, %s6368_s14  ;;  %1495 = vrot.lane.b32.xlu1 %v1472_v51, %s6368_s14  ;;  %v7029_v51 = vld [vmem:[%s10779_s2 + $0x8] sm:$0xff] }
 0x3fa   : > { %1505 = vrot.lane.b32.xlu0 %v1477_v10, %s6368_s14  ;;  %1499 = vrot.lane.b32.xlu1 %v1474_v7, %s6368_s14 }
 0x3fe   : > { %1503 = vrot.lane.b32.xlu1 %v1476_v11, %s6368_s14  ;;  %1538 = vrot.lane.b32.xlu0 %v1537_v41, %s6389_s9  ;;  %v1648_v41 = vcombine.high %v6849_v35, %v6854_v4 }
 0x400   : > { %v7043_v0 = vrot.slane %v1648_v41, %v6487_v15 }
 0x402   : > { %1507 = vrot.lane.b32.xlu1 %v1478_v18, %s6368_s14  ;;  %1550 = vperm.xlu0 %6266, %v7029_v51  }
 0x406   : > { %1546 = vperm.xlu1 %6265, %v7035_v24   ;;  %6268 = vset.pattern.permute.xlu0 %v6390_v20 }
 0x40a   : > { %6267 = vset.pattern.permute.xlu1 %v6390_v20 }
 0x460   : > { %v7050_v38 = vpop.permute.xlu0 %1493  ;;  %v7052_v40 = vpop.permute.xlu1 %1489 }
 0x461   : > { %11113 = vst [vmem:[#allocation67_spill] sm:$0xff] %v7050_v38  ;;  %11114 = vst [vmem:[#allocation68_spill] sm:$0xff] %v7052_v40 }
 0x464   : > { %v7054_v35 = vpop.permute.xlu0 %1497  ;;  %v7056_v4 = vpop.permute.xlu1 %1491 }
 0x465   : > { %11115 = vst [vmem:[#allocation69_spill] sm:$0xff] %v7054_v35  ;;  %11116 = vst [vmem:[#allocation70_spill] sm:$0xff] %v7056_v4 }
 0x468   : > { %v7058_v57 = vpop.permute.xlu0 %1501  ;;  %v7060_v61 = vpop.permute.xlu1 %1495 }
 0x469   : > { %11117 = vst [vmem:[#allocation71_spill] sm:$0xff] %v7058_v57  ;;  %11118 = vst [vmem:[#allocation72_spill] sm:$0xff] %v7060_v61 }
 0x46c   : > { %v7062_v49 = vpop.permute.xlu0 %1505  ;;  %v7064_v43 = vpop.permute.xlu1 %1499 }
 0x46d   : > { %11119 = vst [vmem:[#allocation73_spill] sm:$0xff] %v7062_v49  ;;  %11120 = vst [vmem:[#allocation74_spill] sm:$0xff] %v7064_v43 }
 0x470   : > { %v1539_v10 = vpop.permute.xlu0 %1538  ;;  %v7066_v11 = vpop.permute.xlu1 %1503 }
 0x471   : > { %v1540_v7 = vrot.slane %v1539_v10, 7  ;;  %11121 = vst [vmem:[#allocation75_spill] sm:$0xff] %v7066_v11 }
 0x473   : > { %v1542_v18 = vsel %vm1541_vm10, %v1540_v7, %v1539_v10 }
 0x474   : > { %v1544_v41 = vmul.f32 %v1542_v18, %v6541_v45  ;;  %v7070_v55 = vpop.permute.xlu1 %1507 }
 0x475   : > { %11122 = vst [vmem:[#allocation76_spill] sm:$0xff] %v7070_v55 }
 0x476   : > { %v1565_v20 = vrot.slane %v1544_v41, %v6548_v48  ;;  %v1557_v42 = vrot.slane %v1544_v41, %v6545_v47  ;;  %v1573_v11 = vrot.slane %v1544_v41, %v6559_v54  ;;  %v1561_v10 = vrot.slane %v1544_v41, %v6552_v50 }
 0x477   : > { %v1569_v55 = vrot.slane %v1544_v41, %v6564_v59 }
 0x47d   : > { %v1551_v18 = vpop.permute.xlu0 %1550 }
 0x47e   : > { %v1585_v43 = vmul.f32 %v1561_v10, %v1551_v18  ;;  %v1584_v61 = vmul.f32 %v1557_v42, %v1551_v18 }
 0x481   : > { %v1547_v35 = vpop.permute.xlu1 %1546 }
 0x482   : > { %v1581_v57 = vmul.f32 %v1565_v20, %v1547_v35  ;;  %v1579_v49 = vmul.f32 %v1557_v42, %v1547_v35  ;;  %v1583_v7 = vmul.f32 %v1573_v11, %v1547_v35  ;;  %v1580_v45 = vmul.f32 %v1561_v10, %v1547_v35 }
 0x483   : > { %v1582_v38 = vmul.f32 %v1569_v55, %v1547_v35  ;;  %v1588_v35 = vmul.f32 %v1573_v11, %v1551_v18  ;;  %v6392_v42 = vmov 13  }
 0x484   : > { %1603 = vrot.lane.b32.xlu0 %v1581_v57, %s10873_s10  ;;  %1599 = vrot.lane.b32.xlu1 %v1579_v49, %s10873_s10  ;;  %v1664_v57 = vcombine.low %v7043_v0, %v7046_v32  ;;  %v1587_v49 = vmul.f32 %v1569_v55, %v1551_v18 }
 0x488   : > { %1607 = vrot.lane.b32.xlu0 %v1583_v7, %s10873_s10  ;;  %1601 = vrot.lane.b32.xlu1 %v1580_v45, %s10873_s10  ;;  %v7088_v7 = vrot.slane %v1664_v57, %v6487_v15  ;;  %v1586_v45 = vmul.f32 %v1565_v20, %v1551_v18 }
 0x48c   : > { %1611 = vrot.lane.b32.xlu0 %v1585_v43, %s10873_s10  ;;  %1605 = vrot.lane.b32.xlu1 %v1582_v38, %s10873_s10 }
 0x490   : > { %1615 = vrot.lane.b32.xlu0 %v1587_v49, %s10873_s10  ;;  %1609 = vrot.lane.b32.xlu1 %v1584_v61, %s10873_s10 }
 0x494   : > { %1613 = vrot.lane.b32.xlu1 %v1586_v45, %s10873_s10  ;;  %1672 = vrot.lane.b32.xlu0 %v7088_v7, %s6373_s23 }
 0x498   : > { %1617 = vrot.lane.b32.xlu1 %v1588_v35, %s10873_s10  ;;  %1683 = vperm.xlu0 %6268, %v7029_v51   ;;  %v7116_v35 = vld [vmem:[%s6536_s20] sm:$0x3f]  ;;  %s6409_s10 = smov 9  }
 0x49c   : > { %1679 = vperm.xlu1 %6267, %v7035_v24   ;;  %6269 = vset.pattern.permute.xlu0 %v6392_v42 }
 0x4a0   : > { %6270 = vset.pattern.permute.xlu1 %v6392_v42 }
 0x4f6   : > { %v7096_v38 = vpop.permute.xlu0 %1603  ;;  %v7098_v61 = vpop.permute.xlu1 %1599 }
 0x4f7   : > { %11123 = vst [vmem:[#allocation77_spill] sm:$0xff] %v7096_v38  ;;  %11124 = vst [vmem:[#allocation78_spill] sm:$0xff] %v7098_v61 }
 0x4fa   : > { %v7100_v43 = vpop.permute.xlu0 %1607  ;;  %v7102_v41 = vpop.permute.xlu1 %1601 }
 0x4fb   : > { %11125 = vst [vmem:[#allocation79_spill] sm:$0xff] %v7100_v43  ;;  %11126 = vst [vmem:[#allocation80_spill] sm:$0xff] %v7102_v41 }
 0x4fe   : > { %v7104_v55 = vpop.permute.xlu0 %1611  ;;  %v7106_v11 = vpop.permute.xlu1 %1605 }
 0x4ff   : > { %11127 = vst [vmem:[#allocation81_spill] sm:$0xff] %v7104_v55  ;;  %11128 = vst [vmem:[#allocation82_spill] sm:$0xff] %v7106_v11 }
 0x502   : > { %v7108_v20 = vpop.permute.xlu0 %1615  ;;  %v7110_v10 = vpop.permute.xlu1 %1609 }
 0x503   : > { %11129 = vst [vmem:[#allocation83_spill] sm:$0xff] %v7108_v20  ;;  %11130 = vst [vmem:[#allocation84_spill] sm:$0xff] %v7110_v10 }
 0x506   : > { %v1673_v18 = vpop.permute.xlu0 %1672  ;;  %v7112_v49 = vpop.permute.xlu1 %1613 }
 0x507   : > { %v1674_v57 = vrot.slane %v1673_v18, 7  ;;  %11131 = vst [vmem:[#allocation85_spill] sm:$0xff] %v7112_v49 }
 0x509   : > { %v1675_v45 = vsel %vm449_vm11, %v1674_v57, %v1673_v18 }
 0x50a   : > { %v1677_v42 = vmul.f32 %v7116_v35, %v1675_v45  ;;  %v7119_v43 = vpop.permute.xlu1 %1617 }
 0x50b   : > { %11132 = vst [vmem:[#allocation86_spill] sm:$0xff] %v7119_v43 }
 0x50c   : > { %v1698_v55 = vrot.slane %v1677_v42, %v6548_v48  ;;  %v1690_v38 = vrot.slane %v1677_v42, %v6545_v47  ;;  %v1706_v49 = vrot.slane %v1677_v42, %v6559_v54  ;;  %v1694_v18 = vrot.slane %v1677_v42, %v6552_v50 }
 0x50d   : > { %v1702_v43 = vrot.slane %v1677_v42, %v6564_v59  ;;  %v1781_v42 = vrot.slane %v7116_v35, 1 }
 0x513   : > { %v1684_v45 = vpop.permute.xlu0 %1683 }
 0x514   : > { %v1718_v41 = vmul.f32 %v1694_v18, %v1684_v45  ;;  %v1719_v4 = vmul.f32 %v1698_v55, %v1684_v45 }
 0x517   : > { %v1680_v20 = vpop.permute.xlu1 %1679 }
 0x518   : > { %v1714_v11 = vmul.f32 %v1698_v55, %v1680_v20  ;;  %v1712_v10 = vmul.f32 %v1690_v38, %v1680_v20  ;;  %v1716_v57 = vmul.f32 %v1706_v49, %v1680_v20  ;;  %v1713_v61 = vmul.f32 %v1694_v18, %v1680_v20 }
 0x519   : > { %v1715_v40 = vmul.f32 %v1702_v43, %v1680_v20  ;;  %v6393_v20 = vmov 14  }
 0x51a   : > { %1736 = vrot.lane.b32.xlu0 %v1714_v11, %s6364_s12  ;;  %1732 = vrot.lane.b32.xlu1 %v1712_v10, %s6364_s12  ;;  %v1720_v11 = vmul.f32 %v1702_v43, %v1684_v45  ;;  %v1717_v10 = vmul.f32 %v1690_v38, %v1684_v45 }
 0x51e   : > { %1740 = vrot.lane.b32.xlu0 %v1716_v57, %s6364_s12  ;;  %1734 = vrot.lane.b32.xlu1 %v1713_v61, %s6364_s12  ;;  %v1721_v61 = vmul.f32 %v1706_v49, %v1684_v45 }
 0x522   : > { %1744 = vrot.lane.b32.xlu0 %v1718_v41, %s6364_s12  ;;  %1738 = vrot.lane.b32.xlu1 %v1715_v40, %s6364_s12 }
 0x526   : > { %1748 = vrot.lane.b32.xlu0 %v1720_v11, %s6364_s12  ;;  %1742 = vrot.lane.b32.xlu1 %v1717_v10, %s6364_s12 }
 0x52a   : > { %1794 = vperm.xlu0 %6269, %v7035_v24   ;;  %1746 = vrot.lane.b32.xlu1 %v1719_v4, %s6364_s12  ;;  %v11138_v4 = vcombine.high %v7043_v0, %v7046_v32 }
 0x52c   : > { %v7152_v49 = vrot.slane %v11138_v4, %v6487_v15 }
 0x52e   : > { %1750 = vrot.lane.b32.xlu1 %v1721_v61, %s6364_s12  ;;  %6271 = vset.pattern.permute.xlu0 %v6393_v20  ;;  %v1792_v45 = vmul.f32 %v7152_v49, %v1781_v42 }
 0x530   : > { %v1809_v10 = vrot.slane %v1792_v45, %v6552_v50  ;;  %v1805_v61 = vrot.slane %v1792_v45, %v6545_v47  ;;  %v1817_v4 = vrot.slane %v1792_v45, %v6564_v59 }
 0x532   : > { %1798 = vperm.xlu1 %6270, %v7029_v51  }
 0x536   : > { %6272 = vset.pattern.permute.xlu1 %v6393_v20 }
 0x58c   : > { %v7138_v40 = vpop.permute.xlu1 %1732  ;;  %v7140_v38 = vpop.permute.xlu0 %1736 }
 0x58d   : > { %11133 = vst [vmem:[#allocation87_spill] sm:$0xff] %v7138_v40  ;;  %11134 = vst [vmem:[#allocation88_spill] sm:$0xff] %v7140_v38  ;;  %v1813_v38 = vrot.slane %v1792_v45, %v6548_v48 }
 0x590   : > { %v7142_v43 = vpop.permute.xlu1 %1734  ;;  %v7144_v41 = vpop.permute.xlu0 %1740 }
 0x591   : > { %11135 = vst [vmem:[#allocation89_spill] sm:$0xff] %v7142_v43  ;;  %11136 = vst [vmem:[#allocation90_spill] sm:$0xff] %v7144_v41 }
 0x594   : > { %v7146_v55 = vpop.permute.xlu1 %1738  ;;  %v7155_v18 = vpop.permute.xlu0 %1744 }
 0x595   : > { %11137 = vst [vmem:[#allocation91_spill] sm:$0xff] %v7146_v55  ;;  %11139 = vst [vmem:[#allocation92_spill] sm:$0xff] %v7155_v18 }
 0x598   : > { %v7157_v57 = vpop.permute.xlu1 %1742  ;;  %v7160_v11 = vpop.permute.xlu0 %1748 }
 0x599   : > { %11140 = vst [vmem:[#allocation93_spill] sm:$0xff] %v7157_v57  ;;  %11141 = vst [vmem:[#allocation94_spill] sm:$0xff] %v7160_v11 }
 0x59c   : > { %v7164_v20 = vpop.permute.xlu1 %1746 }
 0x59d   : > { %11142 = vst [vmem:[#allocation95_spill] sm:$0xff] %v7164_v20 }
 0x5a0   : > { %v7170_v42 = vpop.permute.xlu1 %1750 }
 0x5a1   : > { %11143 = vst [vmem:[#allocation96_spill] sm:$0xff] %v7170_v42 }
 0x5a5   : > { %v1795_v41 = vpop.permute.xlu0 %1794 }
 0x5a6   : > { %v1823_v0 = vmul.f32 %v1809_v10, %v1795_v41  ;;  %v1822_v32 = vmul.f32 %v1805_v61, %v1795_v41  ;;  %v1825_v11 = vmul.f32 %v1817_v4, %v1795_v41  ;;  %v1824_v57 = vmul.f32 %v1813_v38, %v1795_v41 }
 0x5a7   : > { %v6394_v41 = vmov 15  }
 0x5a8   : > { %1840 = vrot.lane.b32.xlu0 %v1823_v0, %s6363_s11  ;;  %1838 = vrot.lane.b32.xlu1 %v1822_v32, %s6363_s11 }
 0x5ac   : > { %1844 = vrot.lane.b32.xlu0 %v1825_v11, %s6363_s11  ;;  %1842 = vrot.lane.b32.xlu1 %v1824_v57, %s6363_s11 }
 0x5ad   : > { %v1799_v20 = vpop.permute.xlu1 %1798 }
 0x5ae   : > { %v1827_v18 = vmul.f32 %v1809_v10, %v1799_v20  ;;  %v1826_v55 = vmul.f32 %v1805_v61, %v1799_v20  ;;  %v1829_v45 = vmul.f32 %v1817_v4, %v1799_v20  ;;  %v1828_v40 = vmul.f32 %v1813_v38, %v1799_v20 }
 0x5af   : > { %v1886_v61 = vcombine.high %v7088_v7, %v7088_v7 }
 0x5b0   : > { %1848 = vrot.lane.b32.xlu0 %v1827_v18, %s6363_s11  ;;  %1846 = vrot.lane.b32.xlu1 %v1826_v55, %s6363_s11 }
 0x5b4   : > { %1852 = vrot.lane.b32.xlu0 %v1829_v45, %s6363_s11  ;;  %1850 = vrot.lane.b32.xlu1 %v1828_v40, %s6363_s11 }
 0x5b8   : > { %1890 = vperm.xlu0 %6271, %v7035_v24   ;;  %1880 = vrot.lane.b32.xlu1 %v7116_v35, %s6373_s23 }
 0x5bc   : > { %1894 = vperm.xlu1 %6272, %v7029_v51   ;;  %6273 = vset.pattern.permute.xlu0 %v6394_v41 }
 0x5c0   : > { %6274 = vset.pattern.permute.xlu1 %v6394_v41 }
 0x61a   : > { %v7182_v57 = vpop.permute.xlu1 %1838  ;;  %v7184_v18 = vpop.permute.xlu0 %1840 }
 0x61b   : > { %11144 = vst [vmem:[#allocation97_spill] sm:$0xff] %v7182_v57  ;;  %11145 = vst [vmem:[#allocation98_spill] sm:$0xff] %v7184_v18 }
 0x61e   : > { %v7186_v55 = vpop.permute.xlu1 %1842  ;;  %v7190_v11 = vpop.permute.xlu0 %1844 }
 0x61f   : > { %11146 = vst [vmem:[#allocation99_spill] sm:$0xff] %v7186_v55  ;;  %11148 = vst [vmem:[#allocation101_spill] sm:$0xff] %v7190_v11 }
 0x622   : > { %v7188_v38 = vpop.permute.xlu1 %1846  ;;  %v7194_v10 = vpop.permute.xlu0 %1848 }
 0x623   : > { %11147 = vst [vmem:[#allocation100_spill] sm:$0xff] %v7188_v38  ;;  %11150 = vst [vmem:[#allocation103_spill] sm:$0xff] %v7194_v10 }
 0x626   : > { %v7192_v40 = vpop.permute.xlu1 %1850  ;;  %v7199_v41 = vpop.permute.xlu0 %1852 }
 0x627   : > { %11149 = vst [vmem:[#allocation102_spill] sm:$0xff] %v7192_v40  ;;  %11151 = vst [vmem:[#allocation104_spill] sm:$0xff] %v7199_v41 }
 0x62a   : > { %v1881_v20 = vpop.permute.xlu1 %1880 }
 0x62b   : > { %v1882_v0 = vrot.slane %v1881_v20, 1  ;;  %v1883_v32 = vrot.slane %v1881_v20, 2 }
 0x62d   : > { %v1884_v4 = vsel %vm449_vm11, %v1882_v0, %v1883_v32 }
 0x62e   : > { %v1888_v45 = vmul.f32 %v1886_v61, %v1884_v4 }
 0x630   : > { %v1905_v42 = vrot.slane %v1888_v45, %v6552_v50  ;;  %v1901_v38 = vrot.slane %v1888_v45, %v6545_v47  ;;  %v1913_v10 = vrot.slane %v1888_v45, %v6564_v59  ;;  %v1909_v18 = vrot.slane %v1888_v45, %v6548_v48 }
 0x633   : > { %v1891_v11 = vpop.permute.xlu0 %1890 }
 0x634   : > { %v1919_v57 = vmul.f32 %v1905_v42, %v1891_v11  ;;  %v1918_v40 = vmul.f32 %v1901_v38, %v1891_v11  ;;  %v1921_v7 = vmul.f32 %v1913_v10, %v1891_v11  ;;  %v1920_v20 = vmul.f32 %v1909_v18, %v1891_v11 }
 0x636   : > { %1936 = vrot.lane.b32.xlu0 %v1919_v57, %s6363_s11  ;;  %1934 = vrot.lane.b32.xlu1 %v1918_v40, %s6363_s11  ;;  %v6395_v57 = vmov 16  }
 0x637   : > { %v1895_v61 = vpop.permute.xlu1 %1894 }
 0x638   : > { %v1923_v0 = vmul.f32 %v1905_v42, %v1895_v61  ;;  %v1922_v32 = vmul.f32 %v1901_v38, %v1895_v61  ;;  %v1925_v4 = vmul.f32 %v1913_v10, %v1895_v61  ;;  %v1924_v41 = vmul.f32 %v1909_v18, %v1895_v61 }
 0x63a   : > { %1940 = vrot.lane.b32.xlu0 %v1921_v7, %s6363_s11  ;;  %1938 = vrot.lane.b32.xlu1 %v1920_v20, %s6363_s11 }
 0x63e   : > { %1944 = vrot.lane.b32.xlu0 %v1923_v0, %s6363_s11  ;;  %1942 = vrot.lane.b32.xlu1 %v1922_v32, %s6363_s11 }
 0x642   : > { %1948 = vrot.lane.b32.xlu0 %v1925_v4, %s6363_s11  ;;  %1946 = vrot.lane.b32.xlu1 %v1924_v41, %s6363_s11  ;;  %v1982_v41 = vcombine.high %v7152_v49, %v7152_v49 }
 0x646   : > { %1986 = vperm.xlu0 %6273, %v7035_v24   ;;  %1976 = vrot.lane.b32.xlu1 %v7116_v35, %s6389_s9 }
 0x64a   : > { %1990 = vperm.xlu1 %6274, %v7029_v51   ;;  %6275 = vset.pattern.permute.xlu0 %v6395_v57 }
 0x64e   : > { %6276 = vset.pattern.permute.xlu1 %v6395_v57 }
 0x6a8   : > { %v7217_v42 = vpop.permute.xlu1 %1934  ;;  %v7219_v38 = vpop.permute.xlu0 %1936 }
 0x6a9   : > { %11152 = vst [vmem:[#allocation105_spill] sm:$0xff] %v7217_v42  ;;  %11153 = vst [vmem:[#allocation106_spill] sm:$0xff] %v7219_v38 }
 0x6ac   : > { %v7221_v11 = vpop.permute.xlu1 %1938  ;;  %v7225_v40 = vpop.permute.xlu0 %1940 }
 0x6ad   : > { %11154 = vst [vmem:[#allocation107_spill] sm:$0xff] %v7221_v11  ;;  %11156 = vst [vmem:[#allocation109_spill] sm:$0xff] %v7225_v40 }
 0x6b0   : > { %v7223_v18 = vpop.permute.xlu1 %1942  ;;  %v7229_v45 = vpop.permute.xlu0 %1944 }
 0x6b1   : > { %11155 = vst [vmem:[#allocation108_spill] sm:$0xff] %v7223_v18  ;;  %11158 = vst [vmem:[#allocation111_spill] sm:$0xff] %v7229_v45 }
 0x6b4   : > { %v7227_v10 = vpop.permute.xlu1 %1946  ;;  %v7234_v4 = vpop.permute.xlu0 %1948 }
 0x6b5   : > { %11157 = vst [vmem:[#allocation110_spill] sm:$0xff] %v7227_v10  ;;  %11159 = vst [vmem:[#allocation112_spill] sm:$0xff] %v7234_v4 }
 0x6b8   : > { %v1977_v7 = vpop.permute.xlu1 %1976 }
 0x6b9   : > { %v1978_v20 = vrot.slane %v1977_v7, 1  ;;  %v1979_v61 = vrot.slane %v1977_v7, 2 }
 0x6bb   : > { %v1980_v0 = vsel %vm1541_vm10, %v1978_v20, %v1979_v61 }
 0x6bc   : > { %v1984_v32 = vmul.f32 %v1982_v41, %v1980_v0 }
 0x6be   : > { %v2001_v57 = vrot.slane %v1984_v32, %v6552_v50  ;;  %v1997_v18 = vrot.slane %v1984_v32, %v6545_v47  ;;  %v2009_v45 = vrot.slane %v1984_v32, %v6564_v59  ;;  %v2005_v38 = vrot.slane %v1984_v32, %v6548_v48 }
 0x6c1   : > { %v1987_v40 = vpop.permute.xlu0 %1986 }
 0x6c2   : > { %v2015_v42 = vmul.f32 %v2001_v57, %v1987_v40  ;;  %v2014_v10 = vmul.f32 %v1997_v18, %v1987_v40  ;;  %v2017_v49 = vmul.f32 %v2009_v45, %v1987_v40  ;;  %v2016_v7 = vmul.f32 %v2005_v38, %v1987_v40  ;;  %v7262_v40 = vld [vmem:[%s10778_s1 + $0x48] sm:$0xff] }
 0x6c4   : > { %2032 = vrot.lane.b32.xlu0 %v2015_v42, %s6363_s11  ;;  %2030 = vrot.lane.b32.xlu1 %v2014_v10, %s6363_s11  ;;  %v6396_v42 = vmov 17   ;;  %v7267_v10 = vld [vmem:[%s10778_s1 + $0x50] sm:$0xff] }
 0x6c5   : > { %v1991_v41 = vpop.permute.xlu1 %1990 }
 0x6c6   : > { %v2019_v20 = vmul.f32 %v2001_v57, %v1991_v41  ;;  %v2018_v61 = vmul.f32 %v1997_v18, %v1991_v41  ;;  %v2021_v0 = vmul.f32 %v2009_v45, %v1991_v41  ;;  %v2020_v4 = vmul.f32 %v2005_v38, %v1991_v41  ;;  %v7257_v38 = vld [vmem:[%s10778_s1 + $0x40] sm:$0xff]  ;;  %v7272_v45 = vld [vmem:[%s10778_s1 + $0x58] sm:$0xff] }
 0x6c7   : > { %v2082_v57 = vcombine.low %v7257_v38, %v7262_v40 }
 0x6c8   : > { %2036 = vrot.lane.b32.xlu0 %v2017_v49, %s6363_s11  ;;  %2034 = vrot.lane.b32.xlu1 %v2016_v7, %s6363_s11  ;;  %v2083_v49 = vcombine.low %v7267_v10, %v7272_v45 }
 0x6c9   : > { %v2090_v41 = vrot.slane %v2082_v57, %v6487_v15 }
 0x6cc   : > { %2040 = vrot.lane.b32.xlu0 %v2019_v20, %s6363_s11  ;;  %2038 = vrot.lane.b32.xlu1 %v2018_v61, %s6363_s11  ;;  %v2097_v20 = vrot.slane %v2083_v49, %v6487_v15 }
 0x6d0   : > { %2044 = vrot.lane.b32.xlu0 %v2021_v0, %s6363_s11  ;;  %2042 = vrot.lane.b32.xlu1 %v2020_v4, %s6363_s11 }
 0x6d4   : > { %2109 = vperm.xlu0 %6275, %v7035_v24   ;;  %2072 = vrot.lane.b32.xlu1 %v7116_v35, %s6377_s27 }
 0x6d8   : > { %2113 = vperm.xlu1 %6276, %v7029_v51   ;;  %6277 = vset.pattern.permute.xlu0 %v6396_v42 }
 0x6dc   : > { %6278 = vset.pattern.permute.xlu1 %v6396_v42  ;;  %v2098_v42 = vcombine.low %v2090_v41, %v2097_v20 }
 0x736   : > { %v7252_v18 = vpop.permute.xlu1 %2030  ;;  %v7274_v32 = vpop.permute.xlu0 %2032 }
 0x737   : > { %11160 = vst [vmem:[#allocation113_spill] sm:$0xff] %v7252_v18  ;;  %11161 = vst [vmem:[#allocation114_spill] sm:$0xff] %v7274_v32  ;;  %v7293_v32 = vrot.slane %v2098_v42, %v6487_v15 }
 0x73a   : > { %v7276_v4 = vpop.permute.xlu1 %2034  ;;  %v7286_v61 = vpop.permute.xlu0 %2036 }
 0x73b   : > { %11162 = vst [vmem:[#allocation115_spill] sm:$0xff] %v7276_v4  ;;  %11164 = vst [vmem:[#allocation117_spill] sm:$0xff] %v7286_v61 }
 0x73e   : > { %v7282_v7 = vpop.permute.xlu1 %2038  ;;  %v7290_v18 = vpop.permute.xlu0 %2040 }
 0x73f   : > { %11163 = vst [vmem:[#allocation116_spill] sm:$0xff] %v7282_v7  ;;  %11166 = vst [vmem:[#allocation119_spill] sm:$0xff] %v7290_v18 }
 0x742   : > { %v7288_v0 = vpop.permute.xlu1 %2042  ;;  %v7297_v57 = vpop.permute.xlu0 %2044 }
 0x743   : > { %11165 = vst [vmem:[#allocation118_spill] sm:$0xff] %v7288_v0  ;;  %11167 = vst [vmem:[#allocation120_spill] sm:$0xff] %v7297_v57 }
 0x746   : > { %v2073_v4 = vpop.permute.xlu1 %2072 }
 0x747   : > { %v2074_v11 = vrot.slane %v2073_v4, 1  ;;  %v2075_v55 = vrot.slane %v2073_v4, 2 }
 0x749   : > { %v2076_v43 = vsel %vm671_vm9, %v2074_v11, %v2075_v55 }
 0x74a   : > { %v2107_v7 = vmul.f32 %v7293_v32, %v2076_v43 }
 0x74c   : > { %v2124_v49 = vrot.slane %v2107_v7, %v6552_v50  ;;  %v2120_v61 = vrot.slane %v2107_v7, %v6545_v47  ;;  %v2132_v18 = vrot.slane %v2107_v7, %v6564_v59  ;;  %v2128_v42 = vrot.slane %v2107_v7, %v6548_v48 }
 0x74f   : > { %v2110_v0 = vpop.permute.xlu0 %2109 }
 0x750   : > { %v2138_v27 = vmul.f32 %v2124_v49, %v2110_v0  ;;  %v2137_v53 = vmul.f32 %v2120_v61, %v2110_v0  ;;  %v2140_v55 = vmul.f32 %v2132_v18, %v2110_v0  ;;  %v2139_v11 = vmul.f32 %v2128_v42, %v2110_v0 }
 0x751   : > { %v2201_v0 = vcombine.high %v2090_v41, %v2097_v20 }
 0x752   : > { %2155 = vrot.lane.b32.xlu0 %v2138_v27, %s6363_s11  ;;  %2153 = vrot.lane.b32.xlu1 %v2137_v53, %s6363_s11  ;;  %v6397_v53 = vmov 18  }
 0x753   : > { %v2114_v43 = vpop.permute.xlu1 %2113 }
 0x754   : > { %v2142_v4 = vmul.f32 %v2124_v49, %v2114_v43  ;;  %v2141_v57 = vmul.f32 %v2120_v61, %v2114_v43  ;;  %v2144_v22 = vmul.f32 %v2132_v18, %v2114_v43  ;;  %v2143_v23 = vmul.f32 %v2128_v42, %v2114_v43 }
 0x755   : > { %v7330_v49 = vrot.slane %v2201_v0, %v6487_v15 }
 0x756   : > { %2159 = vrot.lane.b32.xlu0 %v2140_v55, %s6363_s11  ;;  %2157 = vrot.lane.b32.xlu1 %v2139_v11, %s6363_s11 }
 0x75a   : > { %2163 = vrot.lane.b32.xlu0 %v2142_v4, %s6363_s11  ;;  %2161 = vrot.lane.b32.xlu1 %v2141_v57, %s6363_s11 }
 0x75e   : > { %2167 = vrot.lane.b32.xlu0 %v2144_v22, %s6363_s11  ;;  %2165 = vrot.lane.b32.xlu1 %v2143_v23, %s6363_s11 }
 0x762   : > { %2212 = vperm.xlu0 %6277, %v7035_v24   ;;  %2195 = vrot.lane.b32.xlu1 %v7116_v35, %s6374_s24 }
 0x766   : > { %2216 = vperm.xlu1 %6278, %v7029_v51   ;;  %6279 = vset.pattern.permute.xlu0 %v6397_v53 }
 0x76a   : > { %6280 = vset.pattern.permute.xlu1 %v6397_v53 }
 0x7c4   : > { %v7315_v27 = vpop.permute.xlu1 %2153  ;;  %v7317_v7 = vpop.permute.xlu0 %2155 }
 0x7c5   : > { %11168 = vst [vmem:[#allocation121_spill] sm:$0xff] %v7315_v27  ;;  %11169 = vst [vmem:[#allocation122_spill] sm:$0xff] %v7317_v7 }
 0x7c8   : > { %v7319_v18 = vpop.permute.xlu1 %2157  ;;  %v7323_v22 = vpop.permute.xlu0 %2159 }
 0x7c9   : > { %11171 = vst [vmem:[#allocation124_spill] sm:$0xff] %v7323_v22 }
 0x7cc   : > { %v7321_v61 = vpop.permute.xlu1 %2161  ;;  %v7327_v57 = vpop.permute.xlu0 %2163 }
 0x7cd   : > { %11170 = vst [vmem:[#allocation123_spill] sm:$0xff] %v7321_v61  ;;  %11173 = vst [vmem:[#allocation126_spill] sm:$0xff] %v7327_v57 }
 0x7d0   : > { %v7325_v23 = vpop.permute.xlu1 %2165  ;;  %v7334_v53 = vpop.permute.xlu0 %2167 }
 0x7d1   : > { %11172 = vst [vmem:[#allocation125_spill] sm:$0xff] %v7325_v23  ;;  %11174 = vst [vmem:[#allocation127_spill] sm:$0xff] %v7334_v53 }
 0x7d4   : > { %v2196_v42 = vpop.permute.xlu1 %2195 }
 0x7d5   : > { %v2197_v55 = vrot.slane %v2196_v42, 1  ;;  %v2198_v11 = vrot.slane %v2196_v42, 2 }
 0x7d7   : > { %v2199_v43 = vsel %vm805_vm8, %v2197_v55, %v2198_v11 }
 0x7d8   : > { %v2210_v4 = vmul.f32 %v7330_v49, %v2199_v43 }
 0x7da   : > { %v2227_v61 = vrot.slane %v2210_v4, %v6552_v50  ;;  %v2223_v22 = vrot.slane %v2210_v4, %v6545_v47  ;;  %v2235_v57 = vrot.slane %v2210_v4, %v6564_v59  ;;  %v2231_v0 = vrot.slane %v2210_v4, %v6548_v48 }
 0x7dd   : > { %v2213_v23 = vpop.permute.xlu0 %2212 }
 0x7de   : > { %v2241_v41 = vmul.f32 %v2227_v61, %v2213_v23  ;;  %v2240_v20 = vmul.f32 %v2223_v22, %v2213_v23  ;;  %v2243_v42 = vmul.f32 %v2235_v57, %v2213_v23  ;;  %v2242_v55 = vmul.f32 %v2231_v0, %v2213_v23 }
 0x7df   : > { %v6398_v23 = vmov 19  }
 0x7e0   : > { %2258 = vrot.lane.b32.xlu0 %v2241_v41, %s6363_s11  ;;  %2256 = vrot.lane.b32.xlu1 %v2240_v20, %s6363_s11  ;;  %v2304_v41 = vcombine.high %v7293_v32, %v7293_v32 }
 0x7e1   : > { %v2217_v11 = vpop.permute.xlu1 %2216 }
 0x7e2   : > { %v2245_v43 = vmul.f32 %v2227_v61, %v2217_v11  ;;  %v2244_v53 = vmul.f32 %v2223_v22, %v2217_v11  ;;  %v2247_v27 = vmul.f32 %v2235_v57, %v2217_v11  ;;  %v2246_v7 = vmul.f32 %v2231_v0, %v2217_v11 }
 0x7e4   : > { %2262 = vrot.lane.b32.xlu0 %v2243_v42, %s6363_s11  ;;  %2260 = vrot.lane.b32.xlu1 %v2242_v55, %s6363_s11 }
 0x7e8   : > { %2266 = vrot.lane.b32.xlu0 %v2245_v43, %s6363_s11  ;;  %2264 = vrot.lane.b32.xlu1 %v2244_v53, %s6363_s11 }
 0x7ec   : > { %2270 = vrot.lane.b32.xlu0 %v2247_v27, %s6363_s11  ;;  %2268 = vrot.lane.b32.xlu1 %v2246_v7, %s6363_s11 }
 0x7f0   : > { %2308 = vperm.xlu0 %6279, %v7035_v24   ;;  %2298 = vrot.lane.b32.xlu1 %v7116_v35, %s6384_s29 }
 0x7f4   : > { %2312 = vperm.xlu1 %6280, %v7029_v51   ;;  %6281 = vset.pattern.permute.xlu0 %v6398_v23 }
 0x7f8   : > { %6282 = vset.pattern.permute.xlu1 %v6398_v23 }
 0x852   : > { %v7352_v61 = vpop.permute.xlu1 %2256  ;;  %v7354_v22 = vpop.permute.xlu0 %2258 }
 0x853   : > { %11175 = vst [vmem:[#allocation128_spill] sm:$0xff] %v7352_v61  ;;  %11176 = vst [vmem:[#allocation129_spill] sm:$0xff] %v7354_v22 }
 0x856   : > { %v7356_v57 = vpop.permute.xlu1 %2260  ;;  %v7360_v27 = vpop.permute.xlu0 %2262 }
 0x857   : > { %11178 = vst [vmem:[#allocation131_spill] sm:$0xff] %v7360_v27 }
 0x85a   : > { %v7358_v4 = vpop.permute.xlu1 %2264  ;;  %v7364_v53 = vpop.permute.xlu0 %2266 }
 0x85b   : > { %11177 = vst [vmem:[#allocation130_spill] sm:$0xff] %v7358_v4  ;;  %11180 = vst [vmem:[#allocation133_spill] sm:$0xff] %v7364_v53 }
 0x85e   : > { %v7362_v7 = vpop.permute.xlu1 %2268  ;;  %v7369_v43 = vpop.permute.xlu0 %2270 }
 0x85f   : > { %11179 = vst [vmem:[#allocation132_spill] sm:$0xff] %v7362_v7  ;;  %11181 = vst [vmem:[#allocation134_spill] sm:$0xff] %v7369_v43 }
 0x862   : > { %v2299_v20 = vpop.permute.xlu1 %2298 }
 0x863   : > { %v2300_v0 = vrot.slane %v2299_v20, 1  ;;  %v2301_v42 = vrot.slane %v2299_v20, 2 }
 0x865   : > { %v2302_v55 = vsel %vm1205_vm7, %v2300_v0, %v2301_v42 }
 0x866   : > { %v2306_v11 = vmul.f32 %v2304_v41, %v2302_v55 }
 0x868   : > { %v2323_v23 = vrot.slane %v2306_v11, %v6552_v50  ;;  %v2319_v4 = vrot.slane %v2306_v11, %v6545_v47  ;;  %v2331_v53 = vrot.slane %v2306_v11, %v6564_v59  ;;  %v2327_v22 = vrot.slane %v2306_v11, %v6548_v48 }
 0x86b   : > { %v2309_v27 = vpop.permute.xlu0 %2308 }
 0x86c   : > { %v2337_v61 = vmul.f32 %v2323_v23, %v2309_v27  ;;  %v2336_v7 = vmul.f32 %v2319_v4, %v2309_v27  ;;  %v2339_v32 = vmul.f32 %v2331_v53, %v2309_v27  ;;  %v2338_v20 = vmul.f32 %v2327_v22, %v2309_v27 }
 0x86e   : > { %2354 = vrot.lane.b32.xlu0 %v2337_v61, %s6363_s11  ;;  %2352 = vrot.lane.b32.xlu1 %v2336_v7, %s6363_s11  ;;  %v6399_v61 = vmov 20  }
 0x86f   : > { %v2313_v41 = vpop.permute.xlu1 %2312 }
 0x870   : > { %v2341_v0 = vmul.f32 %v2323_v23, %v2313_v41  ;;  %v2340_v42 = vmul.f32 %v2319_v4, %v2313_v41  ;;  %v2343_v55 = vmul.f32 %v2331_v53, %v2313_v41  ;;  %v2342_v43 = vmul.f32 %v2327_v22, %v2313_v41 }
 0x871   : > { %v2400_v23 = vcombine.high %v7330_v49, %v7330_v49 }
 0x872   : > { %2358 = vrot.lane.b32.xlu0 %v2339_v32, %s6363_s11  ;;  %2356 = vrot.lane.b32.xlu1 %v2338_v20, %s6363_s11 }
 0x876   : > { %2362 = vrot.lane.b32.xlu0 %v2341_v0, %s6363_s11  ;;  %2360 = vrot.lane.b32.xlu1 %v2340_v42, %s6363_s11 }
 0x87a   : > { %2366 = vrot.lane.b32.xlu0 %v2343_v55, %s6363_s11  ;;  %2364 = vrot.lane.b32.xlu1 %v2342_v43, %s6363_s11 }
 0x87e   : > { %2404 = vperm.xlu0 %6281, %v7035_v24   ;;  %2394 = vrot.lane.b32.xlu1 %v7116_v35, %s6381_s30 }
 0x882   : > { %2408 = vperm.xlu1 %6282, %v7029_v51   ;;  %6283 = vset.pattern.permute.xlu0 %v6399_v61 }
 0x886   : > { %6284 = vset.pattern.permute.xlu1 %v6399_v61 }
 0x8e0   : > { %v7387_v4 = vpop.permute.xlu1 %2352  ;;  %v7389_v27 = vpop.permute.xlu0 %2354 }
 0x8e1   : > { %11182 = vst [vmem:[#allocation135_spill] sm:$0xff] %v7387_v4  ;;  %11183 = vst [vmem:[#allocation136_spill] sm:$0xff] %v7389_v27 }
 0x8e4   : > { %v7391_v7 = vpop.permute.xlu1 %2356  ;;  %v7395_v53 = vpop.permute.xlu0 %2358 }
 0x8e5   : > { %11185 = vst [vmem:[#allocation138_spill] sm:$0xff] %v7395_v53 }
 0x8e8   : > { %v7393_v22 = vpop.permute.xlu1 %2360  ;;  %v7399_v43 = vpop.permute.xlu0 %2362 }
 0x8e9   : > { %11184 = vst [vmem:[#allocation137_spill] sm:$0xff] %v7393_v22  ;;  %11187 = vst [vmem:[#allocation140_spill] sm:$0xff] %v7399_v43 }
 0x8ec   : > { %v7397_v11 = vpop.permute.xlu1 %2364  ;;  %v7404_v55 = vpop.permute.xlu0 %2366 }
 0x8ed   : > { %11186 = vst [vmem:[#allocation139_spill] sm:$0xff] %v7397_v11  ;;  %11188 = vst [vmem:[#allocation141_spill] sm:$0xff] %v7404_v55 }
 0x8f0   : > { %v2395_v32 = vpop.permute.xlu1 %2394 }
 0x8f1   : > { %v2396_v20 = vrot.slane %v2395_v32, 1  ;;  %v2397_v41 = vrot.slane %v2395_v32, 2 }
 0x8f3   : > { %v2398_v0 = vsel %vm1067_vm6, %v2396_v20, %v2397_v41 }
 0x8f4   : > { %v2402_v42 = vmul.f32 %v2400_v23, %v2398_v0 }
 0x8f6   : > { %v2419_v61 = vrot.slane %v2402_v42, %v6552_v50  ;;  %v2415_v22 = vrot.slane %v2402_v42, %v6545_v47  ;;  %v2427_v43 = vrot.slane %v2402_v42, %v6564_v59  ;;  %v2423_v27 = vrot.slane %v2402_v42, %v6548_v48 }
 0x8f9   : > { %v2405_v53 = vpop.permute.xlu0 %2404 }
 0x8fa   : > { %v2433_v4 = vmul.f32 %v2419_v61, %v2405_v53  ;;  %v2432_v11 = vmul.f32 %v2415_v22, %v2405_v53  ;;  %v2435_v49 = vmul.f32 %v2427_v43, %v2405_v53  ;;  %v2434_v32 = vmul.f32 %v2423_v27, %v2405_v53 }
 0x8fc   : > { %2450 = vrot.lane.b32.xlu0 %v2433_v4, %s6363_s11  ;;  %2448 = vrot.lane.b32.xlu1 %v2432_v11, %s6363_s11  ;;  %v6400_v4 = vmov 21  }
 0x8fd   : > { %v2409_v23 = vpop.permute.xlu1 %2408 }
 0x8fe   : > { %v2437_v20 = vmul.f32 %v2419_v61, %v2409_v23  ;;  %v2436_v41 = vmul.f32 %v2415_v22, %v2409_v23  ;;  %v2439_v0 = vmul.f32 %v2427_v43, %v2409_v23  ;;  %v2438_v55 = vmul.f32 %v2423_v27, %v2409_v23 }
 0x8ff   : > { %v2496_v27 = vcombine.high %v7257_v38, %v7262_v40  ;;  %v2497_v43 = vcombine.high %v7267_v10, %v7272_v45 }
 0x900   : > { %2454 = vrot.lane.b32.xlu0 %v2435_v49, %s6363_s11  ;;  %2452 = vrot.lane.b32.xlu1 %v2434_v32, %s6363_s11 }
 0x901   : > { %v2511_v61 = vrot.slane %v2497_v43, %v6487_v15 }
 0x904   : > { %2458 = vrot.lane.b32.xlu0 %v2437_v20, %s6363_s11  ;;  %2456 = vrot.lane.b32.xlu1 %v2436_v41, %s6363_s11 }
 0x908   : > { %2462 = vrot.lane.b32.xlu0 %v2439_v0, %s6363_s11  ;;  %2460 = vrot.lane.b32.xlu1 %v2438_v55, %s6363_s11  ;;  %v2504_v55 = vrot.slane %v2496_v27, %v6487_v15 }
 0x90a   : > { %v2512_v23 = vcombine.low %v2504_v55, %v2511_v61 }
 0x90c   : > { %2523 = vperm.xlu0 %6283, %v7035_v24   ;;  %2490 = vrot.lane.b32.xlu1 %v7116_v35, %s6378_s28  ;;  %v7443_v41 = vrot.slane %v2512_v23, %v6487_v15 }
 0x910   : > { %2527 = vperm.xlu1 %6284, %v7029_v51   ;;  %6285 = vset.pattern.permute.xlu0 %v6400_v4 }
 0x914   : > { %6286 = vset.pattern.permute.xlu1 %v6400_v4 }
 0x96e   : > { %v7422_v22 = vpop.permute.xlu1 %2448  ;;  %v7424_v53 = vpop.permute.xlu0 %2450 }
 0x96f   : > { %11189 = vst [vmem:[#allocation142_spill] sm:$0xff] %v7422_v22  ;;  %11190 = vst [vmem:[#allocation143_spill] sm:$0xff] %v7424_v53 }
 0x972   : > { %v7426_v11 = vpop.permute.xlu1 %2452  ;;  %v7436_v49 = vpop.permute.xlu0 %2454 }
 0x973   : > { %11192 = vst [vmem:[#allocation145_spill] sm:$0xff] %v7436_v49 }
 0x976   : > { %v7432_v42 = vpop.permute.xlu1 %2456  ;;  %v7440_v20 = vpop.permute.xlu0 %2458 }
 0x977   : > { %11191 = vst [vmem:[#allocation144_spill] sm:$0xff] %v7432_v42  ;;  %11194 = vst [vmem:[#allocation147_spill] sm:$0xff] %v7440_v20 }
 0x97a   : > { %v7438_v32 = vpop.permute.xlu1 %2460  ;;  %v7447_v4 = vpop.permute.xlu0 %2462 }
 0x97b   : > { %11193 = vst [vmem:[#allocation146_spill] sm:$0xff] %v7438_v32  ;;  %11195 = vst [vmem:[#allocation148_spill] sm:$0xff] %v7447_v4 }
 0x97e   : > { %v2491_v38 = vpop.permute.xlu1 %2490 }
 0x97f   : > { %v2492_v40 = vrot.slane %v2491_v38, 1  ;;  %v2493_v0 = vrot.slane %v2491_v38, 2 }
 0x981   : > { %v2494_v10 = vsel %vm956_vm5, %v2492_v40, %v2493_v0 }
 0x982   : > { %v2521_v45 = vmul.f32 %v7443_v41, %v2494_v10 }
 0x984   : > { %v2538_v27 = vrot.slane %v2521_v45, %v6552_v50  ;;  %v2534_v43 = vrot.slane %v2521_v45, %v6545_v47  ;;  %v2546_v20 = vrot.slane %v2521_v45, %v6564_v59  ;;  %v2542_v23 = vrot.slane %v2521_v45, %v6548_v48 }
 0x987   : > { %v2524_v32 = vpop.permute.xlu0 %2523 }
 0x988   : > { %v2552_v42 = vmul.f32 %v2538_v27, %v2524_v32  ;;  %v2551_v49 = vmul.f32 %v2534_v43, %v2524_v32  ;;  %v2554_v38 = vmul.f32 %v2546_v20, %v2524_v32  ;;  %v2553_v40 = vmul.f32 %v2542_v23, %v2524_v32 }
 0x98a   : > { %2569 = vrot.lane.b32.xlu0 %v2552_v42, %s6363_s11  ;;  %2567 = vrot.lane.b32.xlu1 %v2551_v49, %s6363_s11  ;;  %v6401_v42 = vmov 22  }
 0x98b   : > { %v2528_v0 = vpop.permute.xlu1 %2527 }
 0x98c   : > { %v2556_v10 = vmul.f32 %v2538_v27, %v2528_v0  ;;  %v2555_v4 = vmul.f32 %v2534_v43, %v2528_v0  ;;  %v2558_v22 = vmul.f32 %v2546_v20, %v2528_v0  ;;  %v2557_v53 = vmul.f32 %v2542_v23, %v2528_v0 }
 0x98e   : > { %2573 = vrot.lane.b32.xlu0 %v2554_v38, %s6363_s11  ;;  %2571 = vrot.lane.b32.xlu1 %v2553_v40, %s6363_s11 }
 0x992   : > { %2577 = vrot.lane.b32.xlu0 %v2556_v10, %s6363_s11  ;;  %2575 = vrot.lane.b32.xlu1 %v2555_v4, %s6363_s11  ;;  %v2615_v4 = vcombine.high %v2504_v55, %v2511_v61 }
 0x994   : > { %v7480_v43 = vrot.slane %v2615_v4, %v6487_v15 }
 0x996   : > { %2581 = vrot.lane.b32.xlu0 %v2558_v22, %s6363_s11  ;;  %2579 = vrot.lane.b32.xlu1 %v2557_v53, %s6363_s11 }
 0x99a   : > { %2626 = vperm.xlu0 %6285, %v7035_v24   ;;  %2609 = vrot.lane.b32.xlu1 %v7116_v35, %s6371_s16 }
 0x99e   : > { %2630 = vperm.xlu1 %6286, %v7029_v51   ;;  %6287 = vset.pattern.permute.xlu0 %v6401_v42 }
 0x9a2   : > { %6288 = vset.pattern.permute.xlu1 %v6401_v42 }
 0x9fc   : > { %v7465_v49 = vpop.permute.xlu1 %2567  ;;  %v7467_v32 = vpop.permute.xlu0 %2569 }
 0x9fd   : > { %11196 = vst [vmem:[#allocation149_spill] sm:$0xff] %v7465_v49  ;;  %11197 = vst [vmem:[#allocation150_spill] sm:$0xff] %v7467_v32 }
 0xa00   : > { %v7469_v20 = vpop.permute.xlu1 %2571  ;;  %v7473_v22 = vpop.permute.xlu0 %2573 }
 0xa01   : > { %11199 = vst [vmem:[#allocation152_spill] sm:$0xff] %v7473_v22 }
 0xa04   : > { %v7471_v45 = vpop.permute.xlu1 %2575  ;;  %v7477_v27 = vpop.permute.xlu0 %2577 }
 0xa05   : > { %11198 = vst [vmem:[#allocation151_spill] sm:$0xff] %v7471_v45  ;;  %11201 = vst [vmem:[#allocation154_spill] sm:$0xff] %v7477_v27 }
 0xa08   : > { %v7475_v53 = vpop.permute.xlu1 %2579  ;;  %v7484_v42 = vpop.permute.xlu0 %2581 }
 0xa09   : > { %11200 = vst [vmem:[#allocation153_spill] sm:$0xff] %v7475_v53  ;;  %11202 = vst [vmem:[#allocation155_spill] sm:$0xff] %v7484_v42 }
 0xa0c   : > { %v2610_v23 = vpop.permute.xlu1 %2609 }
 0xa0d   : > { %v2611_v38 = vrot.slane %v2610_v23, 1  ;;  %v2612_v40 = vrot.slane %v2610_v23, 2 }
 0xa0f   : > { %v2613_v0 = vsel %vm845_vm2, %v2611_v38, %v2612_v40 }
 0xa10   : > { %v2624_v10 = vmul.f32 %v7480_v43, %v2613_v0 }
 0xa12   : > { %v2641_v45 = vrot.slane %v2624_v10, %v6552_v50  ;;  %v2637_v22 = vrot.slane %v2624_v10, %v6545_v47  ;;  %v2649_v27 = vrot.slane %v2624_v10, %v6564_v59  ;;  %v2645_v4 = vrot.slane %v2624_v10, %v6548_v48 }
 0xa15   : > { %v2627_v53 = vpop.permute.xlu0 %2626 }
 0xa16   : > { %v2655_v55 = vmul.f32 %v2641_v45, %v2627_v53  ;;  %v2654_v61 = vmul.f32 %v2637_v22, %v2627_v53  ;;  %v2657_v23 = vmul.f32 %v2649_v27, %v2627_v53  ;;  %v2656_v38 = vmul.f32 %v2645_v4, %v2627_v53 }
 0xa17   : > { %v6402_v53 = vmov 23  }
 0xa18   : > { %2672 = vrot.lane.b32.xlu0 %v2655_v55, %s6363_s11  ;;  %2670 = vrot.lane.b32.xlu1 %v2654_v61, %s6363_s11 }
 0xa19   : > { %v2631_v40 = vpop.permute.xlu1 %2630 }
 0xa1a   : > { %v2659_v0 = vmul.f32 %v2641_v45, %v2631_v40  ;;  %v2658_v42 = vmul.f32 %v2637_v22, %v2631_v40  ;;  %v2661_v49 = vmul.f32 %v2649_v27, %v2631_v40  ;;  %v2660_v32 = vmul.f32 %v2645_v4, %v2631_v40 }
 0xa1c   : > { %2676 = vrot.lane.b32.xlu0 %v2657_v23, %s6363_s11  ;;  %2674 = vrot.lane.b32.xlu1 %v2656_v38, %s6363_s11 }
 0xa20   : > { %2680 = vrot.lane.b32.xlu0 %v2659_v0, %s6363_s11  ;;  %2678 = vrot.lane.b32.xlu1 %v2658_v42, %s6363_s11 }
 0xa24   : > { %2684 = vrot.lane.b32.xlu0 %v2661_v49, %s6363_s11  ;;  %2682 = vrot.lane.b32.xlu1 %v2660_v32, %s6363_s11 }
 0xa28   : > { %2722 = vperm.xlu0 %6287, %v7035_v24   ;;  %2712 = vrot.lane.b32.xlu1 %v7116_v35, %s6370_s15 }
 0xa2c   : > { %2726 = vperm.xlu1 %6288, %v7029_v51   ;;  %6289 = vset.pattern.permute.xlu0 %v6402_v53  ;;  %v2718_v51 = vcombine.high %v7443_v41, %v7443_v41 }
 0xa30   : > { %6290 = vset.pattern.permute.xlu1 %v6402_v53 }
 0xa8a   : > { %v7502_v45 = vpop.permute.xlu1 %2670  ;;  %v7504_v22 = vpop.permute.xlu0 %2672 }
 0xa8b   : > { %11203 = vst [vmem:[#allocation156_spill] sm:$0xff] %v7502_v45  ;;  %11204 = vst [vmem:[#allocation157_spill] sm:$0xff] %v7504_v22 }
 0xa8e   : > { %v7506_v27 = vpop.permute.xlu1 %2674  ;;  %v7510_v49 = vpop.permute.xlu0 %2676 }
 0xa8f   : > { %11205 = vst [vmem:[#allocation158_spill] sm:$0xff] %v7506_v27  ;;  %11207 = vst [vmem:[#allocation160_spill] sm:$0xff] %v7510_v49 }
 0xa92   : > { %v7508_v10 = vpop.permute.xlu1 %2678  ;;  %v7514_v24 = vpop.permute.xlu0 %2680 }
 0xa93   : > { %11206 = vst [vmem:[#allocation159_spill] sm:$0xff] %v7508_v10  ;;  %11209 = vst [vmem:[#allocation162_spill] sm:$0xff] %v7514_v24 }
 0xa96   : > { %v7512_v32 = vpop.permute.xlu1 %2682  ;;  %v7519_v38 = vpop.permute.xlu0 %2684 }
 0xa97   : > { %11208 = vst [vmem:[#allocation161_spill] sm:$0xff] %v7512_v32  ;;  %11210 = vst [vmem:[#allocation163_spill] sm:$0xff] %v7519_v38 }
 0xa9a   : > { %v2713_v42 = vpop.permute.xlu1 %2712 }
 0xa9b   : > { %v2714_v55 = vrot.slane %v2713_v42, 1  ;;  %v2715_v61 = vrot.slane %v2713_v42, 2 }
 0xa9d   : > { %v2716_v4 = vsel %vm11042_vm1, %v2714_v55, %v2715_v61 }
 0xa9e   : > { %v2720_v23 = vmul.f32 %v2718_v51, %v2716_v4 }
 0xaa0   : > { %v2737_v40 = vrot.slane %v2720_v23, %v6552_v50  ;;  %v2733_v0 = vrot.slane %v2720_v23, %v6545_v47  ;;  %v2745_v24 = vrot.slane %v2720_v23, %v6564_v59  ;;  %v2741_v49 = vrot.slane %v2720_v23, %v6548_v48 }
 0xaa3   : > { %v2723_v53 = vpop.permute.xlu0 %2722 }
 0xaa4   : > { %v2751_v10 = vmul.f32 %v2737_v40, %v2723_v53  ;;  %v2750_v32 = vmul.f32 %v2733_v0, %v2723_v53  ;;  %v2753_v41 = vmul.f32 %v2745_v24, %v2723_v53  ;;  %v2752_v42 = vmul.f32 %v2741_v49, %v2723_v53 }
 0xaa6   : > { %2768 = vrot.lane.b32.xlu0 %v2751_v10, %s6363_s11  ;;  %2766 = vrot.lane.b32.xlu1 %v2750_v32, %s6363_s11  ;;  %v7536_v10 = vld [vmem:[%s10779_s2] sm:$0xff]  ;;  %v7544_v32 = vld [vmem:[%s10779_s2 + $0x8] sm:$0xff] }
 0xaa7   : > { %v2727_v51 = vpop.permute.xlu1 %2726 }
 0xaa8   : > { %v2755_v55 = vmul.f32 %v2737_v40, %v2727_v51  ;;  %v2754_v61 = vmul.f32 %v2733_v0, %v2727_v51  ;;  %v2757_v4 = vmul.f32 %v2745_v24, %v2727_v51  ;;  %v2756_v38 = vmul.f32 %v2741_v49, %v2727_v51 }
 0xaa9   : > { %v6403_v49 = vmov 24  }
 0xaaa   : > { %2772 = vrot.lane.b32.xlu0 %v2753_v41, %s6363_s11  ;;  %2770 = vrot.lane.b32.xlu1 %v2752_v42, %s6363_s11  ;;  %v2814_v42 = vcombine.high %v7480_v43, %v7480_v43 }
 0xaae   : > { %2776 = vrot.lane.b32.xlu0 %v2755_v55, %s6363_s11  ;;  %2774 = vrot.lane.b32.xlu1 %v2754_v61, %s6363_s11 }
 0xab2   : > { %2780 = vrot.lane.b32.xlu0 %v2757_v4, %s6363_s11  ;;  %2778 = vrot.lane.b32.xlu1 %v2756_v38, %s6363_s11 }
 0xab6   : > { %2818 = vperm.xlu0 %6289, %v7536_v10   ;;  %2808 = vrot.lane.b32.xlu1 %v7116_v35, %s6368_s14 }
 0xaba   : > { %2822 = vperm.xlu1 %6290, %v7544_v32   ;;  %6291 = vset.pattern.permute.xlu0 %v6403_v49 }
 0xabe   : > { %6292 = vset.pattern.permute.xlu1 %v6403_v49 }
 0xb18   : > { %v7547_v24 = vpop.permute.xlu1 %2766  ;;  %v7549_v23 = vpop.permute.xlu0 %2768 }
 0xb19   : > { %11211 = vst [vmem:[#allocation164_spill] sm:$0xff] %v7547_v24  ;;  %11212 = vst [vmem:[#allocation165_spill] sm:$0xff] %v7549_v23 }
 0xb1c   : > { %v7551_v38 = vpop.permute.xlu1 %2770  ;;  %v7555_v0 = vpop.permute.xlu0 %2772 }
 0xb1d   : > { %11213 = vst [vmem:[#allocation166_spill] sm:$0xff] %v7551_v38  ;;  %11215 = vst [vmem:[#allocation168_spill] sm:$0xff] %v7555_v0 }
 0xb20   : > { %v7553_v40 = vpop.permute.xlu1 %2774  ;;  %v7559_v41 = vpop.permute.xlu0 %2776 }
 0xb21   : > { %11214 = vst [vmem:[#allocation167_spill] sm:$0xff] %v7553_v40  ;;  %11217 = vst [vmem:[#allocation170_spill] sm:$0xff] %v7559_v41 }
 0xb24   : > { %v7557_v53 = vpop.permute.xlu1 %2778  ;;  %v7564_v24 = vpop.permute.xlu0 %2780 }
 0xb25   : > { %11216 = vst [vmem:[#allocation169_spill] sm:$0xff] %v7557_v53  ;;  %11218 = vst [vmem:[#allocation171_spill] sm:$0xff] %v7564_v24 }
 0xb28   : > { %v2809_v51 = vpop.permute.xlu1 %2808 }
 0xb29   : > { %v2810_v55 = vrot.slane %v2809_v51, 1  ;;  %v2811_v61 = vrot.slane %v2809_v51, 2 }
 0xb2b   : > { %v2812_v4 = vsel %vm593_vm4, %v2810_v55, %v2811_v61 }
 0xb2c   : > { %v2816_v49 = vmul.f32 %v2814_v42, %v2812_v4 }
 0xb2e   : > { %v2833_v23 = vrot.slane %v2816_v49, %v6552_v50  ;;  %v2829_v40 = vrot.slane %v2816_v49, %v6545_v47  ;;  %v2841_v41 = vrot.slane %v2816_v49, %v6564_v59  ;;  %v2837_v45 = vrot.slane %v2816_v49, %v6548_v48 }
 0xb31   : > { %v2819_v0 = vpop.permute.xlu0 %2818 }
 0xb32   : > { %v2847_v38 = vmul.f32 %v2833_v23, %v2819_v0  ;;  %v2846_v53 = vmul.f32 %v2829_v40, %v2819_v0  ;;  %v2849_v43 = vmul.f32 %v2841_v41, %v2819_v0  ;;  %v2848_v51 = vmul.f32 %v2837_v45, %v2819_v0 }
 0xb34   : > { %2864 = vrot.lane.b32.xlu0 %v2847_v38, %s6363_s11  ;;  %2862 = vrot.lane.b32.xlu1 %v2846_v53, %s6363_s11  ;;  %v6404_v38 = vmov 25  }
 0xb35   : > { %v2823_v42 = vpop.permute.xlu1 %2822 }
 0xb36   : > { %v2851_v55 = vmul.f32 %v2833_v23, %v2823_v42  ;;  %v2850_v61 = vmul.f32 %v2829_v40, %v2823_v42  ;;  %v2853_v4 = vmul.f32 %v2841_v41, %v2823_v42  ;;  %v2852_v24 = vmul.f32 %v2837_v45, %v2823_v42  ;;  %v262_v45 = vld [vmem:[%s10778_s1 + $0x60] sm:$0x7]  ;;  %v264_v40 = vld [vmem:[%s10778_s1 + $0x70] sm:$0x7] }
 0xb38   : > { %2868 = vrot.lane.b32.xlu0 %v2849_v43, %s6363_s11  ;;  %2866 = vrot.lane.b32.xlu1 %v2848_v51, %s6363_s11 }
 0xb3c   : > { %2872 = vrot.lane.b32.xlu0 %v2851_v55, %s6363_s11  ;;  %2870 = vrot.lane.b32.xlu1 %v2850_v61, %s6363_s11 }
 0xb40   : > { %2876 = vrot.lane.b32.xlu0 %v2853_v4, %s6363_s11  ;;  %2874 = vrot.lane.b32.xlu1 %v2852_v24, %s6363_s11  ;;  %v263_v24 = vld [vmem:[%s10778_s1 + $0x68] sm:$0x7] }
 0xb41   : > { %v2914_v41 = vcombine.low %v262_v45, %v263_v24 }
 0xb43   : > { %v2922_v51 = vrot.slane %v2914_v41, %v6487_v15 }
 0xb44   : > { %2941 = vperm.xlu0 %6291, %v7536_v10   ;;  %2904 = vrot.lane.b32.xlu1 %v7116_v35, %s6366_s13  ;;  %v265_v35 = vld [vmem:[%s10778_s1 + $0x78] sm:$0x7] }
 0xb45   : > { %v2915_v49 = vcombine.low %v264_v40, %v265_v35 }
 0xb47   : > { %v2929_v42 = vrot.slane %v2915_v49, %v6487_v15 }
 0xb48   : > { %2945 = vperm.xlu1 %6292, %v7544_v32   ;;  %6293 = vset.pattern.permute.xlu0 %v6404_v38 }
 0xb49   : > { %v2930_v4 = vcombine.low %v2922_v51, %v2929_v42 }
 0xb4c   : > { %6294 = vset.pattern.permute.xlu1 %v6404_v38 }
 0xba6   : > { %v7582_v23 = vpop.permute.xlu1 %2862  ;;  %v7596_v0 = vpop.permute.xlu0 %2864 }
 0xba7   : > { %11219 = vst [vmem:[#allocation172_spill] sm:$0xff] %v7582_v23  ;;  %11220 = vst [vmem:[#allocation173_spill] sm:$0xff] %v7596_v0  ;;  %v7611_v23 = vrot.slane %v2930_v4, %v6487_v15 }
 0xbaa   : > { %v7598_v53 = vpop.permute.xlu1 %2866  ;;  %v7604_v55 = vpop.permute.xlu0 %2868 }
 0xbab   : > { %11221 = vst [vmem:[#allocation174_spill] sm:$0xff] %v7598_v53  ;;  %11223 = vst [vmem:[#allocation176_spill] sm:$0xff] %v7604_v55 }
 0xbae   : > { %v7600_v43 = vpop.permute.xlu1 %2870  ;;  %v7608_v38 = vpop.permute.xlu0 %2872 }
 0xbaf   : > { %11222 = vst [vmem:[#allocation175_spill] sm:$0xff] %v7600_v43  ;;  %11225 = vst [vmem:[#allocation178_spill] sm:$0xff] %v7608_v38 }
 0xbb2   : > { %v7606_v61 = vpop.permute.xlu1 %2874  ;;  %v7615_v35 = vpop.permute.xlu0 %2876 }
 0xbb3   : > { %11224 = vst [vmem:[#allocation177_spill] sm:$0xff] %v7606_v61  ;;  %11226 = vst [vmem:[#allocation179_spill] sm:$0xff] %v7615_v35 }
 0xbb6   : > { %v2905_v0 = vpop.permute.xlu1 %2904 }
 0xbb7   : > { %v2906_v53 = vrot.slane %v2905_v0, 1  ;;  %v2907_v45 = vrot.slane %v2905_v0, 2 }
 0xbb9   : > { %v2908_v24 = vsel %vm482_vm3, %v2906_v53, %v2907_v45 }
 0xbba   : > { %v2939_v40 = vmul.f32 %v7611_v23, %v2908_v24 }
 0xbbc   : > { %v2956_v41 = vrot.slane %v2939_v40, %v6552_v50  ;;  %v2952_v49 = vrot.slane %v2939_v40, %v6545_v47  ;;  %v2964_v38 = vrot.slane %v2939_v40, %v6564_v59  ;;  %v2960_v4 = vrot.slane %v2939_v40, %v6548_v48 }
 0xbbf   : > { %v2942_v61 = vpop.permute.xlu0 %2941 }
 0xbc0   : > { %v2970_v43 = vmul.f32 %v2956_v41, %v2942_v61  ;;  %v2969_v55 = vmul.f32 %v2952_v49, %v2942_v61  ;;  %v2972_v0 = vmul.f32 %v2964_v38, %v2942_v61  ;;  %v2971_v53 = vmul.f32 %v2960_v4, %v2942_v61 }
 0xbc2   : > { %2987 = vrot.lane.b32.xlu0 %v2970_v43, %s6363_s11  ;;  %2985 = vrot.lane.b32.xlu1 %v2969_v55, %s6363_s11  ;;  %v7631_v43 = vld [vmem:[%s6536_s20] sm:$0x3f]  ;;  %v6405_v55 = vmov 26  }
 0xbc3   : > { %v2946_v45 = vpop.permute.xlu1 %2945 }
 0xbc4   : > { %v2974_v24 = vmul.f32 %v2956_v41, %v2946_v45  ;;  %v2973_v35 = vmul.f32 %v2952_v49, %v2946_v45  ;;  %v2976_v22 = vmul.f32 %v2964_v38, %v2946_v45  ;;  %v2975_v40 = vmul.f32 %v2960_v4, %v2946_v45 }
 0xbc5   : > { %v3033_v4 = vcombine.high %v2922_v51, %v2929_v42 }
 0xbc6   : > { %2991 = vrot.lane.b32.xlu0 %v2972_v0, %s6363_s11  ;;  %2989 = vrot.lane.b32.xlu1 %v2971_v53, %s6363_s11 }
 0xbc7   : > { %v3040_v53 = vrot.slane %v3033_v4, %v6487_v15 }
 0xbca   : > { %2995 = vrot.lane.b32.xlu0 %v2974_v24, %s6363_s11  ;;  %2993 = vrot.lane.b32.xlu1 %v2973_v35, %s6363_s11 }
 0xbce   : > { %2999 = vrot.lane.b32.xlu0 %v2976_v22, %s6363_s11  ;;  %2997 = vrot.lane.b32.xlu1 %v2975_v40, %s6363_s11 }
 0xbd2   : > { %3044 = vperm.xlu0 %6293, %v7536_v10   ;;  %3027 = vrot.lane.b32.xlu1 %v7631_v43, %s6364_s12 }
 0xbd6   : > { %3048 = vperm.xlu1 %6294, %v7544_v32   ;;  %6295 = vset.pattern.permute.xlu0 %v6405_v55 }
 0xbda   : > { %6297 = vset.pattern.permute.xlu1 %v6405_v55 }
 0xc34   : > { %v7636_v61 = vpop.permute.xlu1 %2985  ;;  %v7638_v38 = vpop.permute.xlu0 %2987 }
 0xc35   : > { %11227 = vst [vmem:[#allocation180_spill] sm:$0xff] %v7636_v61  ;;  %11228 = vst [vmem:[#allocation181_spill] sm:$0xff] %v7638_v38 }
 0xc38   : > { %v7640_v35 = vpop.permute.xlu1 %2989  ;;  %v7644_v41 = vpop.permute.xlu0 %2991 }
 0xc39   : > { %11229 = vst [vmem:[#allocation182_spill] sm:$0xff] %v7640_v35  ;;  %11231 = vst [vmem:[#allocation184_spill] sm:$0xff] %v7644_v41 }
 0xc3c   : > { %v7642_v22 = vpop.permute.xlu1 %2993  ;;  %v7648_v0 = vpop.permute.xlu0 %2995 }
 0xc3d   : > { %11230 = vst [vmem:[#allocation183_spill] sm:$0xff] %v7642_v22 }
 0xc40   : > { %v7646_v49 = vpop.permute.xlu1 %2997  ;;  %v7652_v38 = vpop.permute.xlu0 %2999 }
 0xc41   : > { %11232 = vst [vmem:[#allocation185_spill] sm:$0xff] %v7646_v49  ;;  %11233 = vst [vmem:[#allocation186_spill] sm:$0xff] %v7652_v38 }
 0xc44   : > { %v3028_v45 = vpop.permute.xlu1 %3027 }
 0xc45   : > { %v3029_v24 = vrot.slane %v3028_v45, 1  ;;  %v3030_v40 = vrot.slane %v3028_v45, 2 }
 0xc47   : > { %v3031_v55 = vsel %vm11035_vm0, %v3029_v24, %v3030_v40 }
 0xc48   : > { %v3042_v61 = vmul.f32 %v3040_v53, %v3031_v55 }
 0xc4a   : > { %v3059_v35 = vrot.slane %v3042_v61, %v6552_v50  ;;  %v3055_v22 = vrot.slane %v3042_v61, %v6545_v47  ;;  %v3067_v51 = vrot.slane %v3042_v61, %v6564_v59  ;;  %v3063_v42 = vrot.slane %v3042_v61, %v6548_v48 }
 0xc4d   : > { %v3045_v41 = vpop.permute.xlu0 %3044 }
 0xc4e   : > { %v3073_v27 = vmul.f32 %v3059_v35, %v3045_v41  ;;  %v3072_v49 = vmul.f32 %v3055_v22, %v3045_v41  ;;  %v3075_v15 = vmul.f32 %v3067_v51, %v3045_v41  ;;  %v3074_v4 = vmul.f32 %v3063_v42, %v3045_v41 }
 0xc50   : > { %3090 = vrot.lane.b32.xlu0 %v3073_v27, %s6363_s11  ;;  %3088 = vrot.lane.b32.xlu1 %v3072_v49, %s6363_s11  ;;  %v11234_v27 = vmov 0  }
 0xc51   : > { %v3049_v53 = vpop.permute.xlu1 %3048 }
 0xc52   : > { %v3077_v45 = vmul.f32 %v3059_v35, %v3049_v53  ;;  %v3076_v24 = vmul.f32 %v3055_v22, %v3049_v53  ;;  %v3079_v40 = vmul.f32 %v3067_v51, %v3049_v53  ;;  %v3078_v55 = vmul.f32 %v3063_v42, %v3049_v53 }
 0xc54   : > { %3094 = vrot.lane.b32.xlu0 %v3075_v15, %s6363_s11  ;;  %3092 = vrot.lane.b32.xlu1 %v3074_v4, %s6363_s11 }
 0xc58   : > { %3098 = vrot.lane.b32.xlu0 %v3077_v45, %s6363_s11  ;;  %3096 = vrot.lane.b32.xlu1 %v3076_v24, %s6363_s11 }
 0xc5c   : > { %3102 = vrot.lane.b32.xlu0 %v3079_v40, %s6363_s11  ;;  %3100 = vrot.lane.b32.xlu1 %v3078_v55, %s6363_s11 }
 0xc60   : > { %3140 = vperm.xlu0 %6295, %v7536_v10   ;;  %3130 = vrot.lane.b32.xlu1 %v7631_v43, %s6363_s11 }
 0xc64   : > { %6296 = vset.pattern.permute.xlu0 %v11234_v27  ;;  %3144 = vperm.xlu1 %6297, %v7544_v32   ;;  %v3136_v32 = vcombine.high %v7611_v23, %v7611_v23 }
 0xc65   : > { %306 = vperm.xlu0 %6296, %v7536_v10  }
 0xc68   : > { %6298 = vset.pattern.permute.xlu1 %v11234_v27 }
 0xcc2   : > { %v7673_v61 = vpop.permute.xlu1 %3088  ;;  %v7675_v35 = vpop.permute.xlu0 %3090 }
 0xcc3   : > { %11235 = vst [vmem:[#allocation187_spill] sm:$0xff] %v7673_v61 }
 0xcc6   : > { %v7677_v22 = vpop.permute.xlu1 %3092  ;;  %v7681_v49 = vpop.permute.xlu0 %3094 }
 0xcc7   : > { %11236 = vst [vmem:[#allocation188_spill] sm:$0xff] %v7681_v49 }
 0xcca   : > { %v7679_v41 = vpop.permute.xlu1 %3096  ;;  %v7685_v42 = vpop.permute.xlu0 %3098 }
 0xcce   : > { %v7683_v51 = vpop.permute.xlu1 %3100  ;;  %v7690_v24 = vpop.permute.xlu0 %3102 }
 0xccf   : > { %11237 = vst [vmem:[#allocation189_spill] sm:$0xff] %v7683_v51  ;;  %11238 = vst [vmem:[#allocation190_spill] sm:$0xff] %v7690_v24 }
 0xcd2   : > { %v3131_v10 = vpop.permute.xlu1 %3130 }
 0xcd3   : > { %v3132_v15 = vrot.slane %v3131_v10, 1  ;;  %v3133_v4 = vrot.slane %v3131_v10, 2 }
 0xcd5   : > { %v3134_v53 = vsel %vm300_vm12, %v3132_v15, %v3133_v4 }
 0xcd6   : > { %v3138_v45 = vmul.f32 %v3136_v32, %v3134_v53 }
 0xcd8   : > { %v3155_v40 = vrot.slane %v3138_v45, %v6552_v50  ;;  %v3151_v55 = vrot.slane %v3138_v45, %v6545_v47  ;;  %v3163_v49 = vrot.slane %v3138_v45, %v6564_v59  ;;  %v3159_v23 = vrot.slane %v3138_v45, %v6548_v48 }
 0xcd9   : > { %v299_v45 = vrot.slane %v6528_v39, 7 }
 0xcdb   : > { %v3141_v27 = vpop.permute.xlu0 %3140 }
 0xcdc   : > { %v3169_v51 = vmul.f32 %v3155_v40, %v3141_v27  ;;  %v3168_v38 = vmul.f32 %v3151_v55, %v3141_v27  ;;  %v3171_v10 = vmul.f32 %v3163_v49, %v3141_v27  ;;  %v3170_v15 = vmul.f32 %v3159_v23, %v3141_v27 }
 0xcde   : > { %3186 = vrot.lane.b32.xlu0 %v3169_v51, %s6363_s11  ;;  %3184 = vrot.lane.b32.xlu1 %v3168_v38, %s6363_s11  ;;  %v3227_v38 = vld [vmem:[%s10780_s3 + $0x8] sm:$0xff]  ;;  %v3226_v51 = vld [vmem:[%s10780_s3] sm:$0xff] }
 0xcdf   : > { %v3145_v32 = vpop.permute.xlu1 %3144 }
 0xce0   : > { %v3173_v4 = vmul.f32 %v3155_v40, %v3145_v32  ;;  %v3172_v53 = vmul.f32 %v3151_v55, %v3145_v32  ;;  %v3175_v24 = vmul.f32 %v3163_v49, %v3145_v32  ;;  %v3174_v61 = vmul.f32 %v3159_v23, %v3145_v32 }
 0xce1   : > { %v301_v49 = vsel %vm300_vm12, %v299_v45, %v6528_v39  ;;  %v450_v45 = vsel %vm449_vm11, %v6698_v58, %v6705_v62  ;;  %v453_v58 = vsel %vm449_vm11, %v6710_v34, %v6703_v44 }
 0xce2   : > { %3190 = vrot.lane.b32.xlu0 %v3171_v10, %s6363_s11  ;;  %3188 = vrot.lane.b32.xlu1 %v3170_v15, %s6363_s11  ;;  %v303_v40 = vmul.f32 %v7631_v43, %v301_v49  ;;  %v454_v43 = vsel %vm449_vm11, %v6712_v63, %v6708_v1  ;;  %v457_v49 = vsel %vm449_vm11, %v6714_v2, %v6720_v46 }
 0xce3   : > { %v452_v63 = vsel %vm449_vm11, %v6696_v6, %v6710_v34  ;;  %v808_v34 = vsel %vm805_vm8, %v6718_v5, %v6730_v13 }
 0xce4   : > { %v326_v55 = vrot.slane %v303_v40, %v6548_v48  ;;  %v330_v27 = vrot.slane %v303_v40, %v6564_v59  ;;  %v334_v23 = vrot.slane %v303_v40, %v6559_v54 }
 0xce6   : > { %3194 = vrot.lane.b32.xlu0 %v3173_v4, %s6363_s11  ;;  %3192 = vrot.lane.b32.xlu1 %v3172_v53, %s6363_s11  ;;  %v347_v32 = vmul.f32 %v326_v55, %v6518_v36  ;;  %v348_v39 = vmul.f32 %v330_v27, %v6518_v36  ;;  %v307_v4 = vpop.permute.xlu0 %306  ;;  %v455_v53 = vsel %vm449_vm11, %v6708_v1, %v6716_v3 }
 0xce7   : > { %v451_v1 = vsel %vm449_vm11, %v6705_v62, %v6696_v6  ;;  %v806_v62 = vsel %vm805_vm8, %v6722_v56, %v6726_v9  ;;  %v807_v6 = vsel %vm805_vm8, %v6726_v9, %v6718_v5  ;;  %v811_v56 = vsel %vm805_vm8, %v6728_v12, %v6736_v17 }
 0xce8   : > { %v812_v9 = vsel %vm805_vm8, %v6736_v17, %v6734_v16  ;;  %v813_v5 = vsel %vm805_vm8, %v6734_v16, %v6740_v19  ;;  %v561_v16 = vsel %vm10977_vm14, %v6756_v26, %v6760_v28  ;;  %v11240_v26 = vld [vmem:[#allocation13_spill] sm:$0xff] }
 0xcea   : > { %3198 = vrot.lane.b32.xlu0 %v3175_v24, %s6363_s11  ;;  %3196 = vrot.lane.b32.xlu1 %v3174_v61, %s6363_s11  ;;  %v318_v24 = vrot.slane %v303_v40, %v6545_v47  ;;  %v322_v61 = vrot.slane %v303_v40, %v6552_v50  ;;  %v344_v47 = vmul.f32 %v334_v23, %v307_v4 }
 0xcec   : > { %v345_v10 = vmul.f32 %v318_v24, %v6518_v36  ;;  %v346_v15 = vmul.f32 %v322_v61, %v6518_v36  ;;  %v341_v50 = vmul.f32 %v322_v61, %v307_v4  ;;  %v472_v17 = vadd.f32 %v6703_v44, %v344_v47 }
 0xcee   : > { %3235 = vperm.xlu0 %6296, %v3227_v38   ;;  %3230 = vperm.xlu1 %6298, %v3226_v51   ;;  %v456_v38 = vsel %vm449_vm11, %v6716_v3, %v6714_v2  ;;  %v349_v51 = vmul.f32 %v334_v23, %v6518_v36  ;;  %v340_v3 = vmul.f32 %v318_v24, %v307_v4 }
 0xcef   : > { %v342_v36 = vmul.f32 %v326_v55, %v307_v4  ;;  %v473_v40 = vadd.f32 %v454_v43, %v345_v10  ;;  %v474_v54 = vadd.f32 %v455_v53, %v346_v15  ;;  %v475_v59 = vadd.f32 %v456_v38, %v347_v32  ;;  %v11242_v53 = vld [vmem:[#allocation22_spill] sm:$0xff] }
 0xcf0   : > { %v476_v2 = vadd.f32 %v457_v49, %v348_v39  ;;  %v477_v48 = vadd.f32 %v6720_v46, %v349_v51  ;;  %v7761_v24 = vsel %vm805_vm8, %v6730_v13, %v6724_v8  ;;  %v810_v46 = vsel %vm805_vm8, %v6732_v14, %v6728_v12  ;;  %v11241_v39 = vld [vmem:[#allocation15_spill] sm:$0xff] }
 0xcf1   : > { %v468_v61 = vadd.f32 %v450_v45, %v340_v3  ;;  %v470_v55 = vadd.f32 %v452_v63, %v342_v36  ;;  %v565_v13 = vsel %vm10977_vm14, %v6766_v31, %v6764_v30  ;;  %v343_v23 = vmul.f32 %v330_v27, %v307_v4  ;;  %v11243_v49 = vld [vmem:[#allocation19_spill] sm:$0xff]  ;;  %v11246_v63 = vld [vmem:[#allocation16_spill] sm:$0xff]  ;;  %v11247_v36 = vld [vmem:[#allocation21_spill] sm:$0xff] }
 0xcf2   : > { %v924_v14 = vsel %vm10978_vm13, %v6742_v60, %v6746_v21  ;;  %v566_v12 = vsel %vm10977_vm14, %v6764_v30, %v6770_v37  ;;  %v469_v10 = vadd.f32 %v451_v1, %v341_v50  ;;  %v562_v31 = vsel %vm10977_vm14, %v6760_v28, %v6754_v25  ;;  %v11239_v50 = vld [vmem:[#allocation14_spill] sm:$0xff]  ;;  %v11244_v1 = vld [vmem:[#allocation17_spill] sm:$0xff] }
 0xcf3   : > { %v563_v27 = vsel %vm10977_vm14, %v6754_v25, %v6762_v29  ;;  %v676_v60 = vsel %vm671_vm9, %v6786_v33, %v6784_v52  ;;  %v584_v30 = vadd.f32 %v565_v13, %v473_v40  ;;  %v567_v47 = vsel %vm10977_vm14, %v6770_v37, %v11239_v50  ;;  %v11248_v40 = vld [vmem:[#allocation24_spill] sm:$0xff] }
 0xcf4   : > { %v579_v44 = vadd.f32 %v561_v16, %v468_v61  ;;  %v581_v15 = vadd.f32 %v563_v27, %v470_v55  ;;  %v564_v32 = vsel %vm10977_vm14, %v6762_v29, %v11240_v26  ;;  %v585_v28 = vadd.f32 %v566_v12, %v474_v54  ;;  %v11245_v29 = vld [vmem:[#allocation20_spill] sm:$0xff] }
 0xcf5   : > { %v568_v25 = vsel %vm10977_vm14, %v11239_v50, %v11241_v39  ;;  %v471_v4 = vadd.f32 %v453_v58, %v343_v23  ;;  %v695_v43 = vadd.f32 %v676_v60, %v584_v30  ;;  %v677_v33 = vsel %vm671_vm9, %v6784_v52, %v11242_v53  ;;  %v11249_v12 = vld [vmem:[#allocation8_spill] sm:$0xff]  ;;  %v11251_v60 = vld [vmem:[#allocation11_spill] sm:$0xff] }
 0xcf6   : > { %v580_v38 = vadd.f32 %v562_v31, %v469_v10  ;;  %v583_v37 = vadd.f32 %v11240_v26, %v472_v17  ;;  %v586_v51 = vadd.f32 %v567_v47, %v475_v59  ;;  %v588_v45 = vadd.f32 %v11241_v39, %v477_v48  ;;  %v11250_v31 = vld [vmem:[#allocation18_spill] sm:$0xff] }
 0xcf7   : > { %v672_v54 = vsel %vm671_vm9, %v11244_v1, %v11243_v49  ;;  %v674_v3 = vsel %vm671_vm9, %v11246_v63, %v11245_v29  ;;  %v678_v58 = vsel %vm671_vm9, %v11242_v53, %v11247_v36  ;;  %v679_v52 = vsel %vm671_vm9, %v11247_v36, %v11248_v40  ;;  %v11253_v26 = vld [vmem:[#allocation10_spill] sm:$0xff] }
 0xcf8   : > { %v690_v61 = vadd.f32 %v672_v54, %v579_v44  ;;  %v692_v59 = vadd.f32 %v674_v3, %v581_v15  ;;  %v587_v55 = vadd.f32 %v568_v25, %v476_v2  ;;  %v673_v48 = vsel %vm671_vm9, %v11243_v49, %v11246_v63  ;;  %v11252_v15 = vld [vmem:[#allocation25_spill] sm:$0xff]  ;;  %v11255_v25 = vld [vmem:[#allocation12_spill] sm:$0xff]  ;;  %v11257_v54 = vld [vmem:[#allocation26_spill] sm:$0xff] }
 0xcf9   : > { %v696_v13 = vadd.f32 %v677_v33, %v585_v28  ;;  %v582_v23 = vadd.f32 %v564_v32, %v471_v4  ;;  %v925_v10 = vsel %vm10978_vm13, %v6746_v21, %v11249_v12  ;;  %v829_v17 = vadd.f32 %v810_v46, %v695_v43  ;;  %v11254_v28 = vld [vmem:[#allocation9_spill] sm:$0xff]  ;;  %v11256_v33 = vld [vmem:[#allocation23_spill] sm:$0xff] }
 0xcfa   : > { %v691_v16 = vadd.f32 %v673_v48, %v580_v38  ;;  %v694_v27 = vadd.f32 %v11250_v31, %v583_v37  ;;  %v926_v30 = vsel %vm10978_vm13, %v11249_v12, %v11251_v60  ;;  %v697_v50 = vadd.f32 %v678_v58, %v586_v51  ;;  %v11258_v58 = vld [vmem:[#allocation31_spill] sm:$0xff]  ;;  %v11263_v48 = vld [vmem:[#allocation28_spill] sm:$0xff] }
 0xcfb   : > { %v698_v2 = vadd.f32 %v679_v52, %v587_v55  ;;  %v699_v47 = vadd.f32 %v11248_v40, %v588_v45  ;;  %v675_v44 = vsel %vm671_vm9, %v11245_v29, %v11250_v31  ;;  %v929_v21 = vsel %vm10978_vm13, %v11253_v26, %v11252_v15  ;;  %v11259_v40 = vld [vmem:[#allocation34_spill] sm:$0xff]  ;;  %v11265_v12 = vld [vmem:[#allocation32_spill] sm:$0xff] }
 0xcfc   : > { %v824_v46 = vadd.f32 %v806_v62, %v690_v61  ;;  %v826_v32 = vadd.f32 %v808_v34, %v692_v59  ;;  %v927_v39 = vsel %vm10978_vm13, %v11251_v60, %v11254_v28  ;;  %v928_v4 = vsel %vm10978_vm13, %v11255_v25, %v11253_v26  ;;  %v11262_v55 = vld [vmem:[#allocation30_spill] sm:$0xff] }
 0xcfd   : > { %v830_v43 = vadd.f32 %v811_v56, %v696_v13  ;;  %v693_v53 = vadd.f32 %v675_v44, %v582_v23  ;;  %v930_v38 = vsel %vm10978_vm13, %v11252_v15, %v11256_v33  ;;  %v947_v37 = vadd.f32 %v928_v4, %v829_v17  ;;  %v11264_v23 = vld [vmem:[#allocation27_spill] sm:$0xff]  ;;  %v11270_v25 = vld [vmem:[#allocation42_spill] sm:$0xff]  ;;  %v11271_v4 = vld [vmem:[#allocation37_spill] sm:$0xff] }
 0xcfe   : > { %v825_v51 = vadd.f32 %v807_v6, %v691_v16  ;;  %v828_v45 = vadd.f32 %v6724_v8, %v694_v27  ;;  %v831_v62 = vadd.f32 %v812_v9, %v697_v50  ;;  %v832_v49 = vadd.f32 %v813_v5, %v698_v2  ;;  %v11260_v9 = vld [vmem:[#allocation35_spill] sm:$0xff]  ;;  %v11261_v5 = vld [vmem:[#allocation33_spill] sm:$0xff] }
 0xcff   : > { %v948_v34 = vadd.f32 %v929_v21, %v830_v43  ;;  %v833_v1 = vadd.f32 %v6740_v19, %v699_v47  ;;  %v931_v29 = vsel %vm10978_vm13, %v11256_v33, %v11257_v54  ;;  %v942_v56 = vadd.f32 %v924_v14, %v824_v46  ;;  %v11266_v16 = vld [vmem:[#allocation29_spill] sm:$0xff]  ;;  %v11267_v47 = vld [vmem:[#allocation36_spill] sm:$0xff] }
 0xd00   : > { %v944_v63 = vadd.f32 %v926_v30, %v826_v32  ;;  %v949_v3 = vadd.f32 %v930_v38, %v831_v62  ;;  %v1039_v6 = vsel %vm11043_vm15, %v11259_v40, %v11258_v58  ;;  %v827_v8 = vadd.f32 %v7761_v24, %v693_v53  ;;  %v11268_v46 = vld [vmem:[#allocation40_spill] sm:$0xff]  ;;  %v11269_v32 = vld [vmem:[#allocation38_spill] sm:$0xff]  ;;  %v11272_v53 = vld [vmem:[#allocation41_spill] sm:$0xff] }
 0xd01   : > { %v951_v36 = vadd.f32 %v11257_v54, %v833_v1  ;;  %v1040_v19 = vsel %vm11043_vm15, %v11258_v58, %v11260_v9  ;;  %v1041_v52 = vsel %vm11043_vm15, %v11260_v9, %v11261_v5  ;;  %v943_v61 = vadd.f32 %v925_v10, %v825_v51  ;;  %v11273_v33 = vld [vmem:[#allocation44_spill] sm:$0xff]  ;;  %v11274_v38 = vld [vmem:[#allocation45_spill] sm:$0xff]  ;;  %v11275_v51 = vld [vmem:[#allocation43_spill] sm:$0xff] }
 0xd02   : > { %v946_v14 = vadd.f32 %v11254_v28, %v828_v45  ;;  %v950_v59 = vadd.f32 %v931_v29, %v832_v49  ;;  %v1035_v13 = vsel %vm11043_vm15, %v11263_v48, %v11262_v55  ;;  %v1036_v24 = vsel %vm11043_vm15, %v11262_v55, %v11264_v23  ;;  %v11276_v54 = vld [vmem:[#allocation39_spill] sm:$0xff]  ;;  %v11278_v9 = vld [vmem:[#allocation50_spill] sm:$0xff] }
 0xd03   : > { %v1037_v17 = vsel %vm11043_vm15, %v11264_v23, %v11265_v12  ;;  %v1038_v31 = vsel %vm11043_vm15, %v11265_v12, %v11266_v16  ;;  %vm1145_vm14 = vcmask 908288   ;;  %v1053_v10 = vadd.f32 %v1035_v13, %v942_v56  ;;  %v11283_v55 = vld [vmem:[#allocation54_spill] sm:$0xff]  ;;  %v11284_v13 = vld [vmem:[#allocation55_spill] sm:$0xff] }
 0xd04   : > { %v1055_v27 = vadd.f32 %v1037_v17, %v944_v63  ;;  %v1058_v60 = vadd.f32 %v1039_v6, %v947_v37  ;;  %v1059_v30 = vadd.f32 %v1040_v19, %v948_v34  ;;  %v1060_v50 = vadd.f32 %v1041_v52, %v949_v3  ;;  %v11277_v6 = vld [vmem:[#allocation46_spill] sm:$0xff]  ;;  %v11279_v19 = vld [vmem:[#allocation48_spill] sm:$0xff] }
 0xd05   : > { %v945_v2 = vadd.f32 %v927_v39, %v827_v8  ;;  %v1042_v44 = vsel %vm11043_vm15, %v11261_v5, %v11267_v47  ;;  %v1062_v15 = vadd.f32 %v11267_v47, %v951_v36  ;;  %v1054_v26 = vadd.f32 %v1036_v24, %v943_v61  ;;  %v11280_v52 = vld [vmem:[#allocation52_spill] sm:$0xff]  ;;  %v11281_v61 = vld [vmem:[#allocation47_spill] sm:$0xff] }
 0xd06   : > { %v1057_v21 = vadd.f32 %v11266_v16, %v946_v14  ;;  %v1146_v28 = vsel %vm1145_vm14, %v11269_v32, %v11268_v46  ;;  %v1148_v43 = vsel %vm1145_vm14, %v11271_v4, %v11270_v25  ;;  %v1150_v39 = vsel %vm1145_vm14, %v11273_v33, %v11272_v53  ;;  %v11289_v32 = vld [vmem:[#allocation62_spill] sm:$0xff] }
 0xd07   : > { %v1151_v37 = vsel %vm1145_vm14, %v11272_v53, %v11274_v38  ;;  %v1152_v45 = vsel %vm1145_vm14, %v11274_v38, %v11275_v51  ;;  %vm10979_vm13 = vcmask 900096   ;;  %v1164_v62 = vadd.f32 %v1146_v28, %v1053_v10  ;;  %v11290_v28 = vld [vmem:[#allocation57_spill] sm:$0xff] }
 0xd08   : > { %v1166_v34 = vadd.f32 %v1148_v43, %v1055_v27  ;;  %v1061_v49 = vadd.f32 %v1042_v44, %v950_v59  ;;  %v1147_v1 = vsel %vm1145_vm14, %v11268_v46, %v11271_v4  ;;  %v1149_v29 = vsel %vm1145_vm14, %v11270_v25, %v11276_v54  ;;  %v11282_v59 = vld [vmem:[#allocation51_spill] sm:$0xff]  ;;  %v11291_v43 = vld [vmem:[#allocation56_spill] sm:$0xff] }
 0xd09   : > { %v1056_v56 = vadd.f32 %v1038_v31, %v945_v2  ;;  %v1169_v63 = vadd.f32 %v1150_v39, %v1058_v60  ;;  %v1170_v3 = vadd.f32 %v1151_v37, %v1059_v30  ;;  %v1165_v36 = vadd.f32 %v1147_v1, %v1054_v26  ;;  %v11285_v31 = vld [vmem:[#allocation53_spill] sm:$0xff] }
 0xd0a   : > { %v1168_v58 = vadd.f32 %v11276_v54, %v1057_v21  ;;  %v1171_v40 = vadd.f32 %v1152_v45, %v1060_v50  ;;  %v1153_v8 = vsel %vm1145_vm14, %v11275_v51, %v11277_v6  ;;  %v1284_v5 = vsel %vm10979_vm13, %v11279_v19, %v11278_v9  ;;  %v11286_v30 = vld [vmem:[#allocation49_spill] sm:$0xff]  ;;  %v11288_v21 = vld [vmem:[#allocation58_spill] sm:$0xff]  ;;  %v11293_v45 = vld [vmem:[#allocation64_spill] sm:$0xff] }
 0xd0b   : > { %v1286_v14 = vsel %vm10979_vm13, %v11281_v61, %v11280_v52  ;;  %v1288_v48 = vsel %vm10979_vm13, %v11283_v55, %v11282_v59  ;;  %v1289_v23 = vsel %vm10979_vm13, %v11282_v59, %v11284_v13  ;;  %v1302_v24 = vadd.f32 %v1284_v5, %v1164_v62  ;;  %v11292_v51 = vld [vmem:[#allocation61_spill] sm:$0xff]  ;;  %v11295_v54 = vld [vmem:[#allocation63_spill] sm:$0xff] }
 0xd0c   : > { %v1304_v12 = vadd.f32 %v1286_v14, %v1166_v34  ;;  %v1173_v17 = vadd.f32 %v11277_v6, %v1062_v15  ;;  %v1285_v16 = vsel %vm10979_vm13, %v11278_v9, %v11281_v61  ;;  %v1290_v10 = vsel %vm10979_vm13, %v11284_v13, %v11285_v31  ;;  %v11287_v15 = vld [vmem:[#allocation60_spill] sm:$0xff]  ;;  %v11300_v19 = vld [vmem:[#allocation67_spill] sm:$0xff] }
 0xd0d   : > { %v1167_v27 = vadd.f32 %v1149_v29, %v1056_v56  ;;  %v1172_v60 = vadd.f32 %v1153_v8, %v1061_v49  ;;  %v1287_v50 = vsel %vm10979_vm13, %v11280_v52, %v11286_v30  ;;  %v1303_v2 = vadd.f32 %v1285_v16, %v1165_v36  ;;  %v11294_v49 = vld [vmem:[#allocation65_spill] sm:$0xff]  ;;  %v11298_v6 = vld [vmem:[#allocation68_spill] sm:$0xff] }
 0xd0e   : > { %v1306_v47 = vadd.f32 %v11286_v30, %v1168_v58  ;;  %v1307_v44 = vadd.f32 %v1288_v48, %v1169_v63  ;;  %v1308_v26 = vadd.f32 %v1289_v23, %v1170_v3  ;;  %v1400_v46 = vsel %vm11042_vm1, %v11288_v21, %v11287_v15  ;;  %v11296_v63 = vld [vmem:[#allocation59_spill] sm:$0xff]  ;;  %v11299_v9 = vld [vmem:[#allocation72_spill] sm:$0xff]  ;;  %v11301_v23 = vld [vmem:[#allocation66_spill] sm:$0xff] }
 0xd0f   : > { %v1402_v25 = vsel %vm11042_vm1, %v11290_v28, %v11289_v32  ;;  %v1309_v4 = vadd.f32 %v1290_v10, %v1171_v40  ;;  %v1291_v53 = vsel %vm10979_vm13, %v11285_v31, %v11291_v43  ;;  %v1418_v33 = vadd.f32 %v1400_v46, %v1302_v24  ;;  %v11297_v40 = vld [vmem:[#allocation70_spill] sm:$0xff]  ;;  %v11304_v10 = vld [vmem:[#allocation69_spill] sm:$0xff]  ;;  %v11305_v30 = vld [vmem:[#allocation75_spill] sm:$0xff] }
 0xd10   : > { %v1420_v39 = vadd.f32 %v1402_v25, %v1304_v12  ;;  %v1311_v38 = vadd.f32 %v11291_v43, %v1173_v17  ;;  %v1401_v37 = vsel %vm11042_vm1, %v11287_v15, %v11290_v28  ;;  %v1404_v62 = vsel %vm11042_vm1, %v11293_v45, %v11292_v51  ;;  %v11302_v12 = vld [vmem:[#allocation71_spill] sm:$0xff]  ;;  %v11303_v17 = vld [vmem:[#allocation74_spill] sm:$0xff]  ;;  %v11309_v15 = vld [vmem:[#allocation77_spill] sm:$0xff] }
 0xd11   : > { %v1305_v34 = vadd.f32 %v1287_v50, %v1167_v27  ;;  %v1405_v1 = vsel %vm11042_vm1, %v11292_v51, %v11294_v49  ;;  %v1406_v29 = vsel %vm11042_vm1, %v11294_v49, %v11295_v54  ;;  %v1419_v56 = vadd.f32 %v1401_v37, %v1303_v2  ;;  %v11306_v2 = vld [vmem:[#allocation80_spill] sm:$0xff] }
 0xd12   : > { %v1422_v3 = vadd.f32 %v11296_v63, %v1306_v47  ;;  %v1310_v36 = vadd.f32 %v1291_v53, %v1172_v60  ;;  %v1403_v58 = vsel %vm11042_vm1, %v11289_v32, %v11296_v63  ;;  %v1509_v8 = vsel %vm593_vm4, %v11298_v6, %v11297_v40  ;;  %v11307_v47 = vld [vmem:[#allocation78_spill] sm:$0xff]  ;;  %v11310_v32 = vld [vmem:[#allocation73_spill] sm:$0xff]  ;;  %v11311_v37 = vld [vmem:[#allocation76_spill] sm:$0xff] }
 0xd13   : > { %v1511_v5 = vsel %vm593_vm4, %v11300_v19, %v11299_v9  ;;  %v1423_v52 = vadd.f32 %v1404_v62, %v1307_v44  ;;  %vm11003_vm13 = vcmask 506880   ;;  %v1527_v61 = vadd.f32 %v1509_v8, %v1418_v33  ;;  %v11312_v62 = vld [vmem:[#allocation79_spill] sm:$0xff]  ;;  %v11319_v8 = vld [vmem:[#allocation85_spill] sm:$0xff] }
 0xd14   : > { %v1529_v14 = vadd.f32 %v1511_v5, %v1420_v39  ;;  %v1424_v59 = vadd.f32 %v1405_v1, %v1308_v26  ;;  %v1425_v55 = vadd.f32 %v1406_v29, %v1309_v4  ;;  %v1510_v48 = vsel %vm593_vm4, %v11297_v40, %v11300_v19  ;;  %v11308_v26 = vld [vmem:[#allocation82_spill] sm:$0xff]  ;;  %v11313_v1 = vld [vmem:[#allocation81_spill] sm:$0xff]  ;;  %v11316_v63 = vld [vmem:[#allocation87_spill] sm:$0xff] }
 0xd15   : > { %v1421_v13 = vadd.f32 %v1403_v58, %v1305_v34  ;;  %v1407_v24 = vsel %vm11042_vm1, %v11295_v54, %v11301_v23  ;;  %v1513_v16 = vsel %vm593_vm4, %v11303_v17, %v11302_v12  ;;  %v1528_v31 = vadd.f32 %v1510_v48, %v1419_v56  ;;  %v11314_v54 = vld [vmem:[#allocation84_spill] sm:$0xff]  ;;  %v11315_v56 = vld [vmem:[#allocation89_spill] sm:$0xff]  ;;  %v11320_v48 = vld [vmem:[#allocation83_spill] sm:$0xff] }
 0xd16   : > { %v1531_v27 = vadd.f32 %v11304_v10, %v1422_v3  ;;  %v1427_v60 = vadd.f32 %v11301_v23, %v1311_v38  ;;  %v1514_v50 = vsel %vm593_vm4, %v11302_v12, %v11305_v30  ;;  %v1620_v44 = vsel %vm11003_vm13, %v11307_v47, %v11306_v2  ;;  %v11318_v58 = vld [vmem:[#allocation88_spill] sm:$0xff] }
 0xd17   : > { %v1622_v21 = vsel %vm11003_vm13, %v11309_v15, %v11308_v26  ;;  %v1512_v46 = vsel %vm593_vm4, %v11299_v9, %v11304_v10  ;;  %v1515_v28 = vsel %vm593_vm4, %v11305_v30, %v11310_v32  ;;  %v1638_v4 = vadd.f32 %v1620_v44, %v1527_v61  ;;  %v11327_v44 = vld [vmem:[#allocation95_spill] sm:$0xff] }
 0xd18   : > { %v1640_v25 = vadd.f32 %v1622_v21, %v1529_v14  ;;  %v1426_v43 = vadd.f32 %v1407_v24, %v1310_v36  ;;  %v1532_v53 = vadd.f32 %v1513_v16, %v1423_v52  ;;  %v1621_v33 = vsel %vm11003_vm13, %v11306_v2, %v11309_v15  ;;  %v11317_v36 = vld [vmem:[#allocation91_spill] sm:$0xff]  ;;  %v11321_v24 = vld [vmem:[#allocation90_spill] sm:$0xff]  ;;  %v11326_v2 = vld [vmem:[#allocation93_spill] sm:$0xff] }
 0xd19   : > { %v1530_v39 = vadd.f32 %v1512_v46, %v1421_v13  ;;  %v1533_v38 = vadd.f32 %v1514_v50, %v1424_v59  ;;  %v1516_v51 = vsel %vm593_vm4, %v11310_v32, %v11311_v37  ;;  %v1639_v45 = vadd.f32 %v1621_v33, %v1528_v31  ;;  %v11322_v16 = vld [vmem:[#allocation86_spill] sm:$0xff]  ;;  %v11325_v50 = vld [vmem:[#allocation92_spill] sm:$0xff]  ;;  %v11328_v15 = vld [vmem:[#allocation97_spill] sm:$0xff] }
 0xd1a   : > { %v1642_v34 = vadd.f32 %v11312_v62, %v1531_v27  ;;  %v1534_v49 = vadd.f32 %v1515_v28, %v1425_v55  ;;  %v1624_v29 = vsel %vm11003_vm13, %v11314_v54, %v11313_v1  ;;  %v1752_v3 = vsel %vm11035_vm0, %v11316_v63, %v11315_v56  ;;  %v11323_v27 = vld [vmem:[#allocation99_spill] sm:$0xff]  ;;  %v11335_v63 = vld [vmem:[#allocation100_spill] sm:$0xff] }
 0xd1b   : > { %v1754_v40 = vsel %vm11035_vm0, %v11318_v58, %v11317_v36  ;;  %v1623_v6 = vsel %vm11003_vm13, %v11308_v26, %v11312_v62  ;;  %v1625_v9 = vsel %vm11003_vm13, %v11313_v1, %v11319_v8  ;;  %v1770_v19 = vadd.f32 %v1752_v3, %v1638_v4  ;;  %v11331_v62 = vld [vmem:[#allocation96_spill] sm:$0xff]  ;;  %v11333_v1 = vld [vmem:[#allocation106_spill] sm:$0xff] }
 0xd1c   : > { %v1772_v5 = vadd.f32 %v1754_v40, %v1640_v25  ;;  %v1535_v52 = vadd.f32 %v1516_v51, %v1426_v43  ;;  %v1536_v61 = vadd.f32 %v11311_v37, %v1427_v60  ;;  %v1753_v14 = vsel %vm11035_vm0, %v11315_v56, %v11318_v58  ;;  %v11324_v60 = vld [vmem:[#allocation98_spill] sm:$0xff]  ;;  %v11334_v56 = vld [vmem:[#allocation103_spill] sm:$0xff] }
 0xd1d   : > { %v1641_v59 = vadd.f32 %v1623_v6, %v1530_v39  ;;  %v1643_v55 = vadd.f32 %v1624_v29, %v1532_v53  ;;  %v1626_v13 = vsel %vm11003_vm13, %v11319_v8, %v11320_v48  ;;  %v1771_v23 = vadd.f32 %v1753_v14, %v1639_v45  ;;  %v11329_v53 = vld [vmem:[#allocation94_spill] sm:$0xff] }
 0xd1e   : > { %v1774_v12 = vadd.f32 %v11321_v24, %v1642_v34  ;;  %v1644_v17 = vadd.f32 %v1625_v9, %v1533_v38  ;;  %v1627_v31 = vsel %vm11003_vm13, %v11320_v48, %v11322_v16  ;;  %v1755_v10 = vsel %vm11035_vm0, %v11317_v36, %v11321_v24  ;;  %v11330_v38 = vld [vmem:[#allocation101_spill] sm:$0xff] }
 0xd1f   : > { %v1855_v30 = vsel %vm300_vm12, %v11324_v60, %v11323_v27  ;;  %v1756_v47 = vsel %vm11035_vm0, %v11326_v2, %v11325_v50  ;;  %v1757_v26 = vsel %vm11035_vm0, %v11325_v50, %v11327_v44  ;;  %v1870_v21 = vadd.f32 %v11328_v15, %v1770_v19  ;;  %v11336_v36 = vld [vmem:[#allocation105_spill] sm:$0xff] }
 0xd20   : > { %v1872_v46 = vadd.f32 %v1855_v30, %v1772_v5  ;;  %v1645_v32 = vadd.f32 %v1626_v13, %v1534_v49  ;;  %v1647_v28 = vadd.f32 %v11322_v16, %v1536_v61  ;;  %v1854_v25 = vsel %vm300_vm12, %v11328_v15, %v11324_v60  ;;  %v11332_v49 = vld [vmem:[#allocation107_spill] sm:$0xff]  ;;  %v11344_v30 = vld [vmem:[#allocation113_spill] sm:$0xff] }
 0xd21   : > { %v1773_v4 = vadd.f32 %v1755_v10, %v1641_v59  ;;  %v1646_v43 = vadd.f32 %v1627_v31, %v1535_v52  ;;  %v1758_v33 = vsel %vm11035_vm0, %v11327_v44, %v11329_v53  ;;  %v1871_v39 = vadd.f32 %v1854_v25, %v1771_v23  ;;  %v11337_v52 = vld [vmem:[#allocation102_spill] sm:$0xff]  ;;  %v11338_v59 = vld [vmem:[#allocation109_spill] sm:$0xff]  ;;  %v11339_v23 = vld [vmem:[#allocation104_spill] sm:$0xff] }
 0xd22   : > { %v1874_v37 = vadd.f32 %v11330_v38, %v1774_v12  ;;  %v1775_v51 = vadd.f32 %v1756_v47, %v1643_v55  ;;  %v1776_v45 = vadd.f32 %v1757_v26, %v1644_v17  ;;  %v1759_v34 = vsel %vm11035_vm0, %v11329_v53, %v11331_v62  ;;  %v11340_v12 = vld [vmem:[#allocation115_spill] sm:$0xff]  ;;  %v11341_v17 = vld [vmem:[#allocation114_spill] sm:$0xff]  ;;  %v11346_v25 = vld [vmem:[#allocation117_spill] sm:$0xff] }
 0xd23   : > { %v1951_v54 = vsel %vm300_vm12, %v11333_v1, %v11332_v49  ;;  %v1856_v29 = vsel %vm300_vm12, %v11323_v27, %v11330_v38  ;;  %v1857_v3 = vsel %vm300_vm12, %v11335_v63, %v11334_v56  ;;  %v1966_v58 = vadd.f32 %v11336_v36, %v1870_v21  ;;  %v11342_v10 = vld [vmem:[#allocation111_spill] sm:$0xff]  ;;  %v11343_v27 = vld [vmem:[#allocation108_spill] sm:$0xff]  ;;  %v11348_v38 = vld [vmem:[#allocation122_spill] sm:$0xff] }
 0xd24   : > { %v1968_v40 = vadd.f32 %v1951_v54, %v1872_v46  ;;  %v1777_v6 = vadd.f32 %v1758_v33, %v1645_v32  ;;  %v1779_v8 = vadd.f32 %v11331_v62, %v1647_v28  ;;  %v1950_v9 = vsel %vm300_vm12, %v11336_v36, %v11333_v1  ;;  %v11345_v46 = vld [vmem:[#allocation110_spill] sm:$0xff]  ;;  %v11347_v33 = vld [vmem:[#allocation112_spill] sm:$0xff] }
 0xd25   : > { %v1873_v19 = vadd.f32 %v1856_v29, %v1773_v4  ;;  %v1778_v5 = vadd.f32 %v1759_v34, %v1646_v43  ;;  %v1858_v61 = vsel %vm300_vm12, %v11334_v56, %v11337_v52  ;;  %v1967_v14 = vadd.f32 %v1950_v9, %v1871_v39  ;;  %v11350_v62 = vld [vmem:[#allocation116_spill] sm:$0xff] }
 0xd26   : > { %v1970_v55 = vadd.f32 %v11338_v59, %v1874_v37  ;;  %v1875_v48 = vadd.f32 %v11335_v63, %v1775_v51  ;;  %v1876_v13 = vadd.f32 %v1857_v3, %v1776_v45  ;;  %v1859_v24 = vsel %vm300_vm12, %v11337_v52, %v11339_v23  ;;  %v11349_v45 = vld [vmem:[#allocation119_spill] sm:$0xff]  ;;  %v11354_v52 = vld [vmem:[#allocation120_spill] sm:$0xff] }
 0xd27   : > { %v2047_v16 = vsel %vm300_vm12, %v11341_v17, %v11340_v12  ;;  %v1952_v31 = vsel %vm300_vm12, %v11332_v49, %v11338_v59  ;;  %v1953_v60 = vsel %vm300_vm12, %v11343_v27, %v11342_v10  ;;  %v2062_v50 = vadd.f32 %v11344_v30, %v1966_v58  ;;  %v11351_v49 = vld [vmem:[#allocation121_spill] sm:$0xff]  ;;  %v11352_v58 = vld [vmem:[#allocation118_spill] sm:$0xff] }
 0xd28   : > { %v2064_v2 = vadd.f32 %v2047_v16, %v1968_v40  ;;  %v1879_v47 = vadd.f32 %v11339_v23, %v1779_v8  ;;  %v1877_v44 = vadd.f32 %v1858_v61, %v1777_v6  ;;  %v2046_v26 = vsel %vm300_vm12, %v11344_v30, %v11341_v17  ;;  %v11353_v8 = vld [vmem:[#allocation124_spill] sm:$0xff]  ;;  %v11359_v30 = vld [vmem:[#allocation125_spill] sm:$0xff] }
 0xd29   : > { %v1969_v15 = vadd.f32 %v1952_v31, %v1873_v19  ;;  %v1878_v21 = vadd.f32 %v1859_v24, %v1778_v5  ;;  %v1954_v32 = vsel %vm300_vm12, %v11342_v10, %v11345_v46  ;;  %v2063_v28 = vadd.f32 %v2046_v26, %v1967_v14  ;;  %v11355_v14 = vld [vmem:[#allocation129_spill] sm:$0xff]  ;;  %v11358_v24 = vld [vmem:[#allocation128_spill] sm:$0xff] }
 0xd2a   : > { %v2066_v4 = vadd.f32 %v11346_v25, %v1970_v55  ;;  %v1971_v43 = vadd.f32 %v11343_v27, %v1875_v48  ;;  %v1972_v53 = vadd.f32 %v1953_v60, %v1876_v13  ;;  %v1955_v39 = vsel %vm300_vm12, %v11345_v46, %v11347_v33  ;;  %v11356_v48 = vld [vmem:[#allocation126_spill] sm:$0xff]  ;;  %v11357_v13 = vld [vmem:[#allocation123_spill] sm:$0xff]  ;;  %v11362_v46 = vld [vmem:[#allocation136_spill] sm:$0xff] }
 0xd2b   : > { %v2170_v37 = vsel %vm300_vm12, %v11348_v38, %v7319_v18  ;;  %v2048_v51 = vsel %vm300_vm12, %v11340_v12, %v11346_v25  ;;  %v2049_v34 = vsel %vm300_vm12, %v11350_v62, %v11349_v45  ;;  %v2185_v1 = vadd.f32 %v11351_v49, %v2062_v50  ;;  %v11363_v25 = vld [vmem:[#allocation133_spill] sm:$0xff] }
 0xd2c   : > { %v2187_v54 = vadd.f32 %v2170_v37, %v2064_v2  ;;  %v1975_v29 = vadd.f32 %v11347_v33, %v1879_v47  ;;  %v1973_v56 = vadd.f32 %v1954_v32, %v1877_v44  ;;  %v2169_v63 = vsel %vm300_vm12, %v11351_v49, %v11348_v38  ;;  %v11360_v2 = vld [vmem:[#allocation131_spill] sm:$0xff] }
 0xd2d   : > { %v2065_v3 = vadd.f32 %v2048_v51, %v1969_v15  ;;  %v1974_v36 = vadd.f32 %v1955_v39, %v1878_v21  ;;  %v2050_v40 = vsel %vm300_vm12, %v11349_v45, %v11352_v58  ;;  %v2186_v6 = vadd.f32 %v2169_v63, %v2063_v28  ;;  %v11361_v15 = vld [vmem:[#allocation127_spill] sm:$0xff]  ;;  %v11368_v63 = vld [vmem:[#allocation134_spill] sm:$0xff] }
 0xd2e   : > { %v2189_v9 = vadd.f32 %v11353_v8, %v2066_v4  ;;  %v2067_v19 = vadd.f32 %v11350_v62, %v1971_v43  ;;  %v2068_v5 = vadd.f32 %v2049_v34, %v1972_v53  ;;  %v2051_v61 = vsel %vm300_vm12, %v11352_v58, %v11354_v52  ;;  %v11364_v4 = vld [vmem:[#allocation130_spill] sm:$0xff]  ;;  %v11365_v53 = vld [vmem:[#allocation135_spill] sm:$0xff]  ;;  %v11366_v34 = vld [vmem:[#allocation132_spill] sm:$0xff] }
 0xd2f   : > { %v2273_v59 = vsel %vm300_vm12, %v11355_v14, %v7356_v57  ;;  %v2171_v55 = vsel %vm300_vm12, %v7319_v18, %v11353_v8  ;;  %v2172_v23 = vsel %vm300_vm12, %v11357_v13, %v11356_v48  ;;  %v2288_v12 = vadd.f32 %v11358_v24, %v2185_v1  ;;  %v11367_v1 = vld [vmem:[#allocation138_spill] sm:$0xff]  ;;  %v11371_v8 = vld [vmem:[#allocation137_spill] sm:$0xff] }
 0xd30   : > { %v2290_v17 = vadd.f32 %v2273_v59, %v2187_v54  ;;  %v2071_v16 = vadd.f32 %v11354_v52, %v1975_v29  ;;  %v2069_v31 = vadd.f32 %v2050_v40, %v1973_v56  ;;  %v2272_v10 = vsel %vm300_vm12, %v11358_v24, %v11355_v14  ;;  %v11374_v24 = vld [vmem:[#allocation145_spill] sm:$0xff] }
 0xd31   : > { %v2188_v27 = vadd.f32 %v2171_v55, %v2065_v3  ;;  %v2070_v60 = vadd.f32 %v2051_v61, %v1974_v36  ;;  %v2173_v18 = vsel %vm300_vm12, %v11356_v48, %v11359_v30  ;;  %v2289_v50 = vadd.f32 %v2272_v10, %v2186_v6  ;;  %v11369_v36 = vld [vmem:[#allocation143_spill] sm:$0xff]  ;;  %v11370_v6 = vld [vmem:[#allocation140_spill] sm:$0xff] }
 0xd32   : > { %v2292_v47 = vadd.f32 %v11360_v2, %v2189_v9  ;;  %v2190_v44 = vadd.f32 %v11357_v13, %v2067_v19  ;;  %v2191_v26 = vadd.f32 %v2172_v23, %v2068_v5  ;;  %v2174_v21 = vsel %vm300_vm12, %v11359_v30, %v11361_v15  ;;  %v11372_v19 = vld [vmem:[#allocation142_spill] sm:$0xff]  ;;  %v11373_v13 = vld [vmem:[#allocation139_spill] sm:$0xff] }
 0xd33   : > { %v2369_v32 = vsel %vm300_vm12, %v11362_v46, %v7391_v7  ;;  %v2274_v28 = vsel %vm300_vm12, %v7356_v57, %v11360_v2  ;;  %v2275_v43 = vsel %vm300_vm12, %v11364_v4, %v11363_v25  ;;  %v2384_v33 = vadd.f32 %v11365_v53, %v2288_v12 }
 0xd34   : > { %v2386_v39 = vadd.f32 %v2369_v32, %v2290_v17  ;;  %v2194_v38 = vadd.f32 %v11361_v15, %v2071_v16  ;;  %v2192_v37 = vadd.f32 %v2173_v18, %v2069_v31  ;;  %v2368_v51 = vsel %vm300_vm12, %v11365_v53, %v11362_v46  ;;  %v11375_v31 = vld [vmem:[#allocation141_spill] sm:$0xff]  ;;  %v11377_v18 = vld [vmem:[#allocation147_spill] sm:$0xff]  ;;  %v11381_v53 = vld [vmem:[#allocation152_spill] sm:$0xff] }
 0xd35   : > { %v2291_v45 = vadd.f32 %v2274_v28, %v2188_v27  ;;  %v2193_v62 = vadd.f32 %v2174_v21, %v2070_v60  ;;  %v2276_v57 = vsel %vm300_vm12, %v11363_v25, %v11366_v34  ;;  %v2385_v49 = vadd.f32 %v2368_v51, %v2289_v50  ;;  %v11376_v27 = vld [vmem:[#allocation150_spill] sm:$0xff]  ;;  %v11378_v50 = vld [vmem:[#allocation144_spill] sm:$0xff] }
 0xd36   : > { %v2388_v54 = vadd.f32 %v11367_v1, %v2292_v47  ;;  %v2293_v29 = vadd.f32 %v11364_v4, %v2190_v44  ;;  %v2294_v56 = vadd.f32 %v2275_v43, %v2191_v26  ;;  %v2277_v3 = vsel %vm300_vm12, %v11366_v34, %v11368_v63  ;;  %v11379_v47 = vld [vmem:[#allocation149_spill] sm:$0xff]  ;;  %v11380_v4 = vld [vmem:[#allocation146_spill] sm:$0xff] }
 0xd37   : > { %v2465_v58 = vsel %vm300_vm12, %v11369_v36, %v7426_v11  ;;  %v2370_v40 = vsel %vm300_vm12, %v7391_v7, %v11367_v1  ;;  %v2371_v9 = vsel %vm300_vm12, %v11371_v8, %v11370_v6  ;;  %v2480_v5 = vadd.f32 %v11372_v19, %v2384_v33  ;;  %v11386_v1 = vld [vmem:[#allocation151_spill] sm:$0xff] }
 0xd38   : > { %v2482_v52 = vadd.f32 %v2465_v58, %v2386_v39  ;;  %v2297_v61 = vadd.f32 %v11368_v63, %v2194_v38  ;;  %v2295_v14 = vadd.f32 %v2276_v57, %v2192_v37  ;;  %v2464_v59 = vsel %vm300_vm12, %v11372_v19, %v11369_v36  ;;  %v11382_v37 = vld [vmem:[#allocation148_spill] sm:$0xff] }
 0xd39   : > { %v2387_v55 = vadd.f32 %v2370_v40, %v2291_v45  ;;  %v2296_v48 = vadd.f32 %v2277_v3, %v2193_v62  ;;  %v2372_v7 = vsel %vm300_vm12, %v11370_v6, %v11373_v13  ;;  %v2481_v23 = vadd.f32 %v2464_v59, %v2385_v49  ;;  %v11383_v45 = vld [vmem:[#allocation158_spill] sm:$0xff]  ;;  %v11384_v62 = vld [vmem:[#allocation157_spill] sm:$0xff]  ;;  %v11390_v59 = vld [vmem:[#allocation155_spill] sm:$0xff] }
 0xd3a   : > { %v2484_v12 = vadd.f32 %v11374_v24, %v2388_v54  ;;  %v2389_v17 = vadd.f32 %v11371_v8, %v2293_v29  ;;  %v2390_v16 = vadd.f32 %v2371_v9, %v2294_v56  ;;  %v2373_v10 = vsel %vm300_vm12, %v11373_v13, %v11375_v31  ;;  %v11385_v49 = vld [vmem:[#allocation154_spill] sm:$0xff]  ;;  %v11387_v29 = vld [vmem:[#allocation156_spill] sm:$0xff]  ;;  %v11388_v9 = vld [vmem:[#allocation153_spill] sm:$0xff] }
 0xd3b   : > { %v2584_v60 = vsel %vm300_vm12, %v11376_v27, %v7469_v20  ;;  %v2466_v30 = vsel %vm300_vm12, %v7426_v11, %v11374_v24  ;;  %v2467_v2 = vsel %vm300_vm12, %v11378_v50, %v11377_v18  ;;  %v2599_v44 = vadd.f32 %v11379_v47, %v2480_v5  ;;  %v11389_v5 = vld [vmem:[#allocation160_spill] sm:$0xff]  ;;  %v11392_v13 = vld [vmem:[#allocation165_spill] sm:$0xff] }
 0xd3c   : > { %v2601_v26 = vadd.f32 %v2584_v60, %v2482_v52  ;;  %v2393_v15 = vadd.f32 %v11375_v31, %v2297_v61  ;;  %v2391_v21 = vadd.f32 %v2372_v7, %v2295_v14  ;;  %v2583_v46 = vsel %vm300_vm12, %v11379_v47, %v11376_v27  ;;  %v11395_v31 = vld [vmem:[#allocation164_spill] sm:$0xff]  ;;  %v11396_v47 = vld [vmem:[#allocation161_spill] sm:$0xff] }
 0xd3d   : > { %v2483_v28 = vadd.f32 %v2466_v30, %v2387_v55  ;;  %v2392_v25 = vadd.f32 %v2373_v10, %v2296_v48  ;;  %v2468_v11 = vsel %vm300_vm12, %v11377_v18, %v11380_v4  ;;  %v2600_v43 = vadd.f32 %v2583_v46, %v2481_v23  ;;  %v11391_v48 = vld [vmem:[#allocation166_spill] sm:$0xff] }
 0xd3e   : > { %v2603_v33 = vadd.f32 %v11381_v53, %v2484_v12  ;;  %v2485_v39 = vadd.f32 %v11378_v50, %v2389_v17  ;;  %v2486_v38 = vadd.f32 %v2467_v2, %v2390_v16  ;;  %v2469_v51 = vsel %vm300_vm12, %v11380_v4, %v11382_v37  ;;  %v11393_v12 = vld [vmem:[#allocation162_spill] sm:$0xff]  ;;  %v11394_v17 = vld [vmem:[#allocation159_spill] sm:$0xff] }
 0xd3f   : > { %v2687_v34 = vsel %vm300_vm12, %v11384_v62, %v11383_v45  ;;  %v2585_v57 = vsel %vm300_vm12, %v7469_v20, %v11381_v53  ;;  %v2586_v54 = vsel %vm300_vm12, %v11386_v1, %v11385_v49  ;;  %v2702_v56 = vadd.f32 %v11387_v29, %v2599_v44 }
 0xd40   : > { %v2704_v63 = vadd.f32 %v2687_v34, %v2601_v26  ;;  %v2489_v3 = vadd.f32 %v11382_v37, %v2393_v15  ;;  %v2487_v36 = vadd.f32 %v2468_v11, %v2391_v21  ;;  %v2686_v58 = vsel %vm300_vm12, %v11387_v29, %v11384_v62  ;;  %v11397_v15 = vld [vmem:[#allocation168_spill] sm:$0xff]  ;;  %v11399_v11 = vld [vmem:[#allocation174_spill] sm:$0xff]  ;;  %v11402_v37 = vld [vmem:[#allocation167_spill] sm:$0xff] }
 0xd41   : > { %v2602_v6 = vadd.f32 %v2585_v57, %v2483_v28  ;;  %v2488_v8 = vadd.f32 %v2469_v51, %v2392_v25  ;;  %v2587_v20 = vsel %vm300_vm12, %v11385_v49, %v11388_v9  ;;  %v2703_v19 = vadd.f32 %v2686_v58, %v2600_v43  ;;  %v11398_v25 = vld [vmem:[#allocation163_spill] sm:$0xff]  ;;  %v11400_v43 = vld [vmem:[#allocation173_spill] sm:$0xff] }
 0xd42   : > { %v2706_v52 = vadd.f32 %v11389_v5, %v2603_v33  ;;  %v2604_v61 = vadd.f32 %v11386_v1, %v2485_v39  ;;  %v2605_v14 = vadd.f32 %v2586_v54, %v2486_v38  ;;  %v2588_v55 = vsel %vm300_vm12, %v11388_v9, %v11390_v59  ;;  %v11401_v38 = vld [vmem:[#allocation170_spill] sm:$0xff]  ;;  %v11404_v49 = vld [vmem:[#allocation169_spill] sm:$0xff] }
 0xd43   : > { %v2783_v7 = vsel %vm300_vm12, %v11392_v13, %v11391_v48  ;;  %v2688_v24 = vsel %vm300_vm12, %v11383_v45, %v11389_v5  ;;  %v2689_v16 = vsel %vm300_vm12, %v11394_v17, %v11393_v12  ;;  %v2798_v10 = vadd.f32 %v11395_v31, %v2702_v56  ;;  %v11403_v45 = vld [vmem:[#allocation172_spill] sm:$0xff]  ;;  %v11408_v5 = vld [vmem:[#allocation175_spill] sm:$0xff] }
 0xd44   : > { %v2800_v27 = vadd.f32 %v2783_v7, %v2704_v63  ;;  %v8239_v60 = vadd.f32 %v11390_v59, %v2489_v3  ;;  %v2606_v30 = vadd.f32 %v2587_v20, %v2487_v36  ;;  %v2782_v18 = vsel %vm300_vm12, %v11395_v31, %v11392_v13  ;;  %v11405_v3 = vld [vmem:[#allocation171_spill] sm:$0xff]  ;;  %v11411_v13 = vld [vmem:[#allocation180_spill] sm:$0xff] }
 0xd45   : > { %v2705_v50 = vadd.f32 %v2688_v24, %v2602_v6  ;;  %v2607_v2 = vadd.f32 %v2588_v55, %v2488_v8  ;;  %v2690_v44 = vsel %vm300_vm12, %v11393_v12, %v11396_v47  ;;  %v2799_v26 = vadd.f32 %v2782_v18, %v2703_v19  ;;  %v11406_v6 = vld [vmem:[#allocation176_spill] sm:$0xff]  ;;  %v11407_v19 = vld [vmem:[#allocation178_spill] sm:$0xff] }
 0xd46   : > { %v2802_v21 = vadd.f32 %v11397_v15, %v2706_v52  ;;  %v2707_v46 = vadd.f32 %v11394_v17, %v2604_v61  ;;  %v2708_v28 = vadd.f32 %v2689_v16, %v2605_v14  ;;  %v2691_v4 = vsel %vm300_vm12, %v11396_v47, %v11398_v25  ;;  %v11409_v61 = vld [vmem:[#allocation182_spill] sm:$0xff]  ;;  %v11410_v14 = vld [vmem:[#allocation181_spill] sm:$0xff] }
 0xd47   : > { %v2879_v53 = vsel %vm300_vm12, %v11400_v43, %v11399_v11  ;;  %v2784_v39 = vsel %vm300_vm12, %v11391_v48, %v11397_v15  ;;  %v2785_v51 = vsel %vm300_vm12, %v11402_v37, %v11401_v38  ;;  %v2894_v62 = vadd.f32 %v11403_v45, %v2798_v10  ;;  %v11415_v15 = vld [vmem:[#allocation179_spill] sm:$0xff] }
 0xd48   : > { %v2896_v34 = vadd.f32 %v2879_v53, %v2800_v27  ;;  %v2709_v57 = vadd.f32 %v2690_v44, %v2606_v30  ;;  %v2786_v1 = vsel %vm300_vm12, %v11401_v38, %v11404_v49  ;;  %v2878_v54 = vsel %vm300_vm12, %v11403_v45, %v11400_v43  ;;  %v11412_v30 = vld [vmem:[#allocation183_spill] sm:$0xff]  ;;  %v11414_v44 = vld [vmem:[#allocation177_spill] sm:$0xff] }
 0xd49   : > { %v2801_v29 = vadd.f32 %v2784_v39, %v2705_v50  ;;  %v2710_v63 = vadd.f32 %v2691_v4, %v2607_v2  ;;  %v2787_v36 = vsel %vm300_vm12, %v11404_v49, %v11405_v3  ;;  %v2895_v58 = vadd.f32 %v2878_v54, %v2799_v26  ;;  %v11413_v2 = vld [vmem:[#allocation184_spill] sm:$0xff]  ;;  %v11416_v53 = vld [vmem:[#allocation187_spill] sm:$0xff] }
 0xd4a   : > { %v2898_v8 = vadd.f32 %v11406_v6, %v2802_v21  ;;  %v2803_v9 = vadd.f32 %v11402_v37, %v2707_v46  ;;  %v2804_v20 = vadd.f32 %v2785_v51, %v2708_v28  ;;  %v2881_v52 = vsel %vm300_vm12, %v11408_v5, %v11407_v19  ;;  %v11417_v49 = vld [vmem:[#allocation188_spill] sm:$0xff] }
 0xd4b   : > { %v3002_v59 = vsel %vm300_vm12, %v11410_v14, %v11409_v61  ;;  %v2805_v55 = vadd.f32 %v2786_v1, %v2709_v57  ;;  %v2880_v48 = vsel %vm300_vm12, %v11399_v11, %v11406_v6  ;;  %v3017_v7 = vadd.f32 %v11411_v13, %v2894_v62 }
 0xd4c   : > { %v3019_v24 = vadd.f32 %v3002_v59, %v2896_v34  ;;  %v2806_v12 = vadd.f32 %v2787_v36, %v2710_v63  ;;  %v2899_v17 = vadd.f32 %v11408_v5, %v2803_v9  ;;  %v3001_v16 = vsel %vm300_vm12, %v11411_v13, %v11410_v14  ;;  %v11418_v63 = vld [vmem:[#allocation186_spill] sm:$0xff]  ;;  %v11419_v36 = vld [vmem:[#allocation185_spill] sm:$0xff] }
 0xd4d   : > { %v2897_v31 = vadd.f32 %v2880_v48, %v2801_v29  ;;  %v2900_v27 = vadd.f32 %v2881_v52, %v2804_v20  ;;  %v3004_v18 = vsel %vm300_vm12, %v11412_v30, %v7648_v0  ;;  %v3018_v50 = vadd.f32 %v3001_v16, %v2895_v58  ;;  %v11421_v52 = vld [vmem:[#allocation189_spill] sm:$0xff] }
 0xd4e   : > { %v3021_v47 = vadd.f32 %v11413_v2, %v2898_v8  ;;  %v2882_v26 = vsel %vm300_vm12, %v11407_v19, %v11414_v44  ;;  %v2883_v21 = vsel %vm300_vm12, %v11414_v44, %v11415_v15  ;;  %v3105_v46 = vsel %vm300_vm12, %v7675_v35, %v7677_v22 }
 0xd4f   : > { %v3003_v11 = vsel %vm300_vm12, %v11409_v61, %v11413_v2  ;;  %v3107_v43 = vsel %vm300_vm12, %v7679_v41, %v7685_v42  ;;  %v3120_v39 = vadd.f32 %v11416_v53, %v3017_v7  ;;  %v3122_v38 = vadd.f32 %v3105_v46, %v3019_v24 }
 0xd50   : > { %v8192_v32 = vpop.permute.xlu1 %3184  ;;  %v8216_v40 = vpop.permute.xlu0 %3186  ;;  %v3023_v37 = vadd.f32 %v3004_v18, %v2900_v27  ;;  %v3104_v51 = vsel %vm300_vm12, %v11416_v53, %v7675_v35  ;;  %v3020_v62 = vadd.f32 %v3003_v11, %v2897_v31  ;;  %v3124_v1 = vadd.f32 %v11417_v49, %v3021_v47 }
 0xd51   : > { %v3200_v45 = vsel %vm300_vm12, %v8192_v32, %v8216_v40  ;;  %v3121_v34 = vadd.f32 %v3104_v51, %v3018_v50  ;;  %v3216_v57 = vadd.f32 %v8192_v32, %v3120_v39  ;;  %v2902_v29 = vadd.f32 %v2883_v21, %v2806_v12  ;;  %v11420_v32 = vld [vmem:[#allocation190_spill] sm:$0xff] }
 0xd52   : > { %v3006_v58 = vsel %vm300_vm12, %v11419_v36, %v11418_v63  ;;  %v3106_v35 = vsel %vm300_vm12, %v7677_v22, %v11417_v49  ;;  %v3126_v6 = vadd.f32 %v3107_v43, %v3023_v37  ;;  %v3109_v61 = vsel %vm300_vm12, %v11421_v52, %v11420_v32  ;;  %v8374_v49 = vld [vmem:[%s10778_s1 + $0x10] sm:$0xff] }
 0xd53   : > { %v3123_v14 = vadd.f32 %v3106_v35, %v3020_v62  ;;  %v2711_v12 = vadd.f32 %v11398_v25, %v8239_v60  ;;  %v2901_v16 = vadd.f32 %v2882_v26, %v2805_v55  ;;  %v3022_v31 = vadd.f32 %v11412_v30, %v2899_v17 }
 0xd54   : > { %v8229_v23 = vpop.permute.xlu1 %3188  ;;  %v3191_v33 = vpop.permute.xlu0 %3190  ;;  %v3025_v27 = vadd.f32 %v3006_v58, %v2902_v29  ;;  %v3108_v60 = vsel %vm300_vm12, %v7685_v42, %v11421_v52  ;;  %v11423_v29 = vld [vmem:[#allocation5_spill] sm:$0xff]  ;;  %vm4061_vm13 = vcmask 56320  }
 0xd55   : > { %v3201_v28 = vsel %vm300_vm12, %v8216_v40, %v8229_v23  ;;  %v3217_v40 = vadd.f32 %v3200_v45, %v3121_v34  ;;  %v3220_v20 = vadd.f32 %v3191_v33, %v3124_v1  ;;  %v3202_v59 = vsel %vm300_vm12, %v8229_v23, %v3191_v33 }
 0xd56   : > { %v3218_v54 = vadd.f32 %v3201_v28, %v3122_v38  ;;  %v3005_v23 = vsel %vm300_vm12, %v7648_v0, %v11419_v36  ;;  %v3219_v33 = vadd.f32 %v3202_v59, %v3123_v14  ;;  %v3125_v2 = vadd.f32 %v7679_v41, %v3022_v31  ;;  %v8385_v36 = vld [vmem:[%s10778_s1 + $0x8] sm:$0xff] }
 0xd57   : > { %v3128_v25 = vadd.f32 %v3109_v61, %v3025_v27  ;;  %v2807_v0 = vadd.f32 %v11405_v3, %v2711_v12  ;;  %v3024_v26 = vadd.f32 %v3005_v23, %v2901_v16  ;;  %v3365_v35 = vrot.slane %v8374_v49, %v11423_v29  ;;  %v11427_v12 = vld [vmem:[#allocation2_spill] sm:$0xff] }
 0xd58   : > { %v8268_v56 = vpop.permute.xlu1 %3192  ;;  %v8289_v10 = vpop.permute.xlu0 %3194  ;;  %v8437_v16 = vsub.s32 5, %v11427_v12 }
 0xd59   : > { %v3203_v48 = vsel %vm300_vm12, %v8268_v56, %v8289_v10  ;;  %v3221_v21 = vadd.f32 %v8268_v56, %v3125_v2  ;;  %v2903_v41 = vadd.f32 %v11415_v15, %v2807_v0  ;;  %v3127_v42 = vadd.f32 %v3108_v60, %v3024_v26  ;;  %v8486_v0 = vld [vmem:[%s10778_s1 + $0x20] sm:$0xff] }
 0xd5a   : > { %v3222_v50 = vadd.f32 %v3203_v48, %v3126_v6  ;;  %v8396_v6 = vld [vmem:[%s10778_s1 + $0x18] sm:$0xff]  ;;  %v11426_v48 = vld [vmem:[#allocation6_spill] sm:$0xff]  ;;  %11428 = vst [vmem:[#allocation14_spill] sm:$0xff] %v8437_v16  ;;  %v3561_v2 = vrot.slane %v8385_v36, %v8437_v16 }
 0xd5b   : > { %v3026_v3 = vadd.f32 %v11418_v63, %v2903_v41  ;;  %v3511_v27 = vrot.slane %v8385_v36, %v11426_v48  ;;  %v3519_v23 = vrot.slane %v8396_v6, %v11426_v48 }
 0xd5c   : > { %v3197_v4 = vpop.permute.xlu1 %3196  ;;  %v3199_v8 = vpop.permute.xlu0 %3198 }
 0xd5d   : > { %v3205_v55 = vsel %vm300_vm12, %v3197_v4, %v3199_v8  ;;  %v3204_v28 = vsel %vm300_vm12, %v8289_v10, %v3197_v4  ;;  %v3129_v56 = vadd.f32 %v11420_v32, %v3026_v3  ;;  %v8365_v10 = vld [vmem:[%s10778_s1] sm:$0xff]  ;;  %v11422_v4 = vld [vmem:[#allocation3_spill] sm:$0xff] }
 0xd5e   : > { %v3224_v46 = vadd.f32 %v3205_v55, %v3128_v25  ;;  %v3223_v38 = vadd.f32 %v3204_v28, %v3127_v42  ;;  %v3307_v62 = vrot.slane %v8365_v10, %v11422_v4  ;;  %v3315_v1 = vrot.slane %v8374_v49, %v11422_v4  ;;  %v11425_v32 = vld [vmem:[#allocation7_spill] sm:$0xff] }
 0xd5f   : > { %v3225_v45 = vadd.f32 %v3199_v8, %v3129_v56  ;;  %v3357_v63 = vrot.slane %v8365_v10, %v11423_v29  ;;  %v3311_v58 = vrot.slane %v8385_v36, %v11422_v4  ;;  %v3319_v8 = vrot.slane %v8396_v6, %v11422_v4 }
 0xd60   : > { %v3457_v52 = vrot.slane %v8365_v10, %v11425_v32  ;;  %v3465_v14 = vrot.slane %v8374_v49, %v11425_v32  ;;  %v3557_v31 = vrot.slane %v8365_v10, %v8437_v16  ;;  %v3569_v25 = vrot.slane %v8396_v6, %v8437_v16 }
 0xd61   : > { %v8467_v55 = vsub.s32 7, %v11427_v12  ;;  %v3707_v26 = vrot.slane %v8486_v0, %v11422_v4  ;;  %v3757_v28 = vrot.slane %v8486_v0, %v11423_v29 }
 0xd63   : > { %v3669_v42 = vrot.slane %v8396_v6, %v8467_v55 }
 0xd69   : > { %v3231_v9 = vpop.permute.xlu1 %3230  ;;  %v3236_v18 = vpop.permute.xlu0 %3235 }
 0xd6a   : > { %v3240_v19 = vadd.f32 %v3231_v9, %v3218_v54  ;;  %v3238_v5 = vadd.f32 %v3231_v9, %v3216_v57  ;;  %v3242_v7 = vadd.f32 %v3231_v9, %v3220_v20  ;;  %v3239_v24 = vadd.f32 %v3231_v9, %v3217_v40 }
 0xd6b   : > { %v3244_v47 = vadd.f32 %v3236_v18, %v3222_v50  ;;  %v3241_v44 = vadd.f32 %v3231_v9, %v3219_v33  ;;  %v3246_v53 = vadd.f32 %v3236_v18, %v3224_v46  ;;  %v3243_v39 = vadd.f32 %v3236_v18, %v3221_v21  ;;  %v11424_v9 = vld [vmem:[#allocation4_spill] sm:$0xff] }
 0xd6c   : > { %v3250_v22 = vmax.f32 %v3240_v19, 0.0  ;;  %v3248_v13 = vmax.f32 %v3238_v5, 0.0  ;;  %v3252_v17 = vmax.f32 %v3242_v7, 0.0  ;;  %v3249_v30 = vmax.f32 %v3239_v24, 0.0  ;;  %v8497_v46 = vld [vmem:[%s10778_s1 + $0x30] sm:$0xff] }
 0xd6d   : > { %v3254_v11 = vmax.f32 %v3244_v47, 0.0  ;;  %v3251_v43 = vmax.f32 %v3241_v44, 0.0  ;;  %v3256_v37 = vmax.f32 %v3246_v53, 0.0  ;;  %v3253_v51 = vmax.f32 %v3243_v39, 0.0  ;;  %v8521_v39 = vld [vmem:[%s10778_s1 + $0x38] sm:$0xff] }
 0xd6e   : > { %3272 = vrot.lane.b32.xlu0 %v3250_v22, %s6384_s29  ;;  %3268 = vrot.lane.b32.xlu1 %v3248_v13, %s6384_s29  ;;  %v3245_v15 = vadd.f32 %v3236_v18, %v3223_v38  ;;  %v3247_v57 = vadd.f32 %v3236_v18, %v3225_v45  ;;  %v3407_v40 = vrot.slane %v8365_v10, %v11424_v9  ;;  %v8452_v33 = vsub.s32 6, %v11427_v12 }
 0xd6f   : > { %v3361_v20 = vrot.slane %v8385_v36, %v11423_v29  ;;  %v3415_v19 = vrot.slane %v8374_v49, %v11424_v9  ;;  %v3369_v5 = vrot.slane %v8396_v6, %v11423_v29  ;;  %v3411_v61 = vrot.slane %v8385_v36, %v11424_v9 }
 0xd70   : > { %v3255_v34 = vmax.f32 %v3245_v15, 0.0  ;;  %v3257_v54 = vmax.f32 %v3247_v57, 0.0  ;;  %v3419_v59 = vrot.slane %v8396_v6, %v11424_v9  ;;  %v3507_v22 = vrot.slane %v8365_v10, %v11426_v48 }
 0xd71   : > { %v3461_v13 = vrot.slane %v8385_v36, %v11425_v32  ;;  %v3515_v7 = vrot.slane %v8374_v49, %v11426_v48  ;;  %v3469_v24 = vrot.slane %v8396_v6, %v11425_v32  ;;  %v3565_v18 = vrot.slane %v8374_v49, %v8437_v16 }
 0xd72   : > { %3276 = vrot.lane.b32.xlu0 %v3252_v17, %s6384_s29  ;;  %3270 = vrot.lane.b32.xlu1 %v3249_v30, %s6384_s29  ;;  %v3607_v50 = vrot.slane %v8365_v10, %v8452_v33  ;;  %v3615_v60 = vrot.slane %v8374_v49, %v8452_v33  ;;  %v3657_v17 = vrot.slane %v8365_v10, %v8467_v55 }
 0xd73   : > { %v3611_v30 = vrot.slane %v8385_v36, %v8452_v33  ;;  %v3665_v47 = vrot.slane %v8374_v49, %v8467_v55  ;;  %v3619_v44 = vrot.slane %v8396_v6, %v8452_v33  ;;  %v3661_v21 = vrot.slane %v8385_v36, %v8467_v55 }
 0xd74   : > { %v3715_v41 = vrot.slane %v8497_v46, %v11422_v4  ;;  %v3765_v53 = vrot.slane %v8497_v46, %v11423_v29  ;;  %v3719_v3 = vrot.slane %v8521_v39, %v11422_v4  ;;  %v3807_v38 = vrot.slane %v8486_v0, %v11424_v9 }
 0xd75   : > { %v3857_v15 = vrot.slane %v8486_v0, %v11425_v32  ;;  %v3865_v10 = vrot.slane %v8497_v46, %v11425_v32  ;;  %v3915_v49 = vrot.slane %v8497_v46, %v11426_v48  ;;  %v3985_v36 = vrot.slane %v8486_v0, %v8452_v33 }
 0xd76   : > { %3280 = vrot.lane.b32.xlu0 %v3254_v11, %s6384_s29  ;;  %3274 = vrot.lane.b32.xlu1 %v3251_v43, %s6384_s29  ;;  %v8510_v11 = vld [vmem:[%s10778_s1 + $0x28] sm:$0xff] }
 0xd77   : > { %v3711_v43 = vrot.slane %v8510_v11, %v11422_v4  ;;  %v3761_v56 = vrot.slane %v8510_v11, %v11423_v29  ;;  %v3811_v45 = vrot.slane %v8510_v11, %v11424_v9  ;;  %v3861_v57 = vrot.slane %v8510_v11, %v11425_v32 }
 0xd7a   : > { %3284 = vrot.lane.b32.xlu0 %v3256_v37, %s6384_s29  ;;  %3278 = vrot.lane.b32.xlu1 %v3253_v51, %s6384_s29  ;;  %v3815_v37 = vrot.slane %v8497_v46, %v11424_v9  ;;  %v3769_v51 = vrot.slane %v8521_v39, %v11423_v29 }
 0xd7e   : > { %3324 = vrot.lane.b32.xlu0 %v3307_v62, %s6363_s11  ;;  %3282 = vrot.lane.b32.xlu1 %v3255_v34, %s6384_s29  ;;  %v3819_v62 = vrot.slane %v8521_v39, %v11424_v9  ;;  %v3907_v34 = vrot.slane %v8486_v0, %v11426_v48 }
 0xd82   : > { %3328 = vrot.lane.b32.xlu0 %v3315_v1, %s6363_s11  ;;  %3286 = vrot.lane.b32.xlu1 %v3257_v54, %s6384_s29  ;;  %v3869_v1 = vrot.slane %v8521_v39, %v11425_v32 }
 0xd86   : > { %3374 = vrot.lane.b32.xlu0 %v3357_v63, %s6364_s12  ;;  %3326 = vrot.lane.b32.xlu1 %v3311_v58, %s6363_s11  ;;  %v3911_v58 = vrot.slane %v8510_v11, %v11426_v48 }
 0xd8a   : > { %3378 = vrot.lane.b32.xlu0 %v3365_v35, %s6364_s12  ;;  %3330 = vrot.lane.b32.xlu1 %v3319_v8, %s6363_s11  ;;  %v3993_v8 = vrot.slane %v8497_v46, %v8452_v33 }
 0xd8e   : > { %3424 = vrot.lane.b32.xlu0 %v3407_v40, %s6366_s13  ;;  %3376 = vrot.lane.b32.xlu1 %v3361_v20, %s6364_s12  ;;  %v3919_v40 = vrot.slane %v8521_v39, %v11426_v48 }
 0xd92   : > { %3428 = vrot.lane.b32.xlu0 %v3415_v19, %s6366_s13  ;;  %3380 = vrot.lane.b32.xlu1 %v3369_v5, %s6364_s12  ;;  %v4036_v5 = vrot.slane %v8486_v0, %v8467_v55 }
 0xd96   : > { %3474 = vrot.lane.b32.xlu0 %v3457_v52, %s6368_s14  ;;  %3426 = vrot.lane.b32.xlu1 %v3411_v61, %s6366_s13  ;;  %v3989_v52 = vrot.slane %v8510_v11, %v8452_v33 }
 0xd9a   : > { %3478 = vrot.lane.b32.xlu0 %v3465_v14, %s6368_s14  ;;  %3430 = vrot.lane.b32.xlu1 %v3419_v59, %s6366_s13  ;;  %v4044_v59 = vrot.slane %v8497_v46, %v8467_v55 }
 0xd9e   : > { %3524 = vrot.lane.b32.xlu0 %v3507_v22, %s6370_s15  ;;  %3476 = vrot.lane.b32.xlu1 %v3461_v13, %s6368_s14  ;;  %v3997_v22 = vrot.slane %v8521_v39, %v8452_v33 }
 0xda2   : > { %3528 = vrot.lane.b32.xlu0 %v3515_v7, %s6370_s15  ;;  %3480 = vrot.lane.b32.xlu1 %v3469_v24, %s6368_s14  ;;  %v8604_v24 = vld [vmem:[%s10778_s1 + $0x40] sm:$0xff] }
 0xda3   : > { %v4087_v12 = vrot.slane %v8604_v24, %v11422_v4 }
 0xda6   : > { %3574 = vrot.lane.b32.xlu0 %v3557_v31, %s6371_s16  ;;  %3526 = vrot.lane.b32.xlu1 %v3511_v27, %s6370_s15  ;;  %v4040_v31 = vrot.slane %v8510_v11, %v8467_v55 }
 0xdaa   : > { %3578 = vrot.lane.b32.xlu0 %v3565_v18, %s6371_s16  ;;  %3530 = vrot.lane.b32.xlu1 %v3519_v23, %s6370_s15  ;;  %v8617_v23 = vld [vmem:[%s10778_s1 + $0x50] sm:$0xff] }
 0xdae   : > { %3624 = vrot.lane.b32.xlu0 %v3607_v50, %s6378_s28  ;;  %3576 = vrot.lane.b32.xlu1 %v3561_v2, %s6371_s16  ;;  %v4095_v50 = vrot.slane %v8617_v23, %v11422_v4  ;;  %v4048_v2 = vrot.slane %v8521_v39, %v8467_v55  ;;  %v4197_v39 = vrot.slane %v8617_v23, %v11424_v9 }
 0xdb2   : > { %3628 = vrot.lane.b32.xlu0 %v3615_v60, %s6378_s28  ;;  %3580 = vrot.lane.b32.xlu1 %v3569_v25, %s6371_s16 }
 0xdb6   : > { %3674 = vrot.lane.b32.xlu0 %v3657_v17, %s6381_s30  ;;  %3626 = vrot.lane.b32.xlu1 %v3611_v30, %s6378_s28  ;;  %v4138_v17 = vrot.slane %v8604_v24, %v11423_v29  ;;  %v8632_v30 = vld [vmem:[%s10778_s1 + $0x48] sm:$0xff] }
 0xdb7   : > { %v4142_v11 = vrot.slane %v8632_v30, %v11423_v29 }
 0xdba   : > { %3678 = vrot.lane.b32.xlu0 %v3665_v47, %s6381_s30  ;;  %3630 = vrot.lane.b32.xlu1 %v3619_v44, %s6378_s28  ;;  %v4091_v47 = vrot.slane %v8632_v30, %v11422_v4 }
 0xdbe   : > { %3724 = vrot.lane.b32.xlu0 %v3707_v26, %s6384_s29  ;;  %3676 = vrot.lane.b32.xlu1 %v3661_v21, %s6381_s30  ;;  %v4146_v26 = vrot.slane %v8617_v23, %v11423_v29  ;;  %v8645_v21 = vld [vmem:[%s10778_s1 + $0x58] sm:$0xff] }
 0xdbf   : > { %v4099_v46 = vrot.slane %v8645_v21, %v11422_v4 }
 0xdc2   : > { %3728 = vrot.lane.b32.xlu0 %v3715_v41, %s6384_s29  ;;  %3680 = vrot.lane.b32.xlu1 %v3669_v42, %s6381_s30 }
 0xdc6   : > { %3774 = vrot.lane.b32.xlu0 %v3757_v28, %s6374_s24  ;;  %3726 = vrot.lane.b32.xlu1 %v3711_v43, %s6384_s29  ;;  %v4189_v28 = vrot.slane %v8604_v24, %v11424_v9 }
 0xdca   : > { %3778 = vrot.lane.b32.xlu0 %v3765_v53, %s6374_s24  ;;  %3730 = vrot.lane.b32.xlu1 %v3719_v3, %s6384_s29  ;;  %v4150_v3 = vrot.slane %v8645_v21, %v11423_v29 }
 0xdce   : > { %3824 = vrot.lane.b32.xlu0 %v3807_v38, %s6377_s27  ;;  %3776 = vrot.lane.b32.xlu1 %v3761_v56, %s6374_s24 }
 0xdd2   : > { %3828 = vrot.lane.b32.xlu0 %v3815_v37, %s6377_s27  ;;  %3780 = vrot.lane.b32.xlu1 %v3769_v51, %s6374_s24  ;;  %v4239_v37 = vrot.slane %v8604_v24, %v11425_v32  ;;  %v4193_v51 = vrot.slane %v8632_v30, %v11424_v9 }
 0xdd6   : > { %3874 = vrot.lane.b32.xlu0 %v3857_v15, %s6389_s9  ;;  %3826 = vrot.lane.b32.xlu1 %v3811_v45, %s6377_s27 }
 0xdda   : > { %3878 = vrot.lane.b32.xlu0 %v3865_v10, %s6389_s9  ;;  %3830 = vrot.lane.b32.xlu1 %v3819_v62, %s6377_s27  ;;  %v4247_v10 = vrot.slane %v8617_v23, %v11425_v32  ;;  %v4201_v62 = vrot.slane %v8645_v21, %v11424_v9 }
 0xdde   : > { %3924 = vrot.lane.b32.xlu0 %v3907_v34, %s6373_s23  ;;  %3876 = vrot.lane.b32.xlu1 %v3861_v57, %s6389_s9 }
 0xde0   : > { %v8561_v54 = vpop.permute.xlu0 %3272  ;;  %v8563_v63 = vpop.permute.xlu1 %3268 }
 0xde2   : > { %3928 = vrot.lane.b32.xlu0 %v3915_v49, %s6373_s23  ;;  %3880 = vrot.lane.b32.xlu1 %v3869_v1, %s6389_s9  ;;  %s6407_s9 = smov 7   ;;  %v4289_v49 = vrot.slane %v8604_v24, %v11426_v48  ;;  %v4243_v1 = vrot.slane %v8632_v30, %v11425_v32 }
 0xde4   : > { %v8571_v35 = vpop.permute.xlu0 %3276  ;;  %v8573_v6 = vpop.permute.xlu1 %3270 }
 0xde6   : > { %4002 = vrot.lane.b32.xlu0 %v3985_v36, %s6406_s17  ;;  %3926 = vrot.lane.b32.xlu1 %v3911_v58, %s6373_s23 }
 0xde8   : > { %v8580_v20 = vpop.permute.xlu0 %3280  ;;  %v8582_v19 = vpop.permute.xlu1 %3274 }
 0xdea   : > { %4006 = vrot.lane.b32.xlu0 %v3993_v8, %s6406_s17  ;;  %3930 = vrot.lane.b32.xlu1 %v3919_v40, %s6373_s23  ;;  %v4297_v8 = vrot.slane %v8617_v23, %v11426_v48  ;;  %v4251_v40 = vrot.slane %v8645_v21, %v11425_v32  ;;  %v4347_v32 = vrot.slane %v8617_v23, %v8437_v16 }
 0xdec   : > { %v8589_v61 = vpop.permute.xlu0 %3284  ;;  %v8591_v14 = vpop.permute.xlu1 %3278 }
 0xdee   : > { %4053 = vrot.lane.b32.xlu0 %v4036_v5, %s6407_s9  ;;  %4004 = vrot.lane.b32.xlu1 %v3989_v52, %s6406_s17 }
 0xdf0   : > { %v8597_v13 = vpop.permute.xlu0 %3324  ;;  %v8599_v7 = vpop.permute.xlu1 %3282 }
 0xdf1   : > { %11429 = vst [vmem:[#allocation13_spill] sm:$0xff] %v8597_v13 }
 0xdf2   : > { %4057 = vrot.lane.b32.xlu0 %v4044_v59, %s6407_s9  ;;  %4008 = vrot.lane.b32.xlu1 %v3997_v22, %s6406_s17  ;;  %v4339_v59 = vrot.slane %v8604_v24, %v8437_v16  ;;  %v4293_v22 = vrot.slane %v8632_v30, %v11426_v48  ;;  %s11446_s17 = smov 111  }
 0xdf4   : > { %v8610_v27 = vpop.permute.xlu0 %3328  ;;  %v8612_v18 = vpop.permute.xlu1 %3286 }
 0xdf5   : > { %11430 = vst [vmem:[#allocation15_spill] sm:$0xff] %v8610_v27 }
 0xdf6   : > { %4104 = vrot.lane.b32.xlu0 %v4087_v12, %s6408_s25  ;;  %4055 = vrot.lane.b32.xlu1 %v4040_v31, %s6407_s9 }
 0xdf8   : > { %v8623_v60 = vpop.permute.xlu0 %3374  ;;  %v8625_v25 = vpop.permute.xlu1 %3326 }
 0xdf9   : > { %11431 = vst [vmem:[#allocation22_spill] sm:$0xff] %v8625_v25 }
 0xdfa   : > { %4108 = vrot.lane.b32.xlu0 %v4095_v50, %s6408_s25  ;;  %4059 = vrot.lane.b32.xlu1 %v4048_v2, %s6407_s9  ;;  %v4301_v50 = vrot.slane %v8645_v21, %v11426_v48  ;;  %v4397_v48 = vrot.slane %v8617_v23, %v8452_v33  ;;  %s11447_s9 = smov 110  }
 0xdfc   : > { %v8636_v44 = vpop.permute.xlu0 %3378  ;;  %v8638_v0 = vpop.permute.xlu1 %3330 }
 0xdfd   : > { %11432 = vst [vmem:[#allocation19_spill] sm:$0xff] %v8638_v0 }
 0xdfe   : > { %4155 = vrot.lane.b32.xlu0 %v4138_v17, %s6409_s10  ;;  %4106 = vrot.lane.b32.xlu1 %v4091_v47, %s6408_s25  ;;  %v4389_v47 = vrot.slane %v8604_v24, %v8452_v33 }
 0xe00   : > { %v8649_v41 = vpop.permute.xlu0 %3424  ;;  %v8651_v42 = vpop.permute.xlu1 %3376 }
 0xe02   : > { %4159 = vrot.lane.b32.xlu0 %v4146_v26, %s6409_s10  ;;  %4110 = vrot.lane.b32.xlu1 %v4099_v46, %s6408_s25  ;;  %v4343_v26 = vrot.slane %v8632_v30, %v8437_v16 }
 0xe04   : > { %v8657_v43 = vpop.permute.xlu0 %3428  ;;  %v8659_v53 = vpop.permute.xlu1 %3380 }
 0xe06   : > { %4206 = vrot.lane.b32.xlu0 %v4189_v28, %s6363_s11  ;;  %4157 = vrot.lane.b32.xlu1 %v4142_v11, %s6409_s10  ;;  %v4351_v11 = vrot.slane %v8645_v21, %v8437_v16 }
 0xe08   : > { %v8666_v38 = vpop.permute.xlu0 %3474  ;;  %v8668_v56 = vpop.permute.xlu1 %3426 }
 0xe0a   : > { %4210 = vrot.lane.b32.xlu0 %v4197_v39, %s6363_s11  ;;  %4161 = vrot.lane.b32.xlu1 %v4150_v3, %s6409_s10  ;;  %s11435_s10 = smov 126  }
 0xe0c   : > { %v8675_v15 = vpop.permute.xlu0 %3478  ;;  %v8677_v45 = vpop.permute.xlu1 %3430 }
 0xe0e   : > { %4256 = vrot.lane.b32.xlu0 %v4239_v37, %s6364_s12  ;;  %4208 = vrot.lane.b32.xlu1 %v4193_v51, %s6363_s11  ;;  %v4439_v37 = vrot.slane %v8604_v24, %v8467_v55  ;;  %v4393_v51 = vrot.slane %v8632_v30, %v8452_v33 }
 0xe10   : > { %v8685_v34 = vpop.permute.xlu0 %3524  ;;  %v8687_v57 = vpop.permute.xlu1 %3476 }
 0xe12   : > { %4260 = vrot.lane.b32.xlu0 %v4247_v10, %s6364_s12  ;;  %4212 = vrot.lane.b32.xlu1 %v4201_v62, %s6363_s11 }
 0xe14   : > { %v8695_v36 = vpop.permute.xlu0 %3528  ;;  %v8697_v58 = vpop.permute.xlu1 %3480 }
 0xe16   : > { %4306 = vrot.lane.b32.xlu0 %v4289_v49, %s6366_s13  ;;  %4258 = vrot.lane.b32.xlu1 %v4243_v1, %s6364_s12  ;;  %v4447_v49 = vrot.slane %v8617_v23, %v8467_v55  ;;  %v4401_v1 = vrot.slane %v8645_v21, %v8452_v33  ;;  %v4443_v23 = vrot.slane %v8632_v30, %v8467_v55 }
 0xe18   : > { %v8705_v5 = vpop.permute.xlu0 %3574  ;;  %v8707_v52 = vpop.permute.xlu1 %3526 }
 0xe1a   : > { %4310 = vrot.lane.b32.xlu0 %v4297_v8, %s6366_s13  ;;  %4262 = vrot.lane.b32.xlu1 %v4251_v40, %s6364_s12  ;;  %v6343_v40 = vld [vmem:[%s10778_s1 + $0x60] sm:$0x7] }
 0xe1c   : > { %v8715_v12 = vpop.permute.xlu0 %3578  ;;  %v8717_v31 = vpop.permute.xlu1 %3530 }
 0xe1e   : > { %4356 = vrot.lane.b32.xlu0 %v4339_v59, %s6368_s14  ;;  %4308 = vrot.lane.b32.xlu1 %v4293_v22, %s6366_s13  ;;  %v4489_v59 = vrot.slane %v6343_v40, %v11422_v4 }
 0xe20   : > { %v8725_v2 = vpop.permute.xlu0 %3624  ;;  %v8727_v17 = vpop.permute.xlu1 %3576 }
 0xe22   : > { %4360 = vrot.lane.b32.xlu0 %v4347_v32, %s6368_s14  ;;  %4312 = vrot.lane.b32.xlu1 %v4301_v50, %s6366_s13  ;;  %v6344_v32 = vld [vmem:[%s10778_s1 + $0x70] sm:$0x7]  ;;  %s11452_s13 = smov 62  }
 0xe23   : > { %v4497_v50 = vrot.slane %v6344_v32, %v11422_v4 }
 0xe24   : > { %v8735_v46 = vpop.permute.xlu0 %3628  ;;  %v8737_v28 = vpop.permute.xlu1 %3580 }
 0xe26   : > { %4406 = vrot.lane.b32.xlu0 %v4389_v47, %s6370_s15  ;;  %4358 = vrot.lane.b32.xlu1 %v4343_v26, %s6368_s14  ;;  %v4451_v47 = vrot.slane %v8645_v21, %v8467_v55  ;;  %v4547_v55 = vrot.slane %v6344_v32, %v11423_v29  ;;  %v6346_v21 = vld [vmem:[%s10778_s1 + $0x78] sm:$0x7] }
 0xe27   : > { %v4551_v0 = vrot.slane %v6346_v21, %v11423_v29 }
 0xe28   : > { %v8745_v39 = vpop.permute.xlu0 %3674  ;;  %v8747_v3 = vpop.permute.xlu1 %3626 }
 0xe2a   : > { %4410 = vrot.lane.b32.xlu0 %v4397_v48, %s6370_s15  ;;  %4362 = vrot.lane.b32.xlu1 %v4351_v11, %s6368_s14  ;;  %v4539_v48 = vrot.slane %v6343_v40, %v11423_v29  ;;  %v6345_v11 = vld [vmem:[%s10778_s1 + $0x68] sm:$0x7] }
 0xe2c   : > { %v8755_v10 = vpop.permute.xlu0 %3678  ;;  %v8757_v62 = vpop.permute.xlu1 %3630 }
 0xe2e   : > { %4456 = vrot.lane.b32.xlu0 %v4439_v37, %s6371_s16  ;;  %4408 = vrot.lane.b32.xlu1 %v4393_v51, %s6370_s15  ;;  %v4493_v37 = vrot.slane %v6345_v11, %v11422_v4 }
 0xe30   : > { %v8765_v24 = vpop.permute.xlu0 %3724  ;;  %v8767_v8 = vpop.permute.xlu1 %3676 }
 0xe32   : > { %4460 = vrot.lane.b32.xlu0 %v4447_v49, %s6371_s16  ;;  %4412 = vrot.lane.b32.xlu1 %v4401_v1, %s6370_s15  ;;  %v4501_v1 = vrot.slane %v6346_v21, %v11422_v4  ;;  %v4597_v4 = vrot.slane %v6344_v32, %v11424_v9  ;;  %v8839_v32 = vsel %vm1205_vm7, %v8573_v6, %v8561_v54 }
 0xe34   : > { %v8777_v22 = vpop.permute.xlu0 %3728  ;;  %v8779_v33 = vpop.permute.xlu1 %3680 }
 0xe36   : > { %4506 = vrot.lane.b32.xlu0 %v4489_v59, %s6378_s28  ;;  %4458 = vrot.lane.b32.xlu1 %v4443_v23, %s6371_s16 }
 0xe38   : > { %v8789_v26 = vpop.permute.xlu0 %3774  ;;  %v8791_v30 = vpop.permute.xlu1 %3726 }
 0xe3a   : > { %4510 = vrot.lane.b32.xlu0 %v4497_v50, %s6378_s28  ;;  %4462 = vrot.lane.b32.xlu1 %v4451_v47, %s6371_s16  ;;  %v4589_v50 = vrot.slane %v6343_v40, %v11424_v9  ;;  %v4543_v47 = vrot.slane %v6345_v11, %v11423_v29  ;;  %v8844_v29 = vsel %vm1205_vm7, %v8580_v20, %v8599_v7 }
 0xe3c   : > { %v8800_v51 = vpop.permute.xlu0 %3778  ;;  %v8802_v49 = vpop.permute.xlu1 %3730 }
 0xe3e   : > { %4556 = vrot.lane.b32.xlu0 %v4539_v48, %s6381_s30  ;;  %4508 = vrot.lane.b32.xlu1 %v4493_v37, %s6378_s28 }
 0xe40   : > { %v8811_v59 = vpop.permute.xlu0 %3824  ;;  %v8813_v23 = vpop.permute.xlu1 %3776 }
 0xe42   : > { %4560 = vrot.lane.b32.xlu0 %v4547_v55, %s6381_s30  ;;  %4512 = vrot.lane.b32.xlu1 %v4501_v1, %s6378_s28  ;;  %v3390_v55 = vmul.f32 0.0, %v8623_v60  ;;  %v3383_v1 = vsel %vm11035_vm0, %v8651_v42, %v8636_v44 }
 0xe43   : > { %v3392_v13 = vmul.f32 %v3383_v1, %v8839_v32  ;;  %v3396_v25 = vmul.f32 %v3383_v1, %v8844_v29 }
 0xe44   : > { %v8819_v48 = vpop.permute.xlu0 %3828  ;;  %v8821_v37 = vpop.permute.xlu1 %3780 }
 0xe46   : > { %4606 = vrot.lane.b32.xlu0 %v4589_v50, %s6384_s29  ;;  %4558 = vrot.lane.b32.xlu1 %v4543_v47, %s6381_s30  ;;  %v4593_v50 = vrot.slane %v6345_v11, %v11424_v9  ;;  %v3399_v47 = vpack.c.bf16 %v3390_v55, %v3390_v55  ;;  %v8866_v11 = vsel %vm1205_vm7, %v8582_v19, %v8571_v35 }
 0xe47   : > { %v8871_v55 = vsel %vm1205_vm7, %v8589_v61, %v8612_v18 }
 0xe48   : > { %v8828_v27 = vpop.permute.xlu0 %3874  ;;  %v8830_v40 = vpop.permute.xlu1 %3826  ;;  %v3398_v35 = vmul.f32 %v8659_v53, %v8871_v55 }
 0xe49   : > { %11433 = vst [vmem:[#allocation17_spill] sm:$0xff] %v8828_v27  ;;  %v3382_v27 = vsel %vm11035_vm0, %v8623_v60, %v8651_v42  ;;  %v4601_v60 = vrot.slane %v6346_v21, %v11424_v9  ;;  %v8878_v42 = vsel %vm1205_vm7, %v8591_v14, %v8580_v20  ;;  %v3432_v20 = vsel %vm482_vm3, %v8649_v41, %v8668_v56 }
 0xe4a   : > { %4610 = vrot.lane.b32.xlu0 %v4597_v4, %s6384_s29  ;;  %4562 = vrot.lane.b32.xlu1 %v4551_v0, %s6381_s30  ;;  %v8861_v0 = vsel %vm1205_vm7, %v8563_v63, %v8573_v6  ;;  %v3401_v63 = vpack.c.bf16 %v3396_v25, %v3392_v13  ;;  %v3394_v6 = vmul.f32 %v8659_v53, %v8866_v11 }
 0xe4b   : > { %v3395_v9 = vmul.f32 %v3382_v27, %v8878_v42  ;;  %v3384_v14 = vsel %vm11035_vm0, %v8636_v44, %v8659_v53  ;;  %v8900_v13 = vsel %vm1205_vm7, %v8561_v54, %v8582_v19  ;;  %v3441_v25 = vmul.f32 %v3432_v20, %v8861_v0 }
 0xe4c   : > { %v8850_v4 = vpop.permute.xlu0 %3878  ;;  %v8852_v16 = vpop.permute.xlu1 %3830  ;;  %v3445_v21 = vmul.f32 %v3432_v20, %v8878_v42  ;;  %v3403_v53 = vpack.c.bf16 %v3398_v35, %v3394_v6  ;;  %v3393_v54 = vmul.f32 %v3384_v14, %v8900_v13  ;;  %v3440_v35 = vmul.f32 0.0, %v8649_v41 }
 0xe4e   : > { %4641 = vrot.lane.b32.xlu0 %v3399_v47, %s6373_s23  ;;  %4608 = vrot.lane.b32.xlu1 %v4593_v50, %s6384_s29  ;;  %v3391_v50 = vmul.f32 %v3382_v27, %v8861_v0  ;;  %v8906_v27 = vsel %vm1205_vm7, %v8599_v7, %v8589_v61  ;;  %v3450_v61 = vpack.c.bf16 %v3445_v21, %v3441_v25 }
 0xe4f   : > { %v3397_v19 = vmul.f32 %v3384_v14, %v8906_v27  ;;  %v3490_v14 = vmul.f32 0.0, %v8666_v38 }
 0xe50   : > { %v8884_v1 = vpop.permute.xlu0 %3924  ;;  %v8886_v18 = vpop.permute.xlu1 %3876 }
 0xe52   : > { %4645 = vrot.lane.b32.xlu0 %v3401_v63, %s6373_s23  ;;  %4612 = vrot.lane.b32.xlu1 %v4601_v60, %s6384_s29  ;;  %v3400_v63 = vpack.c.bf16 %v3395_v9, %v3391_v50  ;;  %v3434_v60 = vsel %vm482_vm3, %v8657_v43, %v8677_v45  ;;  %v3402_v50 = vpack.c.bf16 %v3397_v19, %v3393_v54 }
 0xe53   : > { %v3443_v7 = vmul.f32 %v3434_v60, %v8900_v13  ;;  %v3447_v20 = vmul.f32 %v3434_v60, %v8906_v27  ;;  %v3433_v9 = vsel %vm482_vm3, %v8668_v56, %v8657_v43  ;;  %v3483_v43 = vsel %vm593_vm4, %v8687_v57, %v8675_v15 }
 0xe54   : > { %v8910_v47 = vpop.permute.xlu0 %3928  ;;  %v8912_v44 = vpop.permute.xlu1 %3880  ;;  %v3442_v60 = vmul.f32 %v3433_v9, %v8839_v32  ;;  %v3446_v41 = vmul.f32 %v3433_v9, %v8844_v29  ;;  %v3499_v56 = vpack.c.bf16 %v3490_v14, %v3490_v14  ;;  %v3492_v54 = vmul.f32 %v3483_v43, %v8839_v32 }
 0xe55   : > { %11434 = vst [vmem:[#allocation20_spill] sm:$0xff] %v8910_v47  ;;  %v3496_v19 = vmul.f32 %v3483_v43, %v8844_v29  ;;  %v3482_v9 = vsel %vm593_vm4, %v8666_v38, %v8687_v57  ;;  %v3532_v38 = vsel %vm11042_vm1, %v8685_v34, %v8707_v52 }
 0xe56   : > { %4649 = vrot.lane.b32.xlu0 %v3403_v53, %s6373_s23  ;;  %4643 = vrot.lane.b32.xlu1 %v3400_v63, %s6373_s23  ;;  %v3452_v53 = vpack.c.bf16 %v3447_v20, %v3443_v7  ;;  %v3449_v63 = vpack.c.bf16 %v3440_v35, %v3440_v35  ;;  %v3451_v20 = vpack.c.bf16 %v3446_v41, %v3442_v60 }
 0xe57   : > { %v3444_v35 = vmul.f32 %v8677_v45, %v8866_v11  ;;  %v3501_v14 = vpack.c.bf16 %v3496_v19, %v3492_v54  ;;  %v3495_v43 = vmul.f32 %v3482_v9, %v8878_v42  ;;  %v3541_v54 = vmul.f32 %v3532_v38, %v8861_v0 }
 0xe58   : > { %v8923_v47 = vpop.permute.xlu0 %4002  ;;  %v8925_v6 = vpop.permute.xlu1 %3926  ;;  %v3545_v19 = vmul.f32 %v3532_v38, %v8878_v42 }
 0xe5a   : > { %4663 = vrot.lane.b32.xlu0 %v3450_v61, %s11435_s10  ;;  %4647 = vrot.lane.b32.xlu1 %v3402_v50, %s6373_s23  ;;  %v3448_v50 = vmul.f32 %v8677_v45, %v8871_v55  ;;  %v3491_v45 = vmul.f32 %v3482_v9, %v8861_v0 }
 0xe5c   : > { %v8934_v25 = vpop.permute.xlu0 %4006  ;;  %v8936_v21 = vpop.permute.xlu1 %3930  ;;  %v3453_v57 = vpack.c.bf16 %v3448_v50, %v3444_v35 }
 0xe5e   : > { %4667 = vrot.lane.b32.xlu0 %v3452_v53, %s11435_s10  ;;  %4661 = vrot.lane.b32.xlu1 %v3449_v63, %s11435_s10  ;;  %v3494_v53 = vmul.f32 %v8697_v58, %v8866_v11  ;;  %v3498_v63 = vmul.f32 %v8697_v58, %v8871_v55 }
 0xe60   : > { %v8947_v61 = vpop.permute.xlu0 %4053  ;;  %v8949_v7 = vpop.permute.xlu1 %4004 }
 0xe61   : > { %11436 = vst [vmem:[#allocation16_spill] sm:$0xff] %v8947_v61  ;;  %v3500_v61 = vpack.c.bf16 %v3495_v43, %v3491_v45  ;;  %v3533_v43 = vsel %vm11042_vm1, %v8707_v52, %v8695_v36 }
 0xe62   : > { %4681 = vrot.lane.b32.xlu0 %v3499_v56, %s6377_s27  ;;  %4665 = vrot.lane.b32.xlu1 %v3451_v20, %s11435_s10  ;;  %v3484_v56 = vsel %vm593_vm4, %v8675_v15, %v8697_v58  ;;  %v3534_v15 = vsel %vm11042_vm1, %v8695_v36, %v8717_v31  ;;  %v3550_v58 = vpack.c.bf16 %v3545_v19, %v3541_v54 }
 0xe63   : > { %v3493_v35 = vmul.f32 %v3484_v56, %v8900_v13  ;;  %v3497_v50 = vmul.f32 %v3484_v56, %v8906_v27  ;;  %v3547_v38 = vmul.f32 %v3534_v15, %v8906_v27  ;;  %v3542_v19 = vmul.f32 %v3533_v43, %v8839_v32 }
 0xe64   : > { %v8964_v60 = vpop.permute.xlu0 %4057  ;;  %v8966_v41 = vpop.permute.xlu1 %4008 }
 0xe65   : > { %11437 = vst [vmem:[#allocation21_spill] sm:$0xff] %v8964_v60  ;;  %v3503_v60 = vpack.c.bf16 %v3498_v63, %v3494_v53  ;;  %v3540_v53 = vmul.f32 0.0, %v8685_v34  ;;  %v3502_v45 = vpack.c.bf16 %v3497_v50, %v3493_v35  ;;  %v3546_v34 = vmul.f32 %v3533_v43, %v8844_v29 }
 0xe66   : > { %4685 = vrot.lane.b32.xlu0 %v3501_v14, %s6377_s27  ;;  %4669 = vrot.lane.b32.xlu1 %v3453_v57, %s11435_s10  ;;  %v3543_v14 = vmul.f32 %v3534_v15, %v8900_v13  ;;  %v3583_v35 = vsel %vm845_vm2, %v8727_v17, %v8715_v12  ;;  %v3582_v43 = vsel %vm845_vm2, %v8705_v5, %v8727_v17 }
 0xe67   : > { %v3549_v54 = vpack.c.bf16 %v3540_v53, %v3540_v53  ;;  %v3592_v52 = vmul.f32 %v3583_v35, %v8839_v32  ;;  %v3596_v15 = vmul.f32 %v3583_v35, %v8844_v29  ;;  %v3548_v53 = vmul.f32 %v8717_v31, %v8871_v55 }
 0xe68   : > { %v8980_v20 = vpop.permute.xlu0 %4104  ;;  %v8982_v9 = vpop.permute.xlu1 %4055  ;;  %v3552_v56 = vpack.c.bf16 %v3547_v38, %v3543_v14  ;;  %v3551_v14 = vpack.c.bf16 %v3546_v34, %v3542_v19  ;;  %v3544_v38 = vmul.f32 %v8717_v31, %v8866_v11  ;;  %v3591_v31 = vmul.f32 %v3582_v43, %v8861_v0 }
 0xe69   : > { %11438 = vst [vmem:[#allocation24_spill] sm:$0xff] %v8980_v20  ;;  %v3595_v34 = vmul.f32 %v3582_v43, %v8878_v42 }
 0xe6a   : > { %4689 = vrot.lane.b32.xlu0 %v3503_v60, %s6377_s27  ;;  %4683 = vrot.lane.b32.xlu1 %v3500_v61, %s6377_s27  ;;  %v3590_v61 = vmul.f32 0.0, %v8705_v5  ;;  %v3632_v5 = vsel %vm956_vm5, %v8725_v2, %v8747_v3  ;;  %v3553_v35 = vpack.c.bf16 %v3548_v53, %v3544_v38 }
 0xe6c   : > { %v8993_v57 = vpop.permute.xlu0 %4108  ;;  %v8996_v63 = vpop.permute.xlu1 %4059  ;;  %v3599_v36 = vpack.c.bf16 %v3590_v61, %v3590_v61  ;;  %v3601_v61 = vpack.c.bf16 %v3596_v15, %v3592_v52  ;;  %v3641_v52 = vmul.f32 %v3632_v5, %v8861_v0  ;;  %v3645_v15 = vmul.f32 %v3632_v5, %v8878_v42 }
 0xe6d   : > { %11439 = vst [vmem:[#allocation8_spill] sm:$0xff] %v8993_v57 }
 0xe6e   : > { %4703 = vrot.lane.b32.xlu0 %v3550_v58, %s6374_s24  ;;  %4687 = vrot.lane.b32.xlu1 %v3502_v45, %s6377_s27  ;;  %s11443_s27 = smov 118   ;;  %v3650_v53 = vpack.c.bf16 %v3645_v15, %v3641_v52 }
 0xe70   : > { %v9004_v60 = vpop.permute.xlu0 %4155  ;;  %v9011_v50 = vpop.permute.xlu1 %4106 }
 0xe71   : > { %11440 = vst [vmem:[#allocation18_spill] sm:$0xff] %v9011_v50 }
 0xe72   : > { %4707 = vrot.lane.b32.xlu0 %v3552_v56, %s6374_s24  ;;  %4701 = vrot.lane.b32.xlu1 %v3549_v54, %s6374_s24  ;;  %v3594_v56 = vmul.f32 %v8737_v28, %v8866_v11  ;;  %v3598_v54 = vmul.f32 %v8737_v28, %v8871_v55 }
 0xe74   : > { %v9017_v58 = vpop.permute.xlu0 %4159  ;;  %v9023_v45 = vpop.permute.xlu1 %4110  ;;  %v3603_v43 = vpack.c.bf16 %v3598_v54, %v3594_v56 }
 0xe75   : > { %11441 = vst [vmem:[#allocation11_spill] sm:$0xff] %v9017_v58  ;;  %11442 = vst [vmem:[#allocation25_spill] sm:$0xff] %v9023_v45  ;;  %v3600_v45 = vpack.c.bf16 %v3595_v34, %v3591_v31  ;;  %v3640_v31 = vmul.f32 0.0, %v8725_v2 }
 0xe76   : > { %4721 = vrot.lane.b32.xlu0 %v3599_v36, %s11443_s27  ;;  %4705 = vrot.lane.b32.xlu1 %v3551_v14, %s6374_s24  ;;  %v3584_v36 = vsel %vm845_vm2, %v8715_v12, %v8737_v28  ;;  %v3634_v12 = vsel %vm956_vm5, %v8735_v46, %v8757_v62 }
 0xe77   : > { %v3593_v57 = vmul.f32 %v3584_v36, %v8900_v13  ;;  %v3597_v38 = vmul.f32 %v3584_v36, %v8906_v27  ;;  %v3647_v56 = vmul.f32 %v3634_v12, %v8906_v27  ;;  %v3649_v15 = vpack.c.bf16 %v3640_v31, %v3640_v31 }
 0xe78   : > { %v9034_v19 = vpop.permute.xlu0 %4206  ;;  %v9041_v17 = vpop.permute.xlu1 %4157  ;;  %v3648_v31 = vmul.f32 %v8757_v62, %v8871_v55 }
 0xe79   : > { %v3602_v5 = vpack.c.bf16 %v3597_v38, %v3593_v57  ;;  %v3683_v57 = vsel %vm1067_vm6, %v8767_v8, %v8755_v10 }
 0xe7a   : > { %4725 = vrot.lane.b32.xlu0 %v3601_v61, %s11443_s27  ;;  %4709 = vrot.lane.b32.xlu1 %v3553_v35, %s6374_s24  ;;  %v3643_v61 = vmul.f32 %v3634_v12, %v8900_v13  ;;  %v3633_v35 = vsel %vm956_vm5, %v8747_v3, %v8735_v46  ;;  %s11445_s24 = smov 112   ;;  %v3692_v3 = vmul.f32 %v3683_v57, %v8839_v32 }
 0xe7b   : > { %v3646_v2 = vmul.f32 %v3633_v35, %v8844_v29  ;;  %v3696_v12 = vmul.f32 %v3683_v57, %v8844_v29 }
 0xe7c   : > { %v9050_v14 = vpop.permute.xlu0 %4210  ;;  %v9057_v28 = vpop.permute.xlu1 %4161  ;;  %v3652_v52 = vpack.c.bf16 %v3647_v56, %v3643_v61  ;;  %v3644_v56 = vmul.f32 %v8757_v62, %v8866_v11 }
 0xe7d   : > { %11444 = vst [vmem:[#allocation10_spill] sm:$0xff] %v9057_v28 }
 0xe7e   : > { %4729 = vrot.lane.b32.xlu0 %v3603_v43, %s11443_s27  ;;  %4723 = vrot.lane.b32.xlu1 %v3600_v45, %s11443_s27  ;;  %v3690_v45 = vmul.f32 0.0, %v8745_v39  ;;  %v3642_v43 = vmul.f32 %v3633_v35, %v8839_v32  ;;  %v3682_v35 = vsel %vm1067_vm6, %v8745_v39, %v8767_v8  ;;  %v3732_v39 = vsel %vm1205_vm7, %v8765_v24, %v8791_v30 }
 0xe7f   : > { %v3691_v62 = vmul.f32 %v3682_v35, %v8861_v0  ;;  %v3653_v57 = vpack.c.bf16 %v3648_v31, %v3644_v56 }
 0xe80   : > { %v9063_v54 = vpop.permute.xlu0 %4256  ;;  %v9066_v34 = vpop.permute.xlu1 %4208  ;;  %v3699_v46 = vpack.c.bf16 %v3690_v45, %v3690_v45  ;;  %v3651_v61 = vpack.c.bf16 %v3646_v2, %v3642_v43  ;;  %v3701_v45 = vpack.c.bf16 %v3696_v12, %v3692_v3  ;;  %v3695_v2 = vmul.f32 %v3682_v35, %v8878_v42 }
 0xe81   : > { %v3741_v3 = vmul.f32 %v3732_v39, %v8861_v0  ;;  %v3745_v12 = vmul.f32 %v3732_v39, %v8878_v42 }
 0xe82   : > { %4743 = vrot.lane.b32.xlu0 %v3650_v53, %s11445_s24  ;;  %4727 = vrot.lane.b32.xlu1 %v3602_v5, %s11443_s27  ;;  %v3700_v50 = vpack.c.bf16 %v3695_v2, %v3691_v62  ;;  %v3740_v62 = vmul.f32 0.0, %v8765_v24  ;;  %s6412_s27 = smov 79  }
 0xe83   : > { %v3750_v31 = vpack.c.bf16 %v3745_v12, %v3741_v3 }
 0xe84   : > { %v9074_v36 = vpop.permute.xlu0 %4260  ;;  %v9081_v38 = vpop.permute.xlu1 %4212  ;;  %v3749_v12 = vpack.c.bf16 %v3740_v62, %v3740_v62  ;;  %v3748_v62 = vmul.f32 %v8802_v49, %v8871_v55 }
 0xe86   : > { %4747 = vrot.lane.b32.xlu0 %v3652_v52, %s11445_s24  ;;  %4741 = vrot.lane.b32.xlu1 %v3649_v15, %s11445_s24  ;;  %v3694_v52 = vmul.f32 %v8779_v33, %v8866_v11  ;;  %v3698_v15 = vmul.f32 %v8779_v33, %v8871_v55 }
 0xe88   : > { %v9087_v53 = vpop.permute.xlu0 %4306  ;;  %v9093_v5 = vpop.permute.xlu1 %4258  ;;  %v3703_v35 = vpack.c.bf16 %v3698_v15, %v3694_v52 }
 0xe8a   : > { %4761 = vrot.lane.b32.xlu0 %v3699_v46, %s11446_s17  ;;  %4745 = vrot.lane.b32.xlu1 %v3651_v61, %s11445_s24  ;;  %v3684_v46 = vsel %vm1067_vm6, %v8755_v10, %v8779_v33  ;;  %v3734_v10 = vsel %vm1205_vm7, %v8777_v22, %v8802_v49 }
 0xe8b   : > { %v3693_v20 = vmul.f32 %v3684_v46, %v8900_v13  ;;  %v3697_v56 = vmul.f32 %v3684_v46, %v8906_v27  ;;  %v3747_v52 = vmul.f32 %v3734_v10, %v8906_v27 }
 0xe8c   : > { %v9104_v43 = vpop.permute.xlu0 %4310  ;;  %v9111_v8 = vpop.permute.xlu1 %4262 }
 0xe8d   : > { %v3702_v39 = vpack.c.bf16 %v3697_v56, %v3693_v20  ;;  %v3783_v20 = vsel %vm805_vm8, %v8813_v23, %v8800_v51 }
 0xe8e   : > { %4765 = vrot.lane.b32.xlu0 %v3701_v45, %s11446_s17  ;;  %4749 = vrot.lane.b32.xlu1 %v3653_v57, %s11445_s24  ;;  %v3743_v45 = vmul.f32 %v3734_v10, %v8900_v13  ;;  %v3733_v57 = vsel %vm1205_vm7, %v8791_v30, %v8777_v22  ;;  %v3792_v30 = vmul.f32 %v3783_v20, %v8839_v32  ;;  %s6413_s24 = smov 80  }
 0xe8f   : > { %v3746_v24 = vmul.f32 %v3733_v57, %v8844_v29  ;;  %v3796_v10 = vmul.f32 %v3783_v20, %v8844_v29 }
 0xe90   : > { %v9120_v61 = vpop.permute.xlu0 %4356  ;;  %v9127_v33 = vpop.permute.xlu1 %4308  ;;  %v3752_v3 = vpack.c.bf16 %v3747_v52, %v3743_v45  ;;  %v3744_v52 = vmul.f32 %v8802_v49, %v8866_v11 }
 0xe92   : > { %4769 = vrot.lane.b32.xlu0 %v3703_v35, %s11446_s17  ;;  %4763 = vrot.lane.b32.xlu1 %v3700_v50, %s11446_s17  ;;  %v3790_v50 = vmul.f32 0.0, %v8789_v26  ;;  %v3742_v35 = vmul.f32 %v3733_v57, %v8839_v32  ;;  %v3782_v57 = vsel %vm805_vm8, %v8789_v26, %v8813_v23  ;;  %v3832_v26 = vsel %vm671_vm9, %v8811_v59, %v8830_v40 }
 0xe93   : > { %v3791_v49 = vmul.f32 %v3782_v57, %v8861_v0  ;;  %v3753_v20 = vpack.c.bf16 %v3748_v62, %v3744_v52 }
 0xe94   : > { %v9133_v15 = vpop.permute.xlu0 %4360  ;;  %v9136_v2 = vpop.permute.xlu1 %4312  ;;  %v3799_v22 = vpack.c.bf16 %v3790_v50, %v3790_v50  ;;  %v3751_v45 = vpack.c.bf16 %v3746_v24, %v3742_v35  ;;  %v3801_v50 = vpack.c.bf16 %v3796_v10, %v3792_v30  ;;  %v3795_v24 = vmul.f32 %v3782_v57, %v8878_v42 }
 0xe95   : > { %v3841_v30 = vmul.f32 %v3832_v26, %v8861_v0  ;;  %v3845_v10 = vmul.f32 %v3832_v26, %v8878_v42 }
 0xe96   : > { %4783 = vrot.lane.b32.xlu0 %v3750_v31, %s11447_s9  ;;  %4767 = vrot.lane.b32.xlu1 %v3702_v39, %s11446_s17  ;;  %v3800_v58 = vpack.c.bf16 %v3795_v24, %v3791_v49  ;;  %v3840_v49 = vmul.f32 0.0, %v8811_v59  ;;  %s6414_s17 = smov 81  }
 0xe97   : > { %v3850_v62 = vpack.c.bf16 %v3845_v10, %v3841_v30 }
 0xe98   : > { %v9144_v46 = vpop.permute.xlu0 %4406  ;;  %v9151_v56 = vpop.permute.xlu1 %4358 }
 0xe9a   : > { %4787 = vrot.lane.b32.xlu0 %v3752_v3, %s11447_s9  ;;  %4781 = vrot.lane.b32.xlu1 %v3749_v12, %s11447_s9  ;;  %v3794_v3 = vmul.f32 %v8821_v37, %v8866_v11  ;;  %v3798_v12 = vmul.f32 %v8821_v37, %v8871_v55 }
 0xe9c   : > { %v9157_v31 = vpop.permute.xlu0 %4410  ;;  %v9163_v39 = vpop.permute.xlu1 %4362  ;;  %v3803_v57 = vpack.c.bf16 %v3798_v12, %v3794_v3 }
 0xe9e   : > { %4801 = vrot.lane.b32.xlu0 %v3799_v22, %s6370_s15  ;;  %4785 = vrot.lane.b32.xlu1 %v3751_v45, %s11447_s9  ;;  %v3784_v22 = vsel %vm805_vm8, %v8800_v51, %v8821_v37  ;;  %v3834_v51 = vsel %vm671_vm9, %v8819_v48, %v8852_v16 }
 0xe9f   : > { %v3793_v28 = vmul.f32 %v3784_v22, %v8900_v13  ;;  %v3797_v52 = vmul.f32 %v3784_v22, %v8906_v27  ;;  %v3847_v3 = vmul.f32 %v3834_v51, %v8906_v27 }
 0xea0   : > { %v9174_v35 = vpop.permute.xlu0 %4456  ;;  %v9181_v23 = vpop.permute.xlu1 %4408 }
 0xea1   : > { %v3802_v26 = vpack.c.bf16 %v3797_v52, %v3793_v28  ;;  %v3883_v28 = vsel %vm1541_vm10, %v8886_v18, %v8850_v4 }
 0xea2   : > { %4805 = vrot.lane.b32.xlu0 %v3801_v50, %s6370_s15  ;;  %4789 = vrot.lane.b32.xlu1 %v3753_v20, %s11447_s9  ;;  %v3843_v50 = vmul.f32 %v3834_v51, %v8900_v13  ;;  %v3833_v20 = vsel %vm671_vm9, %v8830_v40, %v8819_v48  ;;  %v3892_v40 = vmul.f32 %v3883_v28, %v8839_v32  ;;  %s6415_s9 = smov 47  }
 0xea3   : > { %v3842_v51 = vmul.f32 %v3833_v20, %v8839_v32  ;;  %v3846_v59 = vmul.f32 %v3833_v20, %v8844_v29 }
 0xea4   : > { %v9190_v45 = vpop.permute.xlu0 %4460  ;;  %v9197_v37 = vpop.permute.xlu1 %4412  ;;  %v3852_v10 = vpack.c.bf16 %v3847_v3, %v3843_v50 }
 0xea5   : > { %v3851_v3 = vpack.c.bf16 %v3846_v59, %v3842_v51  ;;  %v3898_v51 = vmul.f32 %v8912_v44, %v8871_v55 }
 0xea6   : > { %4809 = vrot.lane.b32.xlu0 %v3803_v57, %s6370_s15  ;;  %4803 = vrot.lane.b32.xlu1 %v3800_v58, %s6370_s15  ;;  %v11449_v58 = vld [vmem:[#allocation17_spill] sm:$0xff]  ;;  %v3849_v57 = vpack.c.bf16 %v3840_v49, %v3840_v49  ;;  %v3844_v49 = vmul.f32 %v8852_v16, %v8866_v11 }
 0xea7   : > { %v3890_v22 = vmul.f32 0.0, %v11449_v58 }
 0xea8   : > { %v9203_v12 = vpop.permute.xlu0 %4506  ;;  %v9206_v24 = vpop.permute.xlu1 %4458 }
 0xea9   : > { %11448 = vst [vmem:[#allocation9_spill] sm:$0xff] %v9203_v12  ;;  %v3899_v48 = vpack.c.bf16 %v3890_v22, %v3890_v22 }
 0xeaa   : > { %4823 = vrot.lane.b32.xlu0 %v3850_v62, %s6368_s14  ;;  %4807 = vrot.lane.b32.xlu1 %v3802_v26, %s6370_s15  ;;  %v3896_v62 = vmul.f32 %v3883_v28, %v8844_v29  ;;  %v3848_v26 = vmul.f32 %v8852_v16, %v8871_v55 }
 0xeac   : > { %v9214_v30 = vpop.permute.xlu0 %4510  ;;  %v9221_v52 = vpop.permute.xlu1 %4462  ;;  %v3901_v22 = vpack.c.bf16 %v3896_v62, %v3892_v40  ;;  %v3884_v40 = vsel %vm1541_vm10, %v8850_v4, %v8912_v44 }
 0xead   : > { %11450 = vst [vmem:[#allocation12_spill] sm:$0xff] %v9214_v30 }
 0xeae   : > { %4827 = vrot.lane.b32.xlu0 %v3852_v10, %s6368_s14  ;;  %4821 = vrot.lane.b32.xlu1 %v3849_v57, %s6368_s14  ;;  %v3882_v10 = vsel %vm1541_vm10, %v11449_v58, %v8886_v18  ;;  %v3894_v57 = vmul.f32 %v8912_v44, %v8866_v11  ;;  %v3932_v18 = vsel %vm449_vm11, %v8884_v1, %v8925_v6  ;;  %vm4010_vm10 = vcmask 7168  }
 0xeaf   : > { %v3891_v16 = vmul.f32 %v3882_v10, %v8861_v0  ;;  %v3895_v28 = vmul.f32 %v3882_v10, %v8878_v42  ;;  %v3941_v62 = vmul.f32 %v3932_v18, %v8861_v0 }
 0xeb0   : > { %v9227_v50 = vpop.permute.xlu0 %4556  ;;  %v9233_v20 = vpop.permute.xlu1 %4508  ;;  %v3903_v30 = vpack.c.bf16 %v3898_v51, %v3894_v57 }
 0xeb1   : > { %11451 = vst [vmem:[#allocation23_spill] sm:$0xff] %v9233_v20  ;;  %v3900_v12 = vpack.c.bf16 %v3895_v28, %v3891_v16  ;;  %v3893_v20 = vmul.f32 %v3884_v40, %v8900_v13  ;;  %v3940_v16 = vmul.f32 0.0, %v8884_v1 }
 0xeb2   : > { %4841 = vrot.lane.b32.xlu0 %v3899_v48, %s11452_s13  ;;  %4825 = vrot.lane.b32.xlu1 %v3851_v3, %s6368_s14  ;;  %v3853_v48 = vpack.c.bf16 %v3848_v26, %v3844_v49  ;;  %v3945_v3 = vmul.f32 %v3932_v18, %v8878_v42  ;;  %v3897_v49 = vmul.f32 %v3884_v40, %v8906_v27  ;;  %v11454_v26 = vld [vmem:[#allocation20_spill] sm:$0xff] }
 0xeb3   : > { %v3934_v4 = vsel %vm449_vm11, %v11454_v26, %v8936_v21  ;;  %v3933_v40 = vsel %vm449_vm11, %v8925_v6, %v11454_v26 }
 0xeb4   : > { %v9244_v59 = vpop.permute.xlu0 %4560  ;;  %v9251_v58 = vpop.permute.xlu1 %4512  ;;  %v3943_v18 = vmul.f32 %v3934_v4, %v8900_v13  ;;  %v3947_v57 = vmul.f32 %v3934_v4, %v8906_v27  ;;  %v3946_v6 = vmul.f32 %v3933_v40, %v8844_v29 }
 0xeb5   : > { %11453 = vst [vmem:[#allocation26_spill] sm:$0xff] %v9251_v58 }
 0xeb6   : > { %4845 = vrot.lane.b32.xlu0 %v3901_v22, %s11452_s13  ;;  %4829 = vrot.lane.b32.xlu1 %v3853_v48, %s6368_s14  ;;  %v3950_v22 = vpack.c.bf16 %v3945_v3, %v3941_v62  ;;  %v3902_v48 = vpack.c.bf16 %v3897_v49, %v3893_v20  ;;  %v3952_v1 = vpack.c.bf16 %v3947_v57, %v3943_v18 }
 0xeb7   : > { %v3949_v20 = vpack.c.bf16 %v3940_v16, %v3940_v16  ;;  %v3942_v49 = vmul.f32 %v3933_v40, %v8839_v32 }
 0xeb8   : > { %v9260_v10 = vpop.permute.xlu0 %4606  ;;  %v9267_v44 = vpop.permute.xlu1 %4558 }
 0xeb9   : > { %v3951_v40 = vpack.c.bf16 %v3946_v6, %v3942_v49  ;;  %v4019_v49 = vmul.f32 %v8923_v47, %v8861_v0 }
 0xeba   : > { %4849 = vrot.lane.b32.xlu0 %v3903_v30, %s11452_s13  ;;  %4843 = vrot.lane.b32.xlu1 %v3900_v12, %s11452_s13  ;;  %v6347_v12 = vld [vmem:[%s10778_s1 + $0x20] sm:$0xff] }
 0xebb   : > { %v11455_v30 = vld [vmem:[#allocation14_spill] sm:$0xff] }
 0xebc   : > { %v9273_v51 = vpop.permute.xlu0 %4610  ;;  %v9276_v28 = vpop.permute.xlu1 %4562  ;;  %v3957_v62 = vrot.slane %v6347_v12, %v11455_v30 }
 0xebe   : > { %4863 = vrot.lane.b32.xlu0 %v3950_v22, %s6364_s12  ;;  %4847 = vrot.lane.b32.xlu1 %v3902_v48, %s11452_s13  ;;  %v3974_v4 = vmul.f32 %v3957_v62, %v8878_v42  ;;  %v3970_v22 = vmul.f32 %v3957_v62, %v8861_v0  ;;  %v6348_v48 = vld [vmem:[%s10778_s1 + $0x30] sm:$0xff]  ;;  %v3948_v62 = vmul.f32 %v8936_v21, %v8871_v55 }
 0xebf   : > { %v3965_v12 = vrot.slane %v6348_v48, %v11455_v30 }
 0xec0   : > { %v9287_v3 = vpop.permute.xlu0 %4641  ;;  %v9292_v26 = vpop.permute.xlu1 %4608  ;;  %v3978_v57 = vpack.c.bf16 %v3974_v4, %v3970_v22  ;;  %v6349_v4 = vld [vmem:[%s10778_s1 + $0x28] sm:$0xff] }
 0xec1   : > { %11456 = vst [vmem:[#allocation31_spill] sm:$0xff] %v9287_v3  ;;  %v3976_v16 = vmul.f32 %v3965_v12, %v8906_v27  ;;  %v3944_v3 = vmul.f32 %v8936_v21, %v8866_v11  ;;  %v3972_v48 = vmul.f32 %v3965_v12, %v8900_v13  ;;  %v4024_v21 = vmul.f32 %v8923_v47, %v8878_v42 }
 0xec2   : > { %4867 = vrot.lane.b32.xlu0 %v3952_v1, %s6364_s12  ;;  %4861 = vrot.lane.b32.xlu1 %v3949_v20, %s6364_s12  ;;  %v3961_v20 = vrot.slane %v6349_v4, %v11455_v30  ;;  %v4012_v12 = vsel %vm4010_vm10, %v8949_v7, %v8934_v25 }
 0xec3   : > { %v3980_v22 = vpack.c.bf16 %v3976_v16, %v3972_v48  ;;  %v4021_v48 = vmul.f32 %v4012_v12, %v8900_v13  ;;  %v4026_v58 = vmul.f32 %v4012_v12, %v8906_v27 }
 0xec4   : > { %v9301_v18 = vpop.permute.xlu0 %4645  ;;  %v9308_v1 = vpop.permute.xlu1 %4612  ;;  %v3971_v4 = vmul.f32 %v3961_v20, %v8839_v32 }
 0xec5   : > { %11457 = vst [vmem:[#allocation34_spill] sm:$0xff] %v9301_v18  ;;  %v3975_v18 = vmul.f32 %v3961_v20, %v8844_v29  ;;  %v4011_v20 = vsel %vm4010_vm10, %v8923_v47, %v8949_v7 }
 0xec6   : > { %4880 = vrot.lane.b32.xlu0 %v3978_v57, %s6363_s11  ;;  %4865 = vrot.lane.b32.xlu1 %v3951_v40, %s6364_s12  ;;  %v3953_v40 = vpack.c.bf16 %v3948_v62, %v3944_v3  ;;  %v4028_v3 = vpack.c.bf16 %v4024_v21, %v4019_v49  ;;  %v4023_v49 = vmul.f32 0.0, %v8966_v41  ;;  %v4025_v12 = vmul.f32 %v4011_v20, %v8844_v29 }
 0xec8   : > { %v9321_v6 = vpop.permute.xlu0 %4649  ;;  %v9326_v57 = vpop.permute.xlu1 %4643 }
 0xec9   : > { %11458 = vst [vmem:[#allocation35_spill] sm:$0xff] %v9321_v6  ;;  %11459 = vst [vmem:[#allocation33_spill] sm:$0xff] %v9326_v57  ;;  %v6350_v6 = vld [vmem:[%s10778_s1 + $0x38] sm:$0xff] }
 0xeca   : > { %4884 = vrot.lane.b32.xlu0 %v3980_v22, %s6363_s11  ;;  %4869 = vrot.lane.b32.xlu1 %v3953_v40, %s6364_s12  ;;  %v3969_v16 = vrot.slane %v6350_v6, %v11455_v30  ;;  %v3979_v22 = vpack.c.bf16 %v3975_v18, %v3971_v4  ;;  %s6410_s12 = smov 54   ;;  %v4030_v6 = vpack.c.bf16 %v4026_v58, %v4021_v48  ;;  %v11463_v4 = vld [vmem:[#allocation16_spill] sm:$0xff] }
 0xecb   : > { %v4020_v18 = vmul.f32 %v4011_v20, %v8839_v32  ;;  %v4062_v47 = vsel %vm4061_vm13, %v11463_v4, %v8982_v9  ;;  %v4032_v58 = vpack.c.bf16 %v4023_v49, %v4023_v49 }
 0xecc   : > { %v9338_v57 = vpop.permute.xlu0 %4663  ;;  %v9340_v62 = vpop.permute.xlu1 %4647  ;;  %v3977_v40 = vmul.f32 %v3969_v16, %v8871_v55  ;;  %v3973_v30 = vmul.f32 %v3969_v16, %v8866_v11  ;;  %v4013_v16 = vsel %vm4010_vm10, %v8934_v25, %v8966_v41  ;;  %v4071_v48 = vmul.f32 %v4062_v47, %v8839_v32 }
 0xecd   : > { %11460 = vst [vmem:[#allocation30_spill] sm:$0xff] %v9338_v57  ;;  %11461 = vst [vmem:[#allocation28_spill] sm:$0xff] %v9340_v62  ;;  %v4029_v62 = vpack.c.bf16 %v4025_v12, %v4020_v18  ;;  %v4070_v12 = vmul.f32 %v11463_v4, %v8861_v0  ;;  %vm4986_vm10 = vcmask 654336  }
 0xece   : > { %4897 = vrot.lane.b32.xlu0 %v4028_v3, %s6410_s12  ;;  %4882 = vrot.lane.b32.xlu1 %v3979_v22, %s6363_s11  ;;  %v3981_v3 = vpack.c.bf16 %v3977_v40, %v3973_v30  ;;  %v4076_v22 = vmul.f32 %v4062_v47, %v8844_v29  ;;  %v4027_v40 = vmul.f32 %v4013_v16, %v8871_v55  ;;  %v11465_v30 = vld [vmem:[#allocation21_spill] sm:$0xff] }
 0xecf   : > { %v4064_v25 = vsel %vm4061_vm13, %v11465_v30, %v8996_v63 }
 0xed0   : > { %v9350_v21 = vpop.permute.xlu0 %4667  ;;  %v9357_v7 = vpop.permute.xlu1 %4661  ;;  %v4073_v49 = vmul.f32 %v4064_v25, %v8866_v11  ;;  %v4078_v47 = vmul.f32 %v4064_v25, %v8871_v55 }
 0xed1   : > { %11462 = vst [vmem:[#allocation27_spill] sm:$0xff] %v9350_v21  ;;  %11464 = vst [vmem:[#allocation32_spill] sm:$0xff] %v9357_v7  ;;  %v4022_v21 = vmul.f32 %v4013_v16, %v8866_v11 }
 0xed2   : > { %4901 = vrot.lane.b32.xlu0 %v4030_v6, %s6410_s12  ;;  %4886 = vrot.lane.b32.xlu1 %v3981_v3, %s6363_s11  ;;  %v4080_v6 = vpack.c.bf16 %v4076_v22, %v4071_v48  ;;  %v4075_v3 = vmul.f32 %v11463_v4, %v8878_v42  ;;  %s6411_s11 = smov 48   ;;  %v4082_v48 = vpack.c.bf16 %v4078_v47, %v4073_v49 }
 0xed3   : > { %v4031_v16 = vpack.c.bf16 %v4027_v40, %v4022_v21 }
 0xed4   : > { %v9366_v20 = vpop.permute.xlu0 %4681  ;;  %v9373_v41 = vpop.permute.xlu1 %4665 }
 0xed5   : > { %11466 = vst [vmem:[#allocation29_spill] sm:$0xff] %v9373_v41 }
 0xed6   : > { %4905 = vrot.lane.b32.xlu0 %v4032_v58, %s6410_s12  ;;  %4899 = vrot.lane.b32.xlu1 %v4029_v62, %s6410_s12  ;;  %v4464_v58 = vsel %vm845_vm2, %v9174_v35, %v9206_v24  ;;  %v4063_v62 = vsel %vm4061_vm13, %v8982_v9, %v11465_v30  ;;  %v4466_v9 = vsel %vm845_vm2, %v9190_v45, %v9221_v52  ;;  %vm5006_vm13 = vcmask 646144  }
 0xed7   : > { %v4473_v22 = vmul.f32 %v4464_v58, %v8839_v32  ;;  %v4478_v21 = vmul.f32 %v4464_v58, %v8844_v29  ;;  %v4072_v40 = vmul.f32 %v4063_v62, %v8900_v13  ;;  %v4077_v25 = vmul.f32 %v4063_v62, %v8906_v27 }
 0xed8   : > { %v9379_v18 = vpop.permute.xlu0 %4685  ;;  %v9388_v7 = vpop.permute.xlu1 %4669  ;;  %v4475_v47 = vmul.f32 %v4466_v9, %v8866_v11  ;;  %v4472_v62 = vmul.f32 %v9174_v35, %v8861_v0 }
 0xed9   : > { %11467 = vst [vmem:[#allocation36_spill] sm:$0xff] %v9388_v7  ;;  %v4482_v49 = vpack.c.bf16 %v4478_v21, %v4473_v22  ;;  %v4081_v7 = vpack.c.bf16 %v4077_v25, %v4072_v40  ;;  %v4416_v25 = vsel %vm11042_vm1, %v9157_v31, %v9197_v37 }
 0xeda   : > { %4919 = vrot.lane.b32.xlu0 %v4080_v6, %s6411_s11  ;;  %4903 = vrot.lane.b32.xlu1 %v4031_v16, %s6410_s12  ;;  %v4079_v6 = vpack.c.bf16 %v4075_v3, %v4070_v12  ;;  %v4480_v16 = vmul.f32 %v4466_v9, %v8871_v55  ;;  %v4414_v12 = vsel %vm11042_vm1, %v9144_v46, %v9181_v23 }
 0xedb   : > { %v4423_v22 = vmul.f32 %v4414_v12, %v8839_v32  ;;  %v4428_v21 = vmul.f32 %v4414_v12, %v8844_v29  ;;  %v4422_v12 = vmul.f32 %v9144_v46, %v8861_v0 }
 0xedc   : > { %v9397_v4 = vpop.permute.xlu0 %4689  ;;  %v9404_v30 = vpop.permute.xlu1 %4683  ;;  %v4484_v40 = vpack.c.bf16 %v4480_v16, %v4475_v47  ;;  %v4430_v47 = vmul.f32 %v4416_v25, %v8871_v55 }
 0xedd   : > { %11468 = vst [vmem:[#allocation40_spill] sm:$0xff] %v9397_v4  ;;  %v4477_v4 = vmul.f32 %v9174_v35, %v8878_v42 }
 0xede   : > { %4923 = vrot.lane.b32.xlu0 %v4082_v48, %s6411_s11  ;;  %4917 = vrot.lane.b32.xlu1 %v4079_v6, %s6411_s11  ;;  %v4465_v48 = vsel %vm845_vm2, %v9206_v24, %v9190_v45 }
 0xedf   : > { %v4474_v9 = vmul.f32 %v4465_v48, %v8900_v13  ;;  %v4479_v6 = vmul.f32 %v4465_v48, %v8906_v27  ;;  %v4481_v24 = vpack.c.bf16 %v4477_v4, %v4472_v62  ;;  %v4427_v48 = vmul.f32 %v9144_v46, %v8878_v42 }
 0xee0   : > { %v9410_v58 = vpop.permute.xlu0 %4703  ;;  %v9419_v3 = vpop.permute.xlu1 %4687  ;;  %v4364_v4 = vsel %vm593_vm4, %v9120_v61, %v9151_v56 }
 0xee1   : > { %v4483_v62 = vpack.c.bf16 %v4479_v6, %v4474_v9  ;;  %v4366_v9 = vsel %vm593_vm4, %v9133_v15, %v9163_v39 }
 0xee2   : > { %5058 = vrot.lane.b32.xlu0 %v4482_v49, %s6378_s28  ;;  %4921 = vrot.lane.b32.xlu1 %v4081_v7, %s6411_s11  ;;  %v4432_v7 = vpack.c.bf16 %v4428_v21, %v4423_v22  ;;  %v4425_v49 = vmul.f32 %v4416_v25, %v8866_v11  ;;  %v4415_v22 = vsel %vm11042_vm1, %v9181_v23, %v9157_v31 }
 0xee3   : > { %v4373_v21 = vmul.f32 %v4364_v4, %v8839_v32  ;;  %v4378_v25 = vmul.f32 %v4364_v4, %v8844_v29  ;;  %v4424_v6 = vmul.f32 %v4415_v22, %v8900_v13  ;;  %v4429_v57 = vmul.f32 %v4415_v22, %v8906_v27 }
 0xee4   : > { %v9428_v35 = vpop.permute.xlu0 %4707  ;;  %v9435_v45 = vpop.permute.xlu1 %4701  ;;  %v4434_v46 = vpack.c.bf16 %v4430_v47, %v4425_v49  ;;  %v4431_v23 = vpack.c.bf16 %v4427_v48, %v4422_v12  ;;  %v4375_v49 = vmul.f32 %v4366_v9, %v8866_v11  ;;  %v4380_v47 = vmul.f32 %v4366_v9, %v8871_v55 }
 0xee5   : > { %v4377_v22 = vmul.f32 %v9120_v61, %v8878_v42  ;;  %v4314_v12 = vsel %vm482_vm3, %v9087_v53, %v9127_v33  ;;  %v4433_v48 = vpack.c.bf16 %v4429_v57, %v4424_v6  ;;  %v4316_v57 = vsel %vm482_vm3, %v9104_v43, %v9136_v2 }
 0xee6   : > { %5062 = vrot.lane.b32.xlu0 %v4484_v40, %s6378_s28  ;;  %5056 = vrot.lane.b32.xlu1 %v4481_v24, %s6378_s28  ;;  %v4328_v9 = vmul.f32 %v4314_v12, %v8844_v29 }
 0xee8   : > { %v9441_v16 = vpop.permute.xlu0 %4721  ;;  %v9450_v40 = vpop.permute.xlu1 %4705 }
 0xeea   : > { %5038 = vrot.lane.b32.xlu0 %v4432_v7, %s6381_s30  ;;  %5060 = vrot.lane.b32.xlu1 %v4483_v62, %s6378_s28  ;;  %v4382_v7 = vpack.c.bf16 %v4378_v25, %v4373_v21  ;;  %v4372_v62 = vmul.f32 %v9120_v61, %v8861_v0  ;;  %v4365_v21 = vsel %vm593_vm4, %v9151_v56, %v9133_v15 }
 0xeeb   : > { %v4323_v25 = vmul.f32 %v4314_v12, %v8839_v32  ;;  %v4384_v61 = vpack.c.bf16 %v4380_v47, %v4375_v49  ;;  %v4374_v6 = vmul.f32 %v4365_v21, %v8900_v13  ;;  %v4325_v49 = vmul.f32 %v4316_v57, %v8866_v11 }
 0xeec   : > { %v9459_v24 = vpop.permute.xlu0 %4725  ;;  %v9466_v31 = vpop.permute.xlu1 %4709  ;;  %v4381_v56 = vpack.c.bf16 %v4377_v22, %v4372_v62  ;;  %v4330_v47 = vmul.f32 %v4316_v57, %v8871_v55  ;;  %v4264_v62 = vsel %vm11035_vm0, %v9063_v54, %v9093_v5 }
 0xeed   : > { %11469 = vst [vmem:[#allocation38_spill] sm:$0xff] %v9466_v31  ;;  %v4379_v31 = vmul.f32 %v4365_v21, %v8906_v27  ;;  %v4327_v21 = vmul.f32 %v9087_v53, %v8878_v42 }
 0xeee   : > { %5042 = vrot.lane.b32.xlu0 %v4434_v46, %s6381_s30  ;;  %5036 = vrot.lane.b32.xlu1 %v4431_v23, %s6381_s30  ;;  %v4334_v57 = vpack.c.bf16 %v4330_v47, %v4325_v49 }
 0xeef   : > { %v4383_v22 = vpack.c.bf16 %v4379_v31, %v4374_v6  ;;  %v4266_v31 = vsel %vm11035_vm0, %v9074_v36, %v9111_v8 }
 0xef0   : > { %v9472_v4 = vpop.permute.xlu0 %4729  ;;  %v9481_v46 = vpop.permute.xlu1 %4723  ;;  %v4275_v49 = vmul.f32 %v4266_v31, %v8866_v11  ;;  %v4280_v47 = vmul.f32 %v4266_v31, %v8871_v55 }
 0xef1   : > { %11470 = vst [vmem:[#allocation42_spill] sm:$0xff] %v9472_v4  ;;  %v4272_v4 = vmul.f32 %v9063_v54, %v8861_v0 }
 0xef2   : > { %5018 = vrot.lane.b32.xlu0 %v4382_v7, %s6384_s29  ;;  %5040 = vrot.lane.b32.xlu1 %v4433_v48, %s6381_s30  ;;  %v4332_v7 = vpack.c.bf16 %v4328_v9, %v4323_v25  ;;  %v4322_v48 = vmul.f32 %v9087_v53, %v8861_v0  ;;  %v4315_v25 = vsel %vm482_vm3, %v9127_v33, %v9104_v43  ;;  %vm4163_vm3 = vcmask 72704  }
 0xef3   : > { %v4273_v9 = vmul.f32 %v4264_v62, %v8839_v32  ;;  %v4278_v53 = vmul.f32 %v4264_v62, %v8844_v29  ;;  %v4324_v6 = vmul.f32 %v4315_v25, %v8900_v13  ;;  %v4329_v43 = vmul.f32 %v4315_v25, %v8906_v27 }
 0xef4   : > { %v9490_v23 = vpop.permute.xlu0 %4743  ;;  %v9497_v15 = vpop.permute.xlu1 %4727  ;;  %v4277_v25 = vmul.f32 %v9063_v54, %v8878_v42  ;;  %v4284_v31 = vpack.c.bf16 %v4280_v47, %v4275_v49 }
 0xef6   : > { %5022 = vrot.lane.b32.xlu0 %v4384_v61, %s6384_s29  ;;  %5016 = vrot.lane.b32.xlu1 %v4381_v56, %s6384_s29 }
 0xef8   : > { %v9503_v12 = vpop.permute.xlu0 %4747  ;;  %v9512_v61 = vpop.permute.xlu1 %4741 }
 0xefa   : > { %4998 = vrot.lane.b32.xlu0 %v4332_v7, %s6412_s27  ;;  %5020 = vrot.lane.b32.xlu1 %v4383_v22, %s6384_s29  ;;  %v4331_v7 = vpack.c.bf16 %v4327_v21, %v4322_v48  ;;  %v4282_v22 = vpack.c.bf16 %v4278_v53, %v4273_v9  ;;  %v4214_v48 = vsel %vm300_vm12, %v9034_v19, %v9066_v34 }
 0xefb   : > { %v4333_v21 = vpack.c.bf16 %v4329_v43, %v4324_v6  ;;  %v4265_v9 = vsel %vm11035_vm0, %v9093_v5, %v9074_v36  ;;  %v4223_v53 = vmul.f32 %v4214_v48, %v8839_v32  ;;  %v4228_v54 = vmul.f32 %v4214_v48, %v8844_v29 }
 0xefc   : > { %v9521_v56 = vpop.permute.xlu0 %4761  ;;  %v9528_v33 = vpop.permute.xlu1 %4745  ;;  %v4216_v6 = vsel %vm300_vm12, %v9050_v14, %v9081_v38  ;;  %v4274_v43 = vmul.f32 %v4265_v9, %v8900_v13  ;;  %v4279_v36 = vmul.f32 %v4265_v9, %v8906_v27  ;;  %v4227_v9 = vmul.f32 %v9034_v19, %v8878_v42 }
 0xefd   : > { %v4232_v48 = vpack.c.bf16 %v4228_v54, %v4223_v53  ;;  %v4225_v49 = vmul.f32 %v4216_v6, %v8866_v11  ;;  %v4230_v47 = vmul.f32 %v4216_v6, %v8871_v55  ;;  %v4215_v53 = vsel %vm300_vm12, %v9066_v34, %v9050_v14 }
 0xefe   : > { %5002 = vrot.lane.b32.xlu0 %v4334_v57, %s6412_s27  ;;  %4996 = vrot.lane.b32.xlu1 %v4331_v7, %s6412_s27  ;;  %v4229_v14 = vmul.f32 %v4215_v53, %v8906_v27  ;;  %vm4112_vm0 = vcmask 64512  }
 0xeff   : > { %v4234_v6 = vpack.c.bf16 %v4230_v47, %v4225_v49 }
 0xf00   : > { %v9534_v62 = vpop.permute.xlu0 %4765  ;;  %v9543_v57 = vpop.permute.xlu1 %4749 }
 0xf01   : > { %11471 = vst [vmem:[#allocation37_spill] sm:$0xff] %v9543_v57  ;;  %v4222_v57 = vmul.f32 %v9034_v19, %v8861_v0 }
 0xf02   : > { %4978 = vrot.lane.b32.xlu0 %v4282_v22, %s6413_s24  ;;  %5000 = vrot.lane.b32.xlu1 %v4333_v21, %s6412_s27  ;;  %v4281_v22 = vpack.c.bf16 %v4277_v25, %v4272_v4  ;;  %v4164_v4 = vsel %vm4163_vm3, %v9004_v60, %v9041_v17  ;;  %v4283_v25 = vpack.c.bf16 %v4279_v36, %v4274_v43  ;;  %v11476_v43 = vld [vmem:[#allocation11_spill] sm:$0xff] }
 0xf03   : > { %v4173_v54 = vmul.f32 %v4164_v4, %v8839_v32  ;;  %v4178_v19 = vmul.f32 %v4164_v4, %v8844_v29 }
 0xf04   : > { %v9552_v7 = vpop.permute.xlu0 %4769  ;;  %v9559_v5 = vpop.permute.xlu1 %4763 }
 0xf05   : > { %11472 = vst [vmem:[#allocation41_spill] sm:$0xff] %v9552_v7  ;;  %v4224_v7 = vmul.f32 %v4215_v53, %v8900_v13  ;;  %v4177_v53 = vmul.f32 %v9004_v60, %v8878_v42 }
 0xf06   : > { %4982 = vrot.lane.b32.xlu0 %v4284_v31, %s6413_s24  ;;  %4976 = vrot.lane.b32.xlu1 %v4281_v22, %s6413_s24 }
 0xf07   : > { %v4233_v41 = vpack.c.bf16 %v4229_v14, %v4224_v7 }
 0xf08   : > { %v9565_v21 = vpop.permute.xlu0 %4783  ;;  %v9574_v31 = vpop.permute.xlu1 %4767 }
 0xf09   : > { %11473 = vst [vmem:[#allocation44_spill] sm:$0xff] %v9565_v21  ;;  %v11475_v21 = vld [vmem:[#allocation10_spill] sm:$0xff] }
 0xf0a   : > { %4958 = vrot.lane.b32.xlu0 %v4232_v48, %s6414_s17  ;;  %4980 = vrot.lane.b32.xlu1 %v4283_v25, %s6413_s24  ;;  %v4166_v36 = vsel %vm4163_vm3, %v11476_v43, %v11475_v21  ;;  %v4231_v48 = vpack.c.bf16 %v4227_v9, %v4222_v57  ;;  %v4182_v25 = vpack.c.bf16 %v4178_v19, %v4173_v54 }
 0xf0b   : > { %v4175_v49 = vmul.f32 %v4166_v36, %v8866_v11  ;;  %v4180_v47 = vmul.f32 %v4166_v36, %v8871_v55  ;;  %v4614_v57 = vsel %vm1205_vm7, %v9260_v10, %v9292_v26  ;;  %v4165_v54 = vsel %vm4163_vm3, %v9041_v17, %v11476_v43 }
 0xf0c   : > { %v9583_v22 = vpop.permute.xlu0 %4787  ;;  %v9590_v34 = vpop.permute.xlu1 %4781  ;;  %v4174_v36 = vmul.f32 %v4165_v54, %v8900_v13  ;;  %v4179_v14 = vmul.f32 %v4165_v54, %v8906_v27  ;;  %v4622_v54 = vmul.f32 %v9260_v10, %v8861_v0  ;;  %vm4966_vm3 = vcmask 662528  }
 0xf0d   : > { %11474 = vst [vmem:[#allocation45_spill] sm:$0xff] %v9583_v22  ;;  %11477 = vst [vmem:[#allocation43_spill] sm:$0xff] %v9590_v34  ;;  %v4172_v22 = vmul.f32 %v9004_v60, %v8861_v0  ;;  %v4184_v19 = vpack.c.bf16 %v4180_v47, %v4175_v49  ;;  %v4628_v60 = vmul.f32 %v4614_v57, %v8844_v29 }
 0xf0e   : > { %4962 = vrot.lane.b32.xlu0 %v4234_v6, %s6414_s17  ;;  %4956 = vrot.lane.b32.xlu1 %v4231_v48, %s6414_s17  ;;  %v4623_v6 = vmul.f32 %v4614_v57, %v8839_v32  ;;  %v4616_v48 = vsel %vm1205_vm7, %v9273_v51, %v9308_v1  ;;  %v4183_v57 = vpack.c.bf16 %v4179_v14, %v4174_v36 }
 0xf0f   : > { %v4181_v43 = vpack.c.bf16 %v4177_v53, %v4172_v22  ;;  %v4630_v49 = vmul.f32 %v4616_v48, %v8871_v55  ;;  %v4627_v34 = vmul.f32 %v9260_v10, %v8878_v42  ;;  %v4564_v22 = vsel %vm1067_vm6, %v9227_v50, %v9267_v44 }
 0xf10   : > { %v9596_v4 = vpop.permute.xlu0 %4801  ;;  %v9605_v9 = vpop.permute.xlu1 %4785  ;;  %v4566_v14 = vsel %vm1067_vm6, %v9244_v59, %v9276_v28 }
 0xf11   : > { %11478 = vst [vmem:[#allocation39_spill] sm:$0xff] %v9596_v4  ;;  %11479 = vst [vmem:[#allocation46_spill] sm:$0xff] %v9605_v9  ;;  %v11491_v9 = vld [vmem:[#allocation26_spill] sm:$0xff]  ;;  %v11492_v4 = vld [vmem:[#allocation12_spill] sm:$0xff] }
 0xf12   : > { %4939 = vrot.lane.b32.xlu0 %v4182_v25, %s6373_s23  ;;  %4960 = vrot.lane.b32.xlu1 %v4233_v41, %s6414_s17  ;;  %v4632_v41 = vpack.c.bf16 %v4628_v60, %v4623_v6  ;;  %v4625_v25 = vmul.f32 %v4616_v48, %v8866_v11  ;;  %v4573_v6 = vmul.f32 %v4564_v22, %v8839_v32 }
 0xf13   : > { %v4578_v60 = vmul.f32 %v4564_v22, %v8844_v29  ;;  %v4572_v22 = vmul.f32 %v9227_v50, %v8861_v0 }
 0xf14   : > { %v9614_v7 = vpop.permute.xlu0 %4805  ;;  %v9621_v17 = vpop.permute.xlu1 %4789  ;;  %v4634_v36 = vpack.c.bf16 %v4630_v49, %v4625_v25  ;;  %v4575_v25 = vmul.f32 %v4566_v14, %v8866_v11  ;;  %v4580_v49 = vmul.f32 %v4566_v14, %v8871_v55 }
 0xf15   : > { %11480 = vst [vmem:[#allocation50_spill] sm:$0xff] %v9614_v7  ;;  %11481 = vst [vmem:[#allocation48_spill] sm:$0xff] %v9621_v17  ;;  %v11487_v17 = vld [vmem:[#allocation23_spill] sm:$0xff] }
 0xf16   : > { %4943 = vrot.lane.b32.xlu0 %v4184_v19, %s6373_s23  ;;  %4937 = vrot.lane.b32.xlu1 %v4181_v43, %s6373_s23  ;;  %v4615_v19 = vsel %vm1205_vm7, %v9292_v26, %v9273_v51  ;;  %v4631_v26 = vpack.c.bf16 %v4627_v34, %v4622_v54 }
 0xf17   : > { %v4624_v48 = vmul.f32 %v4615_v19, %v8900_v13  ;;  %v4629_v43 = vmul.f32 %v4615_v19, %v8906_v27  ;;  %v4577_v19 = vmul.f32 %v9227_v50, %v8878_v42  ;;  %v4584_v50 = vpack.c.bf16 %v4580_v49, %v4575_v25 }
 0xf18   : > { %v9627_v47 = vpop.permute.xlu0 %4809  ;;  %v9636_v53 = vpop.permute.xlu1 %4803 }
 0xf19   : > { %11482 = vst [vmem:[#allocation52_spill] sm:$0xff] %v9627_v47  ;;  %11483 = vst [vmem:[#allocation47_spill] sm:$0xff] %v9636_v53  ;;  %v11488_v47 = vld [vmem:[#allocation9_spill] sm:$0xff]  ;;  %v4633_v54 = vpack.c.bf16 %v4629_v43, %v4624_v48  ;;  %v4516_v48 = vsel %vm956_vm5, %v11492_v4, %v11491_v9 }
 0xf1a   : > { %5117 = vrot.lane.b32.xlu0 %v4632_v41, %s6368_s14  ;;  %4941 = vrot.lane.b32.xlu1 %v4183_v57, %s6373_s23  ;;  %v4582_v41 = vpack.c.bf16 %v4578_v60, %v4573_v6  ;;  %v4514_v34 = vsel %vm956_vm5, %v11488_v47, %v11487_v17  ;;  %v4565_v6 = vsel %vm1067_vm6, %v9267_v44, %v9244_v59 }
 0xf1b   : > { %v4523_v60 = vmul.f32 %v4514_v34, %v8839_v32  ;;  %v4528_v14 = vmul.f32 %v4514_v34, %v8844_v29  ;;  %v4574_v43 = vmul.f32 %v4565_v6, %v8900_v13  ;;  %v4581_v44 = vpack.c.bf16 %v4577_v19, %v4572_v22 }
 0xf1c   : > { %v9645_v10 = vpop.permute.xlu0 %4823  ;;  %v9652_v51 = vpop.permute.xlu1 %4807  ;;  %v4525_v25 = vmul.f32 %v4516_v48, %v8866_v11  ;;  %v4530_v49 = vmul.f32 %v4516_v48, %v8871_v55  ;;  %v4515_v22 = vsel %vm956_vm5, %v11487_v17, %v11492_v4 }
 0xf1d   : > { %11484 = vst [vmem:[#allocation51_spill] sm:$0xff] %v9645_v10  ;;  %11485 = vst [vmem:[#allocation54_spill] sm:$0xff] %v9652_v51  ;;  %v4579_v51 = vmul.f32 %v4565_v6, %v8906_v27  ;;  %v4527_v6 = vmul.f32 %v11488_v47, %v8878_v42 }
 0xf1e   : > { %5121 = vrot.lane.b32.xlu0 %v4634_v36, %s6368_s14  ;;  %5115 = vrot.lane.b32.xlu1 %v4631_v26, %s6368_s14  ;;  %v4534_v19 = vpack.c.bf16 %v4530_v49, %v4525_v25 }
 0xf1f   : > { %v4583_v53 = vpack.c.bf16 %v4579_v51, %v4574_v43 }
 0xf20   : > { %v9658_v57 = vpop.permute.xlu0 %4827  ;;  %v9667_v36 = vpop.permute.xlu1 %4821 }
 0xf21   : > { %11486 = vst [vmem:[#allocation55_spill] sm:$0xff] %v9658_v57  ;;  %11489 = vst [vmem:[#allocation53_spill] sm:$0xff] %v9667_v36 }
 0xf22   : > { %5098 = vrot.lane.b32.xlu0 %v4582_v41, %s6370_s15  ;;  %5119 = vrot.lane.b32.xlu1 %v4633_v54, %s6368_s14  ;;  %v4532_v41 = vpack.c.bf16 %v4528_v14, %v4523_v60  ;;  %v4522_v54 = vmul.f32 %v11488_v47, %v8861_v0  ;;  %v4524_v14 = vmul.f32 %v4515_v22, %v8900_v13 }
 0xf24   : > { %v9676_v26 = vpop.permute.xlu0 %4841  ;;  %v9683_v59 = vpop.permute.xlu1 %4825  ;;  %v4531_v47 = vpack.c.bf16 %v4527_v6, %v4522_v54 }
 0xf25   : > { %11490 = vst [vmem:[#allocation49_spill] sm:$0xff] %v9676_v26  ;;  %11493 = vst [vmem:[#allocation60_spill] sm:$0xff] %v9683_v59 }
 0xf26   : > { %5102 = vrot.lane.b32.xlu0 %v4584_v50, %s6370_s15  ;;  %5096 = vrot.lane.b32.xlu1 %v4581_v44, %s6370_s15  ;;  %v4529_v50 = vmul.f32 %v4515_v22, %v8906_v27 }
 0xf28   : > { %v9689_v34 = vpop.permute.xlu0 %4845  ;;  %v9695_v7 = vpop.permute.xlu1 %4829  ;;  %v4533_v4 = vpack.c.bf16 %v4529_v50, %v4524_v14 }
 0xf29   : > { %11494 = vst [vmem:[#allocation58_spill] sm:$0xff] %v9689_v34  ;;  %11495 = vst [vmem:[#allocation62_spill] sm:$0xff] %v9695_v7 }
 0xf2a   : > { %5078 = vrot.lane.b32.xlu0 %v4532_v41, %s6371_s16  ;;  %5100 = vrot.lane.b32.xlu1 %v4583_v53, %s6370_s15 }
 0xf2c   : > { %v9702_v60 = vpop.permute.xlu0 %4849  ;;  %v9706_v48 = vpop.permute.xlu1 %4843 }
 0xf2d   : > { %11496 = vst [vmem:[#allocation57_spill] sm:$0xff] %v9702_v60  ;;  %11497 = vst [vmem:[#allocation56_spill] sm:$0xff] %v9706_v48 }
 0xf2e   : > { %5082 = vrot.lane.b32.xlu0 %v4534_v19, %s6371_s16  ;;  %5076 = vrot.lane.b32.xlu1 %v4531_v47, %s6371_s16 }
 0xf30   : > { %v9710_v51 = vpop.permute.xlu0 %4863  ;;  %v9712_v17 = vpop.permute.xlu1 %4847 }
 0xf31   : > { %11498 = vst [vmem:[#allocation61_spill] sm:$0xff] %v9710_v51  ;;  %11499 = vst [vmem:[#allocation64_spill] sm:$0xff] %v9712_v17 }
 0xf32   : > { %5080 = vrot.lane.b32.xlu1 %v4533_v4, %s6371_s16 }
 0xf34   : > { %v9715_v53 = vpop.permute.xlu0 %4867  ;;  %v9717_v43 = vpop.permute.xlu1 %4861 }
 0xf35   : > { %11500 = vst [vmem:[#allocation65_spill] sm:$0xff] %v9715_v53  ;;  %11501 = vst [vmem:[#allocation63_spill] sm:$0xff] %v9717_v43 }
 0xf38   : > { %v9719_v44 = vpop.permute.xlu0 %4880  ;;  %v9721_v41 = vpop.permute.xlu1 %4865 }
 0xf39   : > { %11502 = vst [vmem:[#allocation59_spill] sm:$0xff] %v9719_v44  ;;  %11503 = vst [vmem:[#allocation70_spill] sm:$0xff] %v9721_v41 }
 0xf3c   : > { %v9723_v25 = vpop.permute.xlu0 %4884  ;;  %v9725_v49 = vpop.permute.xlu1 %4869 }
 0xf3d   : > { %11504 = vst [vmem:[#allocation68_spill] sm:$0xff] %v9723_v25  ;;  %11505 = vst [vmem:[#allocation72_spill] sm:$0xff] %v9725_v49 }
 0xf40   : > { %v9727_v54 = vpop.permute.xlu0 %4897  ;;  %v9729_v6 = vpop.permute.xlu1 %4882 }
 0xf41   : > { %11506 = vst [vmem:[#allocation67_spill] sm:$0xff] %v9727_v54  ;;  %11507 = vst [vmem:[#allocation66_spill] sm:$0xff] %v9729_v6 }
 0xf44   : > { %v9731_v22 = vpop.permute.xlu0 %4901  ;;  %v9733_v19 = vpop.permute.xlu1 %4886 }
 0xf45   : > { %11508 = vst [vmem:[#allocation71_spill] sm:$0xff] %v9733_v19 }
 0xf48   : > { %v9735_v14 = vpop.permute.xlu0 %4905  ;;  %v9737_v50 = vpop.permute.xlu1 %4899 }
 0xf49   : > { %11509 = vst [vmem:[#allocation74_spill] sm:$0xff] %v9735_v14 }
 0xf4c   : > { %v9739_v47 = vpop.permute.xlu0 %4919  ;;  %v9741_v4 = vpop.permute.xlu1 %4903 }
 0xf4d   : > { %11510 = vst [vmem:[#allocation69_spill] sm:$0xff] %v9741_v4 }
 0xf50   : > { %v9743_v7 = vpop.permute.xlu0 %4923  ;;  %v9745_v60 = vpop.permute.xlu1 %4917 }
 0xf51   : > { %11511 = vst [vmem:[#allocation75_spill] sm:$0xff] %v9743_v7 }
 0xf54   : > { %v5059_v49 = vpop.permute.xlu0 %5058  ;;  %v9747_v57 = vpop.permute.xlu1 %4921 }
 0xf58   : > { %v9749_v36 = vpop.permute.xlu0 %5062  ;;  %v5057_v10 = vpop.permute.xlu1 %5056 }
 0xf59   : > { %v5067_v19 = vsel %vm956_vm5, %v5057_v10, %v5059_v49 }
 0xf5a   : > { %5204 = vrot.lane.b32.xlu1 %v5067_v19, %s6415_s9  ;;  %v4476_v19 = vmul.f32 0.0, %v9221_v52 }
 0xf5c   : > { %v5039_v14 = vpop.permute.xlu0 %5038  ;;  %v5061_v59 = vpop.permute.xlu1 %5060 }
 0xf5d   : > { %v5069_v4 = vsel %vm956_vm5, %v5061_v59, %v9749_v36  ;;  %v5068_v7 = vsel %vm956_vm5, %v5059_v49, %v5061_v59  ;;  %v4485_v49 = vpack.c.bf16 %v4476_v19, %v4476_v19 }
 0xf5e   : > { %5208 = vrot.lane.b32.xlu1 %v5069_v4, %s6415_s9  ;;  %5206 = vrot.lane.b32.xlu0 %v5068_v7, %s6415_s9 }
 0xf60   : > { %v9758_v26 = vpop.permute.xlu0 %5042  ;;  %v5037_v48 = vpop.permute.xlu1 %5036 }
 0xf61   : > { %v5047_v34 = vsel %vm1067_vm6, %v5037_v48, %v5039_v14 }
 0xf62   : > { %5194 = vrot.lane.b32.xlu0 %v5047_v34, %s6415_s9  ;;  %v4426_v34 = vmul.f32 0.0, %v9197_v37 }
 0xf64   : > { %v5019_v10 = vpop.permute.xlu0 %5018  ;;  %v5041_v17 = vpop.permute.xlu1 %5040  ;;  %v4435_v19 = vpack.c.bf16 %v4426_v34, %v4426_v34 }
 0xf65   : > { %v5049_v43 = vsel %vm1067_vm6, %v5041_v17, %v9758_v26  ;;  %v5048_v59 = vsel %vm1067_vm6, %v5039_v14, %v5041_v17 }
 0xf66   : > { %5198 = vrot.lane.b32.xlu0 %v5049_v43, %s6415_s9  ;;  %5196 = vrot.lane.b32.xlu1 %v5048_v59, %s6415_s9 }
 0xf68   : > { %v9768_v7 = vpop.permute.xlu0 %5022  ;;  %v5017_v4 = vpop.permute.xlu1 %5016 }
 0xf69   : > { %v5027_v48 = vsel %vm1205_vm7, %v5017_v4, %v5019_v10  ;;  %v4376_v4 = vmul.f32 0.0, %v9163_v39 }
 0xf6a   : > { %5064 = vrot.lane.b32.xlu1 %v4485_v49, %s6378_s28  ;;  %5184 = vrot.lane.b32.xlu0 %v5027_v48, %s6415_s9 }
 0xf6c   : > { %v4999_v52 = vpop.permute.xlu0 %4998  ;;  %v5021_v53 = vpop.permute.xlu1 %5020 }
 0xf6d   : > { %v5029_v17 = vsel %vm1205_vm7, %v5021_v53, %v9768_v7  ;;  %v5028_v43 = vsel %vm1205_vm7, %v5019_v10, %v5021_v53 }
 0xf6e   : > { %5188 = vrot.lane.b32.xlu0 %v5029_v17, %s6415_s9  ;;  %5186 = vrot.lane.b32.xlu1 %v5028_v43, %s6415_s9  ;;  %v4385_v17 = vpack.c.bf16 %v4376_v4, %v4376_v4 }
 0xf70   : > { %v9779_v14 = vpop.permute.xlu0 %5002  ;;  %v4997_v59 = vpop.permute.xlu1 %4996 }
 0xf71   : > { %v5007_v49 = vsel %vm5006_vm13, %v4997_v59, %v4999_v52  ;;  %v4326_v59 = vmul.f32 0.0, %v9136_v2 }
 0xf72   : > { %5044 = vrot.lane.b32.xlu1 %v4435_v19, %s6381_s30  ;;  %5174 = vrot.lane.b32.xlu0 %v5007_v49, %s6415_s9 }
 0xf74   : > { %v4979_v37 = vpop.permute.xlu0 %4978  ;;  %v5001_v48 = vpop.permute.xlu1 %5000 }
 0xf75   : > { %v5009_v53 = vsel %vm5006_vm13, %v5001_v48, %v9779_v14  ;;  %v5008_v10 = vsel %vm5006_vm13, %v4999_v52, %v5001_v48 }
 0xf76   : > { %5178 = vrot.lane.b32.xlu0 %v5009_v53, %s6415_s9  ;;  %5176 = vrot.lane.b32.xlu1 %v5008_v10, %s6415_s9  ;;  %v4335_v53 = vpack.c.bf16 %v4326_v59, %v4326_v59 }
 0xf78   : > { %v9790_v34 = vpop.permute.xlu0 %4982  ;;  %v4977_v43 = vpop.permute.xlu1 %4976 }
 0xf79   : > { %v4987_v19 = vsel %vm4986_vm10, %v4977_v43, %v4979_v37  ;;  %v4276_v43 = vmul.f32 0.0, %v9111_v8  ;;  %v11512_v8 = vld [vmem:[#allocation24_spill] sm:$0xff] }
 0xf7a   : > { %5024 = vrot.lane.b32.xlu1 %v4385_v17, %s6384_s29  ;;  %5164 = vrot.lane.b32.xlu0 %v4987_v19, %s6415_s9 }
 0xf7b   : > { %v4285_v59 = vpack.c.bf16 %v4276_v43, %v4276_v43 }
 0xf7c   : > { %v4959_v39 = vpop.permute.xlu0 %4958  ;;  %v4981_v49 = vpop.permute.xlu1 %4980 }
 0xf7d   : > { %v4989_v52 = vsel %vm4986_vm10, %v4981_v49, %v9790_v34  ;;  %v4988_v48 = vsel %vm4986_vm10, %v4979_v37, %v4981_v49 }
 0xf7e   : > { %5168 = vrot.lane.b32.xlu0 %v4989_v52, %s6415_s9  ;;  %5166 = vrot.lane.b32.xlu1 %v4988_v48, %s6415_s9 }
 0xf80   : > { %v9801_v4 = vpop.permute.xlu0 %4962  ;;  %v4957_v10 = vpop.permute.xlu1 %4956 }
 0xf81   : > { %v4967_v17 = vsel %vm4966_vm3, %v4957_v10, %v4959_v39  ;;  %v4121_v10 = vmul.f32 %v11512_v8, %v8861_v0 }
 0xf82   : > { %5004 = vrot.lane.b32.xlu1 %v4335_v53, %s6412_s27  ;;  %5154 = vrot.lane.b32.xlu0 %v4967_v17, %s6415_s9  ;;  %v11513_v17 = vld [vmem:[#allocation18_spill] sm:$0xff] }
 0xf83   : > { %v4113_v43 = vsel %vm4112_vm0, %v11512_v8, %v11513_v17 }
 0xf84   : > { %v4940_v2 = vpop.permute.xlu0 %4939  ;;  %v4961_v19 = vpop.permute.xlu1 %4960  ;;  %v4122_v41 = vmul.f32 %v4113_v43, %v8839_v32  ;;  %v4127_v44 = vmul.f32 %v4113_v43, %v8844_v29 }
 0xf85   : > { %v4969_v37 = vsel %vm4966_vm3, %v4961_v19, %v9801_v4  ;;  %v4968_v49 = vsel %vm4966_vm3, %v4959_v39, %v4961_v19  ;;  %v4126_v39 = vmul.f32 %v11512_v8, %v8878_v42  ;;  %v4226_v19 = vmul.f32 0.0, %v9081_v38 }
 0xf86   : > { %5158 = vrot.lane.b32.xlu0 %v4969_v37, %s6415_s9  ;;  %5156 = vrot.lane.b32.xlu1 %v4968_v49, %s6415_s9  ;;  %v11514_v49 = vld [vmem:[#allocation8_spill] sm:$0xff] }
 0xf87   : > { %v4130_v8 = vpack.c.bf16 %v4126_v39, %v4121_v10 }
 0xf88   : > { %v9812_v52 = vpop.permute.xlu0 %4943  ;;  %v4938_v48 = vpop.permute.xlu1 %4937 }
 0xf89   : > { %v4947_v53 = vsel %vm449_vm11, %v4938_v48, %v4940_v2  ;;  %v4114_v48 = vsel %vm4112_vm0, %v11513_v17, %v11514_v49  ;;  %v4235_v17 = vpack.c.bf16 %v4226_v19, %v4226_v19 }
 0xf8a   : > { %4984 = vrot.lane.b32.xlu1 %v4285_v59, %s6413_s24  ;;  %5144 = vrot.lane.b32.xlu0 %v4947_v53, %s6415_s9  ;;  %v4123_v38 = vmul.f32 %v4114_v48, %v8900_v13  ;;  %v4128_v6 = vmul.f32 %v4114_v48, %v8906_v27 }
 0xf8c   : > { %v4942_v37 = vpop.permute.xlu1 %4941  ;;  %v5118_v51 = vpop.permute.xlu0 %5117 }
 0xf8d   : > { %v4949_v59 = vsel %vm449_vm11, %v4942_v37, %v9812_v52  ;;  %v4948_v53 = vsel %vm449_vm11, %v4940_v2, %v4942_v37  ;;  %v4131_v2 = vpack.c.bf16 %v4127_v44, %v4122_v41  ;;  %v4132_v37 = vpack.c.bf16 %v4128_v6, %v4123_v38 }
 0xf8e   : > { %5148 = vrot.lane.b32.xlu0 %v4949_v59, %s6415_s9  ;;  %5146 = vrot.lane.b32.xlu1 %v4948_v53, %s6415_s9  ;;  %v4176_v59 = vmul.f32 0.0, %v11475_v21  ;;  %v4626_v6 = vmul.f32 0.0, %v9308_v1  ;;  %v4576_v1 = vmul.f32 0.0, %v9276_v28 }
 0xf90   : > { %v5116_v25 = vpop.permute.xlu1 %5115  ;;  %v9840_v53 = vpop.permute.xlu0 %5121  ;;  %v4185_v10 = vpack.c.bf16 %v4176_v59, %v4176_v59 }
 0xf91   : > { %v5125_v43 = vsel %vm593_vm4, %v5116_v25, %v5118_v51 }
 0xf92   : > { %5134 = vrot.lane.b32.xlu0 %v4130_v8, %s6415_s9  ;;  %4964 = vrot.lane.b32.xlu1 %v4235_v17, %s6414_s17  ;;  %v4635_v17 = vpack.c.bf16 %v4626_v6, %v4626_v6 }
 0xf94   : > { %v5120_v54 = vpop.permute.xlu1 %5119  ;;  %v5099_v19 = vpop.permute.xlu0 %5098 }
 0xf95   : > { %v5127_v21 = vsel %vm593_vm4, %v5120_v54, %v9840_v53  ;;  %v5126_v41 = vsel %vm593_vm4, %v5118_v51, %v5120_v54 }
 0xf96   : > { %5138 = vrot.lane.b32.xlu0 %v4132_v37, %s6415_s9  ;;  %5136 = vrot.lane.b32.xlu1 %v4131_v2, %s6415_s9 }
 0xf98   : > { %v5097_v39 = vpop.permute.xlu1 %5096  ;;  %v9853_v48 = vpop.permute.xlu0 %5102 }
 0xf99   : > { %v5106_v8 = vsel %vm11042_vm1, %v5097_v39, %v5099_v19  ;;  %v4585_v39 = vpack.c.bf16 %v4576_v1, %v4576_v1 }
 0xf9a   : > { %4945 = vrot.lane.b32.xlu1 %v4185_v10, %s6373_s23  ;;  %5234 = vrot.lane.b32.xlu0 %v5125_v43, %s6415_s9  ;;  %v4526_v10 = vmul.f32 0.0, %v11491_v9 }
 0xf9c   : > { %v5101_v44 = vpop.permute.xlu1 %5100  ;;  %v5079_v54 = vpop.permute.xlu0 %5078  ;;  %v4535_v28 = vpack.c.bf16 %v4526_v10, %v4526_v10 }
 0xf9d   : > { %v5107_v38 = vsel %vm11042_vm1, %v5099_v19, %v5101_v44  ;;  %v5108_v51 = vsel %vm11042_vm1, %v5101_v44, %v9853_v48  ;;  %vm5244_vm1 = vcmask 384000  }
 0xf9e   : > { %5238 = vrot.lane.b32.xlu0 %v5127_v21, %s6415_s9  ;;  %5236 = vrot.lane.b32.xlu1 %v5126_v41, %s6415_s9 }
 0xfa0   : > { %v5077_v25 = vpop.permute.xlu1 %5076  ;;  %v9869_v43 = vpop.permute.xlu0 %5082 }
 0xfa1   : > { %v5087_v37 = vsel %vm845_vm2, %v5077_v25, %v5079_v54 }
 0xfa2   : > { %5224 = vrot.lane.b32.xlu1 %v5106_v8, %s6415_s9  ;;  %5226 = vrot.lane.b32.xlu0 %v5107_v38, %s6415_s9  ;;  %v4773_v8 = vsel %vm1145_vm14, %v9559_v5, %v9534_v62 }
 0xfa4   : > { %v5081_v2 = vpop.permute.xlu1 %5080 }
 0xfa5   : > { %v5088_v59 = vsel %vm845_vm2, %v5079_v54, %v5081_v2  ;;  %v5089_v19 = vsel %vm845_vm2, %v5081_v2, %v9869_v43  ;;  %v4772_v54 = vsel %vm1145_vm14, %v9521_v56, %v9559_v5  ;;  %v4753_v56 = vsel %vm11043_vm15, %v9490_v23, %v9528_v33 }
 0xfa6   : > { %5228 = vrot.lane.b32.xlu1 %v5108_v51, %s6415_s9  ;;  %5123 = vrot.lane.b32.xlu0 %v4635_v17, %s6368_s14  ;;  %v4774_v51 = vsel %vm1145_vm14, %v9534_v62, %v9574_v31 }
 0xfaa   : > { %5214 = vrot.lane.b32.xlu1 %v5087_v37, %s6415_s9  ;;  %5216 = vrot.lane.b32.xlu0 %v5088_v59, %s6415_s9 }
 0xfae   : > { %5218 = vrot.lane.b32.xlu1 %v5089_v19, %s6415_s9  ;;  %5104 = vrot.lane.b32.xlu0 %v4585_v39, %s6370_s15  ;;  %v4754_v39 = vsel %vm11043_vm15, %v9528_v33, %v9503_v12 }
 0xfb2   : > { %5084 = vrot.lane.b32.xlu1 %v4535_v28, %s6371_s16  ;;  %s6177_s16 = sshll.u32 %s11602_s22, 7 }
 0xfb3   : > { %s10756_s30 = scalar_lea.vmem %s10783_s6, %s6177_s16 }
 0xfcc   : > { %v5205_v44 = vpop.permute.xlu1 %5204 }
 0xfd0   : > { %v5207_v21 = vpop.permute.xlu0 %5206  ;;  %v9876_v41 = vpop.permute.xlu1 %5208 }
 0xfd1   : > { %v5273_v9 = vsel %vm5244_vm1, %v5205_v44, %v5207_v21  ;;  %v5274_v6 = vsel %vm5244_vm1, %v5207_v21, %v9876_v41  ;;  %v4752_v21 = vsel %vm11043_vm15, %v9512_v61, %v9490_v23 }
 0xfd2   : > { %5596 = vrot.lane.b32.xlu0 %v5273_v9, %s6384_s29  ;;  %5598 = vrot.lane.b32.xlu1 %v5274_v6, %s6384_s29 }
 0xfd4   : > { %v5195_v25 = vpop.permute.xlu0 %5194 }
 0xfd6   : > { %5594 = vrot.lane.b32.xlu0 %v5205_v44, %s6384_s29  ;;  %5436 = vrot.lane.b32.xlu1 %v4773_v8, %s6384_s29 }
 0xfd8   : > { %v9888_v38 = vpop.permute.xlu0 %5198  ;;  %v5197_v17 = vpop.permute.xlu1 %5196 }
 0xfd9   : > { %v5270_v37 = vsel %vm5244_vm1, %v5197_v17, %v9888_v38  ;;  %v5269_v59 = vsel %vm5244_vm1, %v5195_v25, %v5197_v17 }
 0xfda   : > { %5438 = vrot.lane.b32.xlu0 %v4774_v51, %s6384_s29  ;;  %5434 = vrot.lane.b32.xlu1 %v4772_v54, %s6384_s29 }
 0xfdc   : > { %v5185_v2 = vpop.permute.xlu0 %5184  ;;  %v5065_v1 = vpop.permute.xlu1 %5064 }
 0xfdd   : > { %v5070_v19 = vsel %vm956_vm5, %v9749_v36, %v5065_v1  ;;  %vm11515_vm5 = vcmask 965632  }
 0xfde   : > { %5588 = vrot.lane.b32.xlu1 %v5270_v37, %s6384_s29  ;;  %5586 = vrot.lane.b32.xlu0 %v5269_v59, %s6384_s29  ;;  %v4733_v23 = vsel %vm11515_vm5, %v9481_v46, %v9459_v24  ;;  %vm11516_vm15 = vmmov %vm11515_vm5  ;;  %v4713_v59 = vsel %vm805_vm8, %v9410_v58, %v9450_v40 }
 0xfdf   : > { %v4734_v8 = vsel %vm11516_vm15, %v9459_v24, %v9497_v15 }
 0xfe0   : > { %v9903_v62 = vpop.permute.xlu0 %5188  ;;  %v5187_v10 = vpop.permute.xlu1 %5186 }
 0xfe1   : > { %v5266_v36 = vsel %vm5244_vm1, %v5187_v10, %v9903_v62  ;;  %v5265_v6 = vsel %vm5244_vm1, %v5185_v2, %v5187_v10  ;;  %v4714_v10 = vsel %vm805_vm8, %v9450_v40, %v9428_v35 }
 0xfe2   : > { %5426 = vrot.lane.b32.xlu1 %v4753_v56, %s6384_s29  ;;  %5584 = vrot.lane.b32.xlu0 %v5195_v25, %s6384_s29 }
 0xfe4   : > { %v5045_v5 = vpop.permute.xlu1 %5044  ;;  %v5175_v28 = vpop.permute.xlu0 %5174 }
 0xfe5   : > { %v5050_v17 = vsel %vm1067_vm6, %v9758_v26, %v5045_v5  ;;  %vm11519_vm6 = vcmask 1031168  }
 0xfe6   : > { %5428 = vrot.lane.b32.xlu0 %v4754_v39, %s6384_s29  ;;  %5210 = vrot.lane.b32.xlu1 %v5070_v19, %s6415_s9  ;;  %vm11521_vm15 = vmmov %vm11519_vm6 }
 0xfe8   : > { %v5177_v44 = vpop.permute.xlu1 %5176  ;;  %v9922_v9 = vpop.permute.xlu0 %5178 }
 0xfe9   : > { %v5262_v24 = vsel %vm5244_vm1, %v5177_v44, %v9922_v9  ;;  %v5261_v26 = vsel %vm5244_vm1, %v5175_v28, %v5177_v44 }
 0xfea   : > { %5424 = vrot.lane.b32.xlu1 %v4752_v21, %s6384_s29  ;;  %5212 = vrot.lane.b32.xlu0 %v5065_v1, %s6415_s9  ;;  %v4732_v1 = vsel %vm11515_vm5, %v9441_v16, %v9481_v46  ;;  %vm11542_vm5 = vcmask 457728  }
 0xfec   : > { %v5025_v33 = vpop.permute.xlu1 %5024  ;;  %v5165_v61 = vpop.permute.xlu0 %5164 }
 0xfed   : > { %v5030_v56 = vsel %vm1205_vm7, %v9768_v7, %v5025_v33 }
 0xfee   : > { %5578 = vrot.lane.b32.xlu1 %v5266_v36, %s6384_s29  ;;  %5576 = vrot.lane.b32.xlu0 %v5265_v6, %s6384_s29 }
 0xff0   : > { %v5167_v25 = vpop.permute.xlu1 %5166  ;;  %v9941_v51 = vpop.permute.xlu0 %5168 }
 0xff1   : > { %v5258_v40 = vsel %vm5244_vm1, %v5167_v25, %v9941_v51  ;;  %v5257_v7 = vsel %vm5244_vm1, %v5165_v61, %v5167_v25 }
 0xff2   : > { %5416 = vrot.lane.b32.xlu1 %v4733_v23, %s6384_s29  ;;  %5574 = vrot.lane.b32.xlu0 %v5185_v2, %s6384_s29 }
 0xff4   : > { %v5005_v54 = vpop.permute.xlu1 %5004  ;;  %v5155_v2 = vpop.permute.xlu0 %5154 }
 0xff5   : > { %v5010_v6 = vsel %vm5006_vm13, %v9779_v14, %v5005_v54  ;;  %vm11523_vm13 = vmmov %vm11519_vm6 }
 0xff6   : > { %5418 = vrot.lane.b32.xlu0 %v4734_v8, %s6384_s29  ;;  %5200 = vrot.lane.b32.xlu1 %v5050_v17, %s6415_s9 }
 0xff8   : > { %v5157_v37 = vpop.permute.xlu1 %5156  ;;  %v9958_v16 = vpop.permute.xlu0 %5158 }
 0xff9   : > { %v5253_v25 = vsel %vm5244_vm1, %v5155_v2, %v5157_v37  ;;  %v5254_v14 = vsel %vm5244_vm1, %v5157_v37, %v9958_v16 }
 0xffa   : > { %5414 = vrot.lane.b32.xlu1 %v4732_v1, %s6384_s29  ;;  %5202 = vrot.lane.b32.xlu0 %v5045_v5, %s6415_s9  ;;  %v4712_v5 = vsel %vm805_vm8, %v9435_v45, %v9410_v58  ;;  %v4693_v45 = vsel %vm671_vm9, %v9404_v30, %v9379_v18  ;;  %v11518_v1 = vld [vmem:[#allocation30_spill] sm:$0xff] }
 0xffc   : > { %v4985_v46 = vpop.permute.xlu1 %4984  ;;  %v5145_v39 = vpop.permute.xlu0 %5144 }
 0xffe   : > { %5568 = vrot.lane.b32.xlu1 %v5262_v24, %s6384_s29  ;;  %5566 = vrot.lane.b32.xlu0 %v5261_v26, %s6384_s29 }
0x1000   : > { %v5147_v19 = vpop.permute.xlu1 %5146  ;;  %v9978_v21 = vpop.permute.xlu0 %5148 }
0x1002   : > { %5406 = vrot.lane.b32.xlu1 %v4713_v59, %s6384_s29  ;;  %5564 = vrot.lane.b32.xlu0 %v5175_v28, %s6384_s29  ;;  %v4074_v28 = vmul.f32 0.0, %v8996_v63  ;;  %v4694_v63 = vsel %vm671_vm9, %v9379_v18, %v9419_v3  ;;  %v4692_v18 = vsel %vm671_vm9, %v9366_v20, %v9404_v30  ;;  %v11520_v30 = vld [vmem:[#allocation27_spill] sm:$0xff]  ;;  %v4990_v59 = vsel %vm4986_vm10, %v9790_v34, %v4985_v46 }
0x1003   : > { %v5250_v34 = vsel %vm5244_vm1, %v5147_v19, %v9978_v21  ;;  %vm4927_vm10 = vcmask 392192  }
0x1004   : > { %v4083_v44 = vpack.c.bf16 %v4074_v28, %v4074_v28  ;;  %v4965_v58 = vpop.permute.xlu1 %4964 }
0x1006   : > { %5408 = vrot.lane.b32.xlu0 %v4714_v10, %s6384_s29  ;;  %5190 = vrot.lane.b32.xlu1 %v5030_v56, %s6415_s9  ;;  %v5249_v56 = vsel %vm5244_vm1, %v5145_v39, %v5147_v19  ;;  %v4970_v19 = vsel %vm4966_vm3, %v9801_v4, %v4965_v58  ;;  %vm11537_vm3 = vcmask 523264  }
0x1008   : > { %v5137_v36 = vpop.permute.xlu1 %5136 }
0x100a   : > { %5404 = vrot.lane.b32.xlu1 %v4712_v5, %s6384_s29  ;;  %5192 = vrot.lane.b32.xlu0 %v5025_v33, %s6415_s9  ;;  %v5135_v33 = vpop.permute.xlu0 %5134 }
0x100e   : > { %5558 = vrot.lane.b32.xlu1 %v5258_v40, %s6384_s29  ;;  %5556 = vrot.lane.b32.xlu0 %v5257_v7, %s6384_s29  ;;  %v9994_v23 = vpop.permute.xlu0 %5138  ;;  %v11524_v7 = vld [vmem:[#allocation34_spill] sm:$0xff] }
0x1012   : > { %5554 = vrot.lane.b32.xlu1 %v5165_v61, %s6384_s29  ;;  %4925 = vrot.lane.b32.xlu0 %v4083_v44, %s6411_s11  ;;  %v9996_v61 = vpop.permute.xlu1 %4945  ;;  %v10006_v8 = vpop.permute.xlu0 %5234  ;;  %v11525_v44 = vld [vmem:[#allocation33_spill] sm:$0xff] }
0x1016   : > { %5398 = vrot.lane.b32.xlu1 %v4694_v63, %s6384_s29  ;;  %5396 = vrot.lane.b32.xlu0 %v4693_v45, %s6384_s29  ;;  %v10008_v17 = vpop.permute.xlu1 %5236  ;;  %v10020_v26 = vpop.permute.xlu0 %5238  ;;  %v4653_v63 = vsel %vm449_vm11, %v11525_v44, %v11524_v7  ;;  %v11526_v45 = vld [vmem:[#allocation28_spill] sm:$0xff] }
0x101a   : > { %5180 = vrot.lane.b32.xlu0 %v5010_v6, %s6415_s9  ;;  %5182 = vrot.lane.b32.xlu1 %v5005_v54, %s6415_s9  ;;  %v11517_v54 = vld [vmem:[#allocation29_spill] sm:$0xff]  ;;  %v10022_v37 = vpop.permute.xlu1 %5224  ;;  %v10032_v5 = vpop.permute.xlu0 %5226  ;;  %v4654_v6 = vsel %vm449_vm11, %v11524_v7, %v11526_v45 }
0x101b   : > { %v4673_v20 = vsel %vm11519_vm6, %v11518_v1, %v11517_v54  ;;  %v4674_v24 = vsel %vm11521_vm15, %v11517_v54, %v11520_v30  ;;  %vm11546_vm6 = vmmov %vm11542_vm5  ;;  %vm11551_vm15 = vcmask 506880  }
0x101e   : > { %5394 = vrot.lane.b32.xlu0 %v4692_v18, %s6384_s29  ;;  %5546 = vrot.lane.b32.xlu1 %v5253_v25, %s6384_s29  ;;  %v10034_v28 = vpop.permute.xlu1 %5228  ;;  %v11527_v25 = vld [vmem:[#allocation22_spill] sm:$0xff] }
0x1022   : > { %5548 = vrot.lane.b32.xlu0 %v5254_v14, %s6384_s29  ;;  %5544 = vrot.lane.b32.xlu1 %v5155_v2, %s6384_s29  ;;  %v11522_v2 = vld [vmem:[#allocation32_spill] sm:$0xff]  ;;  %v10044_v40 = vpop.permute.xlu1 %5214  ;;  %v11528_v14 = vld [vmem:[#allocation13_spill] sm:$0xff] }
0x1023   : > { %v4672_v10 = vsel %vm11523_vm13, %v11522_v2, %v11518_v1  ;;  %v3332_v54 = vsel %vm300_vm12, %v11528_v14, %v11527_v25  ;;  %v11529_v1 = vld [vmem:[#allocation15_spill] sm:$0xff]  ;;  %vm11553_vm13 = vmmov %vm11551_vm15 }
0x1026   : > { %5386 = vrot.lane.b32.xlu0 %v4673_v20, %s6384_s29  ;;  %5388 = vrot.lane.b32.xlu1 %v4674_v24, %s6384_s29  ;;  %v10058_v18 = vpop.permute.xlu1 %5218  ;;  %v3333_v20 = vsel %vm300_vm12, %v11527_v25, %v11529_v1  ;;  %v11530_v24 = vld [vmem:[#allocation31_spill] sm:$0xff] }
0x1027   : > { %v4652_v4 = vsel %vm449_vm11, %v11530_v24, %v11525_v44  ;;  %v3342_v2 = vmul.f32 %v3333_v20, %v8839_v32  ;;  %v5246_v44 = vsel %vm5244_vm1, %v5137_v36, %v9994_v23 }
0x102a   : > { %5170 = vrot.lane.b32.xlu0 %v4990_v59, %s6415_s9  ;;  %5172 = vrot.lane.b32.xlu1 %v4985_v46, %s6415_s9  ;;  %v10042_v46 = vpop.permute.xlu0 %5123  ;;  %v5245_v59 = vsel %vm5244_vm1, %v5135_v33, %v5137_v36  ;;  %v10080_v7 = vpop.permute.xlu1 %5084 }
0x102e   : > { %5384 = vrot.lane.b32.xlu0 %v4672_v10, %s6384_s29  ;;  %5536 = vrot.lane.b32.xlu1 %v5249_v56, %s6384_s29  ;;  %v3345_v10 = vmul.f32 %v3332_v54, %v8878_v42  ;;  %v3346_v56 = vmul.f32 %v3333_v20, %v8844_v29  ;;  %v3340_v29 = vmul.f32 0.0, %v11528_v14  ;;  %v5285_v14 = vsel %vm5244_vm1, %v10006_v8, %v10008_v17 }
0x1032   : > { %5538 = vrot.lane.b32.xlu0 %v5250_v34, %s6384_s29  ;;  %5534 = vrot.lane.b32.xlu1 %v5145_v39, %s6384_s29  ;;  %v10056_v39 = vpop.permute.xlu0 %5216 }
0x1036   : > { %5376 = vrot.lane.b32.xlu0 %v4653_v63, %s6384_s29  ;;  %5378 = vrot.lane.b32.xlu1 %v4654_v6, %s6384_s29  ;;  %v10078_v34 = vpop.permute.xlu0 %5104  ;;  %v3351_v6 = vpack.c.bf16 %v3346_v56, %v3342_v2 }
0x103a   : > { %5160 = vrot.lane.b32.xlu0 %v4970_v19, %s6415_s9  ;;  %5162 = vrot.lane.b32.xlu1 %v4965_v58, %s6415_s9  ;;  %v3341_v58 = vmul.f32 %v3332_v54, %v8861_v0  ;;  %v3349_v54 = vpack.c.bf16 %v3340_v29, %v3340_v29 }
0x103c   : > { %v3350_v63 = vpack.c.bf16 %v3345_v10, %v3341_v58  ;;  %v11531_v58 = vld [vmem:[#allocation25_spill] sm:$0xff]  ;;  %v5286_v10 = vsel %vm5244_vm1, %v10008_v17, %v10020_v26  ;;  %v4928_v17 = vsel %vm4927_vm10, %v9745_v60, %v9739_v47 }
0x103d   : > { %v4115_v2 = vsel %vm4112_vm0, %v11514_v49, %v11531_v58  ;;  %vm4907_vm0 = vcmask 441344  }
0x103e   : > { %5374 = vrot.lane.b32.xlu0 %v4652_v4, %s6384_s29  ;;  %5526 = vrot.lane.b32.xlu1 %v5245_v59, %s6384_s29  ;;  %v4129_v49 = vmul.f32 %v4115_v2, %v8871_v55 }
0x1042   : > { %5528 = vrot.lane.b32.xlu0 %v5246_v44, %s6384_s29  ;;  %5524 = vrot.lane.b32.xlu1 %v5135_v33, %s6384_s29  ;;  %v4950_v33 = vsel %vm449_vm11, %v9812_v52, %v9996_v61  ;;  %v4124_v44 = vmul.f32 %v4115_v2, %v8866_v11 }
0x1044   : > { %v5597_v0 = vpop.permute.xlu0 %5596  ;;  %v10086_v19 = vpop.permute.xlu1 %5598  ;;  %v4133_v29 = vpack.c.bf16 %v4129_v49, %v4124_v44  ;;  %v5128_v49 = vsel %vm593_vm4, %v9840_v53, %v10042_v46 }
0x1045   : > { %v5727_v32 = vsel %vm1205_vm7, %v5597_v0, %v10086_v19 }
0x1046   : > { %5366 = vrot.lane.b32.xlu0 %v3350_v63, %s6384_s29  ;;  %5368 = vrot.lane.b32.xlu1 %v3351_v6, %s6384_s29  ;;  %v4125_v63 = vmul.f32 0.0, %v11531_v58 }
0x1047   : > { %5910 = vmatprep.subr.bf16.mxu1 %v5727_v32  ;;  %v4929_v32 = vsel %vm4927_vm10, %v9739_v47, %v9747_v57 }
0x1048   : > { %v5595_v42 = vpop.permute.xlu0 %5594  ;;  %v5437_v36 = vpop.permute.xlu1 %5436 }
0x1049   : > { %v5726_v25 = vsel %vm1205_vm7, %v5595_v42, %v5597_v0  ;;  %v4134_v42 = vpack.c.bf16 %v4125_v63, %v4125_v63 }
0x104a   : > { %5150 = vrot.lane.b32.xlu0 %v4950_v33, %s6415_s9  ;;  %5152 = vrot.lane.b32.xlu1 %v9996_v61, %s6415_s9 }
0x104b   : > { %5911 = vmatpush1.bf16.msra.mxu1 %v5726_v25 }
0x104c   : > { %v10100_v20 = vpop.permute.xlu0 %5438  ;;  %v5435_v24 = vpop.permute.xlu1 %5434 }
0x104d   : > { %v5663_v4 = vsel %vm1205_vm7, %v5437_v36, %v10100_v20  ;;  %v5662_v52 = vsel %vm1205_vm7, %v5435_v24, %v5437_v36  ;;  %v5281_v24 = vsel %vm5244_vm1, %v10022_v37, %v10032_v5 }
0x104e   : > { %5364 = vrot.lane.b32.xlu0 %v3349_v54, %s6384_s29  ;;  %5626 = vrot.lane.b32.xlu1 %v5285_v14, %s6384_s29 }
0x104f   : > { %5857 = vmatprep.subr.bf16.mxu0 %v5663_v4 }
0x1050   : > { %5858 = vmatpush1.bf16.msra.mxu0 %v5662_v52  ;;  %v5587_v61 = vpop.permute.xlu0 %5586  ;;  %v10110_v59 = vpop.permute.xlu1 %5588 }
0x1051   : > { %v5723_v56 = vsel %vm1205_vm7, %v5587_v61, %v10110_v59 }
0x1052   : > { %5628 = vrot.lane.b32.xlu0 %v5286_v10, %s6384_s29  ;;  %5624 = vrot.lane.b32.xlu1 %v10006_v8, %s6384_s29  ;;  %v4909_v10 = vsel %vm4907_vm0, %v9737_v50, %v9731_v22 }
0x1053   : > { %5912 = vmatprep.subr.bf16.mxu1 %v5723_v56  ;;  %v11532_v56 = vld [vmem:[#allocation67_spill] sm:$0xff] }
0x1054   : > { %v5585_v6 = vpop.permute.xlu0 %5584  ;;  %v5427_v0 = vpop.permute.xlu1 %5426 }
0x1055   : > { %v5722_v8 = vsel %vm1205_vm7, %v5585_v6, %v5587_v61  ;;  %v5282_v61 = vsel %vm5244_vm1, %v10032_v5, %v10034_v28  ;;  %v4908_v5 = vsel %vm4907_vm0, %v11532_v56, %v9737_v50 }
0x1056   : > { %5516 = vrot.lane.b32.xlu0 %v4928_v17, %s6384_s29  ;;  %5518 = vrot.lane.b32.xlu1 %v4929_v32, %s6384_s29  ;;  %v5277_v17 = vsel %vm5244_vm1, %v10044_v40, %v10056_v39 }
0x1057   : > { %5913 = vmatpush1.bf16.msra.mxu1 %v5722_v8  ;;  %v5278_v8 = vsel %vm5244_vm1, %v10056_v39, %v10058_v18 }
0x1058   : > { %v10135_v36 = vpop.permute.xlu0 %5428  ;;  %v10137_v33 = vpop.permute.xlu1 %5210 }
0x1059   : > { %v5659_v25 = vsel %vm1205_vm7, %v5427_v0, %v10135_v36 }
0x105a   : > { %5140 = vrot.lane.b32.xlu0 %v4133_v29, %s6415_s9  ;;  %5142 = vrot.lane.b32.xlu1 %v4134_v42, %s6415_s9 }
0x105b   : > { %5859 = vmatprep.subr.bf16.mxu0 %v5659_v25 }
0x105c   : > { %v10143_v47 = vpop.permute.xlu0 %5212  ;;  %v5425_v54 = vpop.permute.xlu1 %5424 }
0x105d   : > { %v5658_v14 = vsel %vm1205_vm7, %v5425_v54, %v5427_v0  ;;  %v10205_v54 = vld [vmem:[%s10781_s4 + $0xc] ss:$16 sps:$4 sm:$0xff]  }
0x105e   : > { %5514 = vrot.lane.b32.xlu0 %v9745_v60, %s6384_s29  ;;  %5616 = vrot.lane.b32.xlu1 %v5281_v24, %s6384_s29  ;;  %v11534_v24 = vld [vmem:[#allocation68_spill] sm:$0xff] }
0x105f   : > { %5860 = vmatpush1.bf16.msra.mxu0 %v5658_v14  ;;  %v11535_v14 = vld [vmem:[#allocation66_spill] sm:$0xff]  ;;  %6171 = vmatprep.mubr.msk.bf16.mxu1 %vm4927_vm10, %v10205_v54 }
0x1060   : > { %v5577_v4 = vpop.permute.xlu0 %5576  ;;  %v10152_v52 = vpop.permute.xlu1 %5578  ;;  %v4890_v39 = vsel %vm300_vm12, %v11535_v14, %v11534_v24 }
0x1061   : > { %v5719_v58 = vsel %vm1205_vm7, %v5577_v4, %v10152_v52 }
0x1062   : > { %5614 = vrot.lane.b32.xlu1 %v10022_v37, %s6384_s29  ;;  %5618 = vrot.lane.b32.xlu0 %v5282_v61, %s6384_s29 }
0x1063   : > { %5914 = vmatprep.subr.bf16.mxu1 %v5719_v58 }
0x1064   : > { %v5575_v60 = vpop.permute.xlu0 %5574  ;;  %v5417_v2 = vpop.permute.xlu1 %5416 }
0x1065   : > { %v5718_v44 = vsel %vm1205_vm7, %v5575_v60, %v5577_v4  ;;  %v11536_v4 = vld [vmem:[#allocation59_spill] sm:$0xff] }
0x1066   : > { %5508 = vrot.lane.b32.xlu1 %v4909_v10, %s6384_s29  ;;  %5506 = vrot.lane.b32.xlu0 %v4908_v5, %s6384_s29  ;;  %v4889_v61 = vsel %vm300_vm12, %v11536_v4, %v11535_v14 }
0x1067   : > { %5915 = vmatpush1.bf16.msra.mxu1 %v5718_v44  ;;  %v11538_v44 = vld [vmem:[#allocation41_spill] sm:$0xff] }
0x1068   : > { %v10171_v37 = vpop.permute.xlu0 %5418  ;;  %v10173_v63 = vpop.permute.xlu1 %5200 }
0x1069   : > { %v5655_v6 = vsel %vm1205_vm7, %v5417_v2, %v10171_v37 }
0x106a   : > { %5242 = vrot.lane.b32.xlu1 %v10042_v46, %s6415_s9  ;;  %5240 = vrot.lane.b32.xlu0 %v5128_v49, %s6415_s9  ;;  %v4775_v49 = vsel %vm1145_vm14, %v9574_v31, %v11538_v44  ;;  %vm11544_vm14 = vmmov %vm11542_vm5 }
0x106b   : > { %5861 = vmatprep.subr.bf16.mxu0 %v5655_v6 }
0x106c   : > { %v10183_v50 = vpop.permute.xlu0 %5202  ;;  %v5415_v0 = vpop.permute.xlu1 %5414 }
0x106d   : > { %v5654_v32 = vsel %vm1205_vm7, %v5415_v0, %v5417_v2  ;;  %v5109_v2 = vsel %vm11537_vm3, %v9853_v48, %v10078_v34  ;;  %v11540_v0 = vld [vmem:[#allocation70_spill] sm:$0xff]  ;;  %vm11556_vm3 = vmmov %vm11553_vm13 }
0x106e   : > { %5504 = vrot.lane.b32.xlu0 %v11532_v56, %s6384_s29  ;;  %5606 = vrot.lane.b32.xlu1 %v5277_v17, %s6384_s29  ;;  %v11541_v17 = vld [vmem:[#allocation61_spill] sm:$0xff] }
0x106f   : > { %5862 = vmatpush1.bf16.msra.mxu0 %v5654_v32  ;;  %v4873_v32 = vsel %vm11542_vm5, %v11541_v17, %v11540_v0  ;;  %vm11558_vm5 = vcmask 965632  }
0x1070   : > { %v5567_v53 = vpop.permute.xlu0 %5566  ;;  %v10192_v46 = vpop.permute.xlu1 %5568 }
0x1071   : > { %11533 = vst [vmem:[#allocation80_spill] sm:$0xff] %v10192_v46  ;;  %v5715_v29 = vsel %vm1205_vm7, %v5567_v53, %v10192_v46 }
0x1072   : > { %5604 = vrot.lane.b32.xlu1 %v10044_v40, %s6384_s29  ;;  %5608 = vrot.lane.b32.xlu0 %v5278_v8, %s6384_s29 }
0x1073   : > { %5916 = vmatprep.subr.bf16.mxu1 %v5715_v29  ;;  %v11543_v29 = vld [vmem:[#allocation65_spill] sm:$0xff] }
0x1074   : > { %v5565_v42 = vpop.permute.xlu0 %5564  ;;  %v5407_v25 = vpop.permute.xlu1 %5406 }
0x1075   : > { %v5714_v40 = vsel %vm1205_vm7, %v5565_v42, %v5567_v53  ;;  %v4874_v42 = vsel %vm11544_vm14, %v11540_v0, %v11543_v29  ;;  %v11550_v0 = vld [vmem:[#allocation58_spill] sm:$0xff]  ;;  %vm11567_vm14 = vcmask 523264  }
0x1076   : > { %5498 = vrot.lane.b32.xlu1 %v4890_v39, %s6384_s29  ;;  %5496 = vrot.lane.b32.xlu0 %v4889_v61, %s6384_s29  ;;  %v11545_v61 = vld [vmem:[#allocation63_spill] sm:$0xff] }
0x1077   : > { %5917 = vmatpush1.bf16.msra.mxu1 %v5714_v40  ;;  %v4872_v40 = vsel %vm11546_vm6, %v11545_v61, %v11541_v17  ;;  %v11552_v17 = vld [vmem:[#allocation56_spill] sm:$0xff]  ;;  %vm11569_vm6 = vmmov %vm11567_vm14 }
0x1078   : > { %v10218_v58 = vpop.permute.xlu0 %5408  ;;  %v10220_v60 = vpop.permute.xlu1 %5190 }
0x1079   : > { %v5651_v10 = vsel %vm1205_vm7, %v5407_v25, %v10218_v58 }
0x107a   : > { %5232 = vrot.lane.b32.xlu1 %v10078_v34, %s6415_s9  ;;  %5230 = vrot.lane.b32.xlu0 %v5109_v2, %s6415_s9 }
0x107b   : > { %5863 = vmatprep.subr.bf16.mxu0 %v5651_v10 }
0x107c   : > { %v10230_v56 = vpop.permute.xlu0 %5192  ;;  %v5405_v5 = vpop.permute.xlu1 %5404 }
0x107d   : > { %v5650_v6 = vsel %vm1205_vm7, %v5405_v5, %v5407_v25  ;;  %v5090_v25 = vsel %vm845_vm2, %v9869_v43, %v10080_v7  ;;  %v11547_v5 = vld [vmem:[#allocation37_spill] sm:$0xff]  ;;  %vm11548_vm2 = vcmask 916480  }
0x107e   : > { %5440 = vrot.lane.b32.xlu1 %v4775_v49, %s6384_s29  ;;  %5494 = vrot.lane.b32.xlu0 %v11536_v4, %s6384_s29 }
0x107f   : > { %5864 = vmatpush1.bf16.msra.mxu0 %v5650_v6 }
0x1080   : > { %v5557_v48 = vpop.permute.xlu0 %5556  ;;  %v10239_v34 = vpop.permute.xlu1 %5558 }
0x1081   : > { %11539 = vst [vmem:[#allocation78_spill] sm:$0xff] %v10239_v34  ;;  %v5711_v53 = vsel %vm1205_vm7, %v5557_v48, %v10239_v34  ;;  %v11580_v34 = vld [vmem:[#allocation36_spill] sm:$0xff] }
0x1082   : > { %5486 = vrot.lane.b32.xlu1 %v4873_v32, %s6384_s29  ;;  %5442 = vrot.lane.b32.xlu0 %v11538_v44, %s6384_s29  ;;  %v4755_v44 = vsel %vm11548_vm2, %v9503_v12, %v11547_v5  ;;  %v4853_v32 = vsel %vm11553_vm13, %v11552_v17, %v11550_v0  ;;  %vm11581_vm13 = vcmask 1031168  }
0x1083   : > { %5918 = vmatprep.subr.bf16.mxu1 %v5711_v53  ;;  %v4675_v46 = vsel %vm11581_vm13, %v11520_v30, %v11580_v34  ;;  %v5275_v30 = vsel %vm5244_vm1, %v9876_v41, %v10137_v33 }
0x1084   : > { %v10249_v31 = vpop.permute.xlu0 %4925  ;;  %v5555_v8 = vpop.permute.xlu1 %5554 }
0x1085   : > { %v5710_v14 = vsel %vm1205_vm7, %v5555_v8, %v5557_v48  ;;  %v11549_v48 = vld [vmem:[#allocation64_spill] sm:$0xff] }
0x1086   : > { %5488 = vrot.lane.b32.xlu0 %v4874_v42, %s6384_s29  ;;  %5220 = vrot.lane.b32.xlu1 %v5090_v25, %s6415_s9  ;;  %v11555_v42 = vld [vmem:[#allocation49_spill] sm:$0xff] }
0x1087   : > { %5919 = vmatpush1.bf16.msra.mxu1 %v5710_v14  ;;  %v4852_v25 = vsel %vm11556_vm3, %v11555_v42, %v11552_v17  ;;  %v11557_v14 = vld [vmem:[#allocation42_spill] sm:$0xff]  ;;  %v11561_v17 = vld [vmem:[#allocation53_spill] sm:$0xff] }
0x1088   : > { %v5397_v39 = vpop.permute.xlu0 %5396  ;;  %v10260_v4 = vpop.permute.xlu1 %5398  ;;  %v4735_v61 = vsel %vm11558_vm5, %v9497_v15, %v11557_v14 }
0x1089   : > { %v5647_v2 = vsel %vm1205_vm7, %v5397_v39, %v10260_v4 }
0x108a   : > { %5484 = vrot.lane.b32.xlu1 %v4872_v40, %s6384_s29  ;;  %5222 = vrot.lane.b32.xlu0 %v10080_v7, %s6415_s9  ;;  %v4854_v7 = vsel %vm11551_vm15, %v11550_v0, %v11549_v48 }
0x108b   : > { %5865 = vmatprep.subr.bf16.mxu0 %v5647_v2 }
0x108c   : > { %v10270_v43 = vpop.permute.xlu0 %5180  ;;  %v10272_v10 = vpop.permute.xlu1 %5182 }
0x108e   : > { %5432 = vrot.lane.b32.xlu1 %v11547_v5, %s6384_s29  ;;  %5430 = vrot.lane.b32.xlu0 %v4755_v44, %s6384_s29  ;;  %v11559_v44 = vld [vmem:[#allocation60_spill] sm:$0xff] }
0x1090   : > { %v5395_v49 = vpop.permute.xlu0 %5394  ;;  %v5547_v6 = vpop.permute.xlu1 %5546 }
0x1091   : > { %v5646_v53 = vsel %vm1205_vm7, %v5395_v49, %v5397_v39  ;;  %v11560_v49 = vld [vmem:[#allocation51_spill] sm:$0xff] }
0x1092   : > { %5478 = vrot.lane.b32.xlu1 %v4854_v7, %s6384_s29  ;;  %5476 = vrot.lane.b32.xlu0 %v4853_v32, %s6384_s29  ;;  %v4833_v0 = vsel %vm593_vm4, %v11560_v49, %v11559_v44  ;;  %v4832_v32 = vsel %vm593_vm4, %v11561_v17, %v11560_v49  ;;  %v11565_v49 = vld [vmem:[#allocation50_spill] sm:$0xff] }
0x1093   : > { %5866 = vmatpush1.bf16.msra.mxu0 %v5646_v53  ;;  %v11562_v53 = vld [vmem:[#allocation55_spill] sm:$0xff]  ;;  %v11568_v17 = vld [vmem:[#allocation54_spill] sm:$0xff] }
0x1094   : > { %v10289_v12 = vpop.permute.xlu0 %5548  ;;  %v5545_v8 = vpop.permute.xlu1 %5544 }
0x1095   : > { %11554 = vst [vmem:[#allocation82_spill] sm:$0xff] %v10289_v12  ;;  %v5707_v40 = vsel %vm1205_vm7, %v5547_v6, %v10289_v12  ;;  %v5706_v39 = vsel %vm1205_vm7, %v5545_v8, %v5547_v6  ;;  %v4834_v8 = vsel %vm593_vm4, %v11559_v44, %v11562_v53 }
0x1096   : > { %5474 = vrot.lane.b32.xlu0 %v4852_v25, %s6384_s29  ;;  %5420 = vrot.lane.b32.xlu1 %v4735_v61, %s6384_s29 }
0x1097   : > { %5920 = vmatprep.subr.bf16.mxu1 %v5707_v40 }
0x1098   : > { %5921 = vmatpush1.bf16.msra.mxu1 %v5706_v39  ;;  %v5387_v2 = vpop.permute.xlu0 %5386  ;;  %v10302_v5 = vpop.permute.xlu1 %5388 }
0x1099   : > { %v5643_v15 = vsel %vm1205_vm7, %v5387_v2, %v10302_v5 }
0x109a   : > { %5422 = vrot.lane.b32.xlu0 %v11557_v14, %s6384_s29  ;;  %5466 = vrot.lane.b32.xlu1 %v4833_v0, %s6384_s29  ;;  %v11563_v14 = vld [vmem:[#allocation38_spill] sm:$0xff]  ;;  %v11566_v0 = vld [vmem:[#allocation47_spill] sm:$0xff] }
0x109b   : > { %5867 = vmatprep.subr.bf16.mxu0 %v5643_v15  ;;  %v4715_v61 = vsel %vm805_vm8, %v9428_v35, %v11563_v14  ;;  %v4813_v15 = vsel %vm11567_vm14, %v11566_v0, %v11565_v49  ;;  %vm11571_vm8 = vmmov %vm11569_vm6 }
0x109c   : > { %v10312_v6 = vpop.permute.xlu0 %5170  ;;  %v10314_v7 = vpop.permute.xlu1 %5172 }
0x109e   : > { %5468 = vrot.lane.b32.xlu0 %v4834_v8, %s6384_s29  ;;  %5464 = vrot.lane.b32.xlu1 %v4832_v32, %s6384_s29  ;;  %v4814_v32 = vsel %vm11569_vm6, %v11565_v49, %v11568_v17 }
0x10a0   : > { %v5385_v42 = vpop.permute.xlu0 %5384  ;;  %v5537_v25 = vpop.permute.xlu1 %5536 }
0x10a1   : > { %v5642_v40 = vsel %vm1205_vm7, %v5385_v42, %v5387_v2 }
0x10a2   : > { %5410 = vrot.lane.b32.xlu0 %v4715_v61, %s6384_s29  ;;  %5412 = vrot.lane.b32.xlu1 %v11563_v14, %s6384_s29  ;;  %v11570_v14 = vld [vmem:[#allocation39_spill] sm:$0xff] }
0x10a3   : > { %5868 = vmatpush1.bf16.msra.mxu0 %v5642_v40  ;;  %v4812_v61 = vsel %vm11571_vm8, %v11570_v14, %v11566_v0  ;;  %v11572_v40 = vld [vmem:[#allocation40_spill] sm:$0xff] }
0x10a4   : > { %v10331_v39 = vpop.permute.xlu0 %5538  ;;  %v5535_v44 = vpop.permute.xlu1 %5534  ;;  %v4695_v49 = vsel %vm671_vm9, %v9419_v3, %v11572_v40  ;;  %v11573_v3 = vld [vmem:[#allocation46_spill] sm:$0xff]  ;;  %vm11575_vm9 = vcmask 900096  }
0x10a5   : > { %11564 = vst [vmem:[#allocation77_spill] sm:$0xff] %v10331_v39  ;;  %v5703_v35 = vsel %vm1205_vm7, %v5537_v25, %v10331_v39  ;;  %v5702_v2 = vsel %vm1205_vm7, %v5535_v44, %v5537_v25  ;;  %v10357_v44 = vld [vmem:[%s10781_s4 + $0x4] ss:$16 sps:$4 sm:$0xff]   ;;  %vm11577_vm2 = vmmov %vm11575_vm9 }
0x10a6   : > { %5456 = vrot.lane.b32.xlu0 %v4813_v15, %s6384_s29  ;;  %5458 = vrot.lane.b32.xlu1 %v4814_v32, %s6384_s29  ;;  %v11574_v32 = vld [vmem:[#allocation44_spill] sm:$0xff]  ;;  %vm11579_vm15 = vmmov %vm11577_vm2 }
0x10a7   : > { %5922 = vmatprep.subr.bf16.mxu1 %v5703_v35  ;;  %5889 = vmatprep.mubr.bf16.mxu0 %v10357_v44  ;;  %v4793_v35 = vsel %vm11575_vm9, %v11574_v32, %v11573_v3 }
0x10a8   : > { %5923 = vmatpush1.bf16.msra.mxu1 %v5702_v2  ;;  %v5377_v8 = vpop.permute.xlu0 %5376  ;;  %v10344_v42 = vpop.permute.xlu1 %5378 }
0x10a9   : > { %v5639_v25 = vsel %vm1205_vm7, %v5377_v8, %v10344_v42 }
0x10aa   : > { %5454 = vrot.lane.b32.xlu0 %v4812_v61, %s6384_s29  ;;  %5400 = vrot.lane.b32.xlu1 %v4695_v49, %s6384_s29  ;;  %v11576_v61 = vld [vmem:[#allocation43_spill] sm:$0xff] }
0x10ab   : > { %5869 = vmatprep.subr.bf16.mxu0 %v5639_v25  ;;  %v4792_v49 = vsel %vm11577_vm2, %v11576_v61, %v11574_v32  ;;  %v11578_v25 = vld [vmem:[#allocation45_spill] sm:$0xff] }
0x10ac   : > { %v10362_v0 = vpop.permute.xlu0 %5160  ;;  %v10364_v15 = vpop.permute.xlu1 %5162  ;;  %v4794_v39 = vsel %vm11579_vm15, %v11573_v3, %v11578_v25 }
0x10ae   : > { %5402 = vrot.lane.b32.xlu0 %v11572_v40, %s6384_s29  ;;  %5446 = vrot.lane.b32.xlu1 %v4793_v35, %s6384_s29 }
0x10b0   : > { %v5375_v2 = vpop.permute.xlu0 %5374  ;;  %v5527_v14 = vpop.permute.xlu1 %5526 }
0x10b1   : > { %v5638_v12 = vsel %vm1205_vm7, %v5375_v2, %v5377_v8  ;;  %v5276_v8 = vsel %vm5244_vm1, %v10137_v33, %v10143_v47  ;;  %v11582_v2 = vld [vmem:[#allocation19_spill] sm:$0xff] }
0x10b2   : > { %5448 = vrot.lane.b32.xlu0 %v4794_v39, %s6384_s29  ;;  %5444 = vrot.lane.b32.xlu1 %v4792_v49, %s6384_s29  ;;  %v3334_v47 = vsel %vm300_vm12, %v11529_v1, %v11582_v2  ;;  %v3344_v49 = vmul.f32 %v11582_v2, %v8866_v11 }
0x10b3   : > { %5870 = vmatpush1.bf16.msra.mxu0 %v5638_v12  ;;  %v3343_v33 = vmul.f32 %v3334_v47, %v8900_v13 }
0x10b4   : > { %v10381_v40 = vpop.permute.xlu0 %5528  ;;  %v5525_v35 = vpop.permute.xlu1 %5524 }
0x10b5   : > { %v5699_v32 = vsel %vm1205_vm7, %v5527_v14, %v10381_v40  ;;  %v5698_v61 = vsel %vm1205_vm7, %v5525_v35, %v5527_v14  ;;  %v11583_v14 = vld [vmem:[#allocation35_spill] sm:$0xff]  ;;  %v3347_v35 = vmul.f32 %v3334_v47, %v8906_v27 }
0x10b6   : > { %5390 = vrot.lane.b32.xlu0 %v4675_v46, %s6384_s29  ;;  %5392 = vrot.lane.b32.xlu1 %v11580_v34, %s6384_s29  ;;  %v4655_v41 = vsel %vm449_vm11, %v11526_v45, %v11583_v14  ;;  %v5272_v45 = vsel %vm5244_vm1, %v10173_v63, %v10183_v50  ;;  %vm11589_vm11 = vcmask 457728  }
0x10b7   : > { %5924 = vmatprep.subr.bf16.mxu1 %v5699_v32  ;;  %v3348_v32 = vmul.f32 %v11582_v2, %v8871_v55  ;;  %v3352_v27 = vpack.c.bf16 %v3347_v35, %v3343_v33  ;;  %v5267_v2 = vsel %vm5244_vm1, %v9903_v62, %v10220_v60  ;;  %v11584_v33 = vld [vmem:[#allocation75_spill] sm:$0xff]  ;;  %v5264_v35 = vsel %vm5244_vm1, %v10270_v43, %v10272_v10 }
0x10b8   : > { %5925 = vmatpush1.bf16.msra.mxu1 %v5698_v61  ;;  %v5367_v12 = vpop.permute.xlu0 %5366  ;;  %v10392_v39 = vpop.permute.xlu1 %5368  ;;  %v4930_v62 = vsel %vm4927_vm10, %v9747_v57, %v11584_v33 }
0x10b9   : > { %v5635_v3 = vsel %vm1205_vm7, %v5367_v12, %v10392_v39 }
0x10ba   : > { %5600 = vrot.lane.b32.xlu0 %v5275_v30, %s6384_s29  ;;  %5602 = vrot.lane.b32.xlu1 %v5276_v8, %s6384_s29  ;;  %v5271_v8 = vsel %vm5244_vm1, %v9888_v38, %v10173_v63  ;;  %v3353_v30 = vpack.c.bf16 %v3348_v32, %v3344_v49  ;;  %v5263_v32 = vsel %vm5244_vm1, %v9922_v9, %v10270_v43 }
0x10bb   : > { %5871 = vmatprep.subr.bf16.mxu0 %v5635_v3 }
0x10bc   : > { %v10404_v46 = vpop.permute.xlu0 %5150  ;;  %v10406_v34 = vpop.permute.xlu1 %5152 }
0x10be   : > { %5380 = vrot.lane.b32.xlu0 %v4655_v41, %s6384_s29  ;;  %5382 = vrot.lane.b32.xlu1 %v11583_v14, %s6384_s29 }
0x10c0   : > { %v5365_v1 = vpop.permute.xlu0 %5364  ;;  %v5627_v61 = vpop.permute.xlu1 %5626 }
0x10c1   : > { %v5634_v13 = vsel %vm1205_vm7, %v5365_v1, %v5367_v12  ;;  %v5268_v12 = vsel %vm5244_vm1, %v10220_v60, %v10230_v56  ;;  %v4931_v56 = vsel %vm4927_vm10, %v11584_v33, %v10249_v31 }
0x10c2   : > { %5590 = vrot.lane.b32.xlu0 %v5271_v8, %s6384_s29  ;;  %5592 = vrot.lane.b32.xlu1 %v5272_v45, %s6384_s29  ;;  %v11586_v8 = vld [vmem:[#allocation74_spill] sm:$0xff] }
0x10c3   : > { %5872 = vmatpush1.bf16.msra.mxu0 %v5634_v13 }
0x10c4   : > { %v10432_v11 = vpop.permute.xlu0 %5628  ;;  %v5625_v55 = vpop.permute.xlu1 %5624 }
0x10c5   : > { %v5739_v3 = vsel %vm1205_vm7, %v5627_v61, %v10432_v11  ;;  %v5738_v50 = vsel %vm1205_vm7, %v5625_v55, %v5627_v61  ;;  %v11585_v61 = vld [vmem:[#allocation69_spill] sm:$0xff] }
0x10c6   : > { %5370 = vrot.lane.b32.xlu0 %v3352_v27, %s6384_s29  ;;  %5372 = vrot.lane.b32.xlu1 %v3353_v30, %s6384_s29  ;;  %v4910_v45 = vsel %vm4907_vm0, %v9731_v22, %v11585_v61  ;;  %v4911_v10 = vsel %vm4907_vm0, %v11585_v61, %v11586_v8  ;;  %v5260_v22 = vsel %vm5244_vm1, %v10312_v6, %v10314_v7  ;;  %vm11596_vm0 = vmmov %vm11577_vm2 }
0x10c7   : > { %5936 = vmatprep.subr.bf16.mxu1 %v5739_v3  ;;  %v5259_v27 = vsel %vm5244_vm1, %v9941_v51, %v10312_v6  ;;  %v5256_v7 = vsel %vm5244_vm1, %v10362_v0, %v10364_v15 }
0x10c8   : > { %5937 = vmatpush2.bf16.msra.mxu1 %v5738_v50  ;;  %v5517_v38 = vpop.permute.xlu0 %5516  ;;  %v10439_v63 = vpop.permute.xlu1 %5518 }
0x10c9   : > { %v5695_v47 = vsel %vm1205_vm7, %v5517_v38, %v10439_v63 }
0x10ca   : > { %5582 = vrot.lane.b32.xlu1 %v5268_v12, %s6384_s29  ;;  %5580 = vrot.lane.b32.xlu0 %v5267_v2, %s6384_s29  ;;  %v5255_v2 = vsel %vm5244_vm1, %v9958_v16, %v10362_v0  ;;  %v10528_v16 = vld [vmem:[%s10781_s4 + $0x8] ss:$16 sps:$4 sm:$0xff]  }
0x10cb   : > { %5873 = vmatprep.subr.bf16.mxu0 %v5695_v47 }
0x10cc   : > { %v10451_v14 = vpop.permute.xlu0 %5140  ;;  %v10453_v41 = vpop.permute.xlu1 %5142 }
0x10ce   : > { %5520 = vrot.lane.b32.xlu0 %v4930_v62, %s6384_s29  ;;  %5522 = vrot.lane.b32.xlu1 %v4931_v56, %s6384_s29  ;;  %v11588_v56 = vld [vmem:[#allocation72_spill] sm:$0xff] }
0x10cf   : > { %v4875_v62 = vsel %vm11589_vm11, %v11543_v29, %v11588_v56  ;;  %v10535_v29 = vld [vmem:[%s10781_s4 + $0x2c] ss:$16 sps:$4 sm:$0xff]  }
0x10d0   : > { %v5515_v60 = vpop.permute.xlu0 %5514  ;;  %v5617_v49 = vpop.permute.xlu1 %5616 }
0x10d1   : > { %v5694_v31 = vsel %vm1205_vm7, %v5515_v60, %v5517_v38  ;;  %v11587_v38 = vld [vmem:[#allocation71_spill] sm:$0xff] }
0x10d2   : > { %5570 = vrot.lane.b32.xlu0 %v5263_v32, %s6384_s29  ;;  %5572 = vrot.lane.b32.xlu1 %v5264_v35, %s6384_s29  ;;  %v4891_v12 = vsel %vm300_vm12, %v11534_v24, %v11587_v38  ;;  %v5252_v35 = vsel %vm5244_vm1, %v10404_v46, %v10406_v34  ;;  %v5251_v32 = vsel %vm5244_vm1, %v9978_v21, %v10404_v46  ;;  %v11590_v34 = vld [vmem:[#allocation57_spill] sm:$0xff]  ;;  %vm11591_vm12 = vmmov %vm11556_vm3 }
0x10d3   : > { %5874 = vmatpush2.bf16.msra.mxu0 %v5694_v31  ;;  %v10559_v21 = vld [vmem:[%s10781_s4 + $0x28] ss:$16 sps:$4 sm:$0xff]  }
0x10d4   : > { %v10472_v57 = vpop.permute.xlu0 %5618  ;;  %v5615_v1 = vpop.permute.xlu1 %5614 }
0x10d5   : > { %v5735_v9 = vsel %vm1205_vm7, %v5617_v49, %v10472_v57  ;;  %v5734_v43 = vsel %vm1205_vm7, %v5615_v1, %v5617_v49 }
0x10d6   : > { %5510 = vrot.lane.b32.xlu0 %v4910_v45, %s6384_s29  ;;  %5512 = vrot.lane.b32.xlu1 %v4911_v10, %s6384_s29  ;;  %v4855_v45 = vsel %vm11591_vm12, %v11549_v48, %v11590_v34  ;;  %v5247_v10 = vsel %vm5244_vm1, %v9994_v23, %v10451_v14  ;;  %v5248_v48 = vsel %vm5244_vm1, %v10451_v14, %v10453_v41 }
0x10d7   : > { %5938 = vmatprep.subr.bf16.mxu1 %v5735_v9 }
0x10d8   : > { %5939 = vmatpush2.bf16.msra.mxu1 %v5734_v43  ;;  %v5507_v13 = vpop.permute.xlu0 %5506  ;;  %v10485_v55 = vpop.permute.xlu1 %5508 }
0x10d9   : > { %v5691_v30 = vsel %vm1205_vm7, %v5507_v13, %v10485_v55 }
0x10da   : > { %5560 = vrot.lane.b32.xlu0 %v5259_v27, %s6384_s29  ;;  %5562 = vrot.lane.b32.xlu1 %v5260_v22, %s6384_s29  ;;  %v11592_v22 = vld [vmem:[#allocation62_spill] sm:$0xff] }
0x10db   : > { %5875 = vmatprep.subr.bf16.mxu0 %v5691_v30  ;;  %v4835_v23 = vsel %vm593_vm4, %v11562_v53, %v11592_v22  ;;  %vm11594_vm4 = vmmov %vm11569_vm6 }
0x10dc   : > { %v10497_v3 = vpop.permute.xlu0 %5240  ;;  %v5243_v50 = vpop.permute.xlu1 %5242 }
0x10dd   : > { %v5288_v53 = vsel %vm5244_vm1, %v10497_v3, %v5243_v50 }
0x10de   : > { %5500 = vrot.lane.b32.xlu0 %v4891_v12, %s6384_s29  ;;  %5502 = vrot.lane.b32.xlu1 %v11587_v38, %s6384_s29 }
0x10e0   : > { %v5505_v51 = vpop.permute.xlu0 %5504  ;;  %v5607_v6 = vpop.permute.xlu1 %5606 }
0x10e1   : > { %v5690_v47 = vsel %vm1205_vm7, %v5505_v51, %v5507_v13  ;;  %v11593_v51 = vld [vmem:[#allocation52_spill] sm:$0xff] }
0x10e2   : > { %5550 = vrot.lane.b32.xlu0 %v5255_v2, %s6384_s29  ;;  %5552 = vrot.lane.b32.xlu1 %v5256_v7, %s6384_s29 }
0x10e3   : > { %5876 = vmatpush2.bf16.msra.mxu0 %v5690_v47 }
0x10e4   : > { %v10514_v24 = vpop.permute.xlu0 %5608  ;;  %v5605_v33 = vpop.permute.xlu1 %5604 }
0x10e5   : > { %v5731_v15 = vsel %vm1205_vm7, %v5607_v6, %v10514_v24  ;;  %v5730_v60 = vsel %vm1205_vm7, %v5605_v33, %v5607_v6  ;;  %v4815_v6 = vsel %vm11594_vm4, %v11568_v17, %v11593_v51 }
0x10e6   : > { %5490 = vrot.lane.b32.xlu0 %v4875_v62, %s6384_s29  ;;  %5492 = vrot.lane.b32.xlu1 %v11588_v56, %s6384_s29  ;;  %v11595_v62 = vld [vmem:[#allocation48_spill] sm:$0xff] }
0x10e7   : > { %5940 = vmatprep.subr.bf16.mxu1 %v5731_v15 }
0x10e8   : > { %5941 = vmatpush2.bf16.msra.mxu1 %v5730_v60  ;;  %v5497_v0 = vpop.permute.xlu0 %5496  ;;  %v10530_v49 = vpop.permute.xlu1 %5498 }
0x10e9   : > { %v5687_v31 = vsel %vm1205_vm7, %v5497_v0, %v10530_v49 }
0x10ea   : > { %5540 = vrot.lane.b32.xlu0 %v5251_v32, %s6384_s29  ;;  %5542 = vrot.lane.b32.xlu1 %v5252_v35, %s6384_s29 }
0x10eb   : > { %5877 = vmatprep.subr.bf16.mxu0 %v5687_v31  ;;  %5943 = vmatmul.mubr.bf16.vlgmr.msra.gmra.mxu1 %v10528_v16  ;;  %v5297_v31 = vld [vmem:[%s10782_s5] sm:$0xff] }
0x10ec   : > { %v5231_v1 = vpop.permute.xlu0 %5230  ;;  %v5233_v61 = vpop.permute.xlu1 %5232  ;;  %6172 = vmatprep.mubr.msk.bf16.mxu1 %vm4927_vm10, %v10535_v29 }
0x10ed   : > { %v5283_v50 = vsel %vm5244_vm1, %v10034_v28, %v5231_v1  ;;  %v5284_v2 = vsel %vm5244_vm1, %v5231_v1, %v5233_v61  ;;  %v4795_v28 = vsel %vm11596_vm0, %v11578_v25, %v11595_v62  ;;  %v5298_v25 = vld [vmem:[%s10782_s5 + $0x8] sm:$0xff] }
0x10ee   : > { %5480 = vrot.lane.b32.xlu0 %v4855_v45, %s6384_s29  ;;  %5482 = vrot.lane.b32.xlu1 %v11590_v34, %s6384_s29  ;;  %v5300_v45 = vld [vmem:[%s10782_s5 + $0x18] sm:$0xff] }
0x10f0   : > { %v5495_v46 = vpop.permute.xlu0 %5494  ;;  %v5441_v8 = vpop.permute.xlu1 %5440 }
0x10f1   : > { %v5686_v9 = vsel %vm1205_vm7, %v5495_v46, %v5497_v0  ;;  %v5664_v14 = vsel %vm1205_vm7, %v10100_v20, %v5441_v8  ;;  %v5299_v46 = vld [vmem:[%s10782_s5 + $0x10] sm:$0xff] }
0x10f2   : > { %5530 = vrot.lane.b32.xlu0 %v5247_v10, %s6384_s29  ;;  %5532 = vrot.lane.b32.xlu1 %v5248_v48, %s6384_s29 }
0x10f3   : > { %5878 = vmatpush2.bf16.msra.mxu0 %v5686_v9  ;;  %5953 = vmatmul.mubr.bf16.gmra.mxu1 %v10559_v21 }
0x10f4   : > { %v5443_v43 = vpop.permute.xlu0 %5442  ;;  %v5487_v13 = vpop.permute.xlu1 %5486  ;;  %5995 = vmatprep.mubr.bf16.mxu1 %v10357_v44  ;;  %v5287_v44 = vsel %vm5244_vm1, %v10020_v26, %v10497_v3 }
0x10f5   : > { %v5665_v27 = vsel %vm1205_vm7, %v5441_v8, %v5443_v43 }
0x10f6   : > { %5470 = vrot.lane.b32.xlu0 %v4835_v23, %s6384_s29  ;;  %5472 = vrot.lane.b32.xlu1 %v11592_v22, %s6384_s29 }
0x10f7   : > { %5963 = vmatprep.subr.bf16.mxu1 %v5665_v27 }
0x10f8   : > { %5964 = vmatpush1.bf16.msra.mxu1 %v5664_v14  ;;  %v10581_v41 = vpop.permute.xlu0 %5488  ;;  %v5221_v30 = vpop.permute.xlu1 %5220 }
0x10f9   : > { %v5683_v38 = vsel %vm1205_vm7, %v5487_v13, %v10581_v41  ;;  %v5279_v0 = vsel %vm5244_vm1, %v10058_v18, %v5221_v30 }
0x10fa   : > { %5630 = vrot.lane.b32.xlu0 %v5287_v44, %s6384_s29  ;;  %5632 = vrot.lane.b32.xlu1 %v5288_v53, %s6384_s29 }
0x10fb   : > { %5879 = vmatprep.subr.bf16.mxu0 %v5683_v38 }
0x10fc   : > { %v5223_v20 = vpop.permute.xlu0 %5222  ;;  %v5485_v12 = vpop.permute.xlu1 %5484 }
0x10fd   : > { %v5682_v7 = vsel %vm1205_vm7, %v5485_v12, %v5487_v13  ;;  %v5280_v35 = vsel %vm5244_vm1, %v5221_v30, %v5223_v20 }
0x10fe   : > { %5460 = vrot.lane.b32.xlu0 %v4815_v6, %s6384_s29  ;;  %5462 = vrot.lane.b32.xlu1 %v11593_v51, %s6384_s29 }
0x10ff   : > { %5880 = vmatpush2.bf16.msra.mxu0 %v5682_v7 }
0x1100   : > { %v5431_v26 = vpop.permute.xlu0 %5430  ;;  %v5433_v3 = vpop.permute.xlu1 %5432 }
0x1101   : > { %v5660_v47 = vsel %vm1205_vm7, %v10135_v36, %v5431_v26  ;;  %v5661_v17 = vsel %vm1205_vm7, %v5431_v26, %v5433_v3  ;;  %v10662_v3 = vld [vmem:[%s10781_s4] ss:$16 sps:$4 sm:$0xff]  }
0x1102   : > { %5620 = vrot.lane.b32.xlu0 %v5283_v50, %s6384_s29  ;;  %5622 = vrot.lane.b32.xlu1 %v5284_v2, %s6384_s29 }
0x1103   : > { %5965 = vmatprep.subr.bf16.mxu1 %v5661_v17 }
0x1104   : > { %5966 = vmatpush1.bf16.msra.mxu1 %v5660_v47  ;;  %v5477_v33 = vpop.permute.xlu0 %5476  ;;  %v10607_v56 = vpop.permute.xlu1 %5478 }
0x1105   : > { %v5679_v15 = vsel %vm1205_vm7, %v5477_v33, %v10607_v56 }
0x1106   : > { %5450 = vrot.lane.b32.xlu0 %v4795_v28, %s6384_s29  ;;  %5452 = vrot.lane.b32.xlu1 %v11595_v62, %s6384_s29 }
0x1107   : > { %5881 = vmatprep.subr.bf16.mxu0 %v5679_v15 }
0x1108   : > { %v5475_v36 = vpop.permute.xlu0 %5474  ;;  %v5421_v60 = vpop.permute.xlu1 %5420 }
0x1109   : > { %v5678_v32 = vsel %vm1205_vm7, %v5475_v36, %v5477_v33  ;;  %v5656_v34 = vsel %vm1205_vm7, %v10171_v37, %v5421_v60 }
0x110a   : > { %5612 = vrot.lane.b32.xlu1 %v5280_v35, %s6384_s29  ;;  %5610 = vrot.lane.b32.xlu0 %v5279_v0, %s6384_s29 }
0x110b   : > { %5882 = vmatpush2.bf16.msra.mxu0 %v5678_v32 }
0x110c   : > { %v5423_v1 = vpop.permute.xlu0 %5422  ;;  %v5467_v61 = vpop.permute.xlu1 %5466 }
0x110d   : > { %v5657_v18 = vsel %vm1205_vm7, %v5421_v60, %v5423_v1 }
0x110e   : > { %5308 = vperm.xlu1 %6298, %v5298_v25   ;;  %5303 = vperm.xlu0 %6296, %v5297_v31  }
0x110f   : > { %5967 = vmatprep.subr.bf16.mxu1 %v5657_v18 }
0x1110   : > { %5968 = vmatpush1.bf16.msra.mxu1 %v5656_v34  ;;  %v10638_v8 = vpop.permute.xlu0 %5468  ;;  %v5465_v10 = vpop.permute.xlu1 %5464 }
0x1111   : > { %v5675_v48 = vsel %vm1205_vm7, %v5467_v61, %v10638_v8  ;;  %v5674_v9 = vsel %vm1205_vm7, %v5465_v10, %v5467_v61 }
0x1112   : > { %5318 = vperm.xlu1 %6298, %v5300_v45   ;;  %5313 = vperm.xlu0 %6296, %v5299_v46  }
0x1113   : > { %5883 = vmatprep.subr.bf16.mxu0 %v5675_v48 }
0x1114   : > { %5884 = vmatpush2.bf16.msra.mxu0 %v5674_v9  ;;  %v5411_v37 = vpop.permute.xlu0 %5410  ;;  %v5413_v43 = vpop.permute.xlu1 %5412 }
0x1115   : > { %v5652_v13 = vsel %vm1205_vm7, %v10218_v58, %v5411_v37  ;;  %v5653_v22 = vsel %vm1205_vm7, %v5411_v37, %v5413_v43  ;;  %v11597_v43 = vld [vmem:[#allocation80_spill] sm:$0xff] }
0x1116   : > { %5969 = vmatprep.subr.bf16.mxu1 %v5653_v22 }
0x1117   : > { %5970 = vmatpush1.bf16.msra.mxu1 %v5652_v13 }
0x1118   : > { %v5457_v23 = vpop.permute.xlu0 %5456  ;;  %v10646_v27 = vpop.permute.xlu1 %5458 }
0x1119   : > { %v5671_v14 = vsel %vm1205_vm7, %v5457_v23, %v10646_v27 }
0x111a   : > { %5885 = vmatprep.subr.bf16.mxu0 %v5671_v14 }
0x111c   : > { %v5455_v30 = vpop.permute.xlu0 %5454  ;;  %v5401_v44 = vpop.permute.xlu1 %5400 }
0x111d   : > { %v5670_v53 = vsel %vm1205_vm7, %v5455_v30, %v5457_v23  ;;  %v5648_v12 = vsel %vm1205_vm7, %v10260_v4, %v5401_v44  ;;  %v10667_v4 = vld [vmem:[%s10781_s4 + $0x24] ss:$16 sps:$4 sm:$0xff]  }
0x111e   : > { %5886 = vmatpush2.bf16.msra.mxu0 %v5670_v53  ;;  %v11598_v53 = vld [vmem:[#allocation78_spill] sm:$0xff] }
0x1120   : > { %v5403_v38 = vpop.permute.xlu0 %5402  ;;  %v5447_v20 = vpop.permute.xlu1 %5446 }
0x1121   : > { %v5649_v58 = vsel %vm1205_vm7, %v5401_v44, %v5403_v38 }
0x1122   : > { %5971 = vmatprep.subr.bf16.mxu1 %v5649_v58 }
0x1123   : > { %5972 = vmatpush1.bf16.msra.mxu1 %v5648_v12 }
0x1124   : > { %v10654_v51 = vpop.permute.xlu0 %5448  ;;  %v5445_v6 = vpop.permute.xlu1 %5444 }
0x1125   : > { %v5667_v7 = vsel %vm1205_vm7, %v5447_v20, %v10654_v51  ;;  %v5666_v26 = vsel %vm1205_vm7, %v5445_v6, %v5447_v20 }
0x1126   : > { %5887 = vmatprep.subr.bf16.mxu0 %v5667_v7 }
0x1127   : > { %5888 = vmatpush2.bf16.msra.mxu0 %v5666_v26 }
0x1128   : > { %v5391_v50 = vpop.permute.xlu0 %5390  ;;  %v5393_v2 = vpop.permute.xlu1 %5392 }
0x1129   : > { %v5644_v47 = vsel %vm1205_vm7, %v10302_v5, %v5391_v50  ;;  %v5645_v17 = vsel %vm1205_vm7, %v5391_v50, %v5393_v2  ;;  %v10680_v5 = vld [vmem:[%s10781_s4 + $0x20] ss:$16 sps:$4 sm:$0xff]  }
0x112a   : > { %5890 = vmatmul.mubr.bf16.vlgmr.msra.gmra.mxu0 %v10662_v3  ;;  %5973 = vmatprep.subr.bf16.mxu1 %v5645_v17  ;;  %v11599_v50 = vld [vmem:[#allocation82_spill] sm:$0xff] }
0x112b   : > { %5974 = vmatpush1.bf16.msra.mxu1 %v5644_v47  ;;  %5899 = vmatprep.mubr.bf16.mxu0 %v10667_v4 }
0x112c   : > { %v5601_v33 = vpop.permute.xlu0 %5600  ;;  %v5603_v62 = vpop.permute.xlu1 %5602 }
0x112d   : > { %v5728_v28 = vsel %vm1205_vm7, %v10086_v19, %v5601_v33  ;;  %v5729_v15 = vsel %vm1205_vm7, %v5601_v33, %v5603_v62 }
0x112e   : > { %6016 = vmatprep.subr.bf16.mxu0 %v5729_v15 }
0x112f   : > { %6017 = vmatpush1.bf16.msra.mxu0 %v5728_v28 }
0x1130   : > { %v5381_v36 = vpop.permute.xlu0 %5380  ;;  %v5383_v60 = vpop.permute.xlu1 %5382 }
0x1131   : > { %v5640_v0 = vsel %vm1205_vm7, %v10344_v42, %v5381_v36  ;;  %v5641_v35 = vsel %vm1205_vm7, %v5381_v36, %v5383_v60  ;;  %v11600_v36 = vld [vmem:[#allocation77_spill] sm:$0xff] }
0x1132   : > { %5900 = vmatmul.mubr.bf16.gmra.mxu0 %v10680_v5  ;;  %5975 = vmatprep.subr.bf16.mxu1 %v5641_v35 }
0x1133   : > { %5976 = vmatpush1.bf16.msra.mxu1 %v5640_v0  ;;  %6173 = vmatprep.mubr.msk.bf16.mxu0 %vm4927_vm10, %v10205_v54 }
0x1134   : > { %v5591_v19 = vpop.permute.xlu0 %5590  ;;  %v5593_v32 = vpop.permute.xlu1 %5592 }
0x1135   : > { %v5724_v25 = vsel %vm1205_vm7, %v10110_v59, %v5591_v19  ;;  %v5725_v31 = vsel %vm1205_vm7, %v5591_v19, %v5593_v32 }
0x1136   : > { %6018 = vmatprep.subr.bf16.mxu0 %v5725_v31 }
0x1137   : > { %6019 = vmatpush1.bf16.msra.mxu0 %v5724_v25 }
0x1138   : > { %v5371_v1 = vpop.permute.xlu0 %5370  ;;  %v5373_v42 = vpop.permute.xlu1 %5372 }
0x1139   : > { %v5636_v61 = vsel %vm1205_vm7, %v10392_v39, %v5371_v1  ;;  %v5637_v18 = vsel %vm1205_vm7, %v5371_v1, %v5373_v42 }
0x113a   : > { %5977 = vmatprep.subr.bf16.mxu1 %v5637_v18 }
0x113b   : > { %5978 = vmatpush1.bf16.msra.mxu1 %v5636_v61 }
0x113c   : > { %v5581_v34 = vpop.permute.xlu0 %5580  ;;  %v5583_v54 = vpop.permute.xlu1 %5582 }
0x113d   : > { %v5720_v45 = vsel %vm1205_vm7, %v10152_v52, %v5581_v34  ;;  %v5721_v59 = vsel %vm1205_vm7, %v5581_v34, %v5583_v54 }
0x113e   : > { %6020 = vmatprep.subr.bf16.mxu0 %v5721_v59 }
0x113f   : > { %6021 = vmatpush1.bf16.msra.mxu0 %v5720_v45 }
0x1140   : > { %v5521_v46 = vpop.permute.xlu0 %5520  ;;  %v5523_v10 = vpop.permute.xlu1 %5522 }
0x1141   : > { %v5696_v48 = vsel %vm1205_vm7, %v10439_v63, %v5521_v46  ;;  %v5697_v39 = vsel %vm1205_vm7, %v5521_v46, %v5523_v10 }
0x1142   : > { %5979 = vmatprep.subr.bf16.mxu1 %v5697_v39 }
0x1143   : > { %5980 = vmatpush2.bf16.msra.mxu1 %v5696_v48 }
0x1144   : > { %v5571_v9 = vpop.permute.xlu0 %5570  ;;  %v5573_v37 = vpop.permute.xlu1 %5572 }
0x1145   : > { %v5716_v13 = vsel %vm1205_vm7, %v11597_v43, %v5571_v9  ;;  %v5717_v52 = vsel %vm1205_vm7, %v5571_v9, %v5573_v37 }
0x1146   : > { %6022 = vmatprep.subr.bf16.mxu0 %v5717_v52 }
0x1147   : > { %6023 = vmatpush1.bf16.msra.mxu0 %v5716_v13 }
0x1148   : > { %v5511_v22 = vpop.permute.xlu0 %5510  ;;  %v5513_v23 = vpop.permute.xlu1 %5512 }
0x1149   : > { %v5692_v14 = vsel %vm1205_vm7, %v10485_v55, %v5511_v22  ;;  %v5693_v63 = vsel %vm1205_vm7, %v5511_v22, %v5513_v23 }
0x114a   : > { %5981 = vmatprep.subr.bf16.mxu1 %v5693_v63 }
0x114b   : > { %5982 = vmatpush2.bf16.msra.mxu1 %v5692_v14 }
0x114c   : > { %v5561_v30 = vpop.permute.xlu0 %5560  ;;  %v5563_v44 = vpop.permute.xlu1 %5562 }
0x114d   : > { %v5712_v38 = vsel %vm1205_vm7, %v11598_v53, %v5561_v30  ;;  %v5713_v20 = vsel %vm1205_vm7, %v5561_v30, %v5563_v44 }
0x114e   : > { %6024 = vmatprep.subr.bf16.mxu0 %v5713_v20 }
0x114f   : > { %6025 = vmatpush1.bf16.msra.mxu0 %v5712_v38 }
0x1150   : > { %v5501_v58 = vpop.permute.xlu0 %5500  ;;  %v5503_v12 = vpop.permute.xlu1 %5502 }
0x1151   : > { %v5688_v6 = vsel %vm1205_vm7, %v10530_v49, %v5501_v58  ;;  %v5689_v55 = vsel %vm1205_vm7, %v5501_v58, %v5503_v12 }
0x1152   : > { %5983 = vmatprep.subr.bf16.mxu1 %v5689_v55 }
0x1153   : > { %5984 = vmatpush2.bf16.msra.mxu1 %v5688_v6 }
0x1154   : > { %v5551_v7 = vpop.permute.xlu0 %5550  ;;  %v5553_v26 = vpop.permute.xlu1 %5552 }
0x1155   : > { %v5708_v2 = vsel %vm1205_vm7, %v11599_v50, %v5551_v7  ;;  %v5709_v47 = vsel %vm1205_vm7, %v5551_v7, %v5553_v26 }
0x1156   : > { %6026 = vmatprep.subr.bf16.mxu0 %v5709_v47 }
0x1157   : > { %6027 = vmatpush1.bf16.msra.mxu0 %v5708_v2 }
0x1158   : > { %v5491_v17 = vpop.permute.xlu0 %5490  ;;  %v5493_v33 = vpop.permute.xlu1 %5492 }
0x1159   : > { %v5684_v62 = vsel %vm1205_vm7, %v10581_v41, %v5491_v17  ;;  %v5685_v49 = vsel %vm1205_vm7, %v5491_v17, %v5493_v33 }
0x115a   : > { %5985 = vmatprep.subr.bf16.mxu1 %v5685_v49 }
0x115b   : > { %5986 = vmatpush2.bf16.msra.mxu1 %v5684_v62 }
0x115c   : > { %v5541_v28 = vpop.permute.xlu0 %5540  ;;  %v5543_v15 = vpop.permute.xlu1 %5542 }
0x115d   : > { %v5704_v60 = vsel %vm1205_vm7, %v11600_v36, %v5541_v28  ;;  %v5705_v0 = vsel %vm1205_vm7, %v5541_v28, %v5543_v15 }
0x115e   : > { %6028 = vmatprep.subr.bf16.mxu0 %v5705_v0 }
0x115f   : > { %6029 = vmatpush1.bf16.msra.mxu0 %v5704_v60 }
0x1160   : > { %v5481_v35 = vpop.permute.xlu0 %5480  ;;  %v5483_v19 = vpop.permute.xlu1 %5482 }
0x1161   : > { %v5680_v32 = vsel %vm1205_vm7, %v10607_v56, %v5481_v35  ;;  %v5681_v41 = vsel %vm1205_vm7, %v5481_v35, %v5483_v19 }
0x1162   : > { %5987 = vmatprep.subr.bf16.mxu1 %v5681_v41 }
0x1163   : > { %5988 = vmatpush2.bf16.msra.mxu1 %v5680_v32 }
0x1164   : > { %v5531_v25 = vpop.permute.xlu0 %5530  ;;  %v5533_v31 = vpop.permute.xlu1 %5532 }
0x1165   : > { %v5700_v1 = vsel %vm1205_vm7, %v10381_v40, %v5531_v25  ;;  %v5701_v42 = vsel %vm1205_vm7, %v5531_v25, %v5533_v31 }
0x1166   : > { %6030 = vmatprep.subr.bf16.mxu0 %v5701_v42 }
0x1167   : > { %6031 = vmatpush1.bf16.msra.mxu0 %v5700_v1 }
0x1168   : > { %v5471_v61 = vpop.permute.xlu0 %5470  ;;  %v5473_v18 = vpop.permute.xlu1 %5472 }
0x1169   : > { %v5676_v34 = vsel %vm1205_vm7, %v10638_v8, %v5471_v61  ;;  %v5677_v56 = vsel %vm1205_vm7, %v5471_v61, %v5473_v18 }
0x116a   : > { %5989 = vmatprep.subr.bf16.mxu1 %v5677_v56 }
0x116b   : > { %5990 = vmatpush2.bf16.msra.mxu1 %v5676_v34 }
0x116c   : > { %v5631_v54 = vpop.permute.xlu0 %5630  ;;  %v5633_v45 = vpop.permute.xlu1 %5632 }
0x116d   : > { %v5740_v59 = vsel %vm1205_vm7, %v10432_v11, %v5631_v54  ;;  %v5741_v40 = vsel %vm1205_vm7, %v5631_v54, %v5633_v45 }
0x116e   : > { %6042 = vmatprep.subr.bf16.mxu0 %v5741_v40 }
0x116f   : > { %6043 = vmatpush2.bf16.msra.mxu0 %v5740_v59 }
0x1170   : > { %v5461_v46 = vpop.permute.xlu0 %5460  ;;  %v5463_v10 = vpop.permute.xlu1 %5462 }
0x1171   : > { %v5672_v48 = vsel %vm1205_vm7, %v10646_v27, %v5461_v46  ;;  %v5673_v8 = vsel %vm1205_vm7, %v5461_v46, %v5463_v10 }
0x1172   : > { %5991 = vmatprep.subr.bf16.mxu1 %v5673_v8 }
0x1173   : > { %5992 = vmatpush2.bf16.msra.mxu1 %v5672_v48 }
0x1174   : > { %v5621_v39 = vpop.permute.xlu0 %5620  ;;  %v5623_v9 = vpop.permute.xlu1 %5622 }
0x1175   : > { %v5736_v37 = vsel %vm1205_vm7, %v10472_v57, %v5621_v39  ;;  %v5737_v11 = vsel %vm1205_vm7, %v5621_v39, %v5623_v9 }
0x1176   : > { %6044 = vmatprep.subr.bf16.mxu0 %v5737_v11 }
0x1177   : > { %6045 = vmatpush2.bf16.msra.mxu0 %v5736_v37 }
0x1178   : > { %v5451_v43 = vpop.permute.xlu0 %5450  ;;  %v5453_v13 = vpop.permute.xlu1 %5452 }
0x1179   : > { %v5668_v52 = vsel %vm1205_vm7, %v10654_v51, %v5451_v43  ;;  %v5669_v27 = vsel %vm1205_vm7, %v5451_v43, %v5453_v13 }
0x117a   : > { %5993 = vmatprep.subr.bf16.mxu1 %v5669_v27 }
0x117b   : > { %5994 = vmatpush2.bf16.msra.mxu1 %v5668_v52 }
0x117c   : > { %v5611_v22 = vpop.permute.xlu0 %5610  ;;  %v5613_v23 = vpop.permute.xlu1 %5612 }
0x117d   : > { %v5732_v14 = vsel %vm1205_vm7, %v10514_v24, %v5611_v22  ;;  %v5733_v57 = vsel %vm1205_vm7, %v5611_v22, %v5613_v23 }
0x117e   : > { %5996 = vmatmul.mubr.bf16.vlgmr.msra.gmra.mxu1 %v10662_v3  ;;  %6046 = vmatprep.subr.bf16.mxu0 %v5733_v57 }
0x117f   : > { %6047 = vmatpush2.bf16.msra.mxu0 %v5732_v14  ;;  %6005 = vmatprep.mubr.bf16.mxu1 %v10667_v4 }
0x1182   : > { %6049 = vmatmul.mubr.bf16.vlgmr.msra.gmra.mxu0 %v10528_v16 }
0x1183   : > { %6174 = vmatprep.mubr.msk.bf16.mxu0 %vm4927_vm10, %v10535_v29 }
0x1186   : > { %6006 = vmatmul.mubr.bf16.gmra.mxu1 %v10680_v5 }
0x1189   : > { %v5304_v44 = vpop.permute.xlu0 %5303  ;;  %v5309_v16 = vpop.permute.xlu1 %5308 }
0x118a   : > { %6059 = vmatmul.mubr.bf16.gmra.mxu0 %v10559_v21 }
0x118d   : > { %v5314_v2 = vpop.permute.xlu0 %5313  ;;  %v5319_v0 = vpop.permute.xlu1 %5318 }
0x11ab   : > { %v5944_v51 = vpop.f32.mrf.mxu1 }
0x11ad   : > { %v5946_v24 = vpop.f32.mrf.mxu1 }
0x11af   : > { %v5948_v63 = vpop.f32.mrf.mxu1 }
0x11b1   : > { %v5950_v30 = vpop.f32.mrf.mxu1 }
0x11b3   : > { %v5954_v20 = vpop.f32.mrf.mxu1 }
0x11b5   : > { %v5956_v55 = vpop.f32.mrf.mxu1 }
0x11b7   : > { %v5958_v28 = vpop.f32.mrf.mxu1 }
0x11b9   : > { %v5960_v31 = vpop.f32.mrf.mxu1 }
0x11ea   : > { %v5891_v53 = vpop.f32.mrf.mxu0 }
0x11eb   : > { %v5892_v3 = vadd.f32 %v5891_v53, %v5304_v44 }
0x11ec   : > { %v5893_v38 = vpop.f32.mrf.mxu0 }
0x11ed   : > { %v5894_v4 = vadd.f32 %v5893_v38, %v5304_v44  ;;  %v5945_v58 = vadd.f32 %v5944_v51, %v5892_v3 }
0x11ee   : > { %v5895_v29 = vpop.f32.mrf.mxu0 }
0x11ef   : > { %v6069_v21 = vmax.f32 %v5945_v58, 0.0  ;;  %v5896_v5 = vadd.f32 %v5895_v29, %v5309_v16  ;;  %v5947_v12 = vadd.f32 %v5946_v24, %v5894_v4 }
0x11f0   : > { %v5897_v6 = vpop.f32.mrf.mxu0 }
0x11f1   : > { %6085 = vst [vmem:[%s10756_s30] sm:$0xff] %v6069_v21  ;;  %v6070_v7 = vmax.f32 %v5947_v12, 0.0  ;;  %v5898_v26 = vadd.f32 %v5897_v6, %v5309_v16  ;;  %v5949_v50 = vadd.f32 %v5948_v63, %v5896_v5 }
0x11f2   : > { %v5901_v47 = vpop.f32.mrf.mxu0 }
0x11f3   : > { %6086 = vst [vmem:[%s10756_s30 + $0x8] sm:$0xff] %v6070_v7  ;;  %v6073_v17 = vmax.f32 %v5949_v50, 0.0  ;;  %v5902_v33 = vadd.f32 %v5901_v47, %v5314_v2  ;;  %v5951_v62 = vadd.f32 %v5950_v30, %v5898_v26 }
0x11f4   : > { %v5903_v49 = vpop.f32.mrf.mxu0 }
0x11f5   : > { %6089 = vst [vmem:[%s10756_s30 + $0x20] sm:$0xff] %v6073_v17  ;;  %v6074_v15 = vmax.f32 %v5951_v62, 0.0  ;;  %v5904_v36 = vadd.f32 %v5903_v49, %v5314_v2  ;;  %v5955_v60 = vadd.f32 %v5954_v20, %v5902_v33 }
0x11f6   : > { %v5905_v35 = vpop.f32.mrf.mxu0 }
0x11f7   : > { %6090 = vst [vmem:[%s10756_s30 + $0x28] sm:$0xff] %v6074_v15  ;;  %v6077_v19 = vmax.f32 %v5955_v60, 0.0  ;;  %v5906_v32 = vadd.f32 %v5905_v35, %v5319_v0  ;;  %v5957_v41 = vadd.f32 %v5956_v55, %v5904_v36 }
0x11f8   : > { %v5907_v25 = vpop.f32.mrf.mxu0 }
0x11f9   : > { %6093 = vst [vmem:[%s10756_s30 + $0x40] sm:$0xff] %v6077_v19  ;;  %v6078_v1 = vmax.f32 %v5957_v41, 0.0  ;;  %v5908_v42 = vadd.f32 %v5907_v25, %v5319_v0  ;;  %v5959_v61 = vadd.f32 %v5958_v28, %v5906_v32 }
0x11fb   : > { %6094 = vst [vmem:[%s10756_s30 + $0x48] sm:$0xff] %v6078_v1  ;;  %v6081_v18 = vmax.f32 %v5959_v61, 0.0  ;;  %v5961_v34 = vadd.f32 %v5960_v31, %v5908_v42 }
0x11fd   : > { %6097 = vst [vmem:[%s10756_s30 + $0x60] sm:$0xff] %v6081_v18  ;;  %v6082_v56 = vmax.f32 %v5961_v34, 0.0 }
0x11ff   : > { %6098 = vst [vmem:[%s10756_s30 + $0x68] sm:$0xff] %v6082_v56 }
0x123e   : > { %v5997_v54 = vpop.f32.mrf.mxu1 }
0x123f   : > { %v5998_v59 = vadd.f32 %v5997_v54, %v5304_v44 }
0x1240   : > { %v5999_v45 = vpop.f32.mrf.mxu1 }
0x1241   : > { %v6000_v10 = vadd.f32 %v5999_v45, %v5304_v44 }
0x1242   : > { %v6001_v40 = vpop.f32.mrf.mxu1  ;;  %v6050_v46 = vpop.f32.mrf.mxu0 }
0x1243   : > { %v6051_v48 = vadd.f32 %v6050_v46, %v5998_v59  ;;  %v6002_v9 = vadd.f32 %v6001_v40, %v5309_v16 }
0x1244   : > { %v6003_v8 = vpop.f32.mrf.mxu1  ;;  %v6052_v39 = vpop.f32.mrf.mxu0 }
0x1245   : > { %v6071_v37 = vmax.f32 %v6051_v48, 0.0  ;;  %v6053_v11 = vadd.f32 %v6052_v39, %v6000_v10  ;;  %v6004_v52 = vadd.f32 %v6003_v8, %v5309_v16 }
0x1246   : > { %v6007_v43 = vpop.f32.mrf.mxu1  ;;  %v6054_v13 = vpop.f32.mrf.mxu0 }
0x1247   : > { %6087 = vst [vmem:[%s10756_s30 + $0x10] sm:$0xff] %v6071_v37  ;;  %v6072_v27 = vmax.f32 %v6053_v11, 0.0  ;;  %v6055_v22 = vadd.f32 %v6054_v13, %v6002_v9  ;;  %v6008_v57 = vadd.f32 %v6007_v43, %v5314_v2 }
0x1248   : > { %v6009_v23 = vpop.f32.mrf.mxu1  ;;  %v6056_v14 = vpop.f32.mrf.mxu0 }
0x1249   : > { %6088 = vst [vmem:[%s10756_s30 + $0x18] sm:$0xff] %v6072_v27  ;;  %v6075_v51 = vmax.f32 %v6055_v22, 0.0  ;;  %v6057_v24 = vadd.f32 %v6056_v14, %v6004_v52  ;;  %v6010_v44 = vadd.f32 %v6009_v23, %v5314_v2 }
0x124a   : > { %v6011_v63 = vpop.f32.mrf.mxu1  ;;  %v6060_v30 = vpop.f32.mrf.mxu0 }
0x124b   : > { %6091 = vst [vmem:[%s10756_s30 + $0x30] sm:$0xff] %v6075_v51  ;;  %v6076_v53 = vmax.f32 %v6057_v24, 0.0  ;;  %v6061_v3 = vadd.f32 %v6060_v30, %v6008_v57  ;;  %v6012_v4 = vadd.f32 %v6011_v63, %v5319_v0 }
0x124c   : > { %v6013_v38 = vpop.f32.mrf.mxu1  ;;  %v6062_v20 = vpop.f32.mrf.mxu0 }
0x124d   : > { %6092 = vst [vmem:[%s10756_s30 + $0x38] sm:$0xff] %v6076_v53  ;;  %v6079_v58 = vmax.f32 %v6061_v3, 0.0  ;;  %v6063_v16 = vadd.f32 %v6062_v20, %v6010_v44  ;;  %v6014_v21 = vadd.f32 %v6013_v38, %v5319_v0 }
0x124e   : > { %v6064_v29 = vpop.f32.mrf.mxu0 }
0x124f   : > { %6095 = vst [vmem:[%s10756_s30 + $0x50] sm:$0xff] %v6079_v58  ;;  %v6080_v5 = vmax.f32 %v6063_v16, 0.0  ;;  %v6065_v12 = vadd.f32 %v6064_v29, %v6012_v4 }
0x1250   : > { %v6066_v6 = vpop.f32.mrf.mxu0 }
0x1251   : > { %6096 = vst [vmem:[%s10756_s30 + $0x58] sm:$0xff] %v6080_v5  ;;  %v6083_v55 = vmax.f32 %v6065_v12, 0.0  ;;  %v6067_v7 = vadd.f32 %v6066_v6, %v6014_v21 }
0x1253   : > { %6099 = vst [vmem:[%s10756_s30 + $0x70] sm:$0xff] %v6083_v55  ;;  %v6084_v26 = vmax.f32 %v6067_v7, 0.0 }
0x1255   : > { %6100 = vst [vmem:[%s10756_s30 + $0x78] sm:$0xff] %v6084_v26 }
0x1256 PF: > { %s16_s21 = sadd.s32 1, %s6357_s21  }
0x1257   : > { %p13_p4 = scmp.ge.s32.totalorder %s16_s21, 4  }
0x1259   :  { %15 = sbr.rel (!%p13_p4) target bundleno = 1 (0x1), region = 74 }

</bundles_post_ra>
